<compile_context>
chip_gen: v6e
topology: v6e:2x2x1
jax: 0.10.0
libtpu: 0.0.40
codegen_flags: <defaults>
</compile_context>

<pallas_src>
from functools import partial

import jax
import jax.numpy as jnp
from jax.experimental import pallas as pl
from jax.experimental.pallas import tpu as pltpu

KPAD = 128  # lane-dense padded width for the (num_class=2) logits output


# ------------------------------------------------------------------
# Fused kernel (samples_per_step samples per grid step):
#   x_res: (SB, N, 512) bf16, x_vit: (SB, N, 256) bf16     N = 7*7 = 49
#   z = [x_res | x_vit] @ W_fold + b_fold                   (concat + dw-conv folded into W/b)
#   LayerNorm([768,7,7]) + affine + AdaptiveAvgPool2d(1) collapsed into per-channel column sums
#   head: ReLU -> Linear into a 128-lane padded logits row
# ------------------------------------------------------------------
def fused_kernel(xr_ref, xv_ref, w_ref, b_ref, g_ref, gsum_ref, bmean_ref,
                 fw_ref, fb_ref, o_ref):
    sb, n_sp, _ = xr_ref.shape
    c = w_ref.shape[1]
    inv_cnt = 1.0 / (n_sp * c)       # 1/(49*768): LayerNorm normalizes over the whole slab
    inv_n = 1.0 / n_sp               # 1/49: spatial average pool

    w = w_ref[...]                   # (768, 768) bf16  (dw 1x1 conv folded into pw 1x1 conv)
    bias = b_ref[...]                # (1, 768)   f32
    gamma = g_ref[...]               # (49, 768)  bf16
    gsum = gsum_ref[...]             # (1, 768)   f32   sum_n gamma[n, c]
    bmean = bmean_ref[...]           # (1, 768)   f32   mean_n beta[n, c]

    # Static unroll over the (small) number of samples folded into this grid step.
    for s in range(sb):
        # Channel concat lives only in VMEM; both halves are lane-multiples of 128.
        x = jnp.concatenate([xr_ref[s], xv_ref[s]], axis=-1)             # (49, 768) bf16
        # depthwise + pointwise 1x1 convs == one MXU matmul against the folded weight
        z = jnp.dot(x, w, preferred_element_type=jnp.float32) + bias     # (49, 768) f32

        # LayerNorm stats: one-pass sum / sum-of-squares over the per-sample slab (f32).
        mean = jnp.sum(z) * inv_cnt
        ez2 = jnp.sum(z * z) * inv_cnt
        rstd = jax.lax.rsqrt(ez2 - mean * mean + 1e-5)

        # Fused LN-affine + AdaptiveAvgPool2d(1):
        #   pooled[c] = mean_n((z-mean)*rstd*gamma + beta)
        #             = rstd/N * (sum_n z*gamma - mean*sum_n gamma) + mean_n beta
        zg = jnp.sum(z * gamma, axis=0, keepdims=True)                   # (1, 768) f32
        pooled = (rstd * inv_n) * (zg - mean * gsum) + bmean             # (1, 768) f32

        # Head: Flatten -> Dropout(eval identity) -> ReLU -> Linear (lane-dense 128-wide slab)
        h = jnp.maximum(pooled, 0.0).astype(jnp.bfloat16)                # (1, 768) bf16
        o_ref[s] = (jnp.dot(h, fw_ref[...], preferred_element_type=jnp.float32)
                    + fb_ref[...])                                       # (1, KPAD) f32


def fused_pallas(res_nlc, vit_nlc, params, samples_per_step, single_buffer):
    B, N, Cr = res_nlc.shape
    Cv = vit_nlc.shape[2]
    C = Cr + Cv
    SB = samples_per_step
    assert B % SB == 0

    # Constant-index parameter blocks: single-buffer them when supported.
    kw = {"pipeline_mode": pl.Buffered(1)} if single_buffer else {}

    def const2d(shape):
        return pl.BlockSpec(shape, lambda b: (0, 0), **kw)

    return pl.pallas_call(
        fused_kernel,
        out_shape=jax.ShapeDtypeStruct((B, 1, KPAD), jnp.float32),
        grid=(B // SB,),
        in_specs=[
            pl.BlockSpec((SB, N, Cr), lambda b: (b, 0, 0)),   # res activations (bf16)
            pl.BlockSpec((SB, N, Cv), lambda b: (b, 0, 0)),   # vit activations (bf16)
            const2d((C, C)),          # folded dw+pw weight (bf16)
            const2d((1, C)),          # folded bias (f32)
            const2d((N, C)),          # LN gamma per-position (bf16)
            const2d((1, C)),          # sum_n gamma (f32)
            const2d((1, C)),          # mean_n beta (f32)
            const2d((C, KPAD)),       # fc weight, lane-padded (bf16)
            const2d((1, KPAD)),       # fc bias, lane-padded (f32)
        ],
        out_specs=pl.BlockSpec((SB, 1, KPAD), lambda b: (b, 0, 0)),
        compiler_params=pltpu.CompilerParams(dimension_semantics=("parallel",)),
    )(res_nlc, vit_nlc, params["w_fold"], params["b_fold"], params["gamma"],
      params["gamma_colsum"], params["beta_colmean"], params["fc_wT"], params["fc_b"])


# ------------------------------------------------------------------
# Parameter initialization (deterministic, synthetic) + algebraic folding
# ------------------------------------------------------------------
def init_params(key, c_res=512, c_vit=256, hw=7, num_class=2):
    assert num_class <= KPAD
    C = c_res + c_vit                                       # 768
    ks = jax.random.split(key, 8)
    scale = 0.02

    # nn.Conv2d(C, C, 1, groups=C): per-channel scale + bias
    dw_w = jax.random.normal(ks[0], (C,), jnp.float32) * scale + 1.0
    dw_b = jax.random.normal(ks[1], (C,), jnp.float32) * scale
    # nn.Conv2d(C, C, 1): weight (C_out, C_in, 1, 1) -> (C_out, C_in)
    pw_w = jax.random.normal(ks[2], (C, C), jnp.float32) * scale
    pw_b = jax.random.normal(ks[3], (C,), jnp.float32) * scale
    # nn.LayerNorm([C, 7, 7]): gamma/beta (C,7,7)
    gamma = jax.random.normal(ks[4], (C, hw, hw), jnp.float32) * scale + 1.0
    beta = jax.random.normal(ks[5], (C, hw, hw), jnp.float32) * scale
    # nn.Linear(768, num_class)
    fc_w = jax.random.normal(ks[6], (num_class, C), jnp.float32) * scale
    fc_b = jax.random.normal(ks[7], (num_class,), jnp.float32) * scale

    # Fold the depthwise 1x1 conv into the pointwise 1x1 conv (channels-last math):
    #   z = (x*a + b_dw) @ W^T + b_pw  =  x @ (a[:,None] * W^T) + (b_dw @ W^T + b_pw)
    pw_wT = pw_w.T                                          # (C_in, C_out)
    w_fold = dw_w[:, None] * pw_wT                          # (C_in, C_out) = (768, 768)
    b_fold = dw_b @ pw_wT + pw_b                            # (C_out,)

    # LN affine, channels-last per-position layout + the pooled-rewrite reductions (f32)
    gamma_nc = jnp.transpose(gamma, (1, 2, 0)).reshape(hw * hw, C)   # (49, 768)
    beta_nc = jnp.transpose(beta, (1, 2, 0)).reshape(hw * hw, C)     # (49, 768)
    gamma_colsum = jnp.sum(gamma_nc, axis=0, keepdims=True)          # (1, 768)
    beta_colmean = jnp.mean(beta_nc, axis=0, keepdims=True)          # (1, 768)

    # Lane-pad the classification head to a 128-wide output slab (zeros beyond num_class)
    fc_wT_pad = jnp.zeros((C, KPAD), jnp.float32).at[:, :num_class].set(fc_w.T)
    fc_b_pad = jnp.zeros((KPAD,), jnp.float32).at[:num_class].set(fc_b)

    return {
        "w_fold": w_fold.astype(jnp.bfloat16),               # (768, 768) bf16
        "b_fold": b_fold.reshape(1, C),                       # (1, 768) f32
        "gamma": gamma_nc.astype(jnp.bfloat16),               # (49, 768) bf16
        "gamma_colsum": gamma_colsum,                          # (1, 768) f32
        "beta_colmean": beta_colmean,                          # (1, 768) f32
        "fc_wT": fc_wT_pad.astype(jnp.bfloat16),               # (768, 128) bf16
        "fc_b": fc_b_pad.reshape(1, KPAD),                     # (1, 128) f32
    }


# ------------------------------------------------------------------
# Grid sizing: fold the batch into the matmul M dimension.
# ------------------------------------------------------------------
def _samples_per_step(batch):
    """v7x has 2 TensorCores/chip: keep >=2 grid steps so both get work.
    Single-TC chips (v5e/v6e) take the whole batch in one grid step."""
    try:
        kind = jax.devices()[0].device_kind.lower()
    except Exception:
        kind = ""
    two_core = ("v7" in kind) or ("7x" in kind)
    target = (batch + 1) // 2 if (two_core and batch >= 2) else batch
    # Largest divisor of batch not exceeding target, so every grid step is full.
    return max(d for d in range(1, max(target, 1) + 1) if batch % d == 0)


# ------------------------------------------------------------------
# Forward wrapper (glue only: per-branch NCHW -> channels-last bf16, logits slice)
# ------------------------------------------------------------------
@partial(jax.jit, static_argnames=("num_class", "samples_per_step", "single_buffer"))
def _forward_jit(res_nchw, vit_nchw, params, num_class, samples_per_step, single_buffer):
    B, Cr, H, W = res_nchw.shape
    Cv = vit_nchw.shape[1]
    N = H * W
    # Channel concat is never materialized in HBM: both branches go channels-last + bf16
    # (the transpose rewrites the data anyway, so the cast is free) into the fused kernel.
    res_nlc = jnp.transpose(res_nchw.reshape(B, Cr, N), (0, 2, 1)).astype(jnp.bfloat16)
    vit_nlc = jnp.transpose(vit_nchw.reshape(B, Cv, N), (0, 2, 1)).astype(jnp.bfloat16)
    logits_pad = fused_pallas(res_nlc, vit_nlc, params, samples_per_step, single_buffer)
    return logits_pad[:, 0, :num_class]                              # (B, num_class)


def restevit_road_cls_forward(res_nchw, vit_nchw, params, num_class=2):
    sb = _samples_per_step(res_nchw.shape[0])
    try:
        return _forward_jit(res_nchw, vit_nchw, params, num_class=num_class,
                            samples_per_step=sb, single_buffer=True)
    except Exception:
        # Fallback if this Pallas build rejects pipeline_mode=pl.Buffered(1) on the constant
        # parameter blocks; everything else about the kernel is identical.
        return _forward_jit(res_nchw, vit_nchw, params, num_class=num_class,
                            samples_per_step=sb, single_buffer=False)


if __name__ == "__main__":
    key = jax.random.PRNGKey(0)
    k_res, k_vit, k_par = jax.random.split(key, 3)

    B, HW = 2, 7
    # Synthetic backbone-branch outputs (stand-ins for the undefined resnet / efficientvit stages)
    res_feat = jax.random.normal(k_res, (B, 512, HW, HW), jnp.float32)
    vit_feat = jax.random.normal(k_vit, (B, 256, HW, HW), jnp.float32)

    params = init_params(k_par, c_res=512, c_vit=256, hw=HW, num_class=2)

    logits = restevit_road_cls_forward(res_feat, vit_feat, params, num_class=2)
    jax.block_until_ready(logits)
    assert logits.shape == (B, 2)
    print("KERNEL_OK")
</pallas_src>

<mosaic_0001>
module attributes {stable_mosaic.version = 11 : i64} {
  func.func @fused_kernel(%arg0: i32, %arg1: memref<2x49x512xbf16, #tpu.memory_space<vmem>>, %arg2: memref<2x49x256xbf16, #tpu.memory_space<vmem>>, %arg3: memref<768x768xbf16, #tpu.memory_space<vmem>>, %arg4: memref<1x768xf32, #tpu.memory_space<vmem>>, %arg5: memref<49x768xbf16, #tpu.memory_space<vmem>>, %arg6: memref<1x768xf32, #tpu.memory_space<vmem>>, %arg7: memref<1x768xf32, #tpu.memory_space<vmem>>, %arg8: memref<768x128xbf16, #tpu.memory_space<vmem>>, %arg9: memref<1x128xf32, #tpu.memory_space<vmem>>, %arg10: memref<2x1x128xf32, #tpu.memory_space<vmem>>) attributes {dimension_semantics = [#tpu.dimension_semantics<parallel>], iteration_bounds = array<i64: 1>, scalar_prefetch = 0 : i64, scratch_operands = 0 : i64, tpu.core_type = #tpu.core_type<tc>, window_params = [{transform_indices = @transform_0, window_bounds = array<i64: 2, 49, 512>}, {transform_indices = @transform_1, window_bounds = array<i64: 2, 49, 256>}, {pipeline_mode = #tpu.pipeline_mode<synchronous>, transform_indices = @transform_2, window_bounds = array<i64: 768, 768>}, {pipeline_mode = #tpu.pipeline_mode<synchronous>, transform_indices = @transform_3, window_bounds = array<i64: 1, 768>}, {pipeline_mode = #tpu.pipeline_mode<synchronous>, transform_indices = @transform_4, window_bounds = array<i64: 49, 768>}, {pipeline_mode = #tpu.pipeline_mode<synchronous>, transform_indices = @transform_5, window_bounds = array<i64: 1, 768>}, {pipeline_mode = #tpu.pipeline_mode<synchronous>, transform_indices = @transform_6, window_bounds = array<i64: 1, 768>}, {pipeline_mode = #tpu.pipeline_mode<synchronous>, transform_indices = @transform_7, window_bounds = array<i64: 768, 128>}, {pipeline_mode = #tpu.pipeline_mode<synchronous>, transform_indices = @transform_8, window_bounds = array<i64: 1, 128>}, {transform_indices = @transform_9, window_bounds = array<i64: 2, 1, 128>}]} {
    %c0 = arith.constant 0 : index
    %c0_0 = arith.constant 0 : index
    %0 = vector.load %arg3[%c0, %c0_0] : memref<768x768xbf16, #tpu.memory_space<vmem>>, vector<768x768xbf16>
    %c0_1 = arith.constant 0 : index
    %c0_2 = arith.constant 0 : index
    %1 = vector.load %arg4[%c0_1, %c0_2] : memref<1x768xf32, #tpu.memory_space<vmem>>, vector<1x768xf32>
    %c0_3 = arith.constant 0 : index
    %c0_4 = arith.constant 0 : index
    %2 = vector.load %arg5[%c0_3, %c0_4] : memref<49x768xbf16, #tpu.memory_space<vmem>>, vector<49x768xbf16>
    %c0_5 = arith.constant 0 : index
    %c0_6 = arith.constant 0 : index
    %3 = vector.load %arg6[%c0_5, %c0_6] : memref<1x768xf32, #tpu.memory_space<vmem>>, vector<1x768xf32>
    %c0_7 = arith.constant 0 : index
    %c0_8 = arith.constant 0 : index
    %4 = vector.load %arg7[%c0_7, %c0_8] : memref<1x768xf32, #tpu.memory_space<vmem>>, vector<1x768xf32>
    %c0_9 = arith.constant 0 : index
    %c0_10 = arith.constant 0 : index
    %c0_11 = arith.constant 0 : index
    %5 = vector.load %arg1[%c0_9, %c0_10, %c0_11] : memref<2x49x512xbf16, #tpu.memory_space<vmem>>, vector<1x49x512xbf16>
    %6 = vector.shape_cast %5 : vector<1x49x512xbf16> to vector<49x512xbf16>
    %c0_12 = arith.constant 0 : index
    %c0_13 = arith.constant 0 : index
    %c0_14 = arith.constant 0 : index
    %7 = vector.load %arg2[%c0_12, %c0_13, %c0_14] : memref<2x49x256xbf16, #tpu.memory_space<vmem>>, vector<1x49x256xbf16>
    %8 = vector.shape_cast %7 : vector<1x49x256xbf16> to vector<49x256xbf16>
    %9 = tpu.concatenate %6, %8 in 1 : vector<49x512xbf16>, vector<49x256xbf16> -> vector<49x768xbf16>
    %cst = arith.constant dense<0.000000e+00> : vector<49x768xf32>
    %10 = tpu.matmul %9, %0, %cst {dimension_numbers = #tpu.dot_dimension_numbers<[1], [0], [0], [1], [0, 0, 1, 1], [], []>} : vector<49x768xbf16>, vector<768x768xbf16>, vector<49x768xf32> -> vector<49x768xf32>
    %11 = vector.broadcast %1 : vector<1x768xf32> to vector<49x768xf32>
    %12 = arith.addf %10, %11 : vector<49x768xf32>
    %13 = vector.shape_cast %12 : vector<49x768xf32> to vector<1x49x768xf32>
    %cst_15 = arith.constant dense<0.000000e+00> : vector<1xf32>
    %14 = vector.multi_reduction <add>, %13, %cst_15 [1, 2] : vector<1x49x768xf32> to vector<1xf32>
    %15 = vector.shape_cast %14 : vector<1xf32> to vector<1x1x1xf32>
    %16 = vector.extract %15[0, 0, 0] : f32 from vector<1x1x1xf32>
    %cst_16 = arith.constant 2.65731287E-5 : f32
    %17 = arith.mulf %16, %cst_16 : f32
    %18 = arith.mulf %12, %12 : vector<49x768xf32>
    %19 = vector.shape_cast %18 : vector<49x768xf32> to vector<1x49x768xf32>
    %cst_17 = arith.constant dense<0.000000e+00> : vector<1xf32>
    %20 = vector.multi_reduction <add>, %19, %cst_17 [1, 2] : vector<1x49x768xf32> to vector<1xf32>
    %21 = vector.shape_cast %20 : vector<1xf32> to vector<1x1x1xf32>
    %22 = vector.extract %21[0, 0, 0] : f32 from vector<1x1x1xf32>
    %cst_18 = arith.constant 2.65731287E-5 : f32
    %23 = arith.mulf %22, %cst_18 : f32
    %24 = arith.mulf %17, %17 : f32
    %25 = arith.subf %23, %24 : f32
    %cst_19 = arith.constant 9.99999974E-6 : f32
    %26 = arith.addf %25, %cst_19 : f32
    %27 = math.rsqrt %26 : f32
    %28 = arith.extf %2 : vector<49x768xbf16> to vector<49x768xf32>
    %29 = arith.mulf %12, %28 : vector<49x768xf32>
    %cst_20 = arith.constant dense<0.000000e+00> : vector<768xf32>
    %30 = vector.multi_reduction <add>, %29, %cst_20 [0] : vector<49x768xf32> to vector<768xf32>
    %31 = vector.shape_cast %30 : vector<768xf32> to vector<1x768xf32>
    %cst_21 = arith.constant 0.0204081628 : f32
    %32 = arith.mulf %27, %cst_21 : f32
    %33 = vector.broadcast %17 : f32 to vector<1x768xf32>
    %34 = arith.mulf %33, %3 : vector<1x768xf32>
    %35 = arith.subf %31, %34 : vector<1x768xf32>
    %36 = vector.broadcast %32 : f32 to vector<1x768xf32>
    %37 = arith.mulf %36, %35 : vector<1x768xf32>
    %38 = arith.addf %37, %4 : vector<1x768xf32>
    %cst_22 = arith.constant 0.000000e+00 : f32
    %39 = vector.broadcast %cst_22 : f32 to vector<1x768xf32>
    %40 = arith.maximumf %38, %39 : vector<1x768xf32>
    %41 = arith.truncf %40 : vector<1x768xf32> to vector<1x768xbf16>
    %c0_23 = arith.constant 0 : index
    %c0_24 = arith.constant 0 : index
    %42 = vector.load %arg8[%c0_23, %c0_24] : memref<768x128xbf16, #tpu.memory_space<vmem>>, vector<768x128xbf16>
    %cst_25 = arith.constant dense<0.000000e+00> : vector<1x128xf32>
    %43 = tpu.matmul %41, %42, %cst_25 {dimension_numbers = #tpu.dot_dimension_numbers<[1], [0], [0], [1], [0, 0, 1, 1], [], []>} : vector<1x768xbf16>, vector<768x128xbf16>, vector<1x128xf32> -> vector<1x128xf32>
    %c0_26 = arith.constant 0 : index
    %c0_27 = arith.constant 0 : index
    %44 = vector.load %arg9[%c0_26, %c0_27] : memref<1x128xf32, #tpu.memory_space<vmem>>, vector<1x128xf32>
    %45 = arith.addf %43, %44 : vector<1x128xf32>
    %c0_28 = arith.constant 0 : index
    %c0_29 = arith.constant 0 : index
    %c0_30 = arith.constant 0 : index
    %46 = vector.load %arg10[%c0_28, %c0_29, %c0_30] : memref<2x1x128xf32, #tpu.memory_space<vmem>>, vector<1x1x128xf32>
    %47 = vector.shape_cast %46 : vector<1x1x128xf32> to vector<1x128xf32>
    %48 = vector.shape_cast %45 : vector<1x128xf32> to vector<1x1x128xf32>
    tpu.vector_store %arg10[%c0_28, %c0_29, %c0_30], %48 {strides = array<i32>} : memref<2x1x128xf32, #tpu.memory_space<vmem>>, vector<1x1x128xf32>,
    %c1 = arith.constant 1 : index
    %c0_31 = arith.constant 0 : index
    %c0_32 = arith.constant 0 : index
    %49 = vector.load %arg1[%c1, %c0_31, %c0_32] : memref<2x49x512xbf16, #tpu.memory_space<vmem>>, vector<1x49x512xbf16>
    %50 = vector.shape_cast %49 : vector<1x49x512xbf16> to vector<49x512xbf16>
    %c1_33 = arith.constant 1 : index
    %c0_34 = arith.constant 0 : index
    %c0_35 = arith.constant 0 : index
    %51 = vector.load %arg2[%c1_33, %c0_34, %c0_35] : memref<2x49x256xbf16, #tpu.memory_space<vmem>>, vector<1x49x256xbf16>
    %52 = vector.shape_cast %51 : vector<1x49x256xbf16> to vector<49x256xbf16>
    %53 = tpu.concatenate %50, %52 in 1 : vector<49x512xbf16>, vector<49x256xbf16> -> vector<49x768xbf16>
    %cst_36 = arith.constant dense<0.000000e+00> : vector<49x768xf32>
    %54 = tpu.matmul %53, %0, %cst_36 {dimension_numbers = #tpu.dot_dimension_numbers<[1], [0], [0], [1], [0, 0, 1, 1], [], []>} : vector<49x768xbf16>, vector<768x768xbf16>, vector<49x768xf32> -> vector<49x768xf32>
    %55 = vector.broadcast %1 : vector<1x768xf32> to vector<49x768xf32>
    %56 = arith.addf %54, %55 : vector<49x768xf32>
    %57 = vector.shape_cast %56 : vector<49x768xf32> to vector<1x49x768xf32>
    %cst_37 = arith.constant dense<0.000000e+00> : vector<1xf32>
    %58 = vector.multi_reduction <add>, %57, %cst_37 [1, 2] : vector<1x49x768xf32> to vector<1xf32>
    %59 = vector.shape_cast %58 : vector<1xf32> to vector<1x1x1xf32>
    %60 = vector.extract %59[0, 0, 0] : f32 from vector<1x1x1xf32>
    %cst_38 = arith.constant 2.65731287E-5 : f32
    %61 = arith.mulf %60, %cst_38 : f32
    %62 = arith.mulf %56, %56 : vector<49x768xf32>
    %63 = vector.shape_cast %62 : vector<49x768xf32> to vector<1x49x768xf32>
    %cst_39 = arith.constant dense<0.000000e+00> : vector<1xf32>
    %64 = vector.multi_reduction <add>, %63, %cst_39 [1, 2] : vector<1x49x768xf32> to vector<1xf32>
    %65 = vector.shape_cast %64 : vector<1xf32> to vector<1x1x1xf32>
    %66 = vector.extract %65[0, 0, 0] : f32 from vector<1x1x1xf32>
    %cst_40 = arith.constant 2.65731287E-5 : f32
    %67 = arith.mulf %66, %cst_40 : f32
    %68 = arith.mulf %61, %61 : f32
    %69 = arith.subf %67, %68 : f32
    %cst_41 = arith.constant 9.99999974E-6 : f32
    %70 = arith.addf %69, %cst_41 : f32
    %71 = math.rsqrt %70 : f32
    %72 = arith.extf %2 : vector<49x768xbf16> to vector<49x768xf32>
    %73 = arith.mulf %56, %72 : vector<49x768xf32>
    %cst_42 = arith.constant dense<0.000000e+00> : vector<768xf32>
    %74 = vector.multi_reduction <add>, %73, %cst_42 [0] : vector<49x768xf32> to vector<768xf32>
    %75 = vector.shape_cast %74 : vector<768xf32> to vector<1x768xf32>
    %cst_43 = arith.constant 0.0204081628 : f32
    %76 = arith.mulf %71, %cst_43 : f32
    %77 = vector.broadcast %61 : f32 to vector<1x768xf32>
    %78 = arith.mulf %77, %3 : vector<1x768xf32>
    %79 = arith.subf %75, %78 : vector<1x768xf32>
    %80 = vector.broadcast %76 : f32 to vector<1x768xf32>
    %81 = arith.mulf %80, %79 : vector<1x768xf32>
    %82 = arith.addf %81, %4 : vector<1x768xf32>
    %cst_44 = arith.constant 0.000000e+00 : f32
    %83 = vector.broadcast %cst_44 : f32 to vector<1x768xf32>
    %84 = arith.maximumf %82, %83 : vector<1x768xf32>
    %85 = arith.truncf %84 : vector<1x768xf32> to vector<1x768xbf16>
    %c0_45 = arith.constant 0 : index
    %c0_46 = arith.constant 0 : index
    %86 = vector.load %arg8[%c0_45, %c0_46] : memref<768x128xbf16, #tpu.memory_space<vmem>>, vector<768x128xbf16>
    %cst_47 = arith.constant dense<0.000000e+00> : vector<1x128xf32>
    %87 = tpu.matmul %85, %86, %cst_47 {dimension_numbers = #tpu.dot_dimension_numbers<[1], [0], [0], [1], [0, 0, 1, 1], [], []>} : vector<1x768xbf16>, vector<768x128xbf16>, vector<1x128xf32> -> vector<1x128xf32>
    %c0_48 = arith.constant 0 : index
    %c0_49 = arith.constant 0 : index
    %88 = vector.load %arg9[%c0_48, %c0_49] : memref<1x128xf32, #tpu.memory_space<vmem>>, vector<1x128xf32>
    %89 = arith.addf %87, %88 : vector<1x128xf32>
    %c1_50 = arith.constant 1 : index
    %c0_51 = arith.constant 0 : index
    %c0_52 = arith.constant 0 : index
    %90 = vector.load %arg10[%c1_50, %c0_51, %c0_52] : memref<2x1x128xf32, #tpu.memory_space<vmem>>, vector<1x1x128xf32>
    %91 = vector.shape_cast %90 : vector<1x1x128xf32> to vector<1x128xf32>
    %92 = vector.shape_cast %89 : vector<1x128xf32> to vector<1x1x128xf32>
    tpu.vector_store %arg10[%c1_50, %c0_51, %c0_52], %92 {strides = array<i32>} : memref<2x1x128xf32, #tpu.memory_space<vmem>>, vector<1x1x128xf32>,
    return
  }
  func.func @transform_0(%arg0: i32) -> (i32, i32, i32) {
    %c0_i32 = arith.constant 0 : i32
    %c0_i32_0 = arith.constant 0 : i32
    %c0_i32_1 = arith.constant 0 : i32
    return %arg0, %c0_i32, %c0_i32_0 : i32, i32, i32
  }
  func.func @transform_1(%arg0: i32) -> (i32, i32, i32) {
    %c0_i32 = arith.constant 0 : i32
    %c0_i32_0 = arith.constant 0 : i32
    %c0_i32_1 = arith.constant 0 : i32
    return %arg0, %c0_i32, %c0_i32_0 : i32, i32, i32
  }
  func.func @transform_2(%arg0: i32) -> (i32, i32) {
    %c0_i32 = arith.constant 0 : i32
    %c0_i32_0 = arith.constant 0 : i32
    %c0_i32_1 = arith.constant 0 : i32
    return %c0_i32, %c0_i32_0 : i32, i32
  }
  func.func @transform_3(%arg0: i32) -> (i32, i32) {
    %c0_i32 = arith.constant 0 : i32
    %c0_i32_0 = arith.constant 0 : i32
    %c0_i32_1 = arith.constant 0 : i32
    return %c0_i32, %c0_i32_0 : i32, i32
  }
  func.func @transform_4(%arg0: i32) -> (i32, i32) {
    %c0_i32 = arith.constant 0 : i32
    %c0_i32_0 = arith.constant 0 : i32
    %c0_i32_1 = arith.constant 0 : i32
    return %c0_i32, %c0_i32_0 : i32, i32
  }
  func.func @transform_5(%arg0: i32) -> (i32, i32) {
    %c0_i32 = arith.constant 0 : i32
    %c0_i32_0 = arith.constant 0 : i32
    %c0_i32_1 = arith.constant 0 : i32
    return %c0_i32, %c0_i32_0 : i32, i32
  }
  func.func @transform_6(%arg0: i32) -> (i32, i32) {
    %c0_i32 = arith.constant 0 : i32
    %c0_i32_0 = arith.constant 0 : i32
    %c0_i32_1 = arith.constant 0 : i32
    return %c0_i32, %c0_i32_0 : i32, i32
  }
  func.func @transform_7(%arg0: i32) -> (i32, i32) {
    %c0_i32 = arith.constant 0 : i32
    %c0_i32_0 = arith.constant 0 : i32
    %c0_i32_1 = arith.constant 0 : i32
    return %c0_i32, %c0_i32_0 : i32, i32
  }
  func.func @transform_8(%arg0: i32) -> (i32, i32) {
    %c0_i32 = arith.constant 0 : i32
    %c0_i32_0 = arith.constant 0 : i32
    %c0_i32_1 = arith.constant 0 : i32
    return %c0_i32, %c0_i32_0 : i32, i32
  }
  func.func @transform_9(%arg0: i32) -> (i32, i32, i32) {
    %c0_i32 = arith.constant 0 : i32
    %c0_i32_0 = arith.constant 0 : i32
    %c0_i32_1 = arith.constant 0 : i32
    return %arg0, %c0_i32, %c0_i32_0 : i32, i32, i32
  }
}

module attributes {stable_mosaic.version = 11 : i64} {
  func.func @fused_kernel(%arg0: i32, %arg1: memref<2x49x512xbf16, #tpu.memory_space<vmem>>, %arg2: memref<2x49x256xbf16, #tpu.memory_space<vmem>>, %arg3: memref<768x768xbf16, #tpu.memory_space<vmem>>, %arg4: memref<1x768xf32, #tpu.memory_space<vmem>>, %arg5: memref<49x768xbf16, #tpu.memory_space<vmem>>, %arg6: memref<1x768xf32, #tpu.memory_space<vmem>>, %arg7: memref<1x768xf32, #tpu.memory_space<vmem>>, %arg8: memref<768x128xbf16, #tpu.memory_space<vmem>>, %arg9: memref<1x128xf32, #tpu.memory_space<vmem>>, %arg10: memref<2x1x128xf32, #tpu.memory_space<vmem>>) attributes {dimension_semantics = [#tpu.dimension_semantics<parallel>], iteration_bounds = array<i64: 1>, scalar_prefetch = 0 : i64, scratch_operands = 0 : i64, tpu.core_type = #tpu.core_type<tc>, window_params = [{transform_indices = @transform_0, window_bounds = array<i64: 2, 49, 512>}, {transform_indices = @transform_1, window_bounds = array<i64: 2, 49, 256>}, {pipeline_mode = #tpu.pipeline_mode<synchronous>, transform_indices = @transform_2, window_bounds = array<i64: 768, 768>}, {pipeline_mode = #tpu.pipeline_mode<synchronous>, transform_indices = @transform_3, window_bounds = array<i64: 1, 768>}, {pipeline_mode = #tpu.pipeline_mode<synchronous>, transform_indices = @transform_4, window_bounds = array<i64: 49, 768>}, {pipeline_mode = #tpu.pipeline_mode<synchronous>, transform_indices = @transform_5, window_bounds = array<i64: 1, 768>}, {pipeline_mode = #tpu.pipeline_mode<synchronous>, transform_indices = @transform_6, window_bounds = array<i64: 1, 768>}, {pipeline_mode = #tpu.pipeline_mode<synchronous>, transform_indices = @transform_7, window_bounds = array<i64: 768, 128>}, {pipeline_mode = #tpu.pipeline_mode<synchronous>, transform_indices = @transform_8, window_bounds = array<i64: 1, 128>}, {transform_indices = @transform_9, window_bounds = array<i64: 2, 1, 128>}]} {
    %c0 = arith.constant 0 : index
    %c0_0 = arith.constant 0 : index
    %0 = vector.load %arg3[%c0, %c0_0] : memref<768x768xbf16, #tpu.memory_space<vmem>>, vector<768x768xbf16>
    %c0_1 = arith.constant 0 : index
    %c0_2 = arith.constant 0 : index
    %1 = vector.load %arg4[%c0_1, %c0_2] : memref<1x768xf32, #tpu.memory_space<vmem>>, vector<1x768xf32>
    %c0_3 = arith.constant 0 : index
    %c0_4 = arith.constant 0 : index
    %2 = vector.load %arg5[%c0_3, %c0_4] : memref<49x768xbf16, #tpu.memory_space<vmem>>, vector<49x768xbf16>
    %c0_5 = arith.constant 0 : index
    %c0_6 = arith.constant 0 : index
    %3 = vector.load %arg6[%c0_5, %c0_6] : memref<1x768xf32, #tpu.memory_space<vmem>>, vector<1x768xf32>
    %c0_7 = arith.constant 0 : index
    %c0_8 = arith.constant 0 : index
    %4 = vector.load %arg7[%c0_7, %c0_8] : memref<1x768xf32, #tpu.memory_space<vmem>>, vector<1x768xf32>
    %c0_9 = arith.constant 0 : index
    %c0_10 = arith.constant 0 : index
    %c0_11 = arith.constant 0 : index
    %5 = vector.load %arg1[%c0_9, %c0_10, %c0_11] : memref<2x49x512xbf16, #tpu.memory_space<vmem>>, vector<1x49x512xbf16>
    %6 = vector.shape_cast %5 : vector<1x49x512xbf16> to vector<49x512xbf16>
    %c0_12 = arith.constant 0 : index
    %c0_13 = arith.constant 0 : index
    %c0_14 = arith.constant 0 : index
    %7 = vector.load %arg2[%c0_12, %c0_13, %c0_14] : memref<2x49x256xbf16, #tpu.memory_space<vmem>>, vector<1x49x256xbf16>
    %8 = vector.shape_cast %7 : vector<1x49x256xbf16> to vector<49x256xbf16>
    %9 = tpu.concatenate %6, %8 in 1 : vector<49x512xbf16>, vector<49x256xbf16> -> vector<49x768xbf16>
    %cst = arith.constant dense<0.000000e+00> : vector<49x768xf32>
    %10 = tpu.matmul %9, %0, %cst {dimension_numbers = #tpu.dot_dimension_numbers<[1], [0], [0], [1], [0, 0, 1, 1], [], []>} : vector<49x768xbf16>, vector<768x768xbf16>, vector<49x768xf32> -> vector<49x768xf32>
    %11 = vector.broadcast %1 : vector<1x768xf32> to vector<49x768xf32>
    %12 = arith.addf %10, %11 : vector<49x768xf32>
    %13 = vector.shape_cast %12 : vector<49x768xf32> to vector<1x49x768xf32>
    %cst_15 = arith.constant dense<0.000000e+00> : vector<1xf32>
    %14 = vector.multi_reduction <add>, %13, %cst_15 [1, 2] : vector<1x49x768xf32> to vector<1xf32>
    %15 = vector.shape_cast %14 : vector<1xf32> to vector<1x1x1xf32>
    %16 = vector.extract %15[0, 0, 0] : f32 from vector<1x1x1xf32>
    %cst_16 = arith.constant 2.65731287E-5 : f32
    %17 = arith.mulf %16, %cst_16 : f32
    %18 = arith.mulf %12, %12 : vector<49x768xf32>
    %19 = vector.shape_cast %18 : vector<49x768xf32> to vector<1x49x768xf32>
    %cst_17 = arith.constant dense<0.000000e+00> : vector<1xf32>
    %20 = vector.multi_reduction <add>, %19, %cst_17 [1, 2] : vector<1x49x768xf32> to vector<1xf32>
    %21 = vector.shape_cast %20 : vector<1xf32> to vector<1x1x1xf32>
    %22 = vector.extract %21[0, 0, 0] : f32 from vector<1x1x1xf32>
    %cst_18 = arith.constant 2.65731287E-5 : f32
    %23 = arith.mulf %22, %cst_18 : f32
    %24 = arith.mulf %17, %17 : f32
    %25 = arith.subf %23, %24 : f32
    %cst_19 = arith.constant 9.99999974E-6 : f32
    %26 = arith.addf %25, %cst_19 : f32
    %27 = math.rsqrt %26 : f32
    %28 = arith.extf %2 : vector<49x768xbf16> to vector<49x768xf32>
    %29 = arith.mulf %12, %28 : vector<49x768xf32>
    %cst_20 = arith.constant dense<0.000000e+00> : vector<768xf32>
    %30 = vector.multi_reduction <add>, %29, %cst_20 [0] : vector<49x768xf32> to vector<768xf32>
    %31 = vector.shape_cast %30 : vector<768xf32> to vector<1x768xf32>
    %cst_21 = arith.constant 0.0204081628 : f32
    %32 = arith.mulf %27, %cst_21 : f32
    %33 = vector.broadcast %17 : f32 to vector<1x768xf32>
    %34 = arith.mulf %33, %3 : vector<1x768xf32>
    %35 = arith.subf %31, %34 : vector<1x768xf32>
    %36 = vector.broadcast %32 : f32 to vector<1x768xf32>
    %37 = arith.mulf %36, %35 : vector<1x768xf32>
    %38 = arith.addf %37, %4 : vector<1x768xf32>
    %cst_22 = arith.constant 0.000000e+00 : f32
    %39 = vector.broadcast %cst_22 : f32 to vector<1x768xf32>
    %40 = arith.maximumf %38, %39 : vector<1x768xf32>
    %41 = arith.truncf %40 : vector<1x768xf32> to vector<1x768xbf16>
    %c0_23 = arith.constant 0 : index
    %c0_24 = arith.constant 0 : index
    %42 = vector.load %arg8[%c0_23, %c0_24] : memref<768x128xbf16, #tpu.memory_space<vmem>>, vector<768x128xbf16>
    %cst_25 = arith.constant dense<0.000000e+00> : vector<1x128xf32>
    %43 = tpu.matmul %41, %42, %cst_25 {dimension_numbers = #tpu.dot_dimension_numbers<[1], [0], [0], [1], [0, 0, 1, 1], [], []>} : vector<1x768xbf16>, vector<768x128xbf16>, vector<1x128xf32> -> vector<1x128xf32>
    %c0_26 = arith.constant 0 : index
    %c0_27 = arith.constant 0 : index
    %44 = vector.load %arg9[%c0_26, %c0_27] : memref<1x128xf32, #tpu.memory_space<vmem>>, vector<1x128xf32>
    %45 = arith.addf %43, %44 : vector<1x128xf32>
    %c0_28 = arith.constant 0 : index
    %c0_29 = arith.constant 0 : index
    %c0_30 = arith.constant 0 : index
    %46 = vector.load %arg10[%c0_28, %c0_29, %c0_30] : memref<2x1x128xf32, #tpu.memory_space<vmem>>, vector<1x1x128xf32>
    %47 = vector.shape_cast %46 : vector<1x1x128xf32> to vector<1x128xf32>
    %48 = vector.shape_cast %45 : vector<1x128xf32> to vector<1x1x128xf32>
    tpu.vector_store %arg10[%c0_28, %c0_29, %c0_30], %48 {strides = array<i32>} : memref<2x1x128xf32, #tpu.memory_space<vmem>>, vector<1x1x128xf32>,
    %c1 = arith.constant 1 : index
    %c0_31 = arith.constant 0 : index
    %c0_32 = arith.constant 0 : index
    %49 = vector.load %arg1[%c1, %c0_31, %c0_32] : memref<2x49x512xbf16, #tpu.memory_space<vmem>>, vector<1x49x512xbf16>
    %50 = vector.shape_cast %49 : vector<1x49x512xbf16> to vector<49x512xbf16>
    %c1_33 = arith.constant 1 : index
    %c0_34 = arith.constant 0 : index
    %c0_35 = arith.constant 0 : index
    %51 = vector.load %arg2[%c1_33, %c0_34, %c0_35] : memref<2x49x256xbf16, #tpu.memory_space<vmem>>, vector<1x49x256xbf16>
    %52 = vector.shape_cast %51 : vector<1x49x256xbf16> to vector<49x256xbf16>
    %53 = tpu.concatenate %50, %52 in 1 : vector<49x512xbf16>, vector<49x256xbf16> -> vector<49x768xbf16>
    %cst_36 = arith.constant dense<0.000000e+00> : vector<49x768xf32>
    %54 = tpu.matmul %53, %0, %cst_36 {dimension_numbers = #tpu.dot_dimension_numbers<[1], [0], [0], [1], [0, 0, 1, 1], [], []>} : vector<49x768xbf16>, vector<768x768xbf16>, vector<49x768xf32> -> vector<49x768xf32>
    %55 = vector.broadcast %1 : vector<1x768xf32> to vector<49x768xf32>
    %56 = arith.addf %54, %55 : vector<49x768xf32>
    %57 = vector.shape_cast %56 : vector<49x768xf32> to vector<1x49x768xf32>
    %cst_37 = arith.constant dense<0.000000e+00> : vector<1xf32>
    %58 = vector.multi_reduction <add>, %57, %cst_37 [1, 2] : vector<1x49x768xf32> to vector<1xf32>
    %59 = vector.shape_cast %58 : vector<1xf32> to vector<1x1x1xf32>
    %60 = vector.extract %59[0, 0, 0] : f32 from vector<1x1x1xf32>
    %cst_38 = arith.constant 2.65731287E-5 : f32
    %61 = arith.mulf %60, %cst_38 : f32
    %62 = arith.mulf %56, %56 : vector<49x768xf32>
    %63 = vector.shape_cast %62 : vector<49x768xf32> to vector<1x49x768xf32>
    %cst_39 = arith.constant dense<0.000000e+00> : vector<1xf32>
    %64 = vector.multi_reduction <add>, %63, %cst_39 [1, 2] : vector<1x49x768xf32> to vector<1xf32>
    %65 = vector.shape_cast %64 : vector<1xf32> to vector<1x1x1xf32>
    %66 = vector.extract %65[0, 0, 0] : f32 from vector<1x1x1xf32>
    %cst_40 = arith.constant 2.65731287E-5 : f32
    %67 = arith.mulf %66, %cst_40 : f32
    %68 = arith.mulf %61, %61 : f32
    %69 = arith.subf %67, %68 : f32
    %cst_41 = arith.constant 9.99999974E-6 : f32
    %70 = arith.addf %69, %cst_41 : f32
    %71 = math.rsqrt %70 : f32
    %72 = arith.extf %2 : vector<49x768xbf16> to vector<49x768xf32>
    %73 = arith.mulf %56, %72 : vector<49x768xf32>
    %cst_42 = arith.constant dense<0.000000e+00> : vector<768xf32>
    %74 = vector.multi_reduction <add>, %73, %cst_42 [0] : vector<49x768xf32> to vector<768xf32>
    %75 = vector.shape_cast %74 : vector<768xf32> to vector<1x768xf32>
    %cst_43 = arith.constant 0.0204081628 : f32
    %76 = arith.mulf %71, %cst_43 : f32
    %77 = vector.broadcast %61 : f32 to vector<1x768xf32>
    %78 = arith.mulf %77, %3 : vector<1x768xf32>
    %79 = arith.subf %75, %78 : vector<1x768xf32>
    %80 = vector.broadcast %76 : f32 to vector<1x768xf32>
    %81 = arith.mulf %80, %79 : vector<1x768xf32>
    %82 = arith.addf %81, %4 : vector<1x768xf32>
    %cst_44 = arith.constant 0.000000e+00 : f32
    %83 = vector.broadcast %cst_44 : f32 to vector<1x768xf32>
    %84 = arith.maximumf %82, %83 : vector<1x768xf32>
    %85 = arith.truncf %84 : vector<1x768xf32> to vector<1x768xbf16>
    %c0_45 = arith.constant 0 : index
    %c0_46 = arith.constant 0 : index
    %86 = vector.load %arg8[%c0_45, %c0_46] : memref<768x128xbf16, #tpu.memory_space<vmem>>, vector<768x128xbf16>
    %cst_47 = arith.constant dense<0.000000e+00> : vector<1x128xf32>
    %87 = tpu.matmul %85, %86, %cst_47 {dimension_numbers = #tpu.dot_dimension_numbers<[1], [0], [0], [1], [0, 0, 1, 1], [], []>} : vector<1x768xbf16>, vector<768x128xbf16>, vector<1x128xf32> -> vector<1x128xf32>
    %c0_48 = arith.constant 0 : index
    %c0_49 = arith.constant 0 : index
    %88 = vector.load %arg9[%c0_48, %c0_49] : memref<1x128xf32, #tpu.memory_space<vmem>>, vector<1x128xf32>
    %89 = arith.addf %87, %88 : vector<1x128xf32>
    %c1_50 = arith.constant 1 : index
    %c0_51 = arith.constant 0 : index
    %c0_52 = arith.constant 0 : index
    %90 = vector.load %arg10[%c1_50, %c0_51, %c0_52] : memref<2x1x128xf32, #tpu.memory_space<vmem>>, vector<1x1x128xf32>
    %91 = vector.shape_cast %90 : vector<1x1x128xf32> to vector<1x128xf32>
    %92 = vector.shape_cast %89 : vector<1x128xf32> to vector<1x1x128xf32>
    tpu.vector_store %arg10[%c1_50, %c0_51, %c0_52], %92 {strides = array<i32>} : memref<2x1x128xf32, #tpu.memory_space<vmem>>, vector<1x1x128xf32>,
    return
  }
  func.func @transform_0(%arg0: i32) -> (i32, i32, i32) {
    %c0_i32 = arith.constant 0 : i32
    %c0_i32_0 = arith.constant 0 : i32
    %c0_i32_1 = arith.constant 0 : i32
    return %arg0, %c0_i32, %c0_i32_0 : i32, i32, i32
  }
  func.func @transform_1(%arg0: i32) -> (i32, i32, i32) {
    %c0_i32 = arith.constant 0 : i32
    %c0_i32_0 = arith.constant 0 : i32
    %c0_i32_1 = arith.constant 0 : i32
    return %arg0, %c0_i32, %c0_i32_0 : i32, i32, i32
  }
  func.func @transform_2(%arg0: i32) -> (i32, i32) {
    %c0_i32 = arith.constant 0 : i32
    %c0_i32_0 = arith.constant 0 : i32
    %c0_i32_1 = arith.constant 0 : i32
    return %c0_i32, %c0_i32_0 : i32, i32
  }
  func.func @transform_3(%arg0: i32) -> (i32, i32) {
    %c0_i32 = arith.constant 0 : i32
    %c0_i32_0 = arith.constant 0 : i32
    %c0_i32_1 = arith.constant 0 : i32
    return %c0_i32, %c0_i32_0 : i32, i32
  }
  func.func @transform_4(%arg0: i32) -> (i32, i32) {
    %c0_i32 = arith.constant 0 : i32
    %c0_i32_0 = arith.constant 0 : i32
    %c0_i32_1 = arith.constant 0 : i32
    return %c0_i32, %c0_i32_0 : i32, i32
  }
  func.func @transform_5(%arg0: i32) -> (i32, i32) {
    %c0_i32 = arith.constant 0 : i32
    %c0_i32_0 = arith.constant 0 : i32
    %c0_i32_1 = arith.constant 0 : i32
    return %c0_i32, %c0_i32_0 : i32, i32
  }
  func.func @transform_6(%arg0: i32) -> (i32, i32) {
    %c0_i32 = arith.constant 0 : i32
    %c0_i32_0 = arith.constant 0 : i32
    %c0_i32_1 = arith.constant 0 : i32
    return %c0_i32, %c0_i32_0 : i32, i32
  }
  func.func @transform_7(%arg0: i32) -> (i32, i32) {
    %c0_i32 = arith.constant 0 : i32
    %c0_i32_0 = arith.constant 0 : i32
    %c0_i32_1 = arith.constant 0 : i32
    return %c0_i32, %c0_i32_0 : i32, i32
  }
  func.func @transform_8(%arg0: i32) -> (i32, i32) {
    %c0_i32 = arith.constant 0 : i32
    %c0_i32_0 = arith.constant 0 : i32
    %c0_i32_1 = arith.constant 0 : i32
    return %c0_i32, %c0_i32_0 : i32, i32
  }
  func.func @transform_9(%arg0: i32) -> (i32, i32, i32) {
    %c0_i32 = arith.constant 0 : i32
    %c0_i32_0 = arith.constant 0 : i32
    %c0_i32_1 = arith.constant 0 : i32
    return %arg0, %c0_i32, %c0_i32_0 : i32, i32, i32
  }
}

</mosaic_0001>

<bundles_post_ra>
// kernel: _forward_jit.1
= control target key start
LH: loop header
LB: loop body
LE: loop exit
PB: predicated region body
PF: predicated region fallthrough
CT: control target
= control target key end

     0   :  { %14 = vsyncpa [#allocation3], 0  ;;  %s8687_s0 = inlined_call_operand.vmem [shape: bf16[2,49,512], index: 0, kind: input, shape index: {}]   ;;  %s8688_s1 = inlined_call_operand.vmem [shape: bf16[2,49,256], index: 1, kind: input, shape index: {}]   ;;  %s8689_s2 = inlined_call_operand.hbm [shape: bf16[768,768], index: 2, kind: input, shape index: {}]   ;;  %s8690_s3 = inlined_call_operand.hbm [shape: f32[1,768], index: 3, kind: input, shape index: {}]   ;;  %s8691_s4 = inlined_call_operand.hbm [shape: bf16[49,768], index: 4, kind: input, shape index: {}]   ;;  %s8692_s5 = inlined_call_operand.hbm [shape: f32[1,768], index: 5, kind: input, shape index: {}]   ;;  %s8693_s6 = inlined_call_operand.hbm [shape: f32[1,768], index: 6, kind: input, shape index: {}]   ;;  %s8694_s7 = inlined_call_operand.hbm [shape: bf16[768,128], index: 7, kind: input, shape index: {}]   ;;  %s8695_s8 = inlined_call_operand.hbm [shape: f32[1,128], index: 8, kind: input, shape index: {}]   ;;  %s8696_s9 = inlined_call_operand.hbm [shape: f32[2,1,128], index: 9, kind: output, shape index: {}]  }
   0x1   :  { %15 = vsyncpa [#allocation6], 0 }
   0x2   :  { %16 = vsyncpa [#allocation9], 0 }
   0x3   :  { %17 = vsyncpa [#allocation12], 0 }
   0x4   :  { %18 = vsyncpa [#allocation4], 0  ;;  %s6935_s30 = smov [#allocation5]   ;;  %s6936_s11 = smov [#allocation8]  }
   0x5   :  { %s41_s10 = sshll.u32 %s6935_s30, 4  ;;  %s63_s12 = sshll.u32 %s6936_s11, 4  ;;  %s42_s10 = int_to_ptr.vmem [resolvable:$true] %s41_s10  ;;  %s64_s12 = int_to_ptr.vmem [resolvable:$true] %s63_s12 }
   0x6   :  { %s6773_s13 = scalar_lea.vmem %s42_s10, 96  ;;  %p6778_p1 = scmp.lt.s32.totalorder %s42_s10, %s42_s10 }
   0x7   :  { %p6774_p0 = scmp.ne.s32.totalorder %s42_s10, %s6773_s13  ;;  %p6779_p2 = scmp.lt.s32.totalorder %s6773_s13, %s6773_s13 }
   0x9   :  { %p6780_p3 = por %p6779_p2, %p6778_p1 }
   0xb   :  { %p6781_p4 = pnand %p6780_p3, %p6774_p0 }
   0xd   :  { %6784 = shalt.err (!%p6781_p4)
}
   0xe   :  { %44 = dma.hbm_to_vmem [thread:$0]  %s8690_s3, 96, %s42_s10, [#allocation6]  }
   0xf   :  { %s6793_s16 = scalar_lea.vmem %s64_s12, 96  ;;  %p6798_p6 = scmp.lt.s32.totalorder %s64_s12, %s64_s12 }
  0x10   :  { %p6794_p5 = scmp.ne.s32.totalorder %s64_s12, %s6793_s16  ;;  %p6799_p7 = scmp.lt.s32.totalorder %s6793_s16, %s6793_s16 }
  0x12   :  { %p6800_p8 = por %p6799_p7, %p6798_p6 }
  0x14   :  { %p6801_p9 = pnand %p6800_p8, %p6794_p5 }
  0x16   :  { %6804 = shalt.err (!%p6801_p9)
}
  0x17   :  { %66 = dma.hbm_to_vmem [thread:$0]  %s8692_s5, 96, %s64_s12, [#allocation9]  }
  0x18   :  { %s6937_s19 = smov [#allocation11]  }
  0x19   :  { %s82_s20 = sshll.u32 %s6937_s19, 4  ;;  %s83_s20 = int_to_ptr.vmem [resolvable:$true] %s82_s20 }
  0x1a   :  { %s6813_s21 = scalar_lea.vmem %s83_s20, 6144  ;;  %p6818_p11 = scmp.lt.s32.totalorder %s83_s20, %s83_s20 }
  0x1b   :  { %p6814_p10 = scmp.ne.s32.totalorder %s83_s20, %s6813_s21  ;;  %p6819_p12 = scmp.lt.s32.totalorder %s6813_s21, %s6813_s21 }
  0x1d   :  { %p6820_p13 = por %p6819_p12, %p6818_p11 }
  0x1f   :  { %p6821_p0 = pnand %p6820_p13, %p6814_p10 }
  0x21   :  { %6824 = shalt.err (!%p6821_p0)
}
  0x22   :  { %s6938_s3 = smov 64   ;;  %s6939_s22 = smov 4  }
  0x23   :  { %88 = dma.hbm_to_vmem [thread:$0]  %s8694_s7, 6144, %s83_s20, [#allocation12], %s6938_s3, %s6938_s3, %s6939_s22  }
  0x24   :  { %s6940_s25 = smov [#allocation2]  }
  0x25   :  { %s28_s26 = sshll.u32 %s6940_s25, 4  ;;  %s29_s26 = int_to_ptr.vmem [resolvable:$true] %s28_s26 }
  0x26   :  { %s6833_s5 = scalar_lea.vmem %s29_s26, 36864  ;;  %p6838_p2 = scmp.lt.s32.totalorder %s29_s26, %s29_s26 }
  0x27   :  { %p6834_p1 = scmp.ne.s32.totalorder %s29_s26, %s6833_s5  ;;  %p6839_p3 = scmp.lt.s32.totalorder %s6833_s5, %s6833_s5 }
  0x29   :  { %p6840_p4 = por %p6839_p3, %p6838_p2 }
  0x2b   :  { %p6841_p5 = pnand %p6840_p4, %p6834_p1 }
  0x2d   :  { %6844 = shalt.err (!%p6841_p5)
}
  0x2e   :  { %s6941_s27 = smov 384   ;;  %s6942_s28 = smov 24  }
  0x2f   :  { %34 = dma.hbm_to_vmem [thread:$0]  %s8689_s2, 36864, %s29_s26, [#allocation3], %s6941_s27, %s6941_s27, %s6942_s28  }
  0x30   :  { %s6943_s10 = smov [#allocation7]   ;;  %s6944_s12 = smov [#allocation10]  }
  0x31   :  { %s50_s11 = sshll.u32 %s6943_s10, 4  ;;  %s73_s7 = sshll.u32 %s6944_s12, 4  ;;  %s51_s11 = int_to_ptr.vmem [resolvable:$true] %s50_s11  ;;  %s74_s7 = int_to_ptr.vmem [resolvable:$true] %s73_s7 }
  0x32   :  { %s6853_s13 = scalar_lea.vmem %s51_s11, 2688  ;;  %p6858_p7 = scmp.lt.s32.totalorder %s51_s11, %s51_s11 }
  0x33   :  { %p6854_p6 = scmp.ne.s32.totalorder %s51_s11, %s6853_s13  ;;  %p6859_p8 = scmp.lt.s32.totalorder %s6853_s13, %s6853_s13 }
  0x35   :  { %p6860_p9 = por %p6859_p8, %p6858_p7 }
  0x37   :  { %p6861_p10 = pnand %p6860_p9, %p6854_p6 }
  0x39   :  { %6864 = shalt.err (!%p6861_p10)
}
  0x3a   :  { %56 = dma.hbm_to_vmem [thread:$0]  %s8691_s4, 2688, %s51_s11, [#allocation6], %s6941_s27, %s6941_s27, %s6942_s28  }
  0x3b   :  { %s6873_s16 = scalar_lea.vmem %s74_s7, 96  ;;  %p6878_p12 = scmp.lt.s32.totalorder %s74_s7, %s74_s7 }
  0x3c   :  { %p6874_p11 = scmp.ne.s32.totalorder %s74_s7, %s6873_s16  ;;  %p6879_p13 = scmp.lt.s32.totalorder %s6873_s16, %s6873_s16 }
  0x3e   :  { %p6880_p0 = por %p6879_p13, %p6878_p12 }
  0x40   :  { %p6881_p1 = pnand %p6880_p0, %p6874_p11 }
  0x42   :  { %6884 = shalt.err (!%p6881_p1)
}
  0x43   :  { %76 = dma.hbm_to_vmem [thread:$0]  %s8693_s6, 96, %s74_s7, [#allocation9]  }
  0x44   :  { %s6945_s18 = smov [#allocation13]  }
  0x45   :  { %s95_s19 = sshll.u32 %s6945_s18, 4  ;;  %s96_s19 = int_to_ptr.vmem [resolvable:$true] %s95_s19 }
  0x46   :  { %s6893_s20 = scalar_lea.vmem %s96_s19, 16  ;;  %s6897_s21 = scalar_lea.vmem %s96_s19, 32 }
  0x47   :  { %p6894_p2 = scmp.ne.s32.totalorder %s96_s19, %s6893_s20  ;;  %p6898_p3 = scmp.lt.s32.totalorder %s96_s19, %s96_s19 }
  0x48   :  { %p6899_p4 = scmp.lt.s32.totalorder %s6897_s21, %s6893_s20 }
  0x4a   :  { %p6900_p5 = por %p6899_p4, %p6898_p3 }
  0x4c   :  { %p6901_p6 = pnand %p6900_p5, %p6894_p2 }
  0x4e   :  { %6904 = shalt.err (!%p6901_p6)
}
  0x4f   :  { %98 = dma.hbm_to_vmem [thread:$0]  %s8695_s8, 16, %s96_s19, [#allocation12]  }
  0x50   :  { %6925 = dma.done.wait [#allocation3], 36864  }
  0x51   :  { %6926 = vsyncadd [#allocation3], 4294930432 }
  0x52   :  { %6927 = dma.done.wait [#allocation6], 2784  }
  0x53   :  { %6928 = vsyncadd [#allocation6], 4294964512 }
  0x54   :  { %6929 = dma.done.wait [#allocation9], 192  }
  0x55   :  { %6930 = vsyncadd [#allocation9], 4294967104 }
  0x56   :  { %6931 = dma.done.wait [#allocation12], 6160  }
  0x57   :  { %6932 = vsyncadd [#allocation12], 4294961136  ;;  %v5860_v0 = vld [vmem:[#allocation2 + $0x154] ss:$24 sps:$4 sm:$0xff]   ;;  %v5862_v1 = vld [vmem:[#allocation2 + $0x150] ss:$24 sps:$4 sm:$0xff]  }
  0x58   :  { %2036 = vmatprep.subr.bf16.mxu0 %v5860_v0  ;;  %v5863_v2 = vld [vmem:[#allocation2 + $0x454] ss:$24 sps:$4 sm:$0xff]   ;;  %v5865_v3 = vld [vmem:[#allocation2 + $0x450] ss:$24 sps:$4 sm:$0xff]   ;;  %v5866_v4 = vld [vmem:[#allocation2 + $0x124] ss:$24 sps:$4 sm:$0xff]  }
  0x59   :  { %2037 = vmatpush1.bf16.msra.mxu0 %v5862_v1  ;;  %v5868_v5 = vld [vmem:[#allocation2 + $0x120] ss:$24 sps:$4 sm:$0xff]   ;;  %2107 = vmatprep.subr.bf16.mxu1 %v5863_v2  ;;  %v5869_v6 = vld [vmem:[#allocation2 + $0x424] ss:$24 sps:$4 sm:$0xff]   ;;  %v5872_v8 = vld [vmem:[#allocation2 + $0xf4] ss:$24 sps:$4 sm:$0xff]  }
  0x5a   :  { %2108 = vmatpush1.bf16.msra.mxu1 %v5865_v3  ;;  %2038 = vmatprep.subr.bf16.mxu0 %v5866_v4  ;;  %v5871_v7 = vld [vmem:[#allocation2 + $0x420] ss:$24 sps:$4 sm:$0xff]   ;;  %v5874_v9 = vld [vmem:[#allocation2 + $0xf0] ss:$24 sps:$4 sm:$0xff]   ;;  %v5875_v10 = vld [vmem:[#allocation2 + $0x3f4] ss:$24 sps:$4 sm:$0xff]  }
  0x5b   :  { %2109 = vmatprep.subr.bf16.mxu1 %v5869_v6  ;;  %v5878_v11 = vld [vmem:[#allocation2 + $0xc4] ss:$24 sps:$4 sm:$0xff]   ;;  %v5877_v12 = vld [vmem:[#allocation2 + $0x3f0] ss:$24 sps:$4 sm:$0xff]   ;;  %v5880_v14 = vld [vmem:[#allocation2 + $0xc0] ss:$24 sps:$4 sm:$0xff]  }
  0x5c   :  { %v5881_v13 = vld [vmem:[#allocation2 + $0x3c4] ss:$24 sps:$4 sm:$0xff]   ;;  %v5884_v15 = vld [vmem:[#allocation2 + $0x94] ss:$24 sps:$4 sm:$0xff]   ;;  %v5883_v16 = vld [vmem:[#allocation2 + $0x3c0] ss:$24 sps:$4 sm:$0xff]  }
  0x5d   :  { %2039 = vmatpush1.bf16.msra.mxu0 %v5868_v5  ;;  %v5887_v17 = vld [vmem:[#allocation2 + $0x394] ss:$24 sps:$4 sm:$0xff]   ;;  %v5886_v18 = vld [vmem:[#allocation2 + $0x90] ss:$24 sps:$4 sm:$0xff]   ;;  %v5890_v19 = vld [vmem:[#allocation2 + $0x64] ss:$24 sps:$4 sm:$0xff]  }
  0x5e   :  { %2040 = vmatprep.subr.bf16.mxu0 %v5872_v8  ;;  %2110 = vmatpush1.bf16.msra.mxu1 %v5871_v7  ;;  %v5889_v20 = vld [vmem:[#allocation2 + $0x390] ss:$24 sps:$4 sm:$0xff]   ;;  %v5893_v21 = vld [vmem:[#allocation2 + $0x364] ss:$24 sps:$4 sm:$0xff]   ;;  %v5892_v22 = vld [vmem:[#allocation2 + $0x60] ss:$24 sps:$4 sm:$0xff]  }
  0x5f   :  { %2111 = vmatprep.subr.bf16.mxu1 %v5875_v10  ;;  %v5896_v23 = vld [vmem:[#allocation2 + $0x34] ss:$24 sps:$4 sm:$0xff]   ;;  %v5895_v24 = vld [vmem:[#allocation2 + $0x360] ss:$24 sps:$4 sm:$0xff]   ;;  %v5898_v26 = vld [vmem:[#allocation2 + $0x30] ss:$24 sps:$4 sm:$0xff]  }
  0x60   :  { %v5899_v25 = vld [vmem:[#allocation2 + $0x334] ss:$24 sps:$4 sm:$0xff]   ;;  %v5902_v27 = vld [vmem:[#allocation2 + $0x4] ss:$24 sps:$4 sm:$0xff]   ;;  %v5901_v28 = vld [vmem:[#allocation2 + $0x330] ss:$24 sps:$4 sm:$0xff]  }
  0x61   :  { %2041 = vmatpush1.bf16.msra.mxu0 %v5874_v9  ;;  %v5905_v29 = vld [vmem:[#allocation2 + $0x304] ss:$24 sps:$4 sm:$0xff]   ;;  %v5904_v30 = vld [vmem:[#allocation2] ss:$24 sps:$4 sm:$0xff]   ;;  %v5908_v31 = vld [vmem:[#allocation2 + $0x2d4] ss:$24 sps:$4 sm:$0xff]  }
  0x62   :  { %2042 = vmatprep.subr.bf16.mxu0 %v5878_v11  ;;  %2112 = vmatpush1.bf16.msra.mxu1 %v5877_v12  ;;  %v5907_v32 = vld [vmem:[#allocation2 + $0x300] ss:$24 sps:$4 sm:$0xff]   ;;  %v5911_v33 = vld [vmem:[#allocation2 + $0x5d4] ss:$24 sps:$4 sm:$0xff]   ;;  %v5910_v34 = vld [vmem:[#allocation2 + $0x2d0] ss:$24 sps:$4 sm:$0xff]  }
  0x63   :  { %2113 = vmatprep.subr.bf16.mxu1 %v5881_v13  ;;  %v5914_v35 = vld [vmem:[#allocation2 + $0x2a4] ss:$24 sps:$4 sm:$0xff]   ;;  %v5913_v36 = vld [vmem:[#allocation2 + $0x5d0] ss:$24 sps:$4 sm:$0xff]   ;;  %v5916_v38 = vld [vmem:[#allocation2 + $0x2a0] ss:$24 sps:$4 sm:$0xff]  }
  0x64   :  { %v5917_v37 = vld [vmem:[#allocation2 + $0x5a4] ss:$24 sps:$4 sm:$0xff]   ;;  %v5920_v39 = vld [vmem:[#allocation2 + $0x274] ss:$24 sps:$4 sm:$0xff]   ;;  %v5919_v40 = vld [vmem:[#allocation2 + $0x5a0] ss:$24 sps:$4 sm:$0xff]  }
  0x65   :  { %2043 = vmatpush1.bf16.msra.mxu0 %v5880_v14  ;;  %v5923_v41 = vld [vmem:[#allocation2 + $0x574] ss:$24 sps:$4 sm:$0xff]   ;;  %v5922_v42 = vld [vmem:[#allocation2 + $0x270] ss:$24 sps:$4 sm:$0xff]   ;;  %v5926_v43 = vld [vmem:[#allocation2 + $0x244] ss:$24 sps:$4 sm:$0xff]  }
  0x66   :  { %2044 = vmatprep.subr.bf16.mxu0 %v5884_v15  ;;  %2114 = vmatpush1.bf16.msra.mxu1 %v5883_v16  ;;  %v5925_v44 = vld [vmem:[#allocation2 + $0x570] ss:$24 sps:$4 sm:$0xff]   ;;  %v5929_v45 = vld [vmem:[#allocation2 + $0x544] ss:$24 sps:$4 sm:$0xff]   ;;  %v5928_v46 = vld [vmem:[#allocation2 + $0x240] ss:$24 sps:$4 sm:$0xff]  }
  0x67   :  { %2115 = vmatprep.subr.bf16.mxu1 %v5887_v17  ;;  %v7023_v47 = vld [vmem:[%s8687_s0 + $0x4] ss:$16 sps:$4 sm:$0xff]   ;;  %v5931_v49 = vld [vmem:[#allocation2 + $0x540] ss:$24 sps:$4 sm:$0xff]   ;;  %v7029_v51 = vld [vmem:[%s8687_s0 + $0xc] ss:$16 sps:$4 sm:$0xff]  }
  0x68   :  { %v5932_v48 = vld [vmem:[#allocation2 + $0x214] ss:$24 sps:$4 sm:$0xff]   ;;  %2068 = vmatprep.mubr.bf16.mxu0 %v7023_v47  ;;  %v5934_v52 = vld [vmem:[#allocation2 + $0x210] ss:$24 sps:$4 sm:$0xff]   ;;  %v5938_v53 = vld [vmem:[#allocation2 + $0x1e4] ss:$24 sps:$4 sm:$0xff]   ;;  %2139 = vmatprep.mubr.bf16.mxu1 %v7029_v51 }
  0x69   :  { %2045 = vmatpush1.bf16.msra.mxu0 %v5886_v18  ;;  %v5935_v50 = vld [vmem:[#allocation2 + $0x514] ss:$24 sps:$4 sm:$0xff]   ;;  %v5937_v54 = vld [vmem:[#allocation2 + $0x510] ss:$24 sps:$4 sm:$0xff]   ;;  %v5941_v55 = vld [vmem:[#allocation2 + $0x4e4] ss:$24 sps:$4 sm:$0xff]  }
  0x6a   :  { %2046 = vmatprep.subr.bf16.mxu0 %v5890_v19  ;;  %2116 = vmatpush1.bf16.msra.mxu1 %v5889_v20  ;;  %v5940_v56 = vld [vmem:[#allocation2 + $0x1e0] ss:$24 sps:$4 sm:$0xff]   ;;  %v5944_v57 = vld [vmem:[#allocation2 + $0x1b4] ss:$24 sps:$4 sm:$0xff]   ;;  %v5946_v60 = vld [vmem:[#allocation2 + $0x1b0] ss:$24 sps:$4 sm:$0xff]  }
  0x6b   :  { %2117 = vmatprep.subr.bf16.mxu1 %v5893_v21  ;;  %v5943_v58 = vld [vmem:[#allocation2 + $0x4e0] ss:$24 sps:$4 sm:$0xff]   ;;  %v5947_v59 = vld [vmem:[#allocation2 + $0x4b4] ss:$24 sps:$4 sm:$0xff]   ;;  %v5950_v61 = vld [vmem:[#allocation2 + $0x184] ss:$24 sps:$4 sm:$0xff]  }
  0x6c   :  { %v5949_v62 = vld [vmem:[#allocation2 + $0x4b0] ss:$24 sps:$4 sm:$0xff]   ;;  %v5953_v63 = vld [vmem:[#allocation2 + $0x484] ss:$24 sps:$4 sm:$0xff]   ;;  %v5952_v0 = vld [vmem:[#allocation2 + $0x180] ss:$24 sps:$4 sm:$0xff]  }
  0x6d   :  { %2047 = vmatpush1.bf16.msra.mxu0 %v5892_v22  ;;  %v5961_v1 = vld [vmem:[#allocation2 + $0x754] ss:$24 sps:$4 sm:$0xff]   ;;  %v5957_v2 = vld [vmem:[#allocation2 + $0x480] ss:$24 sps:$4 sm:$0xff]   ;;  %v5959_v5 = vld [vmem:[#allocation2 + $0x750] ss:$24 sps:$4 sm:$0xff]  }
  0x6e   :  { %2048 = vmatprep.subr.bf16.mxu0 %v5896_v23  ;;  %2118 = vmatpush1.bf16.msra.mxu1 %v5895_v24  ;;  %v7035_v3 = vld [vmem:[%s8687_s0] ss:$16 sps:$4 sm:$0xff]   ;;  %v5967_v4 = vld [vmem:[#allocation2 + $0x15c] ss:$24 sps:$4 sm:$0xff]   ;;  %v7040_v6 = vld [vmem:[%s8687_s0 + $0x8] ss:$16 sps:$4 sm:$0xff]  }
  0x6f   :  { %2119 = vmatprep.subr.bf16.mxu1 %v5899_v25  ;;  %v5970_v7 = vld [vmem:[#allocation2 + $0x724] ss:$24 sps:$4 sm:$0xff]   ;;  %v5965_v8 = vld [vmem:[#allocation2 + $0x158] ss:$24 sps:$4 sm:$0xff]   ;;  %v5971_v11 = vld [vmem:[#allocation2 + $0x128] ss:$24 sps:$4 sm:$0xff]  }
  0x70   :  { %v5968_v9 = vld [vmem:[#allocation2 + $0x720] ss:$24 sps:$4 sm:$0xff]   ;;  %v5973_v10 = vld [vmem:[#allocation2 + $0x12c] ss:$24 sps:$4 sm:$0xff]   ;;  %v5974_v14 = vld [vmem:[#allocation2 + $0x6f0] ss:$24 sps:$4 sm:$0xff]  }
  0x71   :  { %2049 = vmatpush1.bf16.msra.mxu0 %v5898_v26  ;;  %v5976_v12 = vld [vmem:[#allocation2 + $0x6f4] ss:$24 sps:$4 sm:$0xff]   ;;  %v7053_v16 = vld [vmem:[%s8687_s0 + $0x20] ss:$16 sps:$4 sm:$0xff]   ;;  %v5982_v19 = vld [vmem:[#allocation2 + $0x6c4] ss:$24 sps:$4 sm:$0xff]  }
  0x72   :  { %2050 = vmatprep.subr.bf16.mxu0 %v5902_v27  ;;  %2120 = vmatpush1.bf16.msra.mxu1 %v5901_v28  ;;  %v7047_v13 = vld [vmem:[%s8687_s0 + $0x24] ss:$16 sps:$4 sm:$0xff]   ;;  %v7058_v17 = vld [vmem:[%s8687_s0 + $0x2c] ss:$16 sps:$4 sm:$0xff]   ;;  %v5977_v18 = vld [vmem:[#allocation2 + $0xf8] ss:$24 sps:$4 sm:$0xff]  }
  0x73   :  { %2121 = vmatprep.subr.bf16.mxu1 %v5905_v29  ;;  %v5979_v15 = vld [vmem:[#allocation2 + $0xfc] ss:$24 sps:$4 sm:$0xff]   ;;  %v7064_v20 = vld [vmem:[%s8687_s0 + $0x28] ss:$16 sps:$4 sm:$0xff]   ;;  %v5985_v22 = vld [vmem:[#allocation2 + $0xcc] ss:$24 sps:$4 sm:$0xff]  }
  0x74   :  { %v5980_v21 = vld [vmem:[#allocation2 + $0x6c0] ss:$24 sps:$4 sm:$0xff]   ;;  %v5988_v24 = vld [vmem:[#allocation2 + $0x694] ss:$24 sps:$4 sm:$0xff]   ;;  %v5986_v26 = vld [vmem:[#allocation2 + $0x690] ss:$24 sps:$4 sm:$0xff]  }
  0x75   :  { %2051 = vmatpush1.bf16.msra.mxu0 %v5904_v30  ;;  %v5983_v23 = vld [vmem:[#allocation2 + $0xc8] ss:$24 sps:$4 sm:$0xff]   ;;  %v7071_v25 = vld [vmem:[%s8687_s0 + $0x44] ss:$16 sps:$4 sm:$0xff]   ;;  %v7082_v29 = vld [vmem:[%s8687_s0 + $0x4c] ss:$16 sps:$4 sm:$0xff]  }
  0x76   :  { %2052 = vmatprep.subr.bf16.mxu0 %v5908_v31  ;;  %2122 = vmatpush1.bf16.msra.mxu1 %v5907_v32  ;;  %v5991_v27 = vld [vmem:[#allocation2 + $0x9c] ss:$24 sps:$4 sm:$0xff]   ;;  %v7077_v28 = vld [vmem:[%s8687_s0 + $0x40] ss:$16 sps:$4 sm:$0xff]   ;;  %v7088_v32 = vld [vmem:[%s8687_s0 + $0x48] ss:$16 sps:$4 sm:$0xff]  }
  0x77   :  { %2123 = vmatprep.subr.bf16.mxu1 %v5911_v33  ;;  %v5989_v30 = vld [vmem:[#allocation2 + $0x98] ss:$24 sps:$4 sm:$0xff]   ;;  %v5994_v31 = vld [vmem:[#allocation2 + $0x664] ss:$24 sps:$4 sm:$0xff]   ;;  %vm2710_vm0 = vcmask 1040384  }
  0x78   :  { %v5997_v33 = vld [vmem:[#allocation2 + $0x6c] ss:$24 sps:$4 sm:$0xff]  }
  0x79   :  { %2053 = vmatpush2.bf16.msra.mxu0 %v5910_v34  ;;  %v5992_v34 = vld [vmem:[#allocation2 + $0x660] ss:$24 sps:$4 sm:$0xff]  }
  0x7a   :  { %2054 = vmatprep.subr.bf16.mxu0 %v5914_v35  ;;  %2124 = vmatpush2.bf16.msra.mxu1 %v5913_v36  ;;  %v6000_v35 = vld [vmem:[#allocation2 + $0x634] ss:$24 sps:$4 sm:$0xff]   ;;  %v445_v36 = vld [vmem:[%s8687_s0 + $0x60] sm:$0x11] }
  0x7b   :  { %2125 = vmatprep.subr.bf16.mxu1 %v5917_v37  ;;  %v5995_v37 = vld [vmem:[#allocation2 + $0x68] ss:$24 sps:$4 sm:$0xff]  }
  0x7d   :  { %2055 = vmatpush2.bf16.msra.mxu0 %v5916_v38  ;;  %v7095_v38 = vcombine.high %v445_v36, %v445_v36 }
  0x7e   :  { %2056 = vmatprep.subr.bf16.mxu0 %v5920_v39  ;;  %2126 = vmatpush2.bf16.msra.mxu1 %v5919_v40  ;;  %v6003_v39 = vld [vmem:[#allocation2 + $0x3c] ss:$24 sps:$4 sm:$0xff]   ;;  %v7097_v40 = vcombine.low %v445_v36, %v445_v36  ;;  %v6080_v36 = vld [vmem:[#allocation2 + $0x758] ss:$24 sps:$4 sm:$0xff]  }
  0x7f   :  { %2127 = vmatprep.subr.bf16.mxu1 %v5923_v41  ;;  %v5998_v41 = vld [vmem:[#allocation2 + $0x630] ss:$24 sps:$4 sm:$0xff]  }
  0x81   :  { %2057 = vmatpush2.bf16.msra.mxu0 %v5922_v42  ;;  %v6006_v42 = vld [vmem:[#allocation2 + $0x604] ss:$24 sps:$4 sm:$0xff]  }
  0x82   :  { %2058 = vmatprep.subr.bf16.mxu0 %v5926_v43  ;;  %2128 = vmatpush2.bf16.msra.mxu1 %v5925_v44  ;;  %v446_v43 = vld [vmem:[%s8687_s0 + $0x68] sm:$0x11]  ;;  %v6001_v44 = vld [vmem:[#allocation2 + $0x38] ss:$24 sps:$4 sm:$0xff]  }
  0x83   :  { %2129 = vmatprep.subr.bf16.mxu1 %v5929_v45  ;;  %v7103_v45 = vcombine.high %v446_v43, %v446_v43 }
  0x85   :  { %2059 = vmatpush2.bf16.msra.mxu0 %v5928_v46  ;;  %v7105_v46 = vcombine.low %v446_v43, %v446_v43  ;;  %v7133_v43 = vld [vmem:[%s8688_s1 + $0x10] ss:$8 sps:$4 sm:$0xff]  }
  0x86   :  { %2060 = vmatprep.subr.bf16.mxu0 %v5932_v48  ;;  %2130 = vmatpush2.bf16.msra.mxu1 %v5931_v49  ;;  %v6009_v48 = vld [vmem:[#allocation2 + $0xc] ss:$24 sps:$4 sm:$0xff]   ;;  %v6004_v49 = vld [vmem:[#allocation2 + $0x600] ss:$24 sps:$4 sm:$0xff]  }
  0x87   :  { %2131 = vmatprep.subr.bf16.mxu1 %v5935_v50  ;;  %v6012_v50 = vld [vmem:[#allocation2 + $0x8d4] ss:$24 sps:$4 sm:$0xff]  }
  0x89   :  { %2061 = vmatpush2.bf16.msra.mxu0 %v5934_v52  ;;  %v6007_v52 = vld [vmem:[#allocation2 + $0x8] ss:$24 sps:$4 sm:$0xff]  }
  0x8a   :  { %2062 = vmatprep.subr.bf16.mxu0 %v5938_v53  ;;  %2132 = vmatpush2.bf16.msra.mxu1 %v5937_v54  ;;  %v6010_v53 = vld [vmem:[#allocation2 + $0x8d0] ss:$24 sps:$4 sm:$0xff]   ;;  %v6017_v54 = vld [vmem:[#allocation2 + $0x2dc] ss:$24 sps:$4 sm:$0xff]  }
  0x8b   :  { %2133 = vmatprep.subr.bf16.mxu1 %v5941_v55  ;;  %v7114_v55 = vld [vmem:[%s8688_s1 + $0x4] ss:$8 sps:$4 sm:$0xff]  }
  0x8d   :  { %2063 = vmatpush2.bf16.msra.mxu0 %v5940_v56  ;;  %v6023_v56 = vld [vmem:[#allocation2 + $0x8a4] ss:$24 sps:$4 sm:$0xff]  }
  0x8e   :  { %2064 = vmatprep.subr.bf16.mxu0 %v5944_v57  ;;  %2134 = vmatpush2.bf16.msra.mxu1 %v5943_v58  ;;  %v6015_v57 = vld [vmem:[#allocation2 + $0x2d8] ss:$24 sps:$4 sm:$0xff]   ;;  %v6027_v58 = vld [vmem:[#allocation2 + $0x2ac] ss:$24 sps:$4 sm:$0xff]  }
  0x8f   :  { %2135 = vmatprep.subr.bf16.mxu1 %v5947_v59  ;;  %v6021_v59 = vld [vmem:[#allocation2 + $0x8a0] ss:$24 sps:$4 sm:$0xff]  }
  0x91   :  { %2065 = vmatpush2.bf16.msra.mxu0 %v5946_v60  ;;  %v6025_v60 = vld [vmem:[#allocation2 + $0x2a8] ss:$24 sps:$4 sm:$0xff]  }
  0x92   :  { %2066 = vmatprep.subr.bf16.mxu0 %v5950_v61  ;;  %2136 = vmatpush2.bf16.msra.mxu1 %v5949_v62  ;;  %v6035_v61 = vld [vmem:[#allocation2 + $0x27c] ss:$24 sps:$4 sm:$0xff]   ;;  %v6028_v62 = vld [vmem:[#allocation2 + $0x870] ss:$24 sps:$4 sm:$0xff]  }
  0x93   :  { %2137 = vmatprep.subr.bf16.mxu1 %v5953_v63  ;;  %v6041_v63 = vld [vmem:[#allocation2 + $0x844] ss:$24 sps:$4 sm:$0xff]  }
  0x95   :  { %2067 = vmatpush2.bf16.msra.mxu0 %v5952_v0  ;;  %v6033_v0 = vld [vmem:[#allocation2 + $0x278] ss:$24 sps:$4 sm:$0xff]  }
  0x96   :  { %2178 = vmatprep.subr.bf16.mxu0 %v5961_v1  ;;  %2138 = vmatpush2.bf16.msra.mxu1 %v5957_v2  ;;  %v6045_v1 = vld [vmem:[#allocation2 + $0x24c] ss:$24 sps:$4 sm:$0xff]   ;;  %v6039_v2 = vld [vmem:[#allocation2 + $0x840] ss:$24 sps:$4 sm:$0xff]  }
  0x97   :  { %2249 = vmatprep.subr.bf16.mxu1 %v5967_v4  ;;  %v6048_v4 = vld [vmem:[#allocation2 + $0x814] ss:$24 sps:$4 sm:$0xff]  }
  0x98   :  { %2069 = vmatmul.mubr.bf16.vlgmr.msra.gmra.mxu0 %v7035_v3 }
  0x99   :  { %2179 = vmatpush1.bf16.msra.mxu0 %v5959_v5  ;;  %2140 = vmatmul.mubr.bf16.vlgmr.msra.gmra.mxu1 %v7040_v6  ;;  %v6043_v5 = vld [vmem:[#allocation2 + $0x248] ss:$24 sps:$4 sm:$0xff]  }
  0x9a   :  { %2180 = vmatprep.subr.bf16.mxu0 %v5970_v7  ;;  %2250 = vmatpush1.bf16.msra.mxu1 %v5965_v8  ;;  %v6052_v7 = vld [vmem:[#allocation2 + $0x21c] ss:$24 sps:$4 sm:$0xff]   ;;  %v6046_v8 = vld [vmem:[#allocation2 + $0x810] ss:$24 sps:$4 sm:$0xff]  }
  0x9b   :  { %2251 = vmatprep.subr.bf16.mxu1 %v5973_v10  ;;  %2078 = vmatprep.mubr.bf16.mxu0 %v7047_v13  ;;  %v6050_v10 = vld [vmem:[#allocation2 + $0x218] ss:$24 sps:$4 sm:$0xff]  }
  0x9c   :  { %2149 = vmatprep.mubr.bf16.mxu1 %v7058_v17 }
  0x9d   :  { %2181 = vmatpush1.bf16.msra.mxu0 %v5968_v9  ;;  %v6056_v9 = vld [vmem:[#allocation2 + $0x7e4] ss:$24 sps:$4 sm:$0xff]  }
  0x9e   :  { %2182 = vmatprep.subr.bf16.mxu0 %v5976_v12  ;;  %2252 = vmatpush1.bf16.msra.mxu1 %v5971_v11  ;;  %v6059_v11 = vld [vmem:[#allocation2 + $0x1ec] ss:$24 sps:$4 sm:$0xff]   ;;  %v6054_v12 = vld [vmem:[#allocation2 + $0x7e0] ss:$24 sps:$4 sm:$0xff]  }
  0x9f   :  { %2253 = vmatprep.subr.bf16.mxu1 %v5979_v15  ;;  %v6057_v15 = vld [vmem:[#allocation2 + $0x1e8] ss:$24 sps:$4 sm:$0xff]  }
  0xa0   :  { %2079 = vmatmul.mubr.bf16.gmra.mxu0 %v7053_v16 }
  0xa1   :  { %2183 = vmatpush1.bf16.msra.mxu0 %v5974_v14  ;;  %2150 = vmatmul.mubr.bf16.gmra.mxu1 %v7064_v20  ;;  %v6063_v14 = vld [vmem:[#allocation2 + $0x7b4] ss:$24 sps:$4 sm:$0xff]  }
  0xa2   :  { %2184 = vmatprep.subr.bf16.mxu0 %v5982_v19  ;;  %2254 = vmatpush1.bf16.msra.mxu1 %v5977_v18  ;;  %v6067_v18 = vld [vmem:[#allocation2 + $0x1bc] ss:$24 sps:$4 sm:$0xff]   ;;  %v6061_v19 = vld [vmem:[#allocation2 + $0x7b0] ss:$24 sps:$4 sm:$0xff]  }
  0xa3   :  { %2255 = vmatprep.subr.bf16.mxu1 %v5985_v22  ;;  %2088 = vmatprep.mubr.bf16.mxu0 %v7071_v25  ;;  %v6065_v22 = vld [vmem:[#allocation2 + $0x1b8] ss:$24 sps:$4 sm:$0xff]  }
  0xa4   :  { %2159 = vmatprep.mubr.bf16.mxu1 %v7082_v29 }
  0xa5   :  { %2185 = vmatpush1.bf16.msra.mxu0 %v5980_v21  ;;  %v6070_v21 = vld [vmem:[#allocation2 + $0x784] ss:$24 sps:$4 sm:$0xff]  }
  0xa6   :  { %2186 = vmatprep.subr.bf16.mxu0 %v5988_v24  ;;  %2256 = vmatpush1.bf16.msra.mxu1 %v5983_v23  ;;  %v6073_v23 = vld [vmem:[#allocation2 + $0x18c] ss:$24 sps:$4 sm:$0xff]   ;;  %v6068_v24 = vld [vmem:[#allocation2 + $0x780] ss:$24 sps:$4 sm:$0xff]  }
  0xa7   :  { %2257 = vmatprep.subr.bf16.mxu1 %v5991_v27  ;;  %v6079_v27 = vld [vmem:[#allocation2 + $0x45c] ss:$24 sps:$4 sm:$0xff]  }
  0xa8   :  { %2089 = vmatmul.mubr.bf16.gmra.mxu0 %v7077_v28 }
  0xa9   :  { %2187 = vmatpush1.bf16.msra.mxu0 %v5986_v26  ;;  %2160 = vmatmul.mubr.bf16.gmra.mxu1 %v7088_v32  ;;  %v6071_v26 = vld [vmem:[#allocation2 + $0x188] ss:$24 sps:$4 sm:$0xff]  }
  0xaa   :  { %2188 = vmatprep.subr.bf16.mxu0 %v5994_v31  ;;  %2258 = vmatpush1.bf16.msra.mxu1 %v5989_v30  ;;  %v7120_v30 = vld [vmem:[%s8688_s1] ss:$8 sps:$4 sm:$0xff]   ;;  %v6082_v31 = vld [vmem:[#allocation2 + $0x75c] ss:$24 sps:$4 sm:$0xff]  }
  0xab   :  { %2259 = vmatprep.subr.bf16.mxu1 %v5997_v33  ;;  %2098 = vmatprep.mubr.bf16.mxu0 %v7095_v38  ;;  %v6077_v33 = vld [vmem:[#allocation2 + $0x458] ss:$24 sps:$4 sm:$0xff]  }
  0xac   :  { %2169 = vmatprep.mubr.bf16.mxu1 %v7103_v45 }
  0xad   :  { %2189 = vmatpush1.bf16.msra.mxu0 %v5992_v34  ;;  %v7125_v34 = vld [vmem:[%s8688_s1 + $0x14] ss:$8 sps:$4 sm:$0xff]  }
  0xae   :  { %2190 = vmatprep.subr.bf16.mxu0 %v6000_v35  ;;  %2260 = vmatpush1.bf16.msra.mxu1 %v5995_v37  ;;  %v6085_v35 = vld [vmem:[#allocation2 + $0x42c] ss:$24 sps:$4 sm:$0xff]  }
  0xaf   :  { %2261 = vmatprep.subr.bf16.mxu1 %v6003_v39  ;;  %v6088_v37 = vld [vmem:[#allocation2 + $0x72c] ss:$24 sps:$4 sm:$0xff]   ;;  %v6083_v39 = vld [vmem:[#allocation2 + $0x428] ss:$24 sps:$4 sm:$0xff]  }
  0xb0   :  { %2099 = vmatmul.mubr.bf16.gmra.mxu0 %v7097_v40 }
  0xb1   :  { %2191 = vmatpush1.bf16.msra.mxu0 %v5998_v41  ;;  %2170 = vmatmul.mubr.bf16.gmra.mxu1 %v7105_v46  ;;  %v6086_v41 = vld [vmem:[#allocation2 + $0x728] ss:$24 sps:$4 sm:$0xff]  }
  0xb2   :  { %2192 = vmatprep.subr.bf16.mxu0 %v6006_v42  ;;  %2262 = vmatpush1.bf16.msra.mxu1 %v6001_v44  ;;  %v6094_v42 = vld [vmem:[#allocation2 + $0x3fc] ss:$24 sps:$4 sm:$0xff]  }
  0xb3   :  { %2281 = vmatprep.mubr.bf16.mxu1 %v7023_v47  ;;  %2263 = vmatprep.subr.bf16.mxu1 %v6009_v48  ;;  %v6030_v47 = vld [vmem:[#allocation2 + $0x874] ss:$24 sps:$4 sm:$0xff]   ;;  %v6092_v48 = vld [vmem:[#allocation2 + $0x3f8] ss:$24 sps:$4 sm:$0xff]  }
  0xb4   :  { %2210 = vmatprep.mubr.bf16.mxu0 %v7114_v55  ;;  %v6097_v44 = vld [vmem:[#allocation2 + $0x6fc] ss:$24 sps:$4 sm:$0xff]  }
  0xb5   :  { %2193 = vmatpush1.bf16.msra.mxu0 %v6004_v49  ;;  %v7139_v49 = vld [vmem:[%s8688_s1 + $0x24] ss:$8 sps:$4 sm:$0xff]  }
  0xb6   :  { %2194 = vmatprep.subr.bf16.mxu0 %v6012_v50  ;;  %2264 = vmatpush1.bf16.msra.mxu1 %v6007_v52  ;;  %v6095_v50 = vld [vmem:[#allocation2 + $0x6f8] ss:$24 sps:$4 sm:$0xff]   ;;  %v6103_v52 = vld [vmem:[#allocation2 + $0x6cc] ss:$24 sps:$4 sm:$0xff]  }
  0xb7   :  { %2265 = vmatprep.subr.bf16.mxu1 %v6017_v54  ;;  %v6109_v54 = vld [vmem:[#allocation2 + $0x39c] ss:$24 sps:$4 sm:$0xff]  }
  0xb9   :  { %2195 = vmatpush2.bf16.msra.mxu0 %v6010_v53  ;;  %v6098_v53 = vld [vmem:[#allocation2 + $0x3c8] ss:$24 sps:$4 sm:$0xff]  }
  0xba   :  { %2196 = vmatprep.subr.bf16.mxu0 %v6023_v56  ;;  %2266 = vmatpush2.bf16.msra.mxu1 %v6015_v57  ;;  %v453_v56 = vld [vmem:[%s8688_s1 + $0x30] sm:$0x11]  ;;  %v7150_v57 = vld [vmem:[%s8688_s1 + $0x20] ss:$8 sps:$4 sm:$0xff]  }
  0xbb   :  { %2267 = vmatprep.subr.bf16.mxu1 %v6027_v58  ;;  %v6112_v58 = vld [vmem:[#allocation2 + $0x69c] ss:$24 sps:$4 sm:$0xff]  }
  0xbd   :  { %2197 = vmatpush2.bf16.msra.mxu0 %v6021_v59  ;;  %v6107_v59 = vld [vmem:[#allocation2 + $0x398] ss:$24 sps:$4 sm:$0xff]  }
  0xbe   :  { %2198 = vmatprep.subr.bf16.mxu0 %v6030_v47  ;;  %2268 = vmatpush2.bf16.msra.mxu1 %v6025_v60  ;;  %v7153_v47 = vcombine.high %v453_v56, %v453_v56  ;;  %v6115_v60 = vld [vmem:[#allocation2 + $0x36c] ss:$24 sps:$4 sm:$0xff]  }
  0xbf   :  { %2269 = vmatprep.subr.bf16.mxu1 %v6035_v61  ;;  %v6110_v61 = vld [vmem:[#allocation2 + $0x698] ss:$24 sps:$4 sm:$0xff]  }
  0xc1   :  { %2199 = vmatpush2.bf16.msra.mxu0 %v6028_v62  ;;  %v6113_v62 = vld [vmem:[#allocation2 + $0x368] ss:$24 sps:$4 sm:$0xff]  }
  0xc2   :  { %2200 = vmatprep.subr.bf16.mxu0 %v6041_v63  ;;  %2270 = vmatpush2.bf16.msra.mxu1 %v6033_v0  ;;  %v6116_v63 = vld [vmem:[#allocation2 + $0x668] ss:$24 sps:$4 sm:$0xff]   ;;  %v7159_v0 = vcombine.low %v453_v56, %v453_v56 }
  0xc3   :  { %2271 = vmatprep.subr.bf16.mxu1 %v6045_v1  ;;  %v6126_v1 = vld [vmem:[#allocation2 + $0x63c] ss:$24 sps:$4 sm:$0xff]   ;;  %v6178_v56 = vld [vmem:[#allocation2 + $0x788] ss:$24 sps:$4 sm:$0xff]  }
  0xc5   :  { %2201 = vmatpush2.bf16.msra.mxu0 %v6039_v2  ;;  %v6121_v2 = vld [vmem:[#allocation2 + $0x338] ss:$24 sps:$4 sm:$0xff]  }
  0xc6   :  { %2202 = vmatprep.subr.bf16.mxu0 %v6048_v4  ;;  %2272 = vmatpush2.bf16.msra.mxu1 %v6043_v5  ;;  %v6129_v4 = vld [vmem:[#allocation2 + $0x30c] ss:$24 sps:$4 sm:$0xff]   ;;  %v6124_v5 = vld [vmem:[#allocation2 + $0x638] ss:$24 sps:$4 sm:$0xff]  }
  0xc7   :  { %2273 = vmatprep.subr.bf16.mxu1 %v6052_v7  ;;  %v6132_v7 = vld [vmem:[#allocation2 + $0x60c] ss:$24 sps:$4 sm:$0xff]  }
  0xc9   :  { %2203 = vmatpush2.bf16.msra.mxu0 %v6046_v8  ;;  %v6135_v8 = vld [vmem:[#allocation2 + $0x5dc] ss:$24 sps:$4 sm:$0xff]  }
  0xca   :  { %2204 = vmatprep.subr.bf16.mxu0 %v6056_v9  ;;  %2274 = vmatpush2.bf16.msra.mxu1 %v6050_v10  ;;  %v6130_v9 = vld [vmem:[#allocation2 + $0x608] ss:$24 sps:$4 sm:$0xff]   ;;  %v6138_v10 = vld [vmem:[#allocation2 + $0x8dc] ss:$24 sps:$4 sm:$0xff]  }
  0xcb   :  { %2275 = vmatprep.subr.bf16.mxu1 %v6059_v11  ;;  %v6133_v11 = vld [vmem:[#allocation2 + $0x5d8] ss:$24 sps:$4 sm:$0xff]  }
  0xcd   :  { %2205 = vmatpush2.bf16.msra.mxu0 %v6054_v12  ;;  %v6141_v12 = vld [vmem:[#allocation2 + $0x5ac] ss:$24 sps:$4 sm:$0xff]  }
  0xce   :  { %2206 = vmatprep.subr.bf16.mxu0 %v6063_v14  ;;  %2276 = vmatpush2.bf16.msra.mxu1 %v6057_v15  ;;  %v6136_v14 = vld [vmem:[#allocation2 + $0x8d8] ss:$24 sps:$4 sm:$0xff]   ;;  %v6144_v15 = vld [vmem:[#allocation2 + $0x8ac] ss:$24 sps:$4 sm:$0xff]  }
  0xcf   :  { %2277 = vmatprep.subr.bf16.mxu1 %v6067_v18  ;;  %v6147_v18 = vld [vmem:[#allocation2 + $0x57c] ss:$24 sps:$4 sm:$0xff]  }
  0xd1   :  { %2207 = vmatpush2.bf16.msra.mxu0 %v6061_v19  ;;  %v6142_v19 = vld [vmem:[#allocation2 + $0x8a8] ss:$24 sps:$4 sm:$0xff]  }
  0xd2   :  { %2208 = vmatprep.subr.bf16.mxu0 %v6070_v21  ;;  %2278 = vmatpush2.bf16.msra.mxu1 %v6065_v22  ;;  %v6150_v21 = vld [vmem:[#allocation2 + $0x87c] ss:$24 sps:$4 sm:$0xff]   ;;  %v6153_v22 = vld [vmem:[#allocation2 + $0x54c] ss:$24 sps:$4 sm:$0xff]  }
  0xd3   :  { %2279 = vmatprep.subr.bf16.mxu1 %v6073_v23  ;;  %v6148_v23 = vld [vmem:[#allocation2 + $0x878] ss:$24 sps:$4 sm:$0xff]  }
  0xd5   :  { %2209 = vmatpush2.bf16.msra.mxu0 %v6068_v24  ;;  %v6156_v24 = vld [vmem:[#allocation2 + $0x84c] ss:$24 sps:$4 sm:$0xff]  }
  0xd6   :  { %2320 = vmatprep.subr.bf16.mxu0 %v6079_v27  ;;  %2280 = vmatpush2.bf16.msra.mxu1 %v6071_v26  ;;  %v6151_v26 = vld [vmem:[#allocation2 + $0x548] ss:$24 sps:$4 sm:$0xff]   ;;  %v6159_v27 = vld [vmem:[#allocation2 + $0x51c] ss:$24 sps:$4 sm:$0xff]  }
  0xd7   :  { %2391 = vmatprep.subr.bf16.mxu1 %v6082_v31  ;;  %v6154_v31 = vld [vmem:[#allocation2 + $0x848] ss:$24 sps:$4 sm:$0xff]  }
  0xd8   :  { %2211 = vmatmul.mubr.bf16.vlgmr.msra.gmra.mxu0 %v7120_v30 }
  0xd9   :  { %2321 = vmatpush1.bf16.msra.mxu0 %v6077_v33  ;;  %2220 = vmatprep.mubr.bf16.mxu0 %v7125_v34  ;;  %v6162_v33 = vld [vmem:[#allocation2 + $0x81c] ss:$24 sps:$4 sm:$0xff]  }
  0xda   :  { %2282 = vmatmul.mubr.bf16.vlgmr.msra.gmra.mxu1 %v7035_v3  ;;  %2322 = vmatprep.subr.bf16.mxu0 %v6085_v35  ;;  %v6100_v3 = vld [vmem:[#allocation2 + $0x3cc] ss:$24 sps:$4 sm:$0xff]   ;;  %v6157_v35 = vld [vmem:[#allocation2 + $0x518] ss:$24 sps:$4 sm:$0xff]  }
  0xdb   :  { %2392 = vmatpush1.bf16.msra.mxu1 %v6080_v36  ;;  %2291 = vmatprep.mubr.bf16.mxu1 %v7047_v13  ;;  %v6101_v13 = vld [vmem:[#allocation2 + $0x6c8] ss:$24 sps:$4 sm:$0xff]   ;;  %v6165_v36 = vld [vmem:[#allocation2 + $0x4ec] ss:$24 sps:$4 sm:$0xff]  }
  0xdc   :  { %2393 = vmatprep.subr.bf16.mxu1 %v6088_v37  ;;  %v6160_v37 = vld [vmem:[#allocation2 + $0x818] ss:$24 sps:$4 sm:$0xff]  }
  0xdd   :  { %2323 = vmatpush1.bf16.msra.mxu0 %v6083_v39  ;;  %v6168_v39 = vld [vmem:[#allocation2 + $0x7ec] ss:$24 sps:$4 sm:$0xff]  }
  0xde   :  { %2324 = vmatprep.subr.bf16.mxu0 %v6094_v42  ;;  %v6171_v42 = vld [vmem:[#allocation2 + $0x4bc] ss:$24 sps:$4 sm:$0xff]  }
  0xdf   :  { %2394 = vmatpush1.bf16.msra.mxu1 %v6086_v41  ;;  %v6163_v41 = vld [vmem:[#allocation2 + $0x4e8] ss:$24 sps:$4 sm:$0xff]  }
  0xe0   :  { %2221 = vmatmul.mubr.bf16.gmra.mxu0 %v7133_v43  ;;  %2395 = vmatprep.subr.bf16.mxu1 %v6097_v44  ;;  %v6166_v44 = vld [vmem:[#allocation2 + $0x7e8] ss:$24 sps:$4 sm:$0xff]  }
  0xe1   :  { %2325 = vmatpush1.bf16.msra.mxu0 %v6092_v48  ;;  %2230 = vmatprep.mubr.bf16.mxu0 %v7139_v49  ;;  %v6174_v48 = vld [vmem:[#allocation2 + $0x7bc] ss:$24 sps:$4 sm:$0xff]  }
  0xe2   :  { %2326 = vmatprep.subr.bf16.mxu0 %v6100_v3  ;;  %2292 = vmatmul.mubr.bf16.gmra.mxu1 %v7053_v16  ;;  %v6118_v16 = vld [vmem:[#allocation2 + $0x66c] ss:$24 sps:$4 sm:$0xff]   ;;  %v6169_v3 = vld [vmem:[#allocation2 + $0x4b8] ss:$24 sps:$4 sm:$0xff]  }
  0xe3   :  { %2396 = vmatpush1.bf16.msra.mxu1 %v6095_v50  ;;  %2301 = vmatprep.mubr.bf16.mxu1 %v7071_v25  ;;  %v6123_v25 = vld [vmem:[#allocation2 + $0x33c] ss:$24 sps:$4 sm:$0xff]   ;;  %v6177_v50 = vld [vmem:[#allocation2 + $0x48c] ss:$24 sps:$4 sm:$0xff]  }
  0xe4   :  { %2397 = vmatprep.subr.bf16.mxu1 %v6103_v52  ;;  %v6172_v52 = vld [vmem:[#allocation2 + $0x7b8] ss:$24 sps:$4 sm:$0xff]  }
  0xe5   :  { %2327 = vmatpush1.bf16.msra.mxu0 %v6098_v53  ;;  %v6180_v53 = vld [vmem:[#allocation2 + $0x78c] ss:$24 sps:$4 sm:$0xff]  }
  0xe6   :  { %2328 = vmatprep.subr.bf16.mxu0 %v6109_v54  ;;  %v6183_v54 = vld [vmem:[#allocation2 + $0x164] ss:$24 sps:$4 sm:$0xff]  }
  0xe7   :  { %2398 = vmatpush1.bf16.msra.mxu1 %v6101_v13  ;;  %v6175_v13 = vld [vmem:[#allocation2 + $0x488] ss:$24 sps:$4 sm:$0xff]  }
  0xe8   :  { %2231 = vmatmul.mubr.bf16.gmra.mxu0 %v7150_v57  ;;  %2399 = vmatprep.subr.bf16.mxu1 %v6112_v58  ;;  %v6186_v58 = vld [vmem:[#allocation2 + $0x464] ss:$24 sps:$4 sm:$0xff]  }
  0xe9   :  { %2329 = vmatpush1.bf16.msra.mxu0 %v6107_v59  ;;  %2240 = vmatprep.mubr.bf16.mxu0 %v7153_v47  ;;  %v6181_v59 = vld [vmem:[#allocation2 + $0x160] ss:$24 sps:$4 sm:$0xff]  }
  0xea   :  { %2330 = vmatprep.subr.bf16.mxu0 %v6115_v60  ;;  %2302 = vmatmul.mubr.bf16.gmra.mxu1 %v7077_v28  ;;  %v6127_v28 = vld [vmem:[#allocation2 + $0x308] ss:$24 sps:$4 sm:$0xff]   ;;  %v6189_v60 = vld [vmem:[#allocation2 + $0x134] ss:$24 sps:$4 sm:$0xff]  }
  0xeb   :  { %2400 = vmatpush1.bf16.msra.mxu1 %v6110_v61  ;;  %2311 = vmatprep.mubr.bf16.mxu1 %v7095_v38  ;;  %v6184_v61 = vld [vmem:[#allocation2 + $0x460] ss:$24 sps:$4 sm:$0xff]  }
  0xec   :  { %2401 = vmatprep.subr.bf16.mxu1 %v6118_v16  ;;  %v6192_v16 = vld [vmem:[#allocation2 + $0x434] ss:$24 sps:$4 sm:$0xff]  }
  0xed   :  { %2331 = vmatpush1.bf16.msra.mxu0 %v6113_v62  ;;  %v6187_v62 = vld [vmem:[#allocation2 + $0x130] ss:$24 sps:$4 sm:$0xff]  }
  0xee   :  { %2332 = vmatprep.subr.bf16.mxu0 %v6123_v25  ;;  %v6195_v25 = vld [vmem:[#allocation2 + $0x104] ss:$24 sps:$4 sm:$0xff]  }
  0xef   :  { %2402 = vmatpush1.bf16.msra.mxu1 %v6116_v63  ;;  %v6190_v63 = vld [vmem:[#allocation2 + $0x430] ss:$24 sps:$4 sm:$0xff]  }
  0xf0   :  { %2241 = vmatmul.mubr.bf16.gmra.mxu0 %v7159_v0  ;;  %2403 = vmatprep.subr.bf16.mxu1 %v6126_v1  ;;  %v6198_v1 = vld [vmem:[#allocation2 + $0x404] ss:$24 sps:$4 sm:$0xff]  }
  0xf1   :  { %2333 = vmatpush1.bf16.msra.mxu0 %v6121_v2  ;;  %2352 = vmatprep.mubr.bf16.mxu0 %v7029_v51  ;;  %v6139_v51 = vld [vmem:[#allocation2 + $0x5a8] ss:$24 sps:$4 sm:$0xff]  }
  0xf2   :  { %2334 = vmatprep.subr.bf16.mxu0 %v6129_v4  ;;  %2312 = vmatmul.mubr.bf16.gmra.mxu1 %v7097_v40  ;;  %v6193_v2 = vld [vmem:[#allocation2 + $0x100] ss:$24 sps:$4 sm:$0xff]  }
  0xf3   :  { %2404 = vmatpush1.bf16.msra.mxu1 %v6124_v5  ;;  %2423 = vmatprep.mubr.bf16.mxu1 %v7114_v55  ;;  %v6145_v55 = vld [vmem:[#allocation2 + $0x578] ss:$24 sps:$4 sm:$0xff]  }
  0xf4   :  { %2405 = vmatprep.subr.bf16.mxu1 %v6132_v7  ;;  %v6196_v4 = vld [vmem:[#allocation2 + $0x400] ss:$24 sps:$4 sm:$0xff]   ;;  %v6202_v5 = vld [vmem:[#allocation2 + $0x3d0] ss:$24 sps:$4 sm:$0xff]  }
  0xf5   :  { %2335 = vmatpush1.bf16.msra.mxu0 %v6127_v28  ;;  %v6205_v7 = vld [vmem:[#allocation2 + $0xa0] ss:$24 sps:$4 sm:$0xff]   ;;  %v6210_v28 = vld [vmem:[#allocation2 + $0x3a4] ss:$24 sps:$4 sm:$0xff]  }
  0xf6   :  { %2336 = vmatprep.subr.bf16.mxu0 %v6135_v8  ;;  %v6213_v8 = vld [vmem:[#allocation2 + $0x74] ss:$24 sps:$4 sm:$0xff]  }
  0xf7   :  { %2406 = vmatpush1.bf16.msra.mxu1 %v6130_v9  ;;  %v6216_v9 = vld [vmem:[#allocation2 + $0x374] ss:$24 sps:$4 sm:$0xff]  }
  0xf8   :  { %2407 = vmatprep.subr.bf16.mxu1 %v6138_v10  ;;  %v6211_v10 = vld [vmem:[#allocation2 + $0x70] ss:$24 sps:$4 sm:$0xff]  }
  0xf9   :  { %2337 = vmatpush2.bf16.msra.mxu0 %v6133_v11  ;;  %v6217_v11 = vld [vmem:[#allocation2 + $0x40] ss:$24 sps:$4 sm:$0xff]  }
  0xfa   :  { %2338 = vmatprep.subr.bf16.mxu0 %v6141_v12  ;;  %v6225_v12 = vld [vmem:[#allocation2 + $0x14] ss:$24 sps:$4 sm:$0xff]  }
  0xfb   :  { %2408 = vmatpush2.bf16.msra.mxu1 %v6136_v14  ;;  %v6220_v14 = vld [vmem:[#allocation2 + $0x340] ss:$24 sps:$4 sm:$0xff]  }
  0xfc   :  { %2409 = vmatprep.subr.bf16.mxu1 %v6144_v15  ;;  %v6223_v15 = vld [vmem:[#allocation2 + $0x10] ss:$24 sps:$4 sm:$0xff]  }
  0xfd   :  { %2339 = vmatpush2.bf16.msra.mxu0 %v6139_v51  ;;  %v6231_v51 = vld [vmem:[#allocation2 + $0x2e4] ss:$24 sps:$4 sm:$0xff]  }
  0xfe   :  { %2340 = vmatprep.subr.bf16.mxu0 %v6147_v18  ;;  %v6458_v18 = vld [vmem:[%s8687_s0 + $0x4] ss:$16 sps:$4 sm:$0xff]  }
  0xff   :  { %2410 = vmatpush2.bf16.msra.mxu1 %v6142_v19  ;;  %v6234_v19 = vld [vmem:[#allocation2 + $0x5e4] ss:$24 sps:$4 sm:$0xff]  }
 0x100   :  { %2411 = vmatprep.subr.bf16.mxu1 %v6150_v21  ;;  %v6229_v21 = vld [vmem:[#allocation2 + $0x2e0] ss:$24 sps:$4 sm:$0xff]  }
 0x101   :  { %2341 = vmatpush2.bf16.msra.mxu0 %v6145_v55  ;;  %v6459_v55 = vld [vmem:[%s8687_s0 + $0xc] ss:$16 sps:$4 sm:$0xff]  }
 0x102   :  { %2342 = vmatprep.subr.bf16.mxu0 %v6153_v22  ;;  %v6237_v22 = vld [vmem:[#allocation2 + $0x2b4] ss:$24 sps:$4 sm:$0xff]  }
 0x103   :  { %2412 = vmatpush2.bf16.msra.mxu1 %v6148_v23  ;;  %v6232_v23 = vld [vmem:[#allocation2 + $0x5e0] ss:$24 sps:$4 sm:$0xff]  }
 0x104   :  { %2413 = vmatprep.subr.bf16.mxu1 %v6156_v24  ;;  %v6240_v24 = vld [vmem:[#allocation2 + $0x5b4] ss:$24 sps:$4 sm:$0xff]  }
 0x105   :  { %2343 = vmatpush2.bf16.msra.mxu0 %v6151_v26  ;;  %v6235_v26 = vld [vmem:[#allocation2 + $0x2b0] ss:$24 sps:$4 sm:$0xff]  }
 0x106   :  { %2344 = vmatprep.subr.bf16.mxu0 %v6159_v27  ;;  %v6243_v27 = vld [vmem:[#allocation2 + $0x284] ss:$24 sps:$4 sm:$0xff]  }
 0x107   :  { %2414 = vmatpush2.bf16.msra.mxu1 %v6154_v31  ;;  %v6238_v31 = vld [vmem:[#allocation2 + $0x5b0] ss:$24 sps:$4 sm:$0xff]  }
 0x108   :  { %2415 = vmatprep.subr.bf16.mxu1 %v6162_v33  ;;  %v6246_v33 = vld [vmem:[#allocation2 + $0x584] ss:$24 sps:$4 sm:$0xff]  }
 0x109   :  { %2345 = vmatpush2.bf16.msra.mxu0 %v6157_v35  ;;  %v6241_v35 = vld [vmem:[#allocation2 + $0x280] ss:$24 sps:$4 sm:$0xff]  }
 0x10a   :  { %2346 = vmatprep.subr.bf16.mxu0 %v6165_v36  ;;  %v6249_v36 = vld [vmem:[#allocation2 + $0x254] ss:$24 sps:$4 sm:$0xff]  }
 0x10b   :  { %2416 = vmatpush2.bf16.msra.mxu1 %v6160_v37  ;;  %v6244_v37 = vld [vmem:[#allocation2 + $0x580] ss:$24 sps:$4 sm:$0xff]  }
 0x10c   :  { %2417 = vmatprep.subr.bf16.mxu1 %v6168_v39  ;;  %v6252_v39 = vld [vmem:[#allocation2 + $0x554] ss:$24 sps:$4 sm:$0xff]  }
 0x10d   :  { %2347 = vmatpush2.bf16.msra.mxu0 %v6163_v41  ;;  %v6247_v41 = vld [vmem:[#allocation2 + $0x250] ss:$24 sps:$4 sm:$0xff]  }
 0x10e   :  { %2348 = vmatprep.subr.bf16.mxu0 %v6171_v42  ;;  %v6250_v42 = vld [vmem:[#allocation2 + $0x550] ss:$24 sps:$4 sm:$0xff]  }
 0x10f   :  { %2418 = vmatpush2.bf16.msra.mxu1 %v6166_v44  ;;  %v6255_v44 = vld [vmem:[#allocation2 + $0x224] ss:$24 sps:$4 sm:$0xff]  }
 0x110   :  { %2419 = vmatprep.subr.bf16.mxu1 %v6174_v48  ;;  %v6258_v48 = vld [vmem:[#allocation2 + $0x524] ss:$24 sps:$4 sm:$0xff]  }
 0x111   :  { %2349 = vmatpush2.bf16.msra.mxu0 %v6169_v3  ;;  %v6253_v3 = vld [vmem:[#allocation2 + $0x220] ss:$24 sps:$4 sm:$0xff]  }
 0x112   :  { %2350 = vmatprep.subr.bf16.mxu0 %v6177_v50  ;;  %v566_v50 = vlaneseq }
 0x113   :  { %2420 = vmatpush2.bf16.msra.mxu1 %v6172_v52  ;;  %v6261_v52 = vld [vmem:[#allocation2 + $0x1f4] ss:$24 sps:$4 sm:$0xff]  }
 0x114   :  { %2421 = vmatprep.subr.bf16.mxu1 %v6180_v53  ;;  %v6256_v53 = vld [vmem:[#allocation2 + $0x520] ss:$24 sps:$4 sm:$0xff]  }
 0x115   :  { %2351 = vmatpush2.bf16.msra.mxu0 %v6175_v13  ;;  %v6264_v13 = vld [vmem:[#allocation2 + $0x4f4] ss:$24 sps:$4 sm:$0xff]  }
 0x116   :  { %2462 = vmatprep.subr.bf16.mxu0 %v6183_v54  ;;  %v6259_v54 = vld [vmem:[#allocation2 + $0x1f0] ss:$24 sps:$4 sm:$0xff]  }
 0x117   :  { %2422 = vmatpush2.bf16.msra.mxu1 %v6178_v56  ;;  %v7185_v56 = vshrl.u32 %v566_v50, 7  ;;  %v6294_v50 = vld [vmem:[#allocation2 + $0x674] ss:$24 sps:$4 sm:$0xff]  }
 0x118   :  { %2353 = vmatmul.mubr.bf16.vlgmr.msra.gmra.mxu0 %v7040_v6  ;;  %2533 = vmatprep.subr.bf16.mxu1 %v6186_v58  ;;  %v6201_v6 = vld [vmem:[#allocation2 + $0xd4] ss:$24 sps:$4 sm:$0xff]   ;;  %v6267_v58 = vld [vmem:[#allocation2 + $0x1c4] ss:$24 sps:$4 sm:$0xff]  }
 0x119   :  { %2463 = vmatpush1.bf16.msra.mxu0 %v6181_v59  ;;  %2362 = vmatprep.mubr.bf16.mxu0 %v7058_v17  ;;  %v6204_v17 = vld [vmem:[#allocation2 + $0x3d4] ss:$24 sps:$4 sm:$0xff]   ;;  %v6262_v59 = vld [vmem:[#allocation2 + $0x4f0] ss:$24 sps:$4 sm:$0xff]  }
 0x11a   :  { %2424 = vmatmul.mubr.bf16.vlgmr.msra.gmra.mxu1 %v7120_v30  ;;  %2464 = vmatprep.subr.bf16.mxu0 %v6189_v60  ;;  %v6199_v30 = vld [vmem:[#allocation2 + $0xd0] ss:$24 sps:$4 sm:$0xff]   ;;  %v6270_v60 = vld [vmem:[#allocation2 + $0x4c4] ss:$24 sps:$4 sm:$0xff]  }
 0x11b   :  { %2534 = vmatpush1.bf16.msra.mxu1 %v6184_v61  ;;  %2433 = vmatprep.mubr.bf16.mxu1 %v7125_v34  ;;  %v6207_v34 = vld [vmem:[#allocation2 + $0xa4] ss:$24 sps:$4 sm:$0xff]   ;;  %v6265_v61 = vld [vmem:[#allocation2 + $0x1c0] ss:$24 sps:$4 sm:$0xff]  }
 0x11c   :  { %2535 = vmatprep.subr.bf16.mxu1 %v6192_v16  ;;  %v7188_v16 = vsub.s32 0, %v7185_v56 }
 0x11d   :  { %2465 = vmatpush1.bf16.msra.mxu0 %v6187_v62  ;;  %v7191_v62 = vsub.s32 1, %v7185_v56 }
 0x11e   :  { %2466 = vmatprep.subr.bf16.mxu0 %v6195_v25  ;;  %8800 = vst [vmem:[#allocation20_spill] sm:$0xff] %v7188_v16  ;;  %v6273_v25 = vld [vmem:[#allocation2 + $0x194] ss:$24 sps:$4 sm:$0xff]  }
 0x11f   :  { %2536 = vmatpush1.bf16.msra.mxu1 %v6190_v63  ;;  %8801 = vst [vmem:[#allocation21_spill] sm:$0xff] %v7191_v62  ;;  %v6268_v63 = vld [vmem:[#allocation2 + $0x4c0] ss:$24 sps:$4 sm:$0xff]  }
 0x120   :  { %2363 = vmatmul.mubr.bf16.gmra.mxu0 %v7064_v20  ;;  %2537 = vmatprep.subr.bf16.mxu1 %v6198_v1  ;;  %v6208_v20 = vld [vmem:[#allocation2 + $0x3a0] ss:$24 sps:$4 sm:$0xff]   ;;  %v6276_v1 = vld [vmem:[#allocation2 + $0x494] ss:$24 sps:$4 sm:$0xff]  }
 0x121   :  { %2467 = vmatpush1.bf16.msra.mxu0 %v6193_v2  ;;  %2372 = vmatprep.mubr.bf16.mxu0 %v7082_v29  ;;  %v6219_v29 = vld [vmem:[#allocation2 + $0x44] ss:$24 sps:$4 sm:$0xff]   ;;  %v6271_v2 = vld [vmem:[#allocation2 + $0x190] ss:$24 sps:$4 sm:$0xff]  }
 0x122   :  { %2434 = vmatmul.mubr.bf16.gmra.mxu1 %v7133_v43  ;;  %2468 = vmatprep.subr.bf16.mxu0 %v6201_v6  ;;  %v6214_v43 = vld [vmem:[#allocation2 + $0x370] ss:$24 sps:$4 sm:$0xff]   ;;  %v7193_v6 = vld [vmem:[#allocation5] sm:$0x3f] }
 0x123   :  { %2538 = vmatpush1.bf16.msra.mxu1 %v6196_v4  ;;  %2443 = vmatprep.mubr.bf16.mxu1 %v7139_v49  ;;  %v6222_v49 = vld [vmem:[#allocation2 + $0x344] ss:$24 sps:$4 sm:$0xff]  }
 0x124   :  { %2539 = vmatprep.subr.bf16.mxu1 %v6204_v17  ;;  %v6279_v4 = vld [vmem:[#allocation2 + $0x764] ss:$24 sps:$4 sm:$0xff]   ;;  %v6274_v17 = vld [vmem:[#allocation2 + $0x490] ss:$24 sps:$4 sm:$0xff]  }
 0x125   :  { %2469 = vmatpush1.bf16.msra.mxu0 %v6199_v30  ;;  %v6277_v30 = vld [vmem:[#allocation2 + $0x760] ss:$24 sps:$4 sm:$0xff]  }
 0x126   :  { %2470 = vmatprep.subr.bf16.mxu0 %v6207_v34  ;;  %v6282_v34 = vld [vmem:[#allocation2 + $0x734] ss:$24 sps:$4 sm:$0xff]  }
 0x127   :  { %2540 = vmatpush1.bf16.msra.mxu1 %v6202_v5  ;;  %v7197_v5 = vrot.slane %v7193_v6, %v7188_v16 }
 0x128   :  { %2373 = vmatmul.mubr.bf16.gmra.mxu0 %v7088_v32  ;;  %2541 = vmatprep.subr.bf16.mxu1 %v6210_v28  ;;  %v6228_v32 = vld [vmem:[#allocation2 + $0x314] ss:$24 sps:$4 sm:$0xff]   ;;  %v6280_v28 = vld [vmem:[#allocation2 + $0x730] ss:$24 sps:$4 sm:$0xff]  }
 0x129   :  { %2471 = vmatpush1.bf16.msra.mxu0 %v6205_v7  ;;  %2382 = vmatprep.mubr.bf16.mxu0 %v7103_v45  ;;  %8802 = vst [vmem:[#allocation22_spill] sm:$0xff] %v7197_v5  ;;  %v7201_v7 = vrot.slane %v7193_v6, %v7191_v62 }
 0x12a   :  { %2444 = vmatmul.mubr.bf16.gmra.mxu1 %v7150_v57  ;;  %2472 = vmatprep.subr.bf16.mxu0 %v6213_v8  ;;  %v6226_v57 = vld [vmem:[#allocation2 + $0x310] ss:$24 sps:$4 sm:$0xff]  }
 0x12b   :  { %2542 = vmatpush1.bf16.msra.mxu1 %v6208_v20  ;;  %2453 = vmatprep.mubr.bf16.mxu1 %v7153_v47  ;;  %8803 = vst [vmem:[#allocation23_spill] sm:$0xff] %v7201_v7  ;;  %v6460_v20 = vld [vmem:[%s8687_s0] ss:$16 sps:$4 sm:$0xff]  }
 0x12c   :  { %2543 = vmatprep.subr.bf16.mxu1 %v6216_v9  ;;  %v6285_v9 = vld [vmem:[#allocation2 + $0x704] ss:$24 sps:$4 sm:$0xff]  }
 0x12d   :  { %2473 = vmatpush1.bf16.msra.mxu0 %v6211_v10 }
 0x12e   :  { %2474 = vmatprep.subr.bf16.mxu0 %v6219_v29  ;;  %v6461_v29 = vld [vmem:[%s8687_s0 + $0x24] ss:$16 sps:$4 sm:$0xff]  }
 0x12f   :  { %2544 = vmatpush1.bf16.msra.mxu1 %v6214_v43 }
 0x130   :  { %2383 = vmatmul.mubr.bf16.gmra.mxu0 %v7105_v46  ;;  %2545 = vmatprep.subr.bf16.mxu1 %v6222_v49 }
 0x131   :  { %2475 = vmatpush1.bf16.msra.mxu0 %v6217_v11  ;;  %2494 = vmatprep.mubr.bf16.mxu0 %v6458_v18  ;;  %v6462_v11 = vld [vmem:[%s8687_s0 + $0x8] ss:$16 sps:$4 sm:$0xff]   ;;  %v6288_v18 = vld [vmem:[#allocation2 + $0x6d4] ss:$24 sps:$4 sm:$0xff]  }
 0x132   :  { %2454 = vmatmul.mubr.bf16.gmra.mxu1 %v7159_v0  ;;  %2476 = vmatprep.subr.bf16.mxu0 %v6225_v12 }
 0x133   :  { %2546 = vmatpush1.bf16.msra.mxu1 %v6220_v14  ;;  %2565 = vmatprep.mubr.bf16.mxu1 %v6459_v55 }
 0x134   :  { %2547 = vmatprep.subr.bf16.mxu1 %v6228_v32  ;;  %v6283_v32 = vld [vmem:[#allocation2 + $0x700] ss:$24 sps:$4 sm:$0xff]  }
 0x135   :  { %2477 = vmatpush1.bf16.msra.mxu0 %v6223_v15  ;;  %v6463_v15 = vld [vmem:[%s8687_s0 + $0x2c] ss:$16 sps:$4 sm:$0xff]  }
 0x136   :  { %2478 = vmatprep.subr.bf16.mxu0 %v6231_v51 }
 0x137   :  { %2548 = vmatpush1.bf16.msra.mxu1 %v6226_v57 }
 0x138   :  { %2549 = vmatprep.subr.bf16.mxu1 %v6234_v19 }
 0x139   :  { %2479 = vmatpush2.bf16.msra.mxu0 %v6229_v21 }
 0x13a   :  { %2480 = vmatprep.subr.bf16.mxu0 %v6237_v22 }
 0x13b   :  { %2550 = vmatpush2.bf16.msra.mxu1 %v6232_v23 }
 0x13c   :  { %2551 = vmatprep.subr.bf16.mxu1 %v6240_v24  ;;  %v6286_v24 = vld [vmem:[#allocation2 + $0x6d0] ss:$24 sps:$4 sm:$0xff]  }
 0x13d   :  { %2481 = vmatpush2.bf16.msra.mxu0 %v6235_v26 }
 0x13e   :  { %2482 = vmatprep.subr.bf16.mxu0 %v6243_v27  ;;  %v6291_v27 = vld [vmem:[#allocation2 + $0x6a4] ss:$24 sps:$4 sm:$0xff]  }
 0x13f   :  { %2552 = vmatpush2.bf16.msra.mxu1 %v6238_v31  ;;  %v6464_v31 = vld [vmem:[%s8687_s0 + $0x20] ss:$16 sps:$4 sm:$0xff]  }
 0x140   :  { %2553 = vmatprep.subr.bf16.mxu1 %v6246_v33 }
 0x141   :  { %2483 = vmatpush2.bf16.msra.mxu0 %v6241_v35 }
 0x142   :  { %2484 = vmatprep.subr.bf16.mxu0 %v6249_v36  ;;  %v6465_v36 = vld [vmem:[%s8687_s0 + $0x44] ss:$16 sps:$4 sm:$0xff]  }
 0x143   :  { %2554 = vmatpush2.bf16.msra.mxu1 %v6244_v37  ;;  %v6466_v37 = vld [vmem:[%s8687_s0 + $0x28] ss:$16 sps:$4 sm:$0xff]  }
 0x144   :  { %2555 = vmatprep.subr.bf16.mxu1 %v6252_v39 }
 0x145   :  { %2485 = vmatpush2.bf16.msra.mxu0 %v6247_v41 }
 0x146   :  { %2486 = vmatprep.subr.bf16.mxu0 %v6255_v44 }
 0x147   :  { %2556 = vmatpush2.bf16.msra.mxu1 %v6250_v42  ;;  %v6289_v42 = vld [vmem:[#allocation2 + $0x6a0] ss:$24 sps:$4 sm:$0xff]  }
 0x148   :  { %2557 = vmatprep.subr.bf16.mxu1 %v6258_v48 }
 0x149   :  { %2487 = vmatpush2.bf16.msra.mxu0 %v6253_v3  ;;  %v6467_v3 = vld [vmem:[%s8687_s0 + $0x4c] ss:$16 sps:$4 sm:$0xff]  }
 0x14a   :  { %2488 = vmatprep.subr.bf16.mxu0 %v6261_v52 }
 0x14b   :  { %2558 = vmatpush2.bf16.msra.mxu1 %v6256_v53 }
 0x14c   :  { %2559 = vmatprep.subr.bf16.mxu1 %v6264_v13 }
 0x14d   :  { %2489 = vmatpush2.bf16.msra.mxu0 %v6259_v54 }
 0x14e   :  { %2490 = vmatprep.subr.bf16.mxu0 %v6267_v58 }
 0x14f   :  { %2560 = vmatpush2.bf16.msra.mxu1 %v6262_v59 }
 0x150   :  { %2561 = vmatprep.subr.bf16.mxu1 %v6270_v60  ;;  %v6292_v60 = vld [vmem:[#allocation2 + $0x670] ss:$24 sps:$4 sm:$0xff]  }
 0x151   :  { %2491 = vmatpush2.bf16.msra.mxu0 %v6265_v61 }
 0x152   :  { %2492 = vmatprep.subr.bf16.mxu0 %v6273_v25  ;;  %v6297_v25 = vld [vmem:[#allocation2 + $0x644] ss:$24 sps:$4 sm:$0xff]  }
 0x153   :  { %2562 = vmatpush2.bf16.msra.mxu1 %v6268_v63  ;;  %v6468_v63 = vld [vmem:[%s8687_s0 + $0x40] ss:$16 sps:$4 sm:$0xff]  }
 0x154   :  { %2563 = vmatprep.subr.bf16.mxu1 %v6276_v1 }
 0x155   :  { %2493 = vmatpush2.bf16.msra.mxu0 %v6271_v2 }
 0x156   :  { %2604 = vmatprep.subr.bf16.mxu0 %v6279_v4 }
 0x157   :  { %2564 = vmatpush2.bf16.msra.mxu1 %v6274_v17  ;;  %v6469_v17 = vld [vmem:[%s8687_s0 + $0x48] ss:$16 sps:$4 sm:$0xff]  }
 0x158   :  { %v2070_v8 = vpop.f32.mrf.mxu0  ;;  %2495 = vmatmul.mubr.bf16.vlgmr.msra.gmra.mxu0 %v6460_v20 }
 0x159   :  { %v2071_v10 = vadd.f32 %v2070_v8, %v7197_v5  ;;  %2605 = vmatpush1.bf16.msra.mxu0 %v6277_v30  ;;  %2504 = vmatprep.mubr.bf16.mxu0 %v6461_v29  ;;  %v2141_v49 = vpop.f32.mrf.mxu1 }
 0x15a   :  { %v2072_v43 = vpop.f32.mrf.mxu0  ;;  %2566 = vmatmul.mubr.bf16.vlgmr.msra.gmra.mxu1 %v6462_v11  ;;  %2606 = vmatprep.subr.bf16.mxu0 %v6282_v34 }
 0x15b   :  { %v2073_v12 = vadd.f32 %v2072_v43, %v7201_v7  ;;  %v7214_v14 = vadd.f32 %v2141_v49, %v2071_v10  ;;  %2575 = vmatprep.mubr.bf16.mxu1 %v6463_v15  ;;  %v2143_v57 = vpop.f32.mrf.mxu1  ;;  %v6295_v10 = vld [vmem:[#allocation2 + $0x640] ss:$24 sps:$4 sm:$0xff]   ;;  %v6300_v43 = vld [vmem:[#allocation2 + $0x614] ss:$24 sps:$4 sm:$0xff]  }
 0x15c   :  { %v2074_v51 = vpop.f32.mrf.mxu0 }
 0x15d   :  { %v2075_v19 = vadd.f32 %v2074_v51, %v7197_v5  ;;  %v7220_v21 = vadd.f32 %v2143_v57, %v2073_v12  ;;  %2607 = vmatpush1.bf16.msra.mxu0 %v6280_v28  ;;  %v2145_v22 = vpop.f32.mrf.mxu1  ;;  %v6470_v57 = vld [vmem:[%s8688_s1 + $0x4] ss:$8 sps:$4 sm:$0xff]  }
 0x15e   :  { %v7222_v55 = vpop.f32.mrf.mxu0  ;;  %2608 = vmatprep.subr.bf16.mxu0 %v6285_v9 }
 0x15f   :  { %v7224_v23 = vadd.f32 %v2145_v22, %v2075_v19  ;;  %v7226_v26 = vpop.f32.mrf.mxu1 }
 0x160   :  { %2505 = vmatmul.mubr.bf16.gmra.mxu0 %v6464_v31  ;;  %v2080_v33 = vpop.f32.mrf.mxu0 }
 0x161   :  { %2609 = vmatpush1.bf16.msra.mxu0 %v6283_v32  ;;  %v2081_v35 = vadd.f32 %v2080_v33, %v7197_v5  ;;  %2514 = vmatprep.mubr.bf16.mxu0 %v6465_v36  ;;  %v2151_v41 = vpop.f32.mrf.mxu1  ;;  %v6301_v33 = vld [vmem:[#allocation2 + $0x8e0] ss:$24 sps:$4 sm:$0xff]   ;;  %v6306_v36 = vld [vmem:[#allocation2 + $0x8b4] ss:$24 sps:$4 sm:$0xff]  }
 0x162   :  { %2610 = vmatprep.subr.bf16.mxu0 %v6288_v18  ;;  %2576 = vmatmul.mubr.bf16.gmra.mxu1 %v6466_v37  ;;  %v2082_v39 = vpop.f32.mrf.mxu0  ;;  %v6303_v18 = vld [vmem:[#allocation2 + $0x8e4] ss:$24 sps:$4 sm:$0xff]  }
 0x163   :  { %v2083_v44 = vadd.f32 %v2082_v39, %v7201_v7  ;;  %v7239_v48 = vadd.f32 %v2151_v41, %v2081_v35  ;;  %2585 = vmatprep.mubr.bf16.mxu1 %v6467_v3  ;;  %v2153_v53 = vpop.f32.mrf.mxu1  ;;  %v6312_v3 = vld [vmem:[#allocation2 + $0x854] ss:$24 sps:$4 sm:$0xff]  }
 0x164   :  { %v2084_v52 = vpop.f32.mrf.mxu0 }
 0x165   :  { %2611 = vmatpush1.bf16.msra.mxu0 %v6286_v24  ;;  %v2085_v13 = vadd.f32 %v2084_v52, %v7197_v5  ;;  %v7245_v54 = vadd.f32 %v2153_v53, %v2083_v44  ;;  %v2155_v59 = vpop.f32.mrf.mxu1  ;;  %v6307_v44 = vld [vmem:[#allocation2 + $0x880] ss:$24 sps:$4 sm:$0xff]   ;;  %v6315_v52 = vld [vmem:[#allocation2 + $0x824] ss:$24 sps:$4 sm:$0xff]  }
 0x166   :  { %2612 = vmatprep.subr.bf16.mxu0 %v6291_v27  ;;  %v7247_v58 = vpop.f32.mrf.mxu0  ;;  %v6313_v53 = vld [vmem:[#allocation2 + $0x820] ss:$24 sps:$4 sm:$0xff]  }
 0x167   :  { %v7249_v61 = vadd.f32 %v2155_v59, %v2085_v13  ;;  %v7254_v2 = vpop.f32.mrf.mxu1  ;;  %v6318_v13 = vld [vmem:[#allocation2 + $0x7f4] ss:$24 sps:$4 sm:$0xff]   ;;  %v6316_v59 = vld [vmem:[#allocation2 + $0x7f0] ss:$24 sps:$4 sm:$0xff]  }
 0x168   :  { %2515 = vmatmul.mubr.bf16.gmra.mxu0 %v6468_v63  ;;  %v2090_v1 = vpop.f32.mrf.mxu0  ;;  %v6324_v63 = vld [vmem:[#allocation2 + $0x794] ss:$24 sps:$4 sm:$0xff]  }
 0x169   :  { %2613 = vmatpush1.bf16.msra.mxu0 %v6289_v42  ;;  %v2091_v4 = vadd.f32 %v2090_v1, %v7197_v5  ;;  %2524 = vmatprep.mubr.bf16.mxu0 %v7095_v38  ;;  %v2161_v34 = vpop.f32.mrf.mxu1  ;;  %v6304_v42 = vld [vmem:[#allocation2 + $0x8b0] ss:$24 sps:$4 sm:$0xff]  }
 0x16a   :  { %2614 = vmatprep.subr.bf16.mxu0 %v6294_v50  ;;  %2586 = vmatmul.mubr.bf16.gmra.mxu1 %v6469_v17  ;;  %v2092_v30 = vpop.f32.mrf.mxu0  ;;  %v6310_v50 = vld [vmem:[#allocation2 + $0x850] ss:$24 sps:$4 sm:$0xff]  }
 0x16b   :  { %v2093_v28 = vadd.f32 %v2092_v30, %v7201_v7  ;;  %v7262_v8 = vadd.f32 %v2161_v34, %v2091_v4  ;;  %2595 = vmatprep.mubr.bf16.mxu1 %v7103_v45  ;;  %v2163_v9 = vpop.f32.mrf.mxu1  ;;  %v6298_v45 = vld [vmem:[#allocation2 + $0x610] ss:$24 sps:$4 sm:$0xff]   ;;  %v6472_v34 = vld [vmem:[%s8688_s1 + $0x14] ss:$8 sps:$4 sm:$0xff]  }
 0x16c   :  { %v2094_v20 = vpop.f32.mrf.mxu0  ;;  %v6322_v1 = vld [vmem:[#allocation2 + $0x790] ss:$24 sps:$4 sm:$0xff]  }
 0x16d   :  { %2615 = vmatpush1.bf16.msra.mxu0 %v6292_v60  ;;  %v2095_v38 = vadd.f32 %v2094_v20, %v7197_v5  ;;  %v7266_v29 = vadd.f32 %v2163_v9, %v2093_v28  ;;  %v2165_v11 = vpop.f32.mrf.mxu1  ;;  %v6321_v60 = vld [vmem:[#allocation2 + $0x7c4] ss:$24 sps:$4 sm:$0xff]   ;;  %v6471_v17 = vld [vmem:[%s8688_s1] ss:$8 sps:$4 sm:$0xff]  }
 0x16e   :  { %2616 = vmatprep.subr.bf16.mxu0 %v6297_v25  ;;  %v7268_v49 = vpop.f32.mrf.mxu0  ;;  %v6319_v25 = vld [vmem:[#allocation2 + $0x7c0] ss:$24 sps:$4 sm:$0xff]  }
 0x16f   :  { %v7270_v12 = vadd.f32 %v2165_v11, %v2095_v38  ;;  %v7273_v15 = vpop.f32.mrf.mxu1 }
 0x170   :  { %2525 = vmatmul.mubr.bf16.gmra.mxu0 %v7097_v40  ;;  %v2100_v32 = vpop.f32.mrf.mxu0 }
 0x171   :  { %2617 = vmatpush1.bf16.msra.mxu0 %v6295_v10  ;;  %v2101_v51 = vadd.f32 %v2100_v32, %v7197_v5  ;;  %2636 = vmatprep.mubr.bf16.mxu0 %v6470_v57  ;;  %v2171_v22 = vpop.f32.mrf.mxu1 }
 0x172   :  { %2618 = vmatprep.subr.bf16.mxu0 %v6300_v43  ;;  %v2102_v19 = vpop.f32.mrf.mxu0  ;;  %2596 = vmatmul.mubr.bf16.gmra.mxu1 %v7105_v46  ;;  %v6309_v46 = vld [vmem:[#allocation2 + $0x884] ss:$24 sps:$4 sm:$0xff]  }
 0x173   :  { %v2103_v40 = vadd.f32 %v2102_v19, %v7201_v7  ;;  %v7281_v24 = vadd.f32 %v2171_v22, %v2101_v51  ;;  %v2173_v31 = vpop.f32.mrf.mxu1  ;;  %v2077_v22 = vadd.f32 %v7222_v55, %v7201_v7 }
 0x174   :  { %v2104_v27 = vpop.f32.mrf.mxu0 }
 0x175   :  { %2619 = vmatpush1.bf16.msra.mxu0 %v6298_v45  ;;  %v7283_v35 = vadd.f32 %v2173_v31, %v2103_v40  ;;  %v2175_v39 = vpop.f32.mrf.mxu1  ;;  %v7318_v40 = vld [vmem:[#allocation7 + $0x18] sm:$0xff] }
 0x176   :  { %2620 = vmatprep.subr.bf16.mxu0 %v6303_v18  ;;  %v2105_v37 = vpop.f32.mrf.mxu0  ;;  %v6473_v18 = vld [vmem:[%s8688_s1 + $0x10] ss:$8 sps:$4 sm:$0xff]   ;;  %8804 = vst [vmem:[#allocation24_spill] sm:$0xff] %v7318_v40  ;;  %v6474_v27 = vld [vmem:[%s8688_s1 + $0x24] ss:$8 sps:$4 sm:$0xff]   ;;  %v8710_v55 = vunpack.c.l.bf16 %v7318_v40 }
 0x177   :  { %v2176_v41 = vpop.f32.mrf.mxu1  ;;  %v7330_v37 = vld [vmem:[#allocation7 + $0x30] sm:$0xff] }
 0x178   :  { %8806 = vst [vmem:[#allocation26_spill] sm:$0xff] %v7330_v37 }
 0x179   :  { %2621 = vmatpush2.bf16.msra.mxu0 %v6301_v33 }
 0x17a   :  { %2622 = vmatprep.subr.bf16.mxu0 %v6306_v36  ;;  %v7328_v36 = vld [vmem:[#allocation7] sm:$0xff] }
 0x17b   :  { %8805 = vst [vmem:[#allocation25_spill] sm:$0xff] %v7328_v36 }
 0x17d   :  { %2623 = vmatpush2.bf16.msra.mxu0 %v6304_v42  ;;  %v2148_v42 = vadd.f32 %v7226_v26, %v2077_v22  ;;  %v7353_v26 = vld [vmem:[#allocation7 + $0x60] sm:$0xff] }
 0x17e   :  { %2624 = vmatprep.subr.bf16.mxu0 %v6309_v46  ;;  %v2087_v46 = vadd.f32 %v7247_v58, %v7201_v7  ;;  %8808 = vst [vmem:[#allocation28_spill] sm:$0xff] %v7353_v26  ;;  %v8697_v58 = vunpack.c.h.bf16 %v7328_v36 }
 0x181   :  { %2625 = vmatpush2.bf16.msra.mxu0 %v6307_v44  ;;  %v7341_v44 = vld [vmem:[#allocation7 + $0x48] sm:$0xff] }
 0x182   :  { %2626 = vmatprep.subr.bf16.mxu0 %v6312_v3  ;;  %8807 = vst [vmem:[#allocation27_spill] sm:$0xff] %v7341_v44 }
 0x185   :  { %2627 = vmatpush2.bf16.msra.mxu0 %v6310_v50  ;;  %v8709_v50 = vunpack.c.l.bf16 %v7328_v36 }
 0x186   :  { %2628 = vmatprep.subr.bf16.mxu0 %v6315_v52 }
 0x189   :  { %2629 = vmatpush2.bf16.msra.mxu0 %v6313_v53 }
 0x18a   :  { %2630 = vmatprep.subr.bf16.mxu0 %v6318_v13 }
 0x18d   :  { %2631 = vmatpush2.bf16.msra.mxu0 %v6316_v59  ;;  %v8707_v59 = vunpack.c.h.bf16 %v7318_v40 }
 0x18e   :  { %2632 = vmatprep.subr.bf16.mxu0 %v6321_v60  ;;  %v8706_v60 = vunpack.c.l.bf16 %v7341_v44 }
 0x191   :  { %2633 = vmatpush2.bf16.msra.mxu0 %v6319_v25 }
 0x192   :  { %2634 = vmatprep.subr.bf16.mxu0 %v6324_v63  ;;  %v6475_v63 = vld [vmem:[%s8688_s1 + $0x20] ss:$8 sps:$4 sm:$0xff]  }
 0x195   :  { %2635 = vmatpush2.bf16.msra.mxu0 %v6322_v1 }
 0x198   :  { %v2212_v4 = vpop.f32.mrf.mxu0  ;;  %2637 = vmatmul.mubr.bf16.vlgmr.msra.gmra.mxu0 %v6471_v17  ;;  %v2097_v17 = vadd.f32 %v7268_v49, %v7201_v7 }
 0x199   :  { %v2213_v30 = vadd.f32 %v2212_v4, %v7214_v14  ;;  %2646 = vmatprep.mubr.bf16.mxu0 %v6472_v34  ;;  %v2158_v4 = vadd.f32 %v7254_v2, %v2087_v46  ;;  %v8699_v34 = vunpack.c.h.bf16 %v7330_v37  ;;  %v8698_v2 = vunpack.c.l.bf16 %v7353_v26 }
 0x19a   :  { %v2214_v28 = vpop.f32.mrf.mxu0  ;;  %v7292_v20 = vpop.f32.mrf.mxu1 }
 0x19b   :  { %v7295_v9 = vadd.f32 %v2214_v28, %v7220_v21  ;;  %v2733_v43 = vmul.f32 %v2213_v30, %v2213_v30 }
 0x19c   :  { %v2216_v10 = vpop.f32.mrf.mxu0  ;;  %v7297_v38 = vpop.f32.mrf.mxu1 }
 0x19d   :  { %v7300_v11 = vadd.f32 %v7295_v9, %v2213_v30  ;;  %v2734_v14 = vmul.f32 %v7295_v9, %v7295_v9  ;;  %v7305_v32 = vadd.f32 %v2216_v10, %v7224_v23  ;;  %v7372_v10 = vld [vmem:[#allocation7 + $0x78] sm:$0xff] }
 0x19e   :  { %v2218_v45 = vpop.f32.mrf.mxu0  ;;  %v7307_v51 = vpop.f32.mrf.mxu1  ;;  %8809 = vst [vmem:[#allocation29_spill] sm:$0xff] %v7372_v10 }
 0x19f   :  { %v7309_v57 = vadd.f32 %v2734_v14, %v2733_v43  ;;  %v7350_v13 = vadd.f32 %v2218_v45, %v2148_v42  ;;  %v2880_v43 = vmul.f32 %v8709_v50, %v2213_v30  ;;  %v7397_v42 = vld [vmem:[#allocation7 + $0x90] sm:$0x11] }
 0x1a0   :  { %v2222_v21 = vpop.f32.mrf.mxu0  ;;  %2647 = vmatmul.mubr.bf16.gmra.mxu0 %v6473_v18  ;;  %v7314_v19 = vpop.f32.mrf.mxu1  ;;  %8810 = vst [vmem:[#allocation30_spill] sm:$0xff] %v7397_v42 }
 0x1a1   :  { %v7321_v23 = vadd.f32 %v2222_v21, %v7239_v48  ;;  %2656 = vmatprep.mubr.bf16.mxu0 %v6474_v27  ;;  %v8701_v27 = vunpack.c.h.bf16 %v7353_v26 }
 0x1a2   :  { %v2224_v31 = vpop.f32.mrf.mxu0  ;;  %v7326_v33 = vpop.f32.mrf.mxu1 }
 0x1a3   :  { %v7333_v39 = vadd.f32 %v2224_v31, %v7245_v54  ;;  %v8708_v54 = vunpack.c.l.bf16 %v7330_v37 }
 0x1a4   :  { %v2226_v41 = vpop.f32.mrf.mxu0  ;;  %v7336_v48 = vpop.f32.mrf.mxu1 }
 0x1a5   :  { %v7344_v3 = vadd.f32 %v2226_v41, %v7249_v61  ;;  %v2886_v61 = vmul.f32 %v8710_v55, %v7305_v32  ;;  %v2892_v14 = vmul.f32 %v8708_v54, %v7321_v23  ;;  %v8700_v41 = vunpack.c.l.bf16 %v7372_v10 }
 0x1a6   :  { %v2228_v52 = vpop.f32.mrf.mxu0  ;;  %v7348_v53 = vpop.f32.mrf.mxu1 }
 0x1a7   :  { %v7386_v21 = vadd.f32 %v2228_v52, %v2158_v4  ;;  %v2922_v30 = vadd.f32 %v2886_v61, %v2880_v43  ;;  %v2898_v22 = vmul.f32 %v8706_v60, %v7344_v3  ;;  %v2168_v52 = vadd.f32 %v7273_v15, %v2097_v17 }
 0x1a8   :  { %v2232_v25 = vpop.f32.mrf.mxu0  ;;  %2657 = vmatmul.mubr.bf16.gmra.mxu0 %v6475_v63  ;;  %v7363_v1 = vpop.f32.mrf.mxu1  ;;  %v2893_v61 = vmul.f32 %v8699_v34, %v7333_v39 }
 0x1a9   :  { %v7370_v28 = vadd.f32 %v2232_v25, %v7262_v8  ;;  %2666 = vmatprep.mubr.bf16.mxu0 %v7153_v47  ;;  %v2887_v8 = vmul.f32 %v8707_v59, %v7350_v13  ;;  %v8703_v47 = vunpack.c.h.bf16 %v7341_v44  ;;  %v2923_v63 = vadd.f32 %v2922_v30, %v2892_v14 }
 0x1aa   :  { %v2234_v45 = vpop.f32.mrf.mxu0  ;;  %v7381_v49 = vpop.f32.mrf.mxu1 }
 0x1ab   :  { %v7390_v18 = vadd.f32 %v2234_v45, %v7266_v29  ;;  %v2881_v29 = vmul.f32 %v8697_v58, %v7295_v9  ;;  %v2904_v4 = vmul.f32 %v8698_v2, %v7370_v28  ;;  %v8702_v45 = vunpack.c.h.bf16 %v7372_v10 }
 0x1ac   :  { %v2236_v31 = vpop.f32.mrf.mxu0  ;;  %v7399_v46 = vpop.f32.mrf.mxu1  ;;  %v2899_v9 = vmul.f32 %v8703_v47, %v7386_v21 }
 0x1ad   :  { %v7409_v25 = vadd.f32 %v2236_v31, %v7270_v12  ;;  %v2935_v17 = vadd.f32 %v2887_v8, %v2881_v29  ;;  %v8704_v12 = vunpack.c.l.bf16 %v7397_v42  ;;  %v2924_v31 = vadd.f32 %v2923_v63, %v2898_v22 }
 0x1ae   :  { %v2238_v43 = vpop.f32.mrf.mxu0  ;;  %v7415_v15 = vpop.f32.mrf.mxu1  ;;  %v2905_v8 = vmul.f32 %v8701_v27, %v7390_v18  ;;  %v8705_v22 = vunpack.c.h.bf16 %v7397_v42 }
 0x1af   :  { %v7420_v58 = vadd.f32 %v2238_v43, %v2168_v52  ;;  %v2910_v14 = vmul.f32 %v8700_v41, %v7409_v25  ;;  %v2936_v34 = vadd.f32 %v2935_v17, %v2893_v61  ;;  %v2925_v29 = vadd.f32 %v2924_v31, %v2904_v4 }
 0x1b0   :  { %v2242_v30 = vpop.f32.mrf.mxu0  ;;  %2667 = vmatmul.mubr.bf16.gmra.mxu0 %v7159_v0  ;;  %v7427_v2 = vpop.f32.mrf.mxu1 }
 0x1b1   :  { %v7433_v52 = vadd.f32 %v2242_v30, %v7281_v24  ;;  %v2937_v41 = vadd.f32 %v2936_v34, %v2899_v9  ;;  %v2911_v0 = vmul.f32 %v8702_v45, %v7420_v58  ;;  %v2926_v17 = vadd.f32 %v2925_v29, %v2910_v14 }
 0x1b2   :  { %v2244_v43 = vpop.f32.mrf.mxu0  ;;  %v7436_v63 = vpop.f32.mrf.mxu1 }
 0x1b3   :  { %v2916_v61 = vmul.f32 %v8704_v12, %v7433_v52  ;;  %v7445_v24 = vadd.f32 %v2244_v43, %v7283_v35  ;;  %v2938_v30 = vadd.f32 %v2937_v41, %v2905_v8  ;;  %v7459_v43 = vsub.s32 2, %v7185_v56 }
 0x1b4   :  { %v2246_v4 = vpop.f32.mrf.mxu0  ;;  %v7447_v31 = vpop.f32.mrf.mxu1  ;;  %v7462_v41 = vsub.s32 3, %v7185_v56 }
 0x1b5   :  { %v2927_v27 = vsel %vm2710_vm0, %v2916_v61, 0.0  ;;  %v2917_v9 = vmul.f32 %v8705_v22, %v7445_v24  ;;  %v2939_v12 = vadd.f32 %v2938_v30, %v2911_v0  ;;  %8811 = vst [vmem:[#allocation31_spill] sm:$0xff] %v7459_v43 }
 0x1b6   :  { %v7450_v34 = vadd.f32 %v2927_v27, %v2926_v17  ;;  %v2247_v45 = vpop.f32.mrf.mxu0  ;;  %v2317_v47 = vpop.f32.mrf.mxu1  ;;  %8812 = vst [vmem:[#allocation32_spill] sm:$0xff] %v7462_v41  ;;  %v7466_v27 = vrot.slane %v7193_v6, %v7459_v43  ;;  %v7668_v43 = vld [vmem:[#allocation7 + $0x10] sm:$0xff] }
 0x1b7   :  { %v2940_v14 = vsel %vm2710_vm0, %v2917_v9, 0.0  ;;  %v7470_v45 = vrot.slane %v7193_v6, %v7462_v41 }
 0x1b8   :  { %v2318_v29 = vpop.f32.mrf.mxu1  ;;  %v7456_v35 = vadd.f32 %v2940_v14, %v2939_v12  ;;  %8813 = vst [vmem:[#allocation33_spill] sm:$0xff] %v7466_v27  ;;  %v2284_v47 = vadd.f32 %v7292_v20, %v7466_v27  ;;  %v2288_v4 = vadd.f32 %v7307_v51, %v7466_v27  ;;  %v2294_v22 = vadd.f32 %v7326_v33, %v7466_v27 }
 0x1b9   :  { %8814 = vst [vmem:[#allocation34_spill] sm:$0xff] %v7470_v45  ;;  %v2286_v12 = vadd.f32 %v7297_v38, %v7470_v45  ;;  %v2296_v51 = vadd.f32 %v7336_v48, %v7470_v45  ;;  %v2310_v44 = vadd.f32 %v7427_v2, %v7470_v45 }
 0x1d8   :  { %v2354_v8 = vpop.f32.mrf.mxu0 }
 0x1d9   :  { %v2355_v0 = vadd.f32 %v2354_v8, %v2284_v47 }
 0x1da   :  { %v2356_v61 = vpop.f32.mrf.mxu0  ;;  %v2425_v17 = vpop.f32.mrf.mxu1 }
 0x1db   :  { %v2357_v30 = vadd.f32 %v2356_v61, %v2286_v12  ;;  %v7478_v9 = vadd.f32 %v2425_v17, %v2355_v0 }
 0x1dc   :  { %v2358_v14 = vpop.f32.mrf.mxu0  ;;  %v2427_v29 = vpop.f32.mrf.mxu1 }
 0x1dd   :  { %v2676_v20 = vadd.f32 %v7300_v11, %v7478_v9  ;;  %v2735_v38 = vmul.f32 %v7478_v9, %v7478_v9  ;;  %v2359_v47 = vadd.f32 %v2358_v14, %v2288_v4  ;;  %v7486_v8 = vadd.f32 %v2427_v29, %v2357_v30 }
 0x1de   :  { %v2360_v60 = vpop.f32.mrf.mxu0  ;;  %v2429_v59 = vpop.f32.mrf.mxu1  ;;  %v2298_v4 = vadd.f32 %v7348_v53, %v7466_v27  ;;  %v2304_v53 = vadd.f32 %v7381_v49, %v7466_v27 }
 0x1df   :  { %v2776_v12 = vadd.f32 %v7309_v57, %v2735_v38  ;;  %v7491_v0 = vadd.f32 %v2429_v59, %v2359_v47  ;;  %v7494_v33 = vadd.f32 %v2676_v20, %v7486_v8  ;;  %v2736_v11 = vmul.f32 %v7486_v8, %v7486_v8  ;;  %v7504_v59 = vld [vmem:[#allocation7 + $0x20] sm:$0xff] }
 0x1e0   :  { %v2364_v61 = vpop.f32.mrf.mxu0  ;;  %v2431_v17 = vpop.f32.mrf.mxu1  ;;  %v2290_v57 = vadd.f32 %v7314_v19, %v7470_v45  ;;  %8815 = vst [vmem:[#allocation35_spill] sm:$0xff] %v7504_v59  ;;  %v2300_v38 = vadd.f32 %v7363_v1, %v7470_v45  ;;  %v2306_v1 = vadd.f32 %v7399_v46, %v7470_v45 }
 0x1e1   :  { %v2365_v30 = vadd.f32 %v2364_v61, %v2294_v22  ;;  %v7500_v14 = vadd.f32 %v2776_v12, %v2736_v11  ;;  %v7512_v22 = vld [vmem:[#allocation7 + $0x8] sm:$0xff]  ;;  %v7514_v11 = vld [vmem:[#allocation7 + $0x38] sm:$0xff] }
 0x1e2   :  { %v2366_v29 = vpop.f32.mrf.mxu0  ;;  %v2435_v48 = vpop.f32.mrf.mxu1  ;;  %8816 = vst [vmem:[#allocation36_spill] sm:$0xff] %v7512_v22  ;;  %v2361_v12 = vadd.f32 %v2360_v60, %v2290_v57  ;;  %8817 = vst [vmem:[#allocation37_spill] sm:$0xff] %v7514_v11  ;;  %v7564_v57 = vld [vmem:[#allocation7 + $0x98] sm:$0x11] }
 0x1e3   :  { %v2367_v20 = vadd.f32 %v2366_v29, %v2296_v51  ;;  %v7508_v47 = vadd.f32 %v2435_v48, %v2365_v30  ;;  %v7521_v30 = vld [vmem:[#allocation7 + $0x50] sm:$0xff]  ;;  %v2308_v51 = vadd.f32 %v7415_v15, %v7466_v27  ;;  %8825 = vst [vmem:[#allocation41_spill] sm:$0xff] %v7564_v57 }
 0x1e4   :  { %v2368_v54 = vpop.f32.mrf.mxu0  ;;  %v2437_v50 = vpop.f32.mrf.mxu1  ;;  %8818 = vst [vmem:[#allocation38_spill] sm:$0xff] %v7521_v30  ;;  %v7533_v46 = vadd.f32 %v2431_v17, %v2361_v12  ;;  %v2314_v12 = vadd.f32 %v7436_v63, %v7466_v27 }
 0x1e5   :  { %v2369_v61 = vadd.f32 %v2368_v54, %v2298_v4  ;;  %v7516_v19 = vadd.f32 %v2437_v50, %v2367_v20  ;;  %v7529_v20 = vld [vmem:[#allocation7 + $0x68] sm:$0xff] }
 0x1e6   :  { %v2370_v29 = vpop.f32.mrf.mxu0  ;;  %v2439_v55 = vpop.f32.mrf.mxu1  ;;  %8819 = vst [vmem:[#allocation39_spill] sm:$0xff] %v7529_v20 }
 0x1e7   :  { %v7523_v48 = vadd.f32 %v2439_v55, %v2369_v61  ;;  %v2371_v42 = vadd.f32 %v2370_v29, %v2300_v38  ;;  %v8820_v61 = vunpack.c.l.bf16 %v7504_v59  ;;  %v8822_v29 = vunpack.c.l.bf16 %v7512_v22 }
 0x1e8   :  { %v2374_v54 = vpop.f32.mrf.mxu0  ;;  %v2441_v4 = vpop.f32.mrf.mxu1 }
 0x1e9   :  { %v2375_v55 = vadd.f32 %v2374_v54, %v2304_v53  ;;  %v2888_v49 = vmul.f32 %v8820_v61, %v7491_v0  ;;  %v7546_v53 = vld [vmem:[#allocation7 + $0x80] sm:$0xff]  ;;  %v2882_v54 = vmul.f32 %v8822_v29, %v7478_v9  ;;  %v8823_v61 = vunpack.c.l.bf16 %v7514_v11 }
 0x1ea   :  { %v2376_v10 = vpop.f32.mrf.mxu0  ;;  %v2445_v26 = vpop.f32.mrf.mxu1  ;;  %8821 = vst [vmem:[#allocation40_spill] sm:$0xff] %v7546_v53  ;;  %v8826_v29 = vunpack.c.l.bf16 %v7521_v30 }
 0x1eb   :  { %v2377_v15 = vadd.f32 %v2376_v10, %v2306_v1  ;;  %v7543_v17 = vadd.f32 %v2445_v26, %v2375_v55  ;;  %v2894_v50 = vmul.f32 %v8823_v61, %v7508_v47  ;;  %v8824_v10 = vunpack.c.h.bf16 %v7504_v59 }
 0x1ec   :  { %v2378_v60 = vpop.f32.mrf.mxu0  ;;  %v2447_v2 = vpop.f32.mrf.mxu1  ;;  %v7560_v55 = vadd.f32 %v2441_v4, %v2371_v42  ;;  %v2948_v9 = vadd.f32 %v2888_v49, %v2882_v54  ;;  %v2900_v61 = vmul.f32 %v8826_v29, %v7523_v48  ;;  %v2316_v42 = vadd.f32 %v7447_v31, %v7470_v45 }
 0x1ed   :  { %v2889_v1 = vmul.f32 %v8824_v10, %v7533_v46  ;;  %v2379_v38 = vadd.f32 %v2378_v60, %v2308_v51  ;;  %v7562_v63 = vadd.f32 %v2447_v2, %v2377_v15  ;;  %v8827_v51 = vunpack.c.h.bf16 %v7512_v22 }
 0x1ee   :  { %v2380_v27 = vpop.f32.mrf.mxu0  ;;  %v2449_v37 = vpop.f32.mrf.mxu1  ;;  %v8828_v49 = vunpack.c.h.bf16 %v7514_v11  ;;  %v2949_v54 = vadd.f32 %v2948_v9, %v2894_v50  ;;  %v8829_v2 = vunpack.c.l.bf16 %v7529_v20 }
 0x1ef   :  { %v2883_v60 = vmul.f32 %v8827_v51, %v7486_v8  ;;  %v2381_v15 = vadd.f32 %v2380_v27, %v2310_v44  ;;  %v7582_v29 = vadd.f32 %v2449_v37, %v2379_v38  ;;  %v8830_v8 = vunpack.c.h.bf16 %v7521_v30 }
 0x1f0   :  { %v2895_v4 = vmul.f32 %v8828_v49, %v7516_v19  ;;  %v2906_v10 = vmul.f32 %v8829_v2, %v7543_v17  ;;  %v2384_v36 = vpop.f32.mrf.mxu0  ;;  %v2451_v26 = vpop.f32.mrf.mxu1  ;;  %v2950_v44 = vadd.f32 %v2949_v54, %v2900_v61  ;;  %v8831_v27 = vunpack.c.l.bf16 %v7546_v53 }
 0x1f1   :  { %v2961_v59 = vadd.f32 %v2889_v1, %v2883_v60  ;;  %v2901_v51 = vmul.f32 %v8830_v8, %v7560_v55  ;;  %v2385_v22 = vadd.f32 %v2384_v36, %v2314_v12  ;;  %v7588_v11 = vadd.f32 %v2451_v26, %v2381_v15 }
 0x1f2   :  { %v2912_v50 = vmul.f32 %v8831_v27, %v7582_v29  ;;  %v2386_v9 = vpop.f32.mrf.mxu0  ;;  %v2455_v37 = vpop.f32.mrf.mxu1  ;;  %v8832_v49 = vunpack.c.h.bf16 %v7529_v20  ;;  %v2951_v31 = vadd.f32 %v2950_v44, %v2906_v10  ;;  %v8731_v36 = vunpack.c.h.bf16 %v7564_v57 }
 0x1f3   :  { %v2962_v38 = vadd.f32 %v2961_v59, %v2895_v4  ;;  %v2387_v1 = vadd.f32 %v2386_v9, %v2316_v42  ;;  %v7596_v60 = vadd.f32 %v2455_v37, %v2385_v22  ;;  %v8833_v61 = vunpack.c.h.bf16 %v7546_v53 }
 0x1f4   :  { %v2907_v2 = vmul.f32 %v8832_v49, %v7562_v63  ;;  %v2457_v8 = vpop.f32.mrf.mxu1  ;;  %v2388_v12 = vpop.f32.mrf.mxu0  ;;  %v8834_v59 = vunpack.c.l.bf16 %v7564_v57  ;;  %v2952_v54 = vadd.f32 %v2951_v31, %v2912_v50  ;;  %v7617_v31 = vsub.s32 4, %v7185_v56 }
 0x1f5   :  { %v2963_v26 = vadd.f32 %v2962_v38, %v2901_v51  ;;  %v2913_v15 = vmul.f32 %v8833_v61, %v7588_v11  ;;  %v7605_v27 = vadd.f32 %v2457_v8, %v2387_v1 }
 0x1f6   :  { %v2918_v4 = vmul.f32 %v8834_v59, %v7596_v60  ;;  %v2389_v42 = vpop.f32.mrf.mxu0  ;;  %v2459_v22 = vpop.f32.mrf.mxu1  ;;  %8835 = vst [vmem:[#allocation42_spill] sm:$0xff] %v7617_v31 }
 0x1f7   :  { %v2964_v9 = vadd.f32 %v2963_v26, %v2907_v2  ;;  %v2919_v51 = vmul.f32 %v8731_v36, %v7605_v27  ;;  %v7620_v2 = vsub.s32 5, %v7185_v56  ;;  %v7624_v26 = vrot.slane %v7193_v6, %v7617_v31 }
 0x1f8   :  { %v2953_v10 = vsel %vm2710_vm0, %v2918_v4, 0.0  ;;  %v2460_v37 = vpop.f32.mrf.mxu1 }
 0x1f9   :  { %v7608_v44 = vadd.f32 %v2953_v10, %v2952_v54  ;;  %v2965_v38 = vadd.f32 %v2964_v9, %v2913_v15  ;;  %v2966_v49 = vsel %vm2710_vm0, %v2919_v51, 0.0  ;;  %8836 = vst [vmem:[#allocation43_spill] sm:$0xff] %v7620_v2  ;;  %8837 = vst [vmem:[#allocation44_spill] sm:$0xff] %v7624_v26  ;;  %v7628_v15 = vrot.slane %v7193_v6, %v7620_v2 }
 0x1fb   :  { %v7614_v12 = vadd.f32 %v2966_v49, %v2965_v38  ;;  %8838 = vst [vmem:[#allocation45_spill] sm:$0xff] %v7628_v15 }
 0x218   :  { %v2496_v50 = vpop.f32.mrf.mxu0 }
 0x21a   :  { %v2498_v1 = vpop.f32.mrf.mxu0  ;;  %v2567_v8 = vpop.f32.mrf.mxu1 }
 0x21b   :  { %v2499_v31 = vadd.f32 %v2498_v1, %v7628_v15 }
 0x21c   :  { %v2500_v61 = vpop.f32.mrf.mxu0  ;;  %v2569_v59 = vpop.f32.mrf.mxu1 }
 0x21d   :  { %v2501_v4 = vadd.f32 %v2500_v61, %v7624_v26 }
 0x21e   :  { %v2502_v54 = vpop.f32.mrf.mxu0  ;;  %v2571_v42 = vpop.f32.mrf.mxu1 }
 0x21f   :  { %v2503_v22 = vadd.f32 %v2502_v54, %v7628_v15  ;;  %v7632_v56 = vadd.f32 %v2571_v42, %v2501_v4 }
 0x220   :  { %v2573_v9 = vpop.f32.mrf.mxu1  ;;  %v2506_v10 = vpop.f32.mrf.mxu0 }
 0x221   :  { %v7634_v51 = vadd.f32 %v2573_v9, %v2503_v22  ;;  %v2507_v37 = vadd.f32 %v2506_v10, %v7624_v26 }
 0x222   :  { %v2508_v38 = vpop.f32.mrf.mxu0  ;;  %v2577_v49 = vpop.f32.mrf.mxu1 }
 0x223   :  { %v2509_v36 = vadd.f32 %v2508_v38, %v7628_v15  ;;  %v7638_v6 = vadd.f32 %v2577_v49, %v2507_v37 }
 0x224   :  { %v2510_v57 = vpop.f32.mrf.mxu0  ;;  %v2579_v61 = vpop.f32.mrf.mxu1 }
 0x225   :  { %v2511_v53 = vadd.f32 %v2510_v57, %v7624_v26  ;;  %v7641_v20 = vadd.f32 %v2579_v61, %v2509_v36 }
 0x226   :  { %v2512_v4 = vpop.f32.mrf.mxu0  ;;  %v2581_v54 = vpop.f32.mrf.mxu1 }
 0x227   :  { %v2513_v42 = vadd.f32 %v2512_v4, %v7628_v15  ;;  %v7644_v22 = vadd.f32 %v2581_v54, %v2511_v53 }
 0x228   :  { %v2516_v9 = vpop.f32.mrf.mxu0  ;;  %v2583_v10 = vpop.f32.mrf.mxu1 }
 0x229   :  { %v2517_v30 = vadd.f32 %v2516_v9, %v7624_v26  ;;  %v7647_v45 = vadd.f32 %v2583_v10, %v2513_v42 }
 0x22a   :  { %v2518_v37 = vpop.f32.mrf.mxu0  ;;  %v2587_v38 = vpop.f32.mrf.mxu1 }
 0x22b   :  { %v2519_v49 = vadd.f32 %v2518_v37, %v7628_v15  ;;  %v7650_v40 = vadd.f32 %v2587_v38, %v2517_v30 }
 0x22c   :  { %v2520_v57 = vpop.f32.mrf.mxu0  ;;  %v2589_v36 = vpop.f32.mrf.mxu1 }
 0x22d   :  { %v2521_v61 = vadd.f32 %v2520_v57, %v7624_v26  ;;  %v7653_v7 = vadd.f32 %v2589_v36, %v2519_v49 }
 0x22e   :  { %v2522_v53 = vpop.f32.mrf.mxu0  ;;  %v2591_v4 = vpop.f32.mrf.mxu1 }
 0x22f   :  { %v2523_v54 = vadd.f32 %v2522_v53, %v7628_v15  ;;  %v7656_v5 = vadd.f32 %v2591_v4, %v2521_v61  ;;  %v2497_v4 = vadd.f32 %v2496_v50, %v7624_v26 }
 0x230   :  { %v2526_v42 = vpop.f32.mrf.mxu0  ;;  %v2593_v9 = vpop.f32.mrf.mxu1 }
 0x231   :  { %v2527_v10 = vadd.f32 %v2526_v42, %v7624_v26  ;;  %v7659_v41 = vadd.f32 %v2593_v9, %v2523_v54  ;;  %v2568_v42 = vadd.f32 %v2567_v8, %v2497_v4  ;;  %v2570_v9 = vadd.f32 %v2569_v59, %v2499_v31 }
 0x232   :  { %v2528_v30 = vpop.f32.mrf.mxu0  ;;  %v2597_v37 = vpop.f32.mrf.mxu1  ;;  %v8839_v26 = vunpack.c.h.bf16 %v7668_v43 }
 0x233   :  { %v2529_v38 = vadd.f32 %v2528_v30, %v7628_v15  ;;  %v7662_v2 = vadd.f32 %v2597_v37, %v2527_v10  ;;  %v7670_v30 = vld [vmem:[#allocation7 + $0x28] sm:$0xff] }
 0x234   :  { %v2530_v49 = vpop.f32.mrf.mxu0  ;;  %v2599_v57 = vpop.f32.mrf.mxu1  ;;  %v8764_v1 = vunpack.c.l.bf16 %v7670_v30 }
 0x235   :  { %v7664_v36 = vadd.f32 %v2599_v57, %v2529_v38 }
 0x236   :  { %v2531_v62 = vpop.f32.mrf.mxu0  ;;  %v2601_v53 = vpop.f32.mrf.mxu1 }
 0x237   :  { %v8765_v62 = vunpack.c.l.bf16 %v7668_v43 }
 0x238   :  { %v2602_v61 = vpop.f32.mrf.mxu1 }
 0x239   :  { %v7678_v61 = vld [vmem:[#allocation7 + $0x40] sm:$0xff] }
 0x23a   :  { %v8775_v57 = vunpack.c.l.bf16 %v7678_v61 }
 0x258   :  { %v2638_v54 = vpop.f32.mrf.mxu0 }
 0x259   :  { %v2639_v16 = vadd.f32 %v2638_v54, %v2568_v42  ;;  %v2740_v54 = vmul.f32 %v7350_v13, %v7350_v13 }
 0x25a   :  { %v2640_v10 = vpop.f32.mrf.mxu0 }
 0x25b   :  { %v2678_v37 = vadd.f32 %v7494_v33, %v2639_v16  ;;  %v2737_v38 = vmul.f32 %v2639_v16, %v2639_v16  ;;  %v2641_v49 = vadd.f32 %v2640_v10, %v2570_v9  ;;  %v2739_v33 = vmul.f32 %v7305_v32, %v7305_v32 }
 0x25c   :  { %v2642_v50 = vpop.f32.mrf.mxu0 }
 0x25d   :  { %v2778_v8 = vadd.f32 %v7500_v14, %v2737_v38  ;;  %v2679_v31 = vadd.f32 %v2678_v37, %v2641_v49  ;;  %v2738_v59 = vmul.f32 %v2641_v49, %v2641_v49  ;;  %v2643_v4 = vadd.f32 %v2642_v50, %v7632_v56 }
 0x25e   :  { %v2644_v42 = vpop.f32.mrf.mxu0  ;;  %v2884_v37 = vmul.f32 %v8765_v62, %v2639_v16  ;;  %v8766_v56 = vunpack.c.h.bf16 %v7678_v61  ;;  %v2741_v16 = vmul.f32 %v7491_v0, %v7491_v0 }
 0x25f   :  { %v2680_v9 = vadd.f32 %v2679_v31, %v7305_v32  ;;  %v2779_v10 = vadd.f32 %v2778_v8, %v2738_v59  ;;  %v2645_v14 = vadd.f32 %v2644_v42, %v7634_v51  ;;  %v2890_v38 = vmul.f32 %v8764_v1, %v2643_v4  ;;  %v7698_v31 = vld [vmem:[#allocation7 + $0x58] sm:$0xff] }
 0x260   :  { %v2648_v53 = vpop.f32.mrf.mxu0  ;;  %v2885_v32 = vmul.f32 %v8839_v26, %v2641_v49  ;;  %v8840_v8 = vunpack.c.h.bf16 %v7670_v30  ;;  %v2742_v26 = vmul.f32 %v7533_v46, %v7533_v46 }
 0x261   :  { %v2681_v50 = vadd.f32 %v2680_v9, %v7350_v13  ;;  %v2780_v15 = vadd.f32 %v2779_v10, %v2739_v33  ;;  %v2974_v59 = vadd.f32 %v2890_v38, %v2884_v37  ;;  %v7703_v42 = vadd.f32 %v2648_v53, %v7638_v6 }
 0x262   :  { %v2891_v51 = vmul.f32 %v8840_v8, %v2645_v14  ;;  %v2650_v1 = vpop.f32.mrf.mxu0  ;;  %v8774_v37 = vunpack.c.l.bf16 %v7698_v31 }
 0x263   :  { %v2781_v62 = vadd.f32 %v2780_v15, %v2740_v54  ;;  %v2682_v13 = vadd.f32 %v2681_v50, %v7491_v0  ;;  %v7707_v9 = vadd.f32 %v2650_v1, %v7641_v20  ;;  %v2896_v49 = vmul.f32 %v8775_v57, %v7703_v42  ;;  %v7720_v15 = vld [vmem:[#allocation7 + $0x70] sm:$0xff] }
 0x264   :  { %v2987_v33 = vadd.f32 %v2891_v51, %v2885_v32  ;;  %v2652_v10 = vpop.f32.mrf.mxu0  ;;  %v8773_v20 = vunpack.c.h.bf16 %v7698_v31  ;;  %v2743_v1 = vmul.f32 %v2643_v4, %v2643_v4 }
 0x265   :  { %v2683_v6 = vadd.f32 %v2682_v13, %v7533_v46  ;;  %v2782_v53 = vadd.f32 %v2781_v62, %v2741_v16  ;;  %v2897_v0 = vmul.f32 %v8766_v56, %v7707_v9  ;;  %v2975_v54 = vadd.f32 %v2974_v59, %v2896_v49 }
 0x266   :  { %v7723_v38 = vadd.f32 %v2652_v10, %v7644_v22  ;;  %v2654_v50 = vpop.f32.mrf.mxu0  ;;  %v8772_v13 = vunpack.c.l.bf16 %v7720_v15  ;;  %v8767_v56 = vunpack.c.h.bf16 %v7720_v15  ;;  %v2744_v22 = vmul.f32 %v2645_v14, %v2645_v14 }
 0x267   :  { %v2684_v32 = vadd.f32 %v2683_v6, %v2643_v4  ;;  %v2783_v8 = vadd.f32 %v2782_v53, %v2742_v26  ;;  %v2988_v51 = vadd.f32 %v2987_v33, %v2897_v0  ;;  %v7726_v46 = vadd.f32 %v2654_v50, %v7647_v45  ;;  %v7736_v33 = vld [vmem:[#allocation7 + $0x88] sm:$0xff] }
 0x268   :  { %v2902_v62 = vmul.f32 %v8774_v37, %v7723_v38  ;;  %v2658_v16 = vpop.f32.mrf.mxu0  ;;  %v2745_v45 = vmul.f32 %v7321_v23, %v7321_v23  ;;  %v2746_v50 = vmul.f32 %v7333_v39, %v7333_v39 }
 0x269   :  { %v2784_v59 = vadd.f32 %v2783_v8, %v2743_v1  ;;  %v2685_v49 = vadd.f32 %v2684_v32, %v2645_v14  ;;  %v2903_v4 = vmul.f32 %v8773_v20, %v7726_v46  ;;  %v7741_v10 = vadd.f32 %v2658_v16, %v7650_v40 }
 0x26a   :  { %v2976_v26 = vadd.f32 %v2975_v54, %v2902_v62  ;;  %v2660_v6 = vpop.f32.mrf.mxu0  ;;  %v8771_v54 = vunpack.c.l.bf16 %v7736_v33  ;;  %v2747_v16 = vmul.f32 %v7508_v47, %v7508_v47 }
 0x26b   :  { %v2686_v53 = vadd.f32 %v2685_v49, %v7321_v23  ;;  %v2785_v0 = vadd.f32 %v2784_v59, %v2744_v22  ;;  %v2989_v1 = vadd.f32 %v2988_v51, %v2903_v4  ;;  %v7745_v14 = vadd.f32 %v2660_v6, %v7653_v7  ;;  %v7758_v51 = vld [vmem:[#allocation7 + $0xa0] sm:$0x11] }
 0x26c   :  { %v2908_v32 = vmul.f32 %v8772_v13, %v7741_v10  ;;  %v2662_v8 = vpop.f32.mrf.mxu0  ;;  %v8768_v7 = vunpack.c.h.bf16 %v7736_v33  ;;  %v6692_v13 = vld [vmem:[#allocation2 + $0x5b0] ss:$24 sps:$4 sm:$0xff]  }
 0x26d   :  { %v2687_v40 = vadd.f32 %v2686_v53, %v7333_v39  ;;  %v2786_v62 = vadd.f32 %v2785_v0, %v2745_v45  ;;  %v2909_v23 = vmul.f32 %v8767_v56, %v7745_v14  ;;  %v7763_v49 = vadd.f32 %v2662_v8, %v7656_v5 }
 0x26e   :  { %v2977_v59 = vadd.f32 %v2976_v26, %v2908_v32  ;;  %v2664_v22 = vpop.f32.mrf.mxu0  ;;  %v2748_v53 = vmul.f32 %v7516_v19, %v7516_v19  ;;  %v8770_v26 = vunpack.c.l.bf16 %v7758_v51 }
 0x26f   :  { %v2787_v4 = vadd.f32 %v2786_v62, %v2746_v50  ;;  %v2688_v39 = vadd.f32 %v2687_v40, %v7508_v47  ;;  %v2990_v45 = vadd.f32 %v2989_v1, %v2909_v23  ;;  %v7767_v6 = vadd.f32 %v2664_v22, %v7659_v41 }
 0x270   :  { %v2914_v0 = vmul.f32 %v8771_v54, %v7763_v49  ;;  %v2668_v56 = vpop.f32.mrf.mxu0  ;;  %v8769_v41 = vunpack.c.h.bf16 %v7758_v51  ;;  %v2749_v1 = vmul.f32 %v7703_v42, %v7703_v42 }
 0x271   :  { %v2689_v5 = vadd.f32 %v2688_v39, %v7516_v19  ;;  %v2788_v32 = vadd.f32 %v2787_v4, %v2747_v16  ;;  %v2915_v47 = vmul.f32 %v8768_v7, %v7767_v6  ;;  %v7783_v8 = vadd.f32 %v2668_v56, %v7662_v2 }
 0x272   :  { %v2978_v50 = vadd.f32 %v2977_v59, %v2914_v0  ;;  %v2670_v40 = vpop.f32.mrf.mxu0  ;;  %v2750_v2 = vmul.f32 %v7707_v9, %v7707_v9 }
 0x273   :  { %v2690_v62 = vadd.f32 %v2689_v5, %v7703_v42  ;;  %v2789_v23 = vadd.f32 %v2788_v32, %v2748_v53  ;;  %v2991_v22 = vadd.f32 %v2990_v45, %v2915_v47  ;;  %v7787_v19 = vadd.f32 %v2670_v40, %v7664_v36 }
 0x274   :  { %v2920_v16 = vmul.f32 %v8770_v26, %v7783_v8  ;;  %v2672_v4 = vpop.f32.mrf.mxu0  ;;  %v2751_v42 = vmul.f32 %v7344_v3, %v7344_v3  ;;  %v2753_v40 = vmul.f32 %v7523_v48, %v7523_v48  ;;  %v6663_v26 = vld [vmem:[#allocation2 + $0x54c] ss:$24 sps:$4 sm:$0xff]  }
 0x275   :  { %v2790_v39 = vadd.f32 %v2789_v23, %v2749_v1  ;;  %v2691_v7 = vadd.f32 %v2690_v62, %v7707_v9  ;;  %v2921_v56 = vmul.f32 %v8769_v41, %v7787_v19  ;;  %v2752_v9 = vmul.f32 %v7386_v21, %v7386_v21  ;;  %v6662_v41 = vld [vmem:[#allocation2 + $0x578] ss:$24 sps:$4 sm:$0xff]  }
 0x276   :  { %v2979_v36 = vsel %vm2710_vm0, %v2920_v16, 0.0  ;;  %v2673_v59 = vpop.f32.mrf.mxu0  ;;  %v2755_v16 = vmul.f32 %v7723_v38, %v7723_v38 }
 0x277   :  { %v2692_v45 = vadd.f32 %v2691_v7, %v7344_v3  ;;  %v2791_v53 = vadd.f32 %v2790_v39, %v2750_v2  ;;  %v7802_v0 = vadd.f32 %v2979_v36, %v2978_v50  ;;  %v2992_v5 = vsel %vm2710_vm0, %v2921_v56, 0.0 }
 0x278   :  { %v7805_v32 = vadd.f32 %v2992_v5, %v2991_v22  ;;  %v2754_v3 = vmul.f32 %v7560_v55, %v7560_v55  ;;  %v2756_v2 = vmul.f32 %v7726_v46, %v7726_v46 }
 0x279   :  { %v2693_v47 = vadd.f32 %v2692_v45, %v7386_v21  ;;  %v2792_v1 = vadd.f32 %v2791_v53, %v2751_v42 }
 0x27b   :  { %v2793_v62 = vadd.f32 %v2792_v1, %v2752_v9  ;;  %v2694_v23 = vadd.f32 %v2693_v47, %v7523_v48  ;;  %v2757_v48 = vmul.f32 %v7370_v28, %v7370_v28  ;;  %v2761_v47 = vmul.f32 %v7741_v10, %v7741_v10 }
 0x27d   :  { %v2695_v7 = vadd.f32 %v2694_v23, %v7560_v55  ;;  %v2794_v50 = vadd.f32 %v2793_v62, %v2753_v40  ;;  %v2758_v55 = vmul.f32 %v7390_v18, %v7390_v18  ;;  %v2762_v62 = vmul.f32 %v7745_v14, %v7745_v14 }
 0x27f   :  { %v2696_v22 = vadd.f32 %v2695_v7, %v7723_v38  ;;  %v2795_v4 = vadd.f32 %v2794_v50, %v2754_v3  ;;  %v2759_v38 = vmul.f32 %v7543_v17, %v7543_v17 }
 0x281   :  { %v2796_v21 = vadd.f32 %v2795_v4, %v2755_v16  ;;  %v2697_v39 = vadd.f32 %v2696_v22, %v7726_v46  ;;  %v2760_v46 = vmul.f32 %v7562_v63, %v7562_v63 }
 0x283   :  { %v2698_v56 = vadd.f32 %v2697_v39, %v7370_v28  ;;  %v2797_v42 = vadd.f32 %v2796_v21, %v2756_v2  ;;  %v2767_v39 = vmul.f32 %v7763_v49, %v7763_v49 }
 0x285   :  { %v2699_v36 = vadd.f32 %v2698_v56, %v7390_v18  ;;  %v2798_v59 = vadd.f32 %v2797_v42, %v2757_v48  ;;  %v2711_v42 = vsel %vm2710_vm0, %v7433_v52, 0.0 }
 0x287   :  { %v2799_v45 = vadd.f32 %v2798_v59, %v2758_v55  ;;  %v2700_v53 = vadd.f32 %v2699_v36, %v7543_v17  ;;  %v2763_v17 = vmul.f32 %v7409_v25, %v7409_v25  ;;  %v2713_v59 = vsel %vm2710_vm0, %v7445_v24, 0.0 }
 0x289   :  { %v2701_v5 = vadd.f32 %v2700_v53, %v7562_v63  ;;  %v2800_v9 = vadd.f32 %v2799_v45, %v2759_v38  ;;  %v2764_v63 = vmul.f32 %v7420_v58, %v7420_v58  ;;  %v2771_v38 = vmul.f32 %v7596_v60, %v7596_v60 }
 0x28b   :  { %v2702_v28 = vadd.f32 %v2701_v5, %v7741_v10  ;;  %v2801_v1 = vadd.f32 %v2800_v9, %v2760_v46  ;;  %v2765_v10 = vmul.f32 %v7582_v29, %v7582_v29  ;;  %v2772_v46 = vmul.f32 %v7605_v27, %v7605_v27 }
 0x28d   :  { %v2802_v18 = vadd.f32 %v2801_v1, %v2761_v47  ;;  %v2703_v40 = vadd.f32 %v2702_v28, %v7745_v14  ;;  %v2766_v14 = vmul.f32 %v7588_v11, %v7588_v11  ;;  %v2814_v28 = vsel %vm2710_vm0, %v2771_v38, 0.0 }
 0x28e   :  { %v2717_v47 = vsel %vm2710_vm0, %v7605_v27, 0.0 }
 0x28f   :  { %v2704_v23 = vadd.f32 %v2703_v40, %v7409_v25  ;;  %v2803_v3 = vadd.f32 %v2802_v18, %v2762_v62  ;;  %v2719_v40 = vsel %vm2710_vm0, %v7783_v8, 0.0  ;;  %v2816_v62 = vsel %vm2710_vm0, %v2772_v46, 0.0 }
 0x291   :  { %v2705_v7 = vadd.f32 %v2704_v23, %v7420_v58  ;;  %v2804_v50 = vadd.f32 %v2803_v3, %v2763_v17  ;;  %v2769_v58 = vmul.f32 %v7433_v52, %v7433_v52  ;;  %v2715_v52 = vsel %vm2710_vm0, %v7596_v60, 0.0 }
 0x292   :  { %v2774_v60 = vmul.f32 %v7787_v19, %v7787_v19  ;;  %v2721_v3 = vsel %vm2710_vm0, %v7787_v19, 0.0  ;;  %v6330_v19 = vld [vmem:[#allocation11 + $0x30] sm:$0xff]  }
 0x293   :  { %v2805_v22 = vadd.f32 %v2804_v50, %v2764_v63  ;;  %v2706_v16 = vadd.f32 %v2705_v7, %v7582_v29  ;;  %v2768_v29 = vmul.f32 %v7767_v6, %v7767_v6 }
 0x294   :  { %v2820_v27 = vsel %vm2710_vm0, %v2774_v60, 0.0 }
 0x295   :  { %v2707_v4 = vadd.f32 %v2706_v16, %v7588_v11  ;;  %v2806_v21 = vadd.f32 %v2805_v22, %v2765_v10  ;;  %v2770_v11 = vmul.f32 %v7445_v24, %v7445_v24  ;;  %v2773_v24 = vmul.f32 %v7783_v8, %v7783_v8  ;;  %v6325_v8 = vld [vmem:[#allocation11 + $0x78] sm:$0xff]  }
 0x296   :  { %v6326_v22 = vld [vmem:[#allocation11 + $0x38] sm:$0xff]   ;;  %5702 = vmatprep.subr.bf16.mxu1 %v6325_v8  ;;  %v6355_v8 = vld [vmem:[#allocation11 + $0x140] sm:$0xff]  }
 0x297   :  { %v2708_v25 = vadd.f32 %v2707_v4, %v7763_v49  ;;  %v2807_v2 = vadd.f32 %v2806_v21, %v2766_v14  ;;  %v2810_v49 = vsel %vm2710_vm0, %v2769_v58, 0.0  ;;  %v2818_v63 = vsel %vm2710_vm0, %v2773_v24, 0.0  ;;  %v6327_v16 = vld [vmem:[#allocation11 + $0x178] sm:$0xff]   ;;  %v6329_v4 = vld [vmem:[#allocation11 + $0x70] sm:$0xff]   ;;  %5703 = vmatpush3.bf16.msra.mxu1 %v6326_v22  ;;  %v6334_v58 = vld [vmem:[#allocation11 + $0x28] sm:$0xff]  }
 0x298   :  { %v6328_v14 = vld [vmem:[#allocation11 + $0x138] sm:$0xff]   ;;  %5746 = vmatprep.subr.bf16.mxu0 %v6327_v16  ;;  %v6331_v21 = vld [vmem:[#allocation11 + $0x170] sm:$0xff]   ;;  %5704 = vmatprep.subr.bf16.mxu1 %v6329_v4  ;;  %v6356_v22 = vld [vmem:[#allocation11 + $0x100] sm:$0xff]   ;;  %v2929_v4 = vrot.slane %v7450_v34, 4 }
 0x299   :  { %v2808_v48 = vadd.f32 %v2807_v2, %v2767_v39  ;;  %v2709_v56 = vadd.f32 %v2708_v25, %v7767_v6  ;;  %v2812_v6 = vsel %vm2710_vm0, %v2770_v11, 0.0  ;;  %5747 = vmatpush3.bf16.msra.mxu0 %v6328_v14  ;;  %v6332_v25 = vld [vmem:[#allocation11 + $0x130] sm:$0xff]   ;;  %v6333_v39 = vld [vmem:[#allocation11 + $0x68] sm:$0xff]   ;;  %v6340_v11 = vld [vmem:[#allocation11 + $0x120] sm:$0xff]  }
 0x29a   :  { %5748 = vmatprep.subr.bf16.mxu0 %v6331_v21  ;;  %v6335_v2 = vld [vmem:[#allocation11 + $0x168] sm:$0xff]   ;;  %v6357_v16 = vld [vmem:[#allocation11 + $0xf8] sm:$0xff]   ;;  %v2942_v21 = vrot.slane %v7456_v35, 4 }
 0x29b   :  { %v2712_v55 = vadd.f32 %v2711_v42, %v2709_v56  ;;  %v2809_v36 = vadd.f32 %v2808_v48, %v2768_v29  ;;  %5705 = vmatpush3.bf16.msra.mxu1 %v6330_v19  ;;  %v6336_v48 = vld [vmem:[#allocation11 + $0x128] sm:$0xff]   ;;  %v6337_v56 = vld [vmem:[#allocation11 + $0x60] sm:$0xff]   ;;  %v6476_v14 = vld [vmem:[#allocation2 + $0x454] ss:$24 sps:$4 sm:$0xff]   ;;  %v2955_v19 = vrot.slane %v7608_v44, 4 }
 0x29c   :  { %5706 = vmatprep.subr.bf16.mxu1 %v6333_v39  ;;  %v6339_v29 = vld [vmem:[#allocation11 + $0x160] sm:$0xff]   ;;  %v2968_v39 = vrot.slane %v7614_v12, 4 }
 0x29d   :  { %v2811_v45 = vadd.f32 %v2810_v49, %v2809_v36  ;;  %v2714_v53 = vadd.f32 %v2713_v59, %v2712_v55  ;;  %5749 = vmatpush3.bf16.msra.mxu0 %v6332_v25  ;;  %v6338_v42 = vld [vmem:[#allocation11 + $0x20] sm:$0xff]   ;;  %v6341_v55 = vld [vmem:[#allocation11 + $0x58] sm:$0xff]   ;;  %v2981_v25 = vrot.slane %v7802_v0, 4 }
 0x29e   :  { %5750 = vmatprep.subr.bf16.mxu0 %v6335_v2  ;;  %v6343_v36 = vld [vmem:[#allocation11 + $0x158] sm:$0xff]   ;;  %v2994_v2 = vrot.slane %v7805_v32, 4 }
 0x29f   :  { %v2716_v5 = vadd.f32 %v2715_v52, %v2714_v53  ;;  %v2813_v9 = vadd.f32 %v2812_v6, %v2811_v45  ;;  %5707 = vmatpush3.bf16.msra.mxu1 %v6334_v58  ;;  %v6342_v49 = vld [vmem:[#allocation11 + $0x18] sm:$0xff]   ;;  %v2930_v58 = vadd.f32 %v2929_v4, %v7450_v34 }
 0x2a0   :  { %5708 = vmatprep.subr.bf16.mxu1 %v6337_v56  ;;  %v6344_v59 = vld [vmem:[#allocation11 + $0x118] sm:$0xff]   ;;  %v2956_v56 = vadd.f32 %v2955_v19, %v7608_v44 }
 0x2a1   :  { %v2718_v1 = vadd.f32 %v2717_v47, %v2716_v5  ;;  %v2815_v18 = vadd.f32 %v2814_v28, %v2813_v9  ;;  %5751 = vmatpush3.bf16.msra.mxu0 %v6336_v48  ;;  %v6345_v28 = vld [vmem:[#allocation11 + $0x50] sm:$0xff]   ;;  %v2943_v48 = vadd.f32 %v2942_v21, %v7456_v35 }
 0x2a2   :  { %5752 = vmatprep.subr.bf16.mxu0 %v6339_v29  ;;  %v2982_v29 = vadd.f32 %v2981_v25, %v7802_v0 }
 0x2a3   :  { %v2720_v17 = vadd.f32 %v2719_v40, %v2718_v1  ;;  %v2817_v23 = vadd.f32 %v2816_v62, %v2815_v18  ;;  %5709 = vmatpush3.bf16.msra.mxu1 %v6338_v42  ;;  %v6346_v1 = vld [vmem:[#allocation11 + $0x10] sm:$0xff]   ;;  %v2969_v42 = vadd.f32 %v2968_v39, %v7614_v12 }
 0x2a4   :  { %5710 = vmatprep.subr.bf16.mxu1 %v6341_v55  ;;  %v6347_v18 = vld [vmem:[#allocation11 + $0x150] sm:$0xff]   ;;  %v2931_v55 = vrot.slane %v2930_v58, 2 }
 0x2a5   :  { %v2722_v7 = vadd.f32 %v2721_v3, %v2720_v17  ;;  %v2819_v50 = vadd.f32 %v2818_v63, %v2817_v23  ;;  %5753 = vmatpush3.bf16.msra.mxu0 %v6340_v11  ;;  %v6348_v40 = vld [vmem:[#allocation11 + $0x110] sm:$0xff]   ;;  %v6349_v17 = vld [vmem:[#allocation11 + $0x48] sm:$0xff]   ;;  %v2995_v11 = vadd.f32 %v2994_v2, %v7805_v32 }
 0x2a6   :  { %5754 = vmatprep.subr.bf16.mxu0 %v6343_v36  ;;  %v6350_v3 = vld [vmem:[#allocation11 + $0x8] sm:$0xff]   ;;  %v2944_v36 = vrot.slane %v2943_v48, 2  ;;  %v431_v12 = vld [vmem:[#allocation8] sm:$0x3f] }
 0x2a7   :  { %2723 = vadd.xlane.f32.xlu0 %v2722_v7  ;;  %v2821_v10 = vadd.f32 %v2820_v27, %v2819_v50  ;;  %5711 = vmatpush3.bf16.msra.mxu1 %v6342_v49  ;;  %v6351_v63 = vld [vmem:[#allocation11 + $0x148] sm:$0xff]   ;;  %v6353_v27 = vld [vmem:[#allocation11 + $0x40] sm:$0xff]   ;;  %v2957_v49 = vrot.slane %v2956_v56, 2 }
 0x2a8   :  { %5712 = vmatprep.subr.bf16.mxu1 %v6345_v28  ;;  %v6352_v7 = vld [vmem:[#allocation11 + $0x108] sm:$0xff]  }
 0x2a9   :  { %5755 = vmatpush3.bf16.msra.mxu0 %v6344_v59  ;;  %v2983_v59 = vrot.slane %v2982_v29, 2 }
 0x2aa   :  { %5756 = vmatprep.subr.bf16.mxu0 %v6347_v18 }
 0x2ab   :  { %2822 = vadd.xlane.f32.xlu0 %v2821_v10  ;;  %5713 = vmatpush3.bf16.msra.mxu1 %v6346_v1  ;;  %v6354_v10 = vld [vmem:[#allocation11] sm:$0xff]   ;;  %v2984_v34 = vadd.f32 %v2983_v59, %v2982_v29  ;;  %v7908_v29 = vld [vmem:[#allocation10] sm:$0x3f] }
 0x2ac   :  { %5714 = vmatprep.subr.bf16.mxu1 %v6349_v17 }
 0x2ad   :  { %5757 = vmatpush3.bf16.msra.mxu0 %v6348_v40 }
 0x2ae   :  { %5758 = vmatprep.subr.bf16.mxu0 %v6351_v63  ;;  %v8843_v63 = vld [vmem:[#allocation42_spill] sm:$0xff] }
 0x2af   :  { %5715 = vmatpush3.bf16.msra.mxu1 %v6350_v3 }
 0x2b0   :  { %5716 = vmatprep.subr.bf16.mxu1 %v6353_v27 }
 0x2b1   :  { %5759 = vmatpush3.bf16.msra.mxu0 %v6352_v7 }
 0x2b2   :  { %5760 = vmatprep.subr.bf16.mxu0 %v6355_v8  ;;  %v8845_v8 = vld [vmem:[#allocation43_spill] sm:$0xff] }
 0x2b3   :  { %5717 = vmatpush3.bf16.msra.mxu1 %v6354_v10 }
 0x2b4   :  { %5724 = vmatprep.subr.bf16.mxu1 %v6357_v16 }
 0x2b5   :  { %5761 = vmatpush3.bf16.msra.mxu0 %v6356_v22 }
 0x2b6   :  { %3807 = vmatprep.subr.bf16.mxu0 %v6476_v14  ;;  %v8846_v14 = vld [vmem:[#allocation32_spill] sm:$0xff] }
 0x2b7   :  { %v7930_v59 = vrot.slane %v7908_v29, %v8846_v14 }
 0x2b9   :  { %8851 = vst [vmem:[#allocation50_spill] sm:$0xff] %v7930_v59 }
 0x330   :  { %v2724_v38 = vpop.xlane.xlu0 %2723 }
 0x331   :  { %v2725_v45 = vrot.slane %v2724_v38, 4 }
 0x333   :  { %v2726_v53 = vadd.f32 %v2725_v45, %v2724_v38  ;;  %v2970_v38 = vrot.slane %v2969_v42, 2  ;;  %v2996_v45 = vrot.slane %v2995_v11, 2 }
 0x334   :  { %v2823_v6 = vpop.xlane.xlu0 %2822 }
 0x335   :  { %v2727_v52 = vrot.slane %v2726_v53, 2  ;;  %v2824_v46 = vrot.slane %v2823_v6, 4  ;;  %v2997_v35 = vadd.f32 %v2996_v45, %v2995_v11  ;;  %v7916_v11 = vrot.slane %v7908_v29, %v8843_v63 }
 0x337   :  { %v2825_v5 = vadd.f32 %v2824_v46, %v2823_v6  ;;  %v2728_v9 = vadd.f32 %v2727_v52, %v2726_v53  ;;  %v2932_v53 = vadd.f32 %v2931_v55, %v2930_v58  ;;  %v2945_v6 = vadd.f32 %v2944_v36, %v2943_v48  ;;  %8848 = vst [vmem:[#allocation47_spill] sm:$0xff] %v7916_v11 }
 0x338   :  { %v2958_v52 = vadd.f32 %v2957_v49, %v2956_v56  ;;  %v2971_v46 = vadd.f32 %v2970_v38, %v2969_v42  ;;  %v2998_v28 = vrot.slane %v2997_v35, 1  ;;  %v7926_v49 = vrot.slane %v7908_v29, %v8845_v8 }
 0x339   :  { %v2826_v24 = vrot.slane %v2825_v5, 2  ;;  %v2729_v47 = vrot.slane %v2728_v9, 1  ;;  %v2946_v44 = vrot.slane %v2945_v6, 1 }
 0x33a   :  { %v2959_v0 = vrot.slane %v2958_v52, 1  ;;  %v2999_v10 = vadd.f32 %v2998_v28, %v2997_v35  ;;  %8850 = vst [vmem:[#allocation49_spill] sm:$0xff] %v7926_v49 }
 0x33b   :  { %v2827_v60 = vadd.f32 %v2826_v24, %v2825_v5  ;;  %v2730_v62 = vadd.f32 %v2729_v47, %v2728_v9  ;;  %v2933_v5 = vrot.slane %v2932_v53, 1  ;;  %v2985_v9 = vrot.slane %v2984_v34, 1 }
 0x33c   :  { %v2972_v24 = vrot.slane %v2971_v46, 1  ;;  %v2960_v18 = vadd.f32 %v2959_v0, %v2958_v52 }
 0x33d   :  { %5834 = vpush %v2730_v62  ;;  %v2828_v23 = vrot.slane %v2827_v60, 1  ;;  %v2934_v1 = vadd.f32 %v2933_v5, %v2932_v53  ;;  %v2986_v40 = vadd.f32 %v2985_v9, %v2984_v34  ;;  %v8841_v62 = vld [vmem:[#allocation20_spill] sm:$0xff] }
 0x33e   :  { %v2973_v16 = vadd.f32 %v2972_v24, %v2971_v46  ;;  %v7912_v42 = vrot.slane %v7908_v29, %v8841_v62 }
 0x33f   :  { %v2829_v50 = vadd.f32 %v2828_v23, %v2827_v60  ;;  %v2947_v60 = vadd.f32 %v2946_v44, %v2945_v6  ;;  %v8842_v23 = vld [vmem:[#allocation31_spill] sm:$0xff] }
 0x340   :  { %8847 = vst [vmem:[#allocation46_spill] sm:$0xff] %v7912_v42 }
 0x341   :  { %5836 = vpush %v2829_v50  ;;  %v8844_v50 = vld [vmem:[#allocation21_spill] sm:$0xff] }
 0x342   :  { %v7920_v55 = vrot.slane %v7908_v29, %v8844_v50 }
 0x344   :  { %8849 = vst [vmem:[#allocation48_spill] sm:$0xff] %v7920_v55 }
 0x36e   :  { %s5835_s18 = spop %5834 }
 0x36f   :  { %s2732_s19 = smul.f32 2.6573129e-05, %s5835_s18 }
 0x371   :  { %v3001_v32 = vstv %s2732_s19  ;;  %s2832_s20 = smul.f32 %s2732_s19, %s2732_s19 }
 0x372   :  { %v3002_v47 = vmul.f32 %v3001_v32, %v431_v12  ;;  %s5837_s21 = spop %5836 }
 0x373   :  { %s2831_s4 = smul.f32 2.6573129e-05, %s5837_s21 }
 0x374   :  { %v3007_v17 = vrot.slane %v3002_v47, %v8841_v62  ;;  %v3015_v3 = vrot.slane %v3002_v47, %v8842_v23  ;;  %v3023_v7 = vrot.slane %v3002_v47, %v8843_v63  ;;  %v3011_v27 = vrot.slane %v3002_v47, %v8844_v50 }
 0x375   :  { %s2833_s3 = ssub.f32 %s2831_s4, %s2832_s20  ;;  %v3027_v22 = vrot.slane %v3002_v47, %v8845_v8  ;;  %v3019_v4 = vrot.slane %v3002_v47, %v8846_v14  ;;  %s6946_s20 = smov [#allocation14]  }
 0x376   :  { %v3034_v21 = vsub.f32 %v2934_v1, %v3007_v17  ;;  %v7906_v19 = vsub.f32 %v2960_v18, %v3015_v3  ;;  %v3038_v25 = vsub.f32 %v2986_v40, %v3023_v7  ;;  %v3035_v39 = vsub.f32 %v2947_v60, %v3011_v27  ;;  %v6358_v1 = vld [vmem:[#allocation11 + $0xb8] sm:$0xff]   ;;  %v6359_v60 = vld [vmem:[#allocation11 + $0xf0] sm:$0xff]   ;;  %v6361_v27 = vld [vmem:[#allocation11 + $0xe8] sm:$0xff]   ;;  %s5234_s21 = sshll.u32 %s6946_s20, 4  ;;  %s5235_s21 = int_to_ptr.vmem [resolvable:$true] %s5234_s21 }
 0x377   :  { %s2834_s6 = sadd.f32 1e-05, %s2833_s3  ;;  %v3039_v2 = vsub.f32 %v2999_v10, %v3027_v22  ;;  %v3037_v58 = vsub.f32 %v2973_v16, %v3019_v4  ;;  %v7945_v17 = vld [vmem:[%s8687_s0 + $0x7c] ss:$16 sps:$4 sm:$0xff]   ;;  %v6477_v10 = vld [vmem:[#allocation2 + $0x450] ss:$24 sps:$4 sm:$0xff]   ;;  %p6910_p8 = scmp.lt.s32.totalorder %s5235_s21, %s5235_s21 }
 0x378   :  { %v6360_v7 = vld [vmem:[#allocation11 + $0xb0] sm:$0xff]   ;;  %v6478_v22 = vld [vmem:[#allocation2 + $0x424] ss:$24 sps:$4 sm:$0xff]   ;;  %s6905_s4 = scalar_lea.vmem %s5235_s21, 32 }
 0x379   :  { %v2835_v48 = vstv %s2834_s6  ;;  %v6362_v16 = vld [vmem:[#allocation11 + $0xa8] sm:$0xff]   ;;  %v6363_v4 = vld [vmem:[#allocation11 + $0xe0] sm:$0xff]   ;;  %p6906_p7 = scmp.ne.s32.totalorder %s5235_s21, %s6905_s4  ;;  %p6911_p9 = scmp.lt.s32.totalorder %s6905_s4, %s6905_s4 }
 0x37a   :  { %6454 = vrsqrt.f32 %v2835_v48  ;;  %v6482_v48 = vld [vmem:[#allocation2 + $0x3c4] ss:$24 sps:$4 sm:$0xff]  }
 0x37b   :  { %p6912_p10 = por %p6911_p9, %p6910_p8 }
 0x37d   :  { %p6913_p11 = pnand %p6912_p10, %p6906_p7 }
 0x387   :  { %v6455_v56 = vpop.eup %6454 }
 0x388   :  { %5838 = vpush %v6455_v56  ;;  %v6366_v56 = vld [vmem:[#allocation11 + $0x98] sm:$0xff]  }
 0x3b9   :  { %s5839_s8 = spop %5838 }
 0x3ba   :  { %s3000_s22 = smul.f32 0.020408163, %s5839_s8 }
 0x3bc   :  { %v7922_v36 = vstv %s3000_s22 }
 0x3bd   :  { %v3041_v38 = vmul.f32 %v7922_v36, %v3034_v21  ;;  %v3045_v45 = vmul.f32 %v7922_v36, %v3038_v25  ;;  %v3042_v53 = vmul.f32 %v7922_v36, %v3035_v39  ;;  %v3046_v6 = vmul.f32 %v7922_v36, %v3039_v2  ;;  %v6479_v21 = vld [vmem:[#allocation2 + $0x420] ss:$24 sps:$4 sm:$0xff]   ;;  %v6480_v25 = vld [vmem:[#allocation2 + $0x3f4] ss:$24 sps:$4 sm:$0xff]  }
 0x3be   :  { %v3044_v52 = vmul.f32 %v7922_v36, %v3037_v58  ;;  %v6364_v39 = vld [vmem:[#allocation11 + $0xa0] sm:$0xff]   ;;  %v6365_v2 = vld [vmem:[#allocation11 + $0xd8] sm:$0xff]  }
 0x3bf   :  { %v3078_v34 = vadd.f32 %v7912_v42, %v3041_v38  ;;  %v3082_v46 = vadd.f32 %v7916_v11, %v3045_v45  ;;  %v3079_v35 = vadd.f32 %v7920_v55, %v3042_v53  ;;  %v3083_v5 = vadd.f32 %v7926_v49, %v3046_v6  ;;  %v6481_v58 = vld [vmem:[#allocation2 + $0x3f0] ss:$24 sps:$4 sm:$0xff]   ;;  %v6483_v45 = vld [vmem:[#allocation2 + $0x3c0] ss:$24 sps:$4 sm:$0xff]   ;;  %v6484_v53 = vld [vmem:[#allocation2 + $0x394] ss:$24 sps:$4 sm:$0xff]  }
 0x3c0   :  { %v3081_v44 = vadd.f32 %v7930_v59, %v3044_v52  ;;  %v6367_v38 = vld [vmem:[#allocation11 + $0xd0] sm:$0xff]   ;;  %v3043_v52 = vmul.f32 %v7922_v36, %v7906_v19  ;;  %v6372_v19 = vld [vmem:[#allocation11 + $0x80] sm:$0xff]  }
 0x3c1   :  { %v3085_v0 = vmax.f32 %v3079_v35, 0.0  ;;  %v3084_v9 = vmax.f32 %v3078_v34, 0.0  ;;  %v3088_v12 = vmax.f32 %v3082_v46, 0.0  ;;  %v3089_v32 = vmax.f32 %v3083_v5, 0.0  ;;  %v6368_v6 = vld [vmem:[#allocation11 + $0x90] sm:$0xff]   ;;  %v6369_v34 = vld [vmem:[#allocation11 + $0xc8] sm:$0xff]  }
 0x3c2   :  { %v3087_v28 = vmax.f32 %v3081_v44, 0.0  ;;  %v7952_v46 = vrot.slane %v7908_v29, %v8842_v23  ;;  %v6485_v35 = vld [vmem:[#allocation2 + $0x390] ss:$24 sps:$4 sm:$0xff]   ;;  %v6486_v5 = vld [vmem:[#allocation2 + $0x364] ss:$24 sps:$4 sm:$0xff]  }
 0x3c3   :  { %v3091_v24 = vpack.c.bf16 %v3085_v0, %v3085_v0  ;;  %v3090_v47 = vpack.c.bf16 %v3084_v9, %v3084_v9  ;;  %v3094_v18 = vpack.c.bf16 %v3088_v12, %v3088_v12  ;;  %v3095_v40 = vpack.c.bf16 %v3089_v32, %v3089_v32  ;;  %v6370_v44 = vld [vmem:[#allocation11 + $0x88] sm:$0xff]   ;;  %v6371_v0 = vld [vmem:[#allocation11 + $0xc0] sm:$0xff]   ;;  %v6488_v32 = vld [vmem:[#allocation2 + $0x334] ss:$24 sps:$4 sm:$0xff]  }
 0x3c4   :  { %v3093_v3 = vpack.c.bf16 %v3087_v28, %v3087_v28  ;;  %8852 = vst [vmem:[#allocation51_spill] sm:$0xff] %v7952_v46  ;;  %v3080_v9 = vadd.f32 %v7952_v46, %v3043_v52  ;;  %v6487_v12 = vld [vmem:[#allocation2 + $0x360] ss:$24 sps:$4 sm:$0xff]   ;;  %v6489_v29 = vld [vmem:[#allocation2 + $0x330] ss:$24 sps:$4 sm:$0xff]  }
 0x3c5   :  { %3513 = vmatprep.mubr.bf16.mxu1 %v3091_v24  ;;  %3593 = vmatprep.mubr.bf16.mxu0 %v3095_v40  ;;  %v6490_v28 = vld [vmem:[#allocation2 + $0x304] ss:$24 sps:$4 sm:$0xff]   ;;  %v6493_v40 = vld [vmem:[#allocation2 + $0x5d4] ss:$24 sps:$4 sm:$0xff]  }
 0x3c6   :  { %3514 = vmatmul.mubr.bf16.vlgmr.msra.gmra.mxu1 %v3090_v47  ;;  %3594 = vmatmul.mubr.bf16.vlgmr.msra.gmra.mxu0 %v3094_v18  ;;  %v3086_v36 = vmax.f32 %v3080_v9, 0.0  ;;  %v7958_v24 = vld [vmem:[%s8687_s0 + $0x74] ss:$16 sps:$4 sm:$0xff]   ;;  %v6492_v18 = vld [vmem:[#allocation2 + $0x300] ss:$24 sps:$4 sm:$0xff]  }
 0x3c7   :  { %5725 = vmatpush3.bf16.msra.mxu1 %v6358_v1  ;;  %3553 = vmatprep.mubr.bf16.mxu1 %v3093_v3  ;;  %v6491_v1 = vld [vmem:[#allocation2 + $0x154] ss:$24 sps:$4 sm:$0xff]   ;;  %v6495_v3 = vld [vmem:[#allocation2 + $0x124] ss:$24 sps:$4 sm:$0xff]  }
 0x3c8   :  { %5726 = vmatprep.subr.bf16.mxu1 %v6359_v60  ;;  %3808 = vmatpush1.bf16.msra.mxu0 %v6477_v10  ;;  %v3092_v47 = vpack.c.bf16 %v3086_v36, %v3086_v36  ;;  %v6494_v60 = vld [vmem:[#allocation2 + $0x150] ss:$24 sps:$4 sm:$0xff]   ;;  %v6498_v10 = vld [vmem:[#allocation2 + $0x120] ss:$24 sps:$4 sm:$0xff]   ;;  %v6513_v52 = vld [vmem:[#allocation2 + $0x4e4] ss:$24 sps:$4 sm:$0xff]  }
 0x3c9   :  { %3839 = vmatprep.mubr.bf16.mxu0 %v7945_v17  ;;  %3809 = vmatprep.subr.bf16.mxu0 %v6478_v22  ;;  %v6499_v22 = vld [vmem:[#allocation2 + $0xf4] ss:$24 sps:$4 sm:$0xff]   ;;  %v6519_v9 = vld [vmem:[#allocation2 + $0x4] ss:$24 sps:$4 sm:$0xff]  }
 0x3ca   :  { %v6523_v36 = vld [vmem:[#allocation2 + $0x2d4] ss:$24 sps:$4 sm:$0xff]   ;;  %v8866_v11 = vld [vmem:[#allocation28_spill] sm:$0xff] }
 0x3cb   :  { %5727 = vmatpush3.bf16.msra.mxu1 %v6360_v7  ;;  %v6496_v7 = vld [vmem:[#allocation2 + $0x5d0] ss:$24 sps:$4 sm:$0xff]  }
 0x3cc   :  { %5728 = vmatprep.subr.bf16.mxu1 %v6361_v27  ;;  %3810 = vmatpush1.bf16.msra.mxu0 %v6479_v21  ;;  %v6497_v27 = vld [vmem:[#allocation2 + $0x5a4] ss:$24 sps:$4 sm:$0xff]   ;;  %v6502_v21 = vld [vmem:[#allocation2 + $0xf0] ss:$24 sps:$4 sm:$0xff]  }
 0x3cd   :  { %3811 = vmatprep.subr.bf16.mxu0 %v6480_v25  ;;  %v6503_v25 = vld [vmem:[#allocation2 + $0xc4] ss:$24 sps:$4 sm:$0xff]  }
 0x3cf   :  { %5729 = vmatpush3.bf16.msra.mxu1 %v6362_v16  ;;  %v6500_v16 = vld [vmem:[#allocation2 + $0x5a0] ss:$24 sps:$4 sm:$0xff]  }
 0x3d0   :  { %5730 = vmatprep.subr.bf16.mxu1 %v6363_v4  ;;  %3812 = vmatpush1.bf16.msra.mxu0 %v6481_v58  ;;  %v6501_v4 = vld [vmem:[#allocation2 + $0x574] ss:$24 sps:$4 sm:$0xff]   ;;  %v6506_v58 = vld [vmem:[#allocation2 + $0xc0] ss:$24 sps:$4 sm:$0xff]  }
 0x3d1   :  { %3813 = vmatprep.subr.bf16.mxu0 %v6482_v48  ;;  %v6507_v48 = vld [vmem:[#allocation2 + $0x94] ss:$24 sps:$4 sm:$0xff]  }
 0x3d3   :  { %5731 = vmatpush3.bf16.msra.mxu1 %v6364_v39  ;;  %v6504_v39 = vld [vmem:[#allocation2 + $0x570] ss:$24 sps:$4 sm:$0xff]  }
 0x3d4   :  { %5732 = vmatprep.subr.bf16.mxu1 %v6365_v2  ;;  %3814 = vmatpush1.bf16.msra.mxu0 %v6483_v45  ;;  %v6505_v2 = vld [vmem:[#allocation2 + $0x544] ss:$24 sps:$4 sm:$0xff]   ;;  %v6510_v45 = vld [vmem:[#allocation2 + $0x90] ss:$24 sps:$4 sm:$0xff]  }
 0x3d5   :  { %3815 = vmatprep.subr.bf16.mxu0 %v6484_v53  ;;  %v6511_v53 = vld [vmem:[#allocation2 + $0x64] ss:$24 sps:$4 sm:$0xff]  }
 0x3d7   :  { %5733 = vmatpush3.bf16.msra.mxu1 %v6366_v56  ;;  %v6508_v56 = vld [vmem:[#allocation2 + $0x540] ss:$24 sps:$4 sm:$0xff]  }
 0x3d8   :  { %5734 = vmatprep.subr.bf16.mxu1 %v6367_v38  ;;  %3816 = vmatpush1.bf16.msra.mxu0 %v6485_v35  ;;  %v6509_v38 = vld [vmem:[#allocation2 + $0x514] ss:$24 sps:$4 sm:$0xff]  }
 0x3d9   :  { %3817 = vmatprep.subr.bf16.mxu0 %v6486_v5  ;;  %v6515_v35 = vld [vmem:[#allocation2 + $0x34] ss:$24 sps:$4 sm:$0xff]   ;;  %v6516_v5 = vld [vmem:[#allocation2 + $0x4e0] ss:$24 sps:$4 sm:$0xff]  }
 0x3db   :  { %5735 = vmatpush3.bf16.msra.mxu1 %v6368_v6  ;;  %v6512_v6 = vld [vmem:[#allocation2 + $0x510] ss:$24 sps:$4 sm:$0xff]  }
 0x3dc   :  { %5736 = vmatprep.subr.bf16.mxu1 %v6369_v34  ;;  %3818 = vmatpush1.bf16.msra.mxu0 %v6487_v12  ;;  %v6514_v34 = vld [vmem:[#allocation2 + $0x60] ss:$24 sps:$4 sm:$0xff]   ;;  %v6520_v12 = vld [vmem:[#allocation2 + $0x4b0] ss:$24 sps:$4 sm:$0xff]  }
 0x3dd   :  { %3819 = vmatprep.subr.bf16.mxu0 %v6488_v32  ;;  %v6521_v32 = vld [vmem:[#allocation2 + $0x484] ss:$24 sps:$4 sm:$0xff]  }
 0x3df   :  { %5737 = vmatpush3.bf16.msra.mxu1 %v6370_v44  ;;  %v6517_v44 = vld [vmem:[#allocation2 + $0x4b4] ss:$24 sps:$4 sm:$0xff]  }
 0x3e0   :  { %5738 = vmatprep.subr.bf16.mxu1 %v6371_v0  ;;  %3820 = vmatpush1.bf16.msra.mxu0 %v6489_v29  ;;  %v6518_v0 = vld [vmem:[#allocation2 + $0x30] ss:$24 sps:$4 sm:$0xff]  }
 0x3e1   :  { %3821 = vmatprep.subr.bf16.mxu0 %v6490_v28  ;;  %v7964_v29 = vld [vmem:[%s8687_s0 + $0x78] ss:$16 sps:$4 sm:$0xff]  }
 0x3e2   :  { %v6524_v28 = vld [vmem:[#allocation2 + $0x480] ss:$24 sps:$4 sm:$0xff]  }
 0x3e3   :  { %5739 = vmatpush3.bf16.msra.mxu1 %v6372_v19  ;;  %v6522_v19 = vld [vmem:[#allocation2] ss:$24 sps:$4 sm:$0xff]  }
 0x3e4   :  { %3736 = vmatprep.subr.bf16.mxu1 %v6491_v1  ;;  %3822 = vmatpush1.bf16.msra.mxu0 %v6492_v18  ;;  %v6525_v1 = vld [vmem:[#allocation2 + $0x15c] ss:$24 sps:$4 sm:$0xff]   ;;  %v6526_v18 = vld [vmem:[#allocation2 + $0x2d0] ss:$24 sps:$4 sm:$0xff]  }
 0x3e5   :  { %3823 = vmatprep.subr.bf16.mxu0 %v6493_v40  ;;  %v6527_v40 = vld [vmem:[#allocation2 + $0x2a4] ss:$24 sps:$4 sm:$0xff]  }
 0x3e6   :  { %3554 = vmatmul.mubr.bf16.vlgmr.msra.gmra.mxu1 %v3092_v47  ;;  %v7969_v47 = vld [vmem:[%s8687_s0 + $0x9c] ss:$16 sps:$4 sm:$0xff]  }
 0x3e7   :  { %3737 = vmatpush1.bf16.msra.mxu1 %v6494_v60  ;;  %3768 = vmatprep.mubr.bf16.mxu1 %v7958_v24  ;;  %v6528_v60 = vld [vmem:[#allocation2 + $0x158] ss:$24 sps:$4 sm:$0xff]  }
 0x3e8   :  { %3738 = vmatprep.subr.bf16.mxu1 %v6495_v3  ;;  %3824 = vmatpush2.bf16.msra.mxu0 %v6496_v7  ;;  %v6529_v3 = vld [vmem:[#allocation2 + $0x12c] ss:$24 sps:$4 sm:$0xff]   ;;  %v6530_v7 = vld [vmem:[#allocation2 + $0x2a0] ss:$24 sps:$4 sm:$0xff]  }
 0x3e9   :  { %3825 = vmatprep.subr.bf16.mxu0 %v6497_v27  ;;  %v6531_v27 = vld [vmem:[#allocation2 + $0x274] ss:$24 sps:$4 sm:$0xff]  }
 0x3eb   :  { %3739 = vmatpush1.bf16.msra.mxu1 %v6498_v10  ;;  %v7976_v10 = vld [vmem:[%s8687_s0 + $0x98] ss:$16 sps:$4 sm:$0xff]  }
 0x3ec   :  { %3740 = vmatprep.subr.bf16.mxu1 %v6499_v22  ;;  %3826 = vmatpush2.bf16.msra.mxu0 %v6500_v16  ;;  %v6532_v22 = vld [vmem:[#allocation2 + $0x128] ss:$24 sps:$4 sm:$0xff]   ;;  %v7981_v16 = vld [vmem:[%s8687_s0 + $0xbc] ss:$16 sps:$4 sm:$0xff]  }
 0x3ed   :  { %3827 = vmatprep.subr.bf16.mxu0 %v6501_v4  ;;  %v6533_v4 = vld [vmem:[#allocation2 + $0xfc] ss:$24 sps:$4 sm:$0xff]  }
 0x3ef   :  { %3741 = vmatpush1.bf16.msra.mxu1 %v6502_v21  ;;  %v6534_v21 = vld [vmem:[#allocation2 + $0x270] ss:$24 sps:$4 sm:$0xff]  }
 0x3f0   :  { %3742 = vmatprep.subr.bf16.mxu1 %v6503_v25  ;;  %3828 = vmatpush2.bf16.msra.mxu0 %v6504_v39  ;;  %v6535_v25 = vld [vmem:[#allocation2 + $0x244] ss:$24 sps:$4 sm:$0xff]   ;;  %v6536_v39 = vld [vmem:[#allocation2 + $0xf8] ss:$24 sps:$4 sm:$0xff]  }
 0x3f1   :  { %3829 = vmatprep.subr.bf16.mxu0 %v6505_v2  ;;  %v6537_v2 = vld [vmem:[#allocation2 + $0xcc] ss:$24 sps:$4 sm:$0xff]  }
 0x3f3   :  { %3743 = vmatpush1.bf16.msra.mxu1 %v6506_v58  ;;  %v5622_v58 = vld [vmem:[%s8687_s0 + $0xd8] sm:$0x11] }
 0x3f4   :  { %3744 = vmatprep.subr.bf16.mxu1 %v6507_v48  ;;  %3830 = vmatpush2.bf16.msra.mxu0 %v6508_v56  ;;  %v6538_v48 = vld [vmem:[#allocation2 + $0x240] ss:$24 sps:$4 sm:$0xff]   ;;  %v6539_v56 = vld [vmem:[#allocation2 + $0x214] ss:$24 sps:$4 sm:$0xff]  }
 0x3f5   :  { %3831 = vmatprep.subr.bf16.mxu0 %v6509_v38  ;;  %v7991_v38 = vld [vmem:[%s8687_s0 + $0xb8] ss:$16 sps:$4 sm:$0xff]  }
 0x3f7   :  { %3745 = vmatpush1.bf16.msra.mxu1 %v6510_v45  ;;  %v6540_v45 = vld [vmem:[#allocation2 + $0xc8] ss:$24 sps:$4 sm:$0xff]  }
 0x3f8   :  { %3746 = vmatprep.subr.bf16.mxu1 %v6511_v53  ;;  %3832 = vmatpush2.bf16.msra.mxu0 %v6512_v6  ;;  %v7993_v53 = vcombine.high %v5622_v58, %v5622_v58  ;;  %v6541_v6 = vld [vmem:[#allocation2 + $0x9c] ss:$24 sps:$4 sm:$0xff]  }
 0x3f9   :  { %3833 = vmatprep.subr.bf16.mxu0 %v6513_v52  ;;  %v6542_v52 = vld [vmem:[#allocation2 + $0x210] ss:$24 sps:$4 sm:$0xff]  }
 0x3fb   :  { %3747 = vmatpush1.bf16.msra.mxu1 %v6514_v34  ;;  %v6543_v34 = vld [vmem:[#allocation2 + $0x1e4] ss:$24 sps:$4 sm:$0xff]  }
 0x3fc   :  { %3748 = vmatprep.subr.bf16.mxu1 %v6515_v35  ;;  %3834 = vmatpush2.bf16.msra.mxu0 %v6516_v5  ;;  %v6544_v35 = vld [vmem:[#allocation2 + $0x98] ss:$24 sps:$4 sm:$0xff]   ;;  %v6545_v5 = vld [vmem:[#allocation2 + $0x6c] ss:$24 sps:$4 sm:$0xff]  }
 0x3fd   :  { %3835 = vmatprep.subr.bf16.mxu0 %v6517_v44  ;;  %v6546_v44 = vld [vmem:[#allocation2 + $0x1e0] ss:$24 sps:$4 sm:$0xff]  }
 0x3ff   :  { %3749 = vmatpush1.bf16.msra.mxu1 %v6518_v0  ;;  %v6547_v0 = vld [vmem:[#allocation2 + $0x1b4] ss:$24 sps:$4 sm:$0xff]  }
 0x400   :  { %3750 = vmatprep.subr.bf16.mxu1 %v6519_v9  ;;  %3836 = vmatpush2.bf16.msra.mxu0 %v6520_v12  ;;  %v7997_v9 = vcombine.low %v5622_v58, %v5622_v58  ;;  %v6548_v12 = vld [vmem:[#allocation2 + $0x68] ss:$24 sps:$4 sm:$0xff]   ;;  %v8021_v58 = vld [vmem:[%s8687_s0 + $0xb4] ss:$16 sps:$4 sm:$0xff]  }
 0x401   :  { %3837 = vmatprep.subr.bf16.mxu0 %v6521_v32  ;;  %v6549_v32 = vld [vmem:[#allocation2 + $0x3c] ss:$24 sps:$4 sm:$0xff]  }
 0x403   :  { %3751 = vmatpush1.bf16.msra.mxu1 %v6522_v19  ;;  %v6550_v19 = vld [vmem:[#allocation2 + $0x1b0] ss:$24 sps:$4 sm:$0xff]  }
 0x404   :  { %3752 = vmatprep.subr.bf16.mxu1 %v6523_v36  ;;  %3838 = vmatpush2.bf16.msra.mxu0 %v6524_v28  ;;  %v6551_v36 = vld [vmem:[#allocation2 + $0x184] ss:$24 sps:$4 sm:$0xff]   ;;  %v6552_v28 = vld [vmem:[#allocation2 + $0x38] ss:$24 sps:$4 sm:$0xff]  }
 0x405   :  { %3949 = vmatprep.subr.bf16.mxu0 %v6525_v1  ;;  %v8004_v1 = vld [vmem:[%s8687_s0 + $0x70] ss:$16 sps:$4 sm:$0xff]  }
 0x407   :  { %3753 = vmatpush2.bf16.msra.mxu1 %v6526_v18  ;;  %3840 = vmatmul.mubr.bf16.vlgmr.msra.gmra.mxu0 %v7964_v29  ;;  %v6553_v18 = vld [vmem:[#allocation2 + $0xc] ss:$24 sps:$4 sm:$0xff]  }
 0x408   :  { %3754 = vmatprep.subr.bf16.mxu1 %v6527_v40  ;;  %3950 = vmatpush1.bf16.msra.mxu0 %v6528_v60  ;;  %v6554_v40 = vld [vmem:[#allocation2 + $0x180] ss:$24 sps:$4 sm:$0xff]   ;;  %v8009_v60 = vld [vmem:[%s8687_s0 + $0x94] ss:$16 sps:$4 sm:$0xff]  }
 0x409   :  { %3849 = vmatprep.mubr.bf16.mxu0 %v7969_v47  ;;  %3951 = vmatprep.subr.bf16.mxu0 %v6529_v3  ;;  %v6555_v3 = vld [vmem:[#allocation2 + $0x754] ss:$24 sps:$4 sm:$0xff]  }
 0x40b   :  { %3755 = vmatpush2.bf16.msra.mxu1 %v6530_v7  ;;  %v6556_v7 = vld [vmem:[#allocation2 + $0x8] ss:$24 sps:$4 sm:$0xff]  }
 0x40c   :  { %3756 = vmatprep.subr.bf16.mxu1 %v6531_v27  ;;  %3952 = vmatpush1.bf16.msra.mxu0 %v6532_v22  ;;  %v6557_v27 = vld [vmem:[#allocation2 + $0x2dc] ss:$24 sps:$4 sm:$0xff]   ;;  %v6558_v22 = vld [vmem:[#allocation2 + $0x750] ss:$24 sps:$4 sm:$0xff]  }
 0x40d   :  { %3953 = vmatprep.subr.bf16.mxu0 %v6533_v4  ;;  %v6559_v4 = vld [vmem:[#allocation2 + $0x724] ss:$24 sps:$4 sm:$0xff]  }
 0x40f   :  { %3757 = vmatpush2.bf16.msra.mxu1 %v6534_v21  ;;  %3850 = vmatmul.mubr.bf16.gmra.mxu0 %v7976_v10  ;;  %v6560_v21 = vld [vmem:[#allocation2 + $0x2d8] ss:$24 sps:$4 sm:$0xff]  }
 0x410   :  { %3758 = vmatprep.subr.bf16.mxu1 %v6535_v25  ;;  %3954 = vmatpush1.bf16.msra.mxu0 %v6536_v39  ;;  %v8016_v25 = vld [vmem:[%s8687_s0 + $0x90] ss:$16 sps:$4 sm:$0xff]   ;;  %v6561_v39 = vld [vmem:[#allocation2 + $0x2ac] ss:$24 sps:$4 sm:$0xff]  }
 0x411   :  { %3859 = vmatprep.mubr.bf16.mxu0 %v7981_v16  ;;  %3955 = vmatprep.subr.bf16.mxu0 %v6537_v2  ;;  %v6562_v2 = vld [vmem:[#allocation2 + $0x720] ss:$24 sps:$4 sm:$0xff]  }
 0x413   :  { %3759 = vmatpush2.bf16.msra.mxu1 %v6538_v48  ;;  %v6563_v48 = vld [vmem:[#allocation2 + $0x6f4] ss:$24 sps:$4 sm:$0xff]  }
 0x414   :  { %3760 = vmatprep.subr.bf16.mxu1 %v6539_v56  ;;  %3956 = vmatpush1.bf16.msra.mxu0 %v6540_v45  ;;  %v6564_v56 = vld [vmem:[#allocation2 + $0x2a8] ss:$24 sps:$4 sm:$0xff]   ;;  %v6565_v45 = vld [vmem:[#allocation2 + $0x27c] ss:$24 sps:$4 sm:$0xff]  }
 0x415   :  { %3957 = vmatprep.subr.bf16.mxu0 %v6541_v6  ;;  %v6566_v6 = vld [vmem:[#allocation2 + $0x6f0] ss:$24 sps:$4 sm:$0xff]  }
 0x417   :  { %3761 = vmatpush2.bf16.msra.mxu1 %v6542_v52  ;;  %3860 = vmatmul.mubr.bf16.gmra.mxu0 %v7991_v38  ;;  %v6567_v52 = vld [vmem:[#allocation2 + $0x6c4] ss:$24 sps:$4 sm:$0xff]  }
 0x418   :  { %3762 = vmatprep.subr.bf16.mxu1 %v6543_v34  ;;  %3958 = vmatpush1.bf16.msra.mxu0 %v6544_v35  ;;  %v5621_v34 = vld [vmem:[%s8687_s0 + $0xd0] sm:$0x11] }
 0x419   :  { %3869 = vmatprep.mubr.bf16.mxu0 %v7993_v53  ;;  %3959 = vmatprep.subr.bf16.mxu0 %v6545_v5  ;;  %v6568_v35 = vld [vmem:[#allocation2 + $0x278] ss:$24 sps:$4 sm:$0xff]  }
 0x41a   :  { %v8031_v5 = vld [vmem:[%s8687_s0 + $0xb0] ss:$16 sps:$4 sm:$0xff]  }
 0x41b   :  { %3763 = vmatpush2.bf16.msra.mxu1 %v6546_v44  ;;  %v6569_v44 = vld [vmem:[#allocation2 + $0x24c] ss:$24 sps:$4 sm:$0xff]  }
 0x41c   :  { %3764 = vmatprep.subr.bf16.mxu1 %v6547_v0  ;;  %3960 = vmatpush1.bf16.msra.mxu0 %v6548_v12  ;;  %v6570_v0 = vld [vmem:[#allocation2 + $0x6c0] ss:$24 sps:$4 sm:$0xff]   ;;  %v8033_v12 = vcombine.high %v5621_v34, %v5621_v34 }
 0x41d   :  { %3961 = vmatprep.subr.bf16.mxu0 %v6549_v32  ;;  %v6571_v32 = vld [vmem:[#allocation2 + $0x694] ss:$24 sps:$4 sm:$0xff]  }
 0x41f   :  { %3765 = vmatpush2.bf16.msra.mxu1 %v6550_v19  ;;  %3870 = vmatmul.mubr.bf16.gmra.mxu0 %v7997_v9  ;;  %v6572_v19 = vld [vmem:[#allocation2 + $0x248] ss:$24 sps:$4 sm:$0xff]  }
 0x420   :  { %3766 = vmatprep.subr.bf16.mxu1 %v6551_v36  ;;  %3962 = vmatpush1.bf16.msra.mxu0 %v6552_v28  ;;  %v6573_v36 = vld [vmem:[#allocation2 + $0x21c] ss:$24 sps:$4 sm:$0xff]   ;;  %v6574_v28 = vld [vmem:[#allocation2 + $0x690] ss:$24 sps:$4 sm:$0xff]  }
 0x421   :  { %3981 = vmatprep.mubr.bf16.mxu0 %v7958_v24  ;;  %3963 = vmatprep.subr.bf16.mxu0 %v6553_v18  ;;  %v6575_v18 = vld [vmem:[#allocation2 + $0x664] ss:$24 sps:$4 sm:$0xff]  }
 0x423   :  { %3767 = vmatpush2.bf16.msra.mxu1 %v6554_v40  ;;  %v6576_v40 = vld [vmem:[#allocation2 + $0x218] ss:$24 sps:$4 sm:$0xff]  }
 0x424   :  { %3878 = vmatprep.subr.bf16.mxu1 %v6555_v3  ;;  %3964 = vmatpush1.bf16.msra.mxu0 %v6556_v7  ;;  %v8037_v3 = vcombine.low %v5621_v34, %v5621_v34  ;;  %v6577_v7 = vld [vmem:[#allocation2 + $0x1ec] ss:$24 sps:$4 sm:$0xff]   ;;  %v6588_v34 = vld [vmem:[#allocation2 + $0x188] ss:$24 sps:$4 sm:$0xff]  }
 0x425   :  { %3965 = vmatprep.subr.bf16.mxu0 %v6557_v27  ;;  %v6578_v27 = vld [vmem:[#allocation2 + $0x660] ss:$24 sps:$4 sm:$0xff]  }
 0x426   :  { %3769 = vmatmul.mubr.bf16.vlgmr.msra.gmra.mxu1 %v8004_v1 }
 0x427   :  { %3879 = vmatpush1.bf16.msra.mxu1 %v6558_v22  ;;  %3778 = vmatprep.mubr.bf16.mxu1 %v8009_v60  ;;  %v8042_v22 = vld [vmem:[%s8688_s1 + $0x3c] ss:$8 sps:$4 sm:$0xff]  }
 0x428   :  { %3880 = vmatprep.subr.bf16.mxu1 %v6559_v4  ;;  %3966 = vmatpush2.bf16.msra.mxu0 %v6560_v21  ;;  %v6579_v4 = vld [vmem:[#allocation2 + $0x634] ss:$24 sps:$4 sm:$0xff]   ;;  %v6580_v21 = vld [vmem:[#allocation2 + $0x1e8] ss:$24 sps:$4 sm:$0xff]  }
 0x429   :  { %3967 = vmatprep.subr.bf16.mxu0 %v6561_v39  ;;  %v6581_v39 = vld [vmem:[#allocation2 + $0x1bc] ss:$24 sps:$4 sm:$0xff]  }
 0x42b   :  { %3881 = vmatpush1.bf16.msra.mxu1 %v6562_v2  ;;  %v6582_v2 = vld [vmem:[#allocation2 + $0x630] ss:$24 sps:$4 sm:$0xff]  }
 0x42c   :  { %3882 = vmatprep.subr.bf16.mxu1 %v6563_v48  ;;  %3968 = vmatpush2.bf16.msra.mxu0 %v6564_v56  ;;  %v6583_v48 = vld [vmem:[#allocation2 + $0x604] ss:$24 sps:$4 sm:$0xff]   ;;  %v6584_v56 = vld [vmem:[#allocation2 + $0x1b8] ss:$24 sps:$4 sm:$0xff]  }
 0x42d   :  { %3969 = vmatprep.subr.bf16.mxu0 %v6565_v45  ;;  %v6585_v45 = vld [vmem:[#allocation2 + $0x18c] ss:$24 sps:$4 sm:$0xff]  }
 0x42e   :  { %3779 = vmatmul.mubr.bf16.gmra.mxu1 %v8016_v25 }
 0x42f   :  { %3883 = vmatpush1.bf16.msra.mxu1 %v6566_v6  ;;  %3788 = vmatprep.mubr.bf16.mxu1 %v8021_v58  ;;  %v6586_v6 = vld [vmem:[#allocation2 + $0x600] ss:$24 sps:$4 sm:$0xff]  }
 0x430   :  { %3884 = vmatprep.subr.bf16.mxu1 %v6567_v52  ;;  %3970 = vmatpush2.bf16.msra.mxu0 %v6568_v35  ;;  %v6587_v52 = vld [vmem:[#allocation2 + $0x8d4] ss:$24 sps:$4 sm:$0xff]  }
 0x431   :  { %3971 = vmatprep.subr.bf16.mxu0 %v6569_v44  ;;  %v6589_v35 = vld [vmem:[#allocation2 + $0x75c] ss:$24 sps:$4 sm:$0xff]   ;;  %v6590_v44 = vld [vmem:[#allocation2 + $0x8d0] ss:$24 sps:$4 sm:$0xff]  }
 0x433   :  { %3885 = vmatpush1.bf16.msra.mxu1 %v6570_v0  ;;  %v6591_v0 = vld [vmem:[#allocation2 + $0x8a4] ss:$24 sps:$4 sm:$0xff]  }
 0x434   :  { %3886 = vmatprep.subr.bf16.mxu1 %v6571_v32  ;;  %3972 = vmatpush2.bf16.msra.mxu0 %v6572_v19  ;;  %v6592_v32 = vld [vmem:[#allocation2 + $0x758] ss:$24 sps:$4 sm:$0xff]   ;;  %v6593_v19 = vld [vmem:[#allocation2 + $0x72c] ss:$24 sps:$4 sm:$0xff]  }
 0x435   :  { %3973 = vmatprep.subr.bf16.mxu0 %v6573_v36  ;;  %v6594_v36 = vld [vmem:[#allocation2 + $0x8a0] ss:$24 sps:$4 sm:$0xff]  }
 0x436   :  { %3789 = vmatmul.mubr.bf16.gmra.mxu1 %v8031_v5 }
 0x437   :  { %3887 = vmatpush1.bf16.msra.mxu1 %v6574_v28  ;;  %3798 = vmatprep.mubr.bf16.mxu1 %v8033_v12  ;;  %v6595_v28 = vld [vmem:[#allocation2 + $0x874] ss:$24 sps:$4 sm:$0xff]  }
 0x438   :  { %3888 = vmatprep.subr.bf16.mxu1 %v6575_v18  ;;  %3974 = vmatpush2.bf16.msra.mxu0 %v6576_v40  ;;  %v6596_v18 = vld [vmem:[#allocation2 + $0x728] ss:$24 sps:$4 sm:$0xff]   ;;  %v6597_v40 = vld [vmem:[#allocation2 + $0x6fc] ss:$24 sps:$4 sm:$0xff]  }
 0x439   :  { %3975 = vmatprep.subr.bf16.mxu0 %v6577_v7  ;;  %v6598_v7 = vld [vmem:[#allocation2 + $0x870] ss:$24 sps:$4 sm:$0xff]  }
 0x43b   :  { %3889 = vmatpush1.bf16.msra.mxu1 %v6578_v27  ;;  %v6599_v27 = vld [vmem:[#allocation2 + $0x844] ss:$24 sps:$4 sm:$0xff]  }
 0x43c   :  { %3890 = vmatprep.subr.bf16.mxu1 %v6579_v4  ;;  %3976 = vmatpush2.bf16.msra.mxu0 %v6580_v21  ;;  %v6600_v4 = vld [vmem:[#allocation2 + $0x6f8] ss:$24 sps:$4 sm:$0xff]   ;;  %v6601_v21 = vld [vmem:[#allocation2 + $0x6cc] ss:$24 sps:$4 sm:$0xff]  }
 0x43d   :  { %3977 = vmatprep.subr.bf16.mxu0 %v6581_v39  ;;  %v6602_v39 = vld [vmem:[#allocation2 + $0x840] ss:$24 sps:$4 sm:$0xff]  }
 0x43e   :  { %3799 = vmatmul.mubr.bf16.gmra.mxu1 %v8037_v3 }
 0x43f   :  { %3891 = vmatpush1.bf16.msra.mxu1 %v6582_v2  ;;  %3910 = vmatprep.mubr.bf16.mxu1 %v8042_v22  ;;  %v6603_v2 = vld [vmem:[#allocation2 + $0x814] ss:$24 sps:$4 sm:$0xff]  }
 0x440   :  { %3892 = vmatprep.subr.bf16.mxu1 %v6583_v48  ;;  %3978 = vmatpush2.bf16.msra.mxu0 %v6584_v56  ;;  %v6604_v48 = vld [vmem:[#allocation2 + $0x6c8] ss:$24 sps:$4 sm:$0xff]   ;;  %v6605_v56 = vld [vmem:[#allocation2 + $0x69c] ss:$24 sps:$4 sm:$0xff]  }
 0x441   :  { %3979 = vmatprep.subr.bf16.mxu0 %v6585_v45  ;;  %v6606_v45 = vld [vmem:[#allocation2 + $0x810] ss:$24 sps:$4 sm:$0xff]  }
 0x443   :  { %3893 = vmatpush1.bf16.msra.mxu1 %v6586_v6  ;;  %v6607_v6 = vld [vmem:[#allocation2 + $0x7e4] ss:$24 sps:$4 sm:$0xff]  }
 0x444   :  { %3894 = vmatprep.subr.bf16.mxu1 %v6587_v52  ;;  %3980 = vmatpush2.bf16.msra.mxu0 %v6588_v34  ;;  %v6608_v52 = vld [vmem:[#allocation2 + $0x698] ss:$24 sps:$4 sm:$0xff]   ;;  %v6609_v34 = vld [vmem:[#allocation2 + $0x66c] ss:$24 sps:$4 sm:$0xff]  }
 0x445   :  { %4091 = vmatprep.subr.bf16.mxu0 %v6589_v35  ;;  %v6610_v35 = vld [vmem:[#allocation2 + $0x7e0] ss:$24 sps:$4 sm:$0xff]  }
 0x447   :  { %3895 = vmatpush2.bf16.msra.mxu1 %v6590_v44  ;;  %3982 = vmatmul.mubr.bf16.vlgmr.msra.gmra.mxu0 %v8004_v1  ;;  %v6611_v44 = vld [vmem:[#allocation2 + $0x7b4] ss:$24 sps:$4 sm:$0xff]  }
 0x448   :  { %3896 = vmatprep.subr.bf16.mxu1 %v6591_v0  ;;  %4092 = vmatpush1.bf16.msra.mxu0 %v6592_v32  ;;  %v6612_v0 = vld [vmem:[#allocation2 + $0x668] ss:$24 sps:$4 sm:$0xff]   ;;  %v6613_v32 = vld [vmem:[#allocation2 + $0x63c] ss:$24 sps:$4 sm:$0xff]  }
 0x449   :  { %3991 = vmatprep.mubr.bf16.mxu0 %v8009_v60  ;;  %4093 = vmatprep.subr.bf16.mxu0 %v6593_v19  ;;  %v6614_v19 = vld [vmem:[#allocation2 + $0x7b0] ss:$24 sps:$4 sm:$0xff]  }
 0x44b   :  { %3897 = vmatpush2.bf16.msra.mxu1 %v6594_v36  ;;  %v6615_v36 = vld [vmem:[#allocation2 + $0x784] ss:$24 sps:$4 sm:$0xff]  }
 0x44c   :  { %3898 = vmatprep.subr.bf16.mxu1 %v6595_v28  ;;  %4094 = vmatpush1.bf16.msra.mxu0 %v6596_v18  ;;  %v6616_v28 = vld [vmem:[#allocation2 + $0x638] ss:$24 sps:$4 sm:$0xff]  }
 0x44d   :  { %4095 = vmatprep.subr.bf16.mxu0 %v6597_v40  ;;  %v8057_v18 = vld [vmem:[%s8688_s1 + $0x38] ss:$8 sps:$4 sm:$0xff]   ;;  %v6617_v40 = vld [vmem:[#allocation2 + $0x60c] ss:$24 sps:$4 sm:$0xff]  }
 0x44f   :  { %3899 = vmatpush2.bf16.msra.mxu1 %v6598_v7  ;;  %3992 = vmatmul.mubr.bf16.gmra.mxu0 %v8016_v25  ;;  %v6618_v7 = vld [vmem:[#allocation2 + $0x780] ss:$24 sps:$4 sm:$0xff]  }
 0x450   :  { %3900 = vmatprep.subr.bf16.mxu1 %v6599_v27  ;;  %4096 = vmatpush1.bf16.msra.mxu0 %v6600_v4  ;;  %v8062_v27 = vld [vmem:[%s8688_s1 + $0x4c] ss:$8 sps:$4 sm:$0xff]  }
 0x451   :  { %4001 = vmatprep.mubr.bf16.mxu0 %v8021_v58  ;;  %4097 = vmatprep.subr.bf16.mxu0 %v6601_v21  ;;  %v6619_v4 = vld [vmem:[#allocation2 + $0x45c] ss:$24 sps:$4 sm:$0xff]   ;;  %v6620_v21 = vld [vmem:[#allocation2 + $0x608] ss:$24 sps:$4 sm:$0xff]  }
 0x453   :  { %3901 = vmatpush2.bf16.msra.mxu1 %v6602_v39  ;;  %v6621_v39 = vld [vmem:[#allocation2 + $0x8dc] ss:$24 sps:$4 sm:$0xff]  }
 0x454   :  { %3902 = vmatprep.subr.bf16.mxu1 %v6603_v2  ;;  %4098 = vmatpush1.bf16.msra.mxu0 %v6604_v48  ;;  %v6622_v2 = vld [vmem:[#allocation2 + $0x458] ss:$24 sps:$4 sm:$0xff]   ;;  %v6623_v48 = vld [vmem:[#allocation2 + $0x42c] ss:$24 sps:$4 sm:$0xff]  }
 0x455   :  { %4099 = vmatprep.subr.bf16.mxu0 %v6605_v56  ;;  %v6624_v56 = vld [vmem:[#allocation2 + $0x8d8] ss:$24 sps:$4 sm:$0xff]  }
 0x457   :  { %3903 = vmatpush2.bf16.msra.mxu1 %v6606_v45  ;;  %4002 = vmatmul.mubr.bf16.gmra.mxu0 %v8031_v5  ;;  %v8069_v45 = vld [vmem:[%s8688_s1 + $0x48] ss:$8 sps:$4 sm:$0xff]  }
 0x458   :  { %3904 = vmatprep.subr.bf16.mxu1 %v6607_v6  ;;  %4100 = vmatpush1.bf16.msra.mxu0 %v6608_v52  ;;  %v6625_v6 = vld [vmem:[#allocation2 + $0x8ac] ss:$24 sps:$4 sm:$0xff]   ;;  %v6626_v52 = vld [vmem:[#allocation2 + $0x428] ss:$24 sps:$4 sm:$0xff]  }
 0x459   :  { %4011 = vmatprep.mubr.bf16.mxu0 %v8033_v12  ;;  %4101 = vmatprep.subr.bf16.mxu0 %v6609_v34  ;;  %v8074_v34 = vld [vmem:[%s8688_s1 + $0x5c] ss:$8 sps:$4 sm:$0xff]  }
 0x45b   :  { %3905 = vmatpush2.bf16.msra.mxu1 %v6610_v35  ;;  %v6627_v35 = vld [vmem:[#allocation2 + $0x3fc] ss:$24 sps:$4 sm:$0xff]  }
 0x45c   :  { %3906 = vmatprep.subr.bf16.mxu1 %v6611_v44  ;;  %4102 = vmatpush1.bf16.msra.mxu0 %v6612_v0  ;;  %v6628_v44 = vld [vmem:[#allocation2 + $0x8a8] ss:$24 sps:$4 sm:$0xff]   ;;  %v6629_v0 = vld [vmem:[#allocation2 + $0x87c] ss:$24 sps:$4 sm:$0xff]  }
 0x45d   :  { %4103 = vmatprep.subr.bf16.mxu0 %v6613_v32  ;;  %v6630_v32 = vld [vmem:[#allocation2 + $0x3f8] ss:$24 sps:$4 sm:$0xff]  }
 0x45f   :  { %3907 = vmatpush2.bf16.msra.mxu1 %v6614_v19  ;;  %4012 = vmatmul.mubr.bf16.gmra.mxu0 %v8037_v3  ;;  %v6631_v19 = vld [vmem:[#allocation2 + $0x3cc] ss:$24 sps:$4 sm:$0xff]  }
 0x460   :  { %3908 = vmatprep.subr.bf16.mxu1 %v6615_v36  ;;  %4104 = vmatpush1.bf16.msra.mxu0 %v6616_v28  ;;  %v5629_v36 = vld [vmem:[%s8688_s1 + $0x68] sm:$0x11]  ;;  %v6632_v28 = vld [vmem:[#allocation2 + $0x878] ss:$24 sps:$4 sm:$0xff]  }
 0x461   :  { %4123 = vmatprep.mubr.bf16.mxu0 %v8042_v22  ;;  %4105 = vmatprep.subr.bf16.mxu0 %v6617_v40  ;;  %v8084_v40 = vld [vmem:[%s8688_s1 + $0x58] ss:$8 sps:$4 sm:$0xff]  }
 0x463   :  { %3909 = vmatpush2.bf16.msra.mxu1 %v6618_v7  ;;  %v6633_v7 = vld [vmem:[#allocation2 + $0x84c] ss:$24 sps:$4 sm:$0xff]  }
 0x464   :  { %4020 = vmatprep.subr.bf16.mxu1 %v6619_v4  ;;  %4106 = vmatpush1.bf16.msra.mxu0 %v6620_v21  ;;  %v6634_v4 = vld [vmem:[#allocation2 + $0x3c8] ss:$24 sps:$4 sm:$0xff]   ;;  %v8086_v21 = vcombine.high %v5629_v36, %v5629_v36 }
 0x465   :  { %4107 = vmatprep.subr.bf16.mxu0 %v6621_v39  ;;  %v6635_v39 = vld [vmem:[#allocation2 + $0x39c] ss:$24 sps:$4 sm:$0xff]  }
 0x466   :  { %3911 = vmatmul.mubr.bf16.vlgmr.msra.gmra.mxu1 %v8057_v18 }
 0x467   :  { %4021 = vmatpush1.bf16.msra.mxu1 %v6622_v2  ;;  %3920 = vmatprep.mubr.bf16.mxu1 %v8062_v27  ;;  %v6636_v2 = vld [vmem:[#allocation2 + $0x848] ss:$24 sps:$4 sm:$0xff]  }
 0x468   :  { %4022 = vmatprep.subr.bf16.mxu1 %v6623_v48  ;;  %4108 = vmatpush2.bf16.msra.mxu0 %v6624_v56  ;;  %v6637_v48 = vld [vmem:[#allocation2 + $0x81c] ss:$24 sps:$4 sm:$0xff]   ;;  %v6638_v56 = vld [vmem:[#allocation2 + $0x398] ss:$24 sps:$4 sm:$0xff]  }
 0x469   :  { %4109 = vmatprep.subr.bf16.mxu0 %v6625_v6  ;;  %v6639_v6 = vld [vmem:[#allocation2 + $0x36c] ss:$24 sps:$4 sm:$0xff]  }
 0x46b   :  { %4023 = vmatpush1.bf16.msra.mxu1 %v6626_v52  ;;  %v6640_v52 = vld [vmem:[#allocation2 + $0x818] ss:$24 sps:$4 sm:$0xff]  }
 0x46c   :  { %4024 = vmatprep.subr.bf16.mxu1 %v6627_v35  ;;  %4110 = vmatpush2.bf16.msra.mxu0 %v6628_v44  ;;  %v8090_v35 = vcombine.low %v5629_v36, %v5629_v36  ;;  %v6641_v44 = vld [vmem:[#allocation2 + $0x7ec] ss:$24 sps:$4 sm:$0xff]   ;;  %v6648_v36 = vld [vmem:[#allocation2 + $0x7b8] ss:$24 sps:$4 sm:$0xff]  }
 0x46d   :  { %4111 = vmatprep.subr.bf16.mxu0 %v6629_v0  ;;  %v6642_v0 = vld [vmem:[#allocation2 + $0x368] ss:$24 sps:$4 sm:$0xff]  }
 0x46e   :  { %3921 = vmatmul.mubr.bf16.gmra.mxu1 %v8069_v45 }
 0x46f   :  { %4025 = vmatpush1.bf16.msra.mxu1 %v6630_v32  ;;  %3930 = vmatprep.mubr.bf16.mxu1 %v8074_v34  ;;  %v6643_v32 = vld [vmem:[#allocation2 + $0x33c] ss:$24 sps:$4 sm:$0xff]  }
 0x470   :  { %4026 = vmatprep.subr.bf16.mxu1 %v6631_v19  ;;  %4112 = vmatpush2.bf16.msra.mxu0 %v6632_v28  ;;  %v6644_v19 = vld [vmem:[#allocation2 + $0x7e8] ss:$24 sps:$4 sm:$0xff]   ;;  %v6645_v28 = vld [vmem:[#allocation2 + $0x7bc] ss:$24 sps:$4 sm:$0xff]  }
 0x471   :  { %4113 = vmatprep.subr.bf16.mxu0 %v6633_v7  ;;  %v6646_v7 = vld [vmem:[#allocation2 + $0x338] ss:$24 sps:$4 sm:$0xff]  }
 0x473   :  { %4027 = vmatpush1.bf16.msra.mxu1 %v6634_v4  ;;  %v6647_v4 = vld [vmem:[#allocation2 + $0x30c] ss:$24 sps:$4 sm:$0xff]  }
 0x474   :  { %4028 = vmatprep.subr.bf16.mxu1 %v6635_v39  ;;  %4114 = vmatpush2.bf16.msra.mxu0 %v6636_v2  ;;  %v6649_v39 = vld [vmem:[#allocation2 + $0x78c] ss:$24 sps:$4 sm:$0xff]   ;;  %v6650_v2 = vld [vmem:[#allocation2 + $0x308] ss:$24 sps:$4 sm:$0xff]  }
 0x475   :  { %4115 = vmatprep.subr.bf16.mxu0 %v6637_v48  ;;  %v6651_v48 = vld [vmem:[#allocation2 + $0x5dc] ss:$24 sps:$4 sm:$0xff]  }
 0x476   :  { %3931 = vmatmul.mubr.bf16.gmra.mxu1 %v8084_v40 }
 0x477   :  { %4029 = vmatpush1.bf16.msra.mxu1 %v6638_v56  ;;  %3940 = vmatprep.mubr.bf16.mxu1 %v8086_v21  ;;  %v6652_v56 = vld [vmem:[#allocation2 + $0x788] ss:$24 sps:$4 sm:$0xff]  }
 0x478   :  { %4030 = vmatprep.subr.bf16.mxu1 %v6639_v6  ;;  %4116 = vmatpush2.bf16.msra.mxu0 %v6640_v52  ;;  %v6653_v52 = vld [vmem:[#allocation2 + $0x464] ss:$24 sps:$4 sm:$0xff]  }
 0x479   :  { %4117 = vmatprep.subr.bf16.mxu0 %v6641_v44 }
 0x47b   :  { %4031 = vmatpush1.bf16.msra.mxu1 %v6642_v0  ;;  %v6654_v0 = vld [vmem:[#allocation2 + $0x5d8] ss:$24 sps:$4 sm:$0xff]  }
 0x47c   :  { %4032 = vmatprep.subr.bf16.mxu1 %v6643_v32  ;;  %4118 = vmatpush2.bf16.msra.mxu0 %v6644_v19  ;;  %v6655_v19 = vld [vmem:[#allocation2 + $0x5ac] ss:$24 sps:$4 sm:$0xff]  }
 0x47d   :  { %4119 = vmatprep.subr.bf16.mxu0 %v6645_v28 }
 0x47e   :  { %3941 = vmatmul.mubr.bf16.gmra.mxu1 %v8090_v35 }
 0x47f   :  { %4033 = vmatpush1.bf16.msra.mxu1 %v6646_v7  ;;  %4052 = vmatprep.mubr.bf16.mxu1 %v7945_v17  ;;  %v6656_v7 = vld [vmem:[#allocation2 + $0x460] ss:$24 sps:$4 sm:$0xff]  }
 0x480   :  { %4034 = vmatprep.subr.bf16.mxu1 %v6647_v4  ;;  %4120 = vmatpush2.bf16.msra.mxu0 %v6648_v36  ;;  %v6657_v36 = vld [vmem:[#allocation2 + $0x434] ss:$24 sps:$4 sm:$0xff]  }
 0x481   :  { %4121 = vmatprep.subr.bf16.mxu0 %v6649_v39 }
 0x483   :  { %4035 = vmatpush1.bf16.msra.mxu1 %v6650_v2  ;;  %v6658_v2 = vld [vmem:[#allocation2 + $0x5a8] ss:$24 sps:$4 sm:$0xff]  }
 0x484   :  { %4036 = vmatprep.subr.bf16.mxu1 %v6651_v48  ;;  %4122 = vmatpush2.bf16.msra.mxu0 %v6652_v56  ;;  %v6659_v56 = vld [vmem:[#allocation2 + $0x57c] ss:$24 sps:$4 sm:$0xff]  }
 0x485   :  { %4233 = vmatprep.subr.bf16.mxu0 %v6653_v52 }
 0x486   :  { %v8094_v6 = vpop.f32.mrf.mxu1  ;;  %v8096_v44 = vpop.f32.mrf.mxu0 }
 0x487   :  { %4037 = vmatpush2.bf16.msra.mxu1 %v6654_v0  ;;  %4124 = vmatmul.mubr.bf16.vlgmr.msra.gmra.mxu0 %v8057_v18  ;;  %v6660_v0 = vld [vmem:[#allocation2 + $0x430] ss:$24 sps:$4 sm:$0xff]  }
 0x488   :  { %v8098_v32 = vpop.f32.mrf.mxu1  ;;  %4038 = vmatprep.subr.bf16.mxu1 %v6655_v19  ;;  %v8101_v28 = vpop.f32.mrf.mxu0  ;;  %4234 = vmatpush1.bf16.msra.mxu0 %v6656_v7  ;;  %v6661_v19 = vld [vmem:[#allocation2 + $0x404] ss:$24 sps:$4 sm:$0xff]   ;;  %v6664_v7 = vld [vmem:[#allocation2 + $0x400] ss:$24 sps:$4 sm:$0xff]  }
 0x489   :  { %4133 = vmatprep.mubr.bf16.mxu0 %v8062_v27  ;;  %4235 = vmatprep.subr.bf16.mxu0 %v6657_v36  ;;  %v6666_v36 = vld [vmem:[#allocation2 + $0x548] ss:$24 sps:$4 sm:$0xff]  }
 0x48a   :  { %v5721_v4 = vpop.f32.mrf.mxu1  ;;  %v5765_v39 = vpop.f32.mrf.mxu0 }
 0x48b   :  { %4039 = vmatpush2.bf16.msra.mxu1 %v6658_v2  ;;  %v6665_v4 = vld [vmem:[#allocation2 + $0x3d4] ss:$24 sps:$4 sm:$0xff]   ;;  %v6668_v2 = vld [vmem:[#allocation2 + $0x3d0] ss:$24 sps:$4 sm:$0xff]  }
 0x48c   :  { %v5722_v48 = vpop.f32.mrf.mxu1  ;;  %4040 = vmatprep.subr.bf16.mxu1 %v6659_v56  ;;  %v5766_v52 = vpop.f32.mrf.mxu0  ;;  %4236 = vmatpush1.bf16.msra.mxu0 %v6660_v0  ;;  %v6667_v39 = vld [vmem:[#allocation2 + $0x51c] ss:$24 sps:$4 sm:$0xff]   ;;  %v6670_v56 = vld [vmem:[#allocation2 + $0x518] ss:$24 sps:$4 sm:$0xff]   ;;  %v6674_v0 = vld [vmem:[#allocation2 + $0x4e8] ss:$24 sps:$4 sm:$0xff]  }
 0x48d   :  { %4237 = vmatprep.subr.bf16.mxu0 %v6661_v19  ;;  %v6669_v48 = vld [vmem:[#allocation2 + $0x3a4] ss:$24 sps:$4 sm:$0xff]   ;;  %v6673_v52 = vld [vmem:[#allocation2 + $0x374] ss:$24 sps:$4 sm:$0xff]  }
 0x48e   :  { %v6675_v19 = vld [vmem:[#allocation2 + $0x4bc] ss:$24 sps:$4 sm:$0xff]  }
 0x48f   :  { %4041 = vmatpush2.bf16.msra.mxu1 %v6662_v41  ;;  %4134 = vmatmul.mubr.bf16.gmra.mxu0 %v8069_v45  ;;  %v6671_v41 = vld [vmem:[#allocation2 + $0x4ec] ss:$24 sps:$4 sm:$0xff]  }
 0x490   :  { %4042 = vmatprep.subr.bf16.mxu1 %v6663_v26  ;;  %4238 = vmatpush1.bf16.msra.mxu0 %v6664_v7  ;;  %v6672_v26 = vld [vmem:[#allocation2 + $0x3a0] ss:$24 sps:$4 sm:$0xff]   ;;  %v6676_v7 = vld [vmem:[#allocation2 + $0x370] ss:$24 sps:$4 sm:$0xff]  }
 0x491   :  { %4143 = vmatprep.mubr.bf16.mxu0 %v8074_v34  ;;  %4239 = vmatprep.subr.bf16.mxu0 %v6665_v4  ;;  %v6677_v4 = vld [vmem:[#allocation2 + $0x344] ss:$24 sps:$4 sm:$0xff]  }
 0x493   :  { %4043 = vmatpush2.bf16.msra.mxu1 %v6666_v36  ;;  %v6678_v36 = vld [vmem:[#allocation2 + $0x4b8] ss:$24 sps:$4 sm:$0xff]  }
 0x494   :  { %4044 = vmatprep.subr.bf16.mxu1 %v6667_v39  ;;  %4240 = vmatpush1.bf16.msra.mxu0 %v6668_v2  ;;  %v6679_v39 = vld [vmem:[#allocation2 + $0x48c] ss:$24 sps:$4 sm:$0xff]   ;;  %v6680_v2 = vld [vmem:[#allocation2 + $0x340] ss:$24 sps:$4 sm:$0xff]  }
 0x495   :  { %4241 = vmatprep.subr.bf16.mxu0 %v6669_v48  ;;  %v6681_v48 = vld [vmem:[#allocation2 + $0x314] ss:$24 sps:$4 sm:$0xff]  }
 0x497   :  { %4045 = vmatpush2.bf16.msra.mxu1 %v6670_v56  ;;  %4144 = vmatmul.mubr.bf16.gmra.mxu0 %v8084_v40  ;;  %v6682_v56 = vld [vmem:[#allocation2 + $0x488] ss:$24 sps:$4 sm:$0xff]  }
 0x498   :  { %4046 = vmatprep.subr.bf16.mxu1 %v6671_v41  ;;  %4242 = vmatpush1.bf16.msra.mxu0 %v6672_v26  ;;  %v6683_v41 = vld [vmem:[#allocation2 + $0x164] ss:$24 sps:$4 sm:$0xff]   ;;  %v5720_v26 = vadd.f32 %v8098_v32, %v8094_v6  ;;  %v6689_v32 = vld [vmem:[#allocation2 + $0x5b4] ss:$24 sps:$4 sm:$0xff]  }
 0x499   :  { %4153 = vmatprep.mubr.bf16.mxu0 %v8086_v21  ;;  %4243 = vmatprep.subr.bf16.mxu0 %v6673_v52  ;;  %v6684_v52 = vld [vmem:[#allocation2 + $0x310] ss:$24 sps:$4 sm:$0xff]  }
 0x49b   :  { %4047 = vmatpush2.bf16.msra.mxu1 %v6674_v0  ;;  %v3192_v0 = vld [vmem:[#allocation13] sm:$0x1] }
 0x49c   :  { %4048 = vmatprep.subr.bf16.mxu1 %v6675_v19  ;;  %4244 = vmatpush1.bf16.msra.mxu0 %v6676_v7  ;;  %v6685_v7 = vld [vmem:[#allocation2 + $0x5e4] ss:$24 sps:$4 sm:$0xff]  }
 0x49d   :  { %4245 = vmatprep.subr.bf16.mxu0 %v6677_v4  ;;  %v6686_v4 = vld [vmem:[#allocation2 + $0x160] ss:$24 sps:$4 sm:$0xff]  }
 0x49f   :  { %4049 = vmatpush2.bf16.msra.mxu1 %v6678_v36  ;;  %4154 = vmatmul.mubr.bf16.gmra.mxu0 %v8090_v35  ;;  %v6687_v36 = vld [vmem:[#allocation2 + $0x134] ss:$24 sps:$4 sm:$0xff]  }
 0x4a0   :  { %4050 = vmatprep.subr.bf16.mxu1 %v6679_v39  ;;  %4246 = vmatpush1.bf16.msra.mxu0 %v6680_v2  ;;  %v3516_v39 = vadd.f32 %v5720_v26, %v3192_v0  ;;  %v6693_v26 = vld [vmem:[#allocation2 + $0x584] ss:$24 sps:$4 sm:$0xff]   ;;  %v6694_v0 = vld [vmem:[#allocation2 + $0x100] ss:$24 sps:$4 sm:$0xff]  }
 0x4a1   :  { %4265 = vmatprep.mubr.bf16.mxu0 %v7945_v17  ;;  %4247 = vmatprep.subr.bf16.mxu0 %v6681_v48  ;;  %v6688_v48 = vld [vmem:[#allocation2 + $0x5e0] ss:$24 sps:$4 sm:$0xff]  }
 0x4a3   :  { %4051 = vmatpush2.bf16.msra.mxu1 %v6682_v56  ;;  %v5764_v56 = vadd.f32 %v8101_v28, %v8096_v44  ;;  %v6696_v44 = vld [vmem:[#allocation2 + $0x580] ss:$24 sps:$4 sm:$0xff]   ;;  %v6697_v28 = vld [vmem:[#allocation2 + $0x554] ss:$24 sps:$4 sm:$0xff]  }
 0x4a4   :  { %4162 = vmatprep.subr.bf16.mxu1 %v6683_v41  ;;  %4248 = vmatpush1.bf16.msra.mxu0 %v6684_v52  ;;  %v6690_v52 = vld [vmem:[#allocation2 + $0x130] ss:$24 sps:$4 sm:$0xff]  }
 0x4a5   :  { %4249 = vmatprep.subr.bf16.mxu0 %v6685_v7 }
 0x4a6   :  { %v5740_v19 = vpop.f32.mrf.mxu1  ;;  %4053 = vmatmul.mubr.bf16.vlgmr.msra.gmra.mxu1 %v7964_v29 }
 0x4a7   :  { %4163 = vmatpush1.bf16.msra.mxu1 %v6686_v4  ;;  %4062 = vmatprep.mubr.bf16.mxu1 %v7969_v47  ;;  %v6691_v4 = vld [vmem:[#allocation2 + $0x104] ss:$24 sps:$4 sm:$0xff]  }
 0x4a8   :  { %v5741_v17 = vpop.f32.mrf.mxu1  ;;  %4164 = vmatprep.subr.bf16.mxu1 %v6687_v36  ;;  %4250 = vmatpush2.bf16.msra.mxu0 %v6688_v48  ;;  %v6699_v36 = vld [vmem:[#allocation2 + $0xa4] ss:$24 sps:$4 sm:$0xff]   ;;  %v6704_v48 = vld [vmem:[#allocation2 + $0x520] ss:$24 sps:$4 sm:$0xff]  }
 0x4a9   :  { %v5742_v2 = vadd.f32 %v5741_v17, %v5740_v19  ;;  %4251 = vmatprep.subr.bf16.mxu0 %v6689_v32  ;;  %v6695_v19 = vld [vmem:[#allocation2 + $0xd4] ss:$24 sps:$4 sm:$0xff]   ;;  %v6698_v17 = vld [vmem:[#allocation2 + $0xd0] ss:$24 sps:$4 sm:$0xff]  }
 0x4aa   :  { %v5743_v6 = vpop.f32.mrf.mxu1  ;;  %v6706_v32 = vld [vmem:[#allocation2 + $0x70] ss:$24 sps:$4 sm:$0xff]  }
 0x4ab   :  { %v3556_v41 = vadd.f32 %v5742_v2, %v3516_v39  ;;  %4165 = vmatpush1.bf16.msra.mxu1 %v6690_v52  ;;  %v6701_v39 = vld [vmem:[#allocation2 + $0x524] ss:$24 sps:$4 sm:$0xff]   ;;  %v6703_v2 = vld [vmem:[#allocation2 + $0x74] ss:$24 sps:$4 sm:$0xff]  }
 0x4ac   :  { %v5744_v7 = vpop.f32.mrf.mxu1  ;;  %4166 = vmatprep.subr.bf16.mxu1 %v6691_v4  ;;  %4252 = vmatpush2.bf16.msra.mxu0 %v6692_v13  ;;  %v6700_v13 = vld [vmem:[#allocation2 + $0x550] ss:$24 sps:$4 sm:$0xff]   ;;  %v6705_v6 = vld [vmem:[#allocation2 + $0x4f4] ss:$24 sps:$4 sm:$0xff]   ;;  %v6709_v52 = vld [vmem:[#allocation2 + $0x4c4] ss:$24 sps:$4 sm:$0xff]  }
 0x4ad   :  { %v3596_v54 = vadd.f32 %v5764_v56, %v3556_v41  ;;  %4253 = vmatprep.subr.bf16.mxu0 %v6693_v26  ;;  %v6707_v56 = vld [vmem:[#allocation2 + $0x44] ss:$24 sps:$4 sm:$0xff]   ;;  %v6708_v41 = vld [vmem:[#allocation2 + $0x4f0] ss:$24 sps:$4 sm:$0xff]   ;;  %v6710_v7 = vld [vmem:[#allocation2 + $0x40] ss:$24 sps:$4 sm:$0xff]  }
 0x4ae   :  { %4063 = vmatmul.mubr.bf16.gmra.mxu1 %v7976_v10  ;;  %v6711_v4 = vld [vmem:[#allocation2 + $0x14] ss:$24 sps:$4 sm:$0xff]   ;;  %v6712_v26 = vld [vmem:[#allocation2 + $0x4c0] ss:$24 sps:$4 sm:$0xff]  }
 0x4af   :  { %3601 = vst [vmem:[#allocation14] sm:$0x1] %v3596_v54  ;;  %4167 = vmatpush1.bf16.msra.mxu1 %v6694_v0  ;;  %4072 = vmatprep.mubr.bf16.mxu1 %v7981_v16  ;;  %v6702_v54 = vld [vmem:[#allocation2 + $0xa0] ss:$24 sps:$4 sm:$0xff]   ;;  %v6713_v0 = vld [vmem:[#allocation2 + $0x494] ss:$24 sps:$4 sm:$0xff]  }
 0x4b0   :  { %4168 = vmatprep.subr.bf16.mxu1 %v6695_v19  ;;  %4254 = vmatpush2.bf16.msra.mxu0 %v6696_v44  ;;  %v6714_v19 = vld [vmem:[#allocation2 + $0x10] ss:$24 sps:$4 sm:$0xff]   ;;  %v6715_v44 = vld [vmem:[#allocation2 + $0x2e4] ss:$24 sps:$4 sm:$0xff]  }
 0x4b1   :  { %4255 = vmatprep.subr.bf16.mxu0 %v6697_v28  ;;  %v6716_v28 = vld [vmem:[#allocation2 + $0x490] ss:$24 sps:$4 sm:$0xff]  }
 0x4b3   :  { %4169 = vmatpush1.bf16.msra.mxu1 %v6698_v17  ;;  %v6717_v17 = vld [vmem:[#allocation2 + $0x2e0] ss:$24 sps:$4 sm:$0xff]  }
 0x4b4   :  { %4170 = vmatprep.subr.bf16.mxu1 %v6699_v36  ;;  %4256 = vmatpush2.bf16.msra.mxu0 %v6700_v13  ;;  %v6718_v36 = vld [vmem:[#allocation2 + $0x2b4] ss:$24 sps:$4 sm:$0xff]  }
 0x4b5   :  { %4257 = vmatprep.subr.bf16.mxu0 %v6701_v39  ;;  %v6719_v39 = vld [vmem:[#allocation2 + $0x2b0] ss:$24 sps:$4 sm:$0xff]  }
 0x4b6   :  { %4073 = vmatmul.mubr.bf16.gmra.mxu1 %v7991_v38 }
 0x4b7   :  { %4171 = vmatpush1.bf16.msra.mxu1 %v6702_v54  ;;  %4082 = vmatprep.mubr.bf16.mxu1 %v7993_v53  ;;  %v6720_v54 = vld [vmem:[#allocation2 + $0x284] ss:$24 sps:$4 sm:$0xff]  }
 0x4b8   :  { %4172 = vmatprep.subr.bf16.mxu1 %v6703_v2  ;;  %4258 = vmatpush2.bf16.msra.mxu0 %v6704_v48 }
 0x4b9   :  { %4259 = vmatprep.subr.bf16.mxu0 %v6705_v6  ;;  %v6721_v6 = vld [vmem:[#allocation2 + $0x280] ss:$24 sps:$4 sm:$0xff]  }
 0x4bb   :  { %4173 = vmatpush1.bf16.msra.mxu1 %v6706_v32  ;;  %v6722_v32 = vld [vmem:[#allocation2 + $0x254] ss:$24 sps:$4 sm:$0xff]  }
 0x4bc   :  { %4174 = vmatprep.subr.bf16.mxu1 %v6707_v56  ;;  %4260 = vmatpush2.bf16.msra.mxu0 %v6708_v41  ;;  %v6724_v41 = vld [vmem:[#allocation2 + $0x224] ss:$24 sps:$4 sm:$0xff]  }
 0x4bd   :  { %4261 = vmatprep.subr.bf16.mxu0 %v6709_v52 }
 0x4be   :  { %4083 = vmatmul.mubr.bf16.gmra.mxu1 %v7997_v9 }
 0x4bf   :  { %4175 = vmatpush1.bf16.msra.mxu1 %v6710_v7  ;;  %4194 = vmatprep.mubr.bf16.mxu1 %v7958_v24 }
 0x4c0   :  { %4176 = vmatprep.subr.bf16.mxu1 %v6711_v4  ;;  %4262 = vmatpush2.bf16.msra.mxu0 %v6712_v26  ;;  %v6725_v4 = vld [vmem:[#allocation2 + $0x220] ss:$24 sps:$4 sm:$0xff]   ;;  %v6726_v26 = vld [vmem:[#allocation2 + $0x1f4] ss:$24 sps:$4 sm:$0xff]  }
 0x4c1   :  { %4263 = vmatprep.subr.bf16.mxu0 %v6713_v0  ;;  %v6727_v0 = vld [vmem:[#allocation2 + $0x1f0] ss:$24 sps:$4 sm:$0xff]  }
 0x4c3   :  { %4177 = vmatpush1.bf16.msra.mxu1 %v6714_v19  ;;  %v6728_v19 = vld [vmem:[#allocation2 + $0x1c4] ss:$24 sps:$4 sm:$0xff]  }
 0x4c4   :  { %4178 = vmatprep.subr.bf16.mxu1 %v6715_v44  ;;  %4264 = vmatpush2.bf16.msra.mxu0 %v6716_v28 }
 0x4c7   :  { %4179 = vmatpush2.bf16.msra.mxu1 %v6717_v17  ;;  %v3841_v13 = vpop.f32.mrf.mxu0  ;;  %4266 = vmatmul.mubr.bf16.vlgmr.msra.gmra.mxu0 %v7964_v29  ;;  %v6729_v17 = vld [vmem:[#allocation2 + $0x1c0] ss:$24 sps:$4 sm:$0xff]  }
 0x4c8   :  { %4180 = vmatprep.subr.bf16.mxu1 %v6718_v36  ;;  %4275 = vmatprep.mubr.bf16.mxu0 %v7969_v47  ;;  %v6723_v47 = vld [vmem:[#allocation2 + $0x250] ss:$24 sps:$4 sm:$0xff]   ;;  %v6730_v36 = vld [vmem:[#allocation2 + $0x194] ss:$24 sps:$4 sm:$0xff]  }
 0x4c9   :  { %v3843_v24 = vpop.f32.mrf.mxu0 }
 0x4cb   :  { %4181 = vmatpush2.bf16.msra.mxu1 %v6719_v39  ;;  %v8124_v2 = vpop.f32.mrf.mxu0 }
 0x4cc   :  { %4182 = vmatprep.subr.bf16.mxu1 %v6720_v54  ;;  %v6732_v54 = vld [vmem:[#allocation2 + $0x764] ss:$24 sps:$4 sm:$0xff]  }
 0x4cd   :  { %v8126_v48 = vpop.f32.mrf.mxu0 }
 0x4cf   :  { %4183 = vmatpush2.bf16.msra.mxu1 %v6721_v6  ;;  %4276 = vmatmul.mubr.bf16.gmra.mxu0 %v7976_v10  ;;  %v8129_v56 = vpop.f32.mrf.mxu0 }
 0x4d0   :  { %4184 = vmatprep.subr.bf16.mxu1 %v6722_v32  ;;  %4285 = vmatprep.mubr.bf16.mxu0 %v7981_v16 }
 0x4d1   :  { %v8132_v29 = vpop.f32.mrf.mxu0 }
 0x4d3   :  { %4185 = vmatpush2.bf16.msra.mxu1 %v6723_v47  ;;  %v8134_v52 = vpop.f32.mrf.mxu0 }
 0x4d4   :  { %4186 = vmatprep.subr.bf16.mxu1 %v6724_v41  ;;  %v8853_v41 = vld [vmem:[#allocation22_spill] sm:$0xff] }
 0x4d5   :  { %v8136_v7 = vpop.f32.mrf.mxu0 }
 0x4d7   :  { %4187 = vmatpush2.bf16.msra.mxu1 %v6725_v4  ;;  %4286 = vmatmul.mubr.bf16.gmra.mxu0 %v7991_v38  ;;  %v8139_v10 = vpop.f32.mrf.mxu0 }
 0x4d8   :  { %4188 = vmatprep.subr.bf16.mxu1 %v6726_v26  ;;  %4295 = vmatprep.mubr.bf16.mxu0 %v7993_v53  ;;  %v6731_v53 = vld [vmem:[#allocation2 + $0x190] ss:$24 sps:$4 sm:$0xff]   ;;  %v6733_v26 = vld [vmem:[#allocation2 + $0x760] ss:$24 sps:$4 sm:$0xff]  }
 0x4d9   :  { %v8142_v16 = vpop.f32.mrf.mxu0 }
 0x4db   :  { %4189 = vmatpush2.bf16.msra.mxu1 %v6727_v0  ;;  %v8144_v44 = vpop.f32.mrf.mxu0  ;;  %v6734_v0 = vld [vmem:[#allocation2 + $0x734] ss:$24 sps:$4 sm:$0xff]  }
 0x4dc   :  { %4190 = vmatprep.subr.bf16.mxu1 %v6728_v19  ;;  %v8854_v19 = vld [vmem:[#allocation23_spill] sm:$0xff] }
 0x4dd   :  { %v8146_v28 = vpop.f32.mrf.mxu0 }
 0x4df   :  { %4191 = vmatpush2.bf16.msra.mxu1 %v6729_v17  ;;  %4296 = vmatmul.mubr.bf16.gmra.mxu0 %v7997_v9  ;;  %v8149_v38 = vpop.f32.mrf.mxu0 }
 0x4e0   :  { %4192 = vmatprep.subr.bf16.mxu1 %v6730_v36 }
 0x4e1   :  { %v8151_v39 = vpop.f32.mrf.mxu0 }
 0x4e3   :  { %4193 = vmatpush2.bf16.msra.mxu1 %v6731_v53  ;;  %v3875_v6 = vpop.f32.mrf.mxu0 }
 0x4e4   :  { %4304 = vmatprep.subr.bf16.mxu1 %v6732_v54 }
 0x4e5   :  { %v3876_v47 = vpop.f32.mrf.mxu0 }
 0x4e6   :  { %v3770_v32 = vpop.f32.mrf.mxu1  ;;  %4195 = vmatmul.mubr.bf16.vlgmr.msra.gmra.mxu1 %v8004_v1  ;;  %v6735_v1 = vld [vmem:[#allocation2 + $0x730] ss:$24 sps:$4 sm:$0xff]  }
 0x4e7   :  { %v3771_v4 = vadd.f32 %v3770_v32, %v8853_v41  ;;  %4305 = vmatpush1.bf16.msra.mxu1 %v6733_v26  ;;  %4204 = vmatprep.mubr.bf16.mxu1 %v8009_v60  ;;  %v6736_v32 = vld [vmem:[#allocation2 + $0x704] ss:$24 sps:$4 sm:$0xff]  }
 0x4e8   :  { %v3772_v9 = vpop.f32.mrf.mxu1  ;;  %4306 = vmatprep.subr.bf16.mxu1 %v6734_v0  ;;  %v6738_v0 = vld [vmem:[#allocation2 + $0x6d4] ss:$24 sps:$4 sm:$0xff]  }
 0x4e9   :  { %v3773_v17 = vadd.f32 %v3772_v9, %v8854_v19  ;;  %v8157_v36 = vadd.f32 %v3841_v13, %v3771_v4  ;;  %v6737_v4 = vld [vmem:[#allocation2 + $0x700] ss:$24 sps:$4 sm:$0xff]  }
 0x4ea   :  { %v3774_v53 = vpop.f32.mrf.mxu1 }
 0x4eb   :  { %v3775_v54 = vadd.f32 %v3774_v53, %v8853_v41  ;;  %v8160_v6 = vadd.f32 %v3843_v24, %v3773_v17  ;;  %4307 = vmatpush1.bf16.msra.mxu1 %v6735_v1 }
 0x4ec   :  { %v3776_v47 = vpop.f32.mrf.mxu1  ;;  %4308 = vmatprep.subr.bf16.mxu1 %v6736_v32 }
 0x4ed   :  { %v3777_v26 = vadd.f32 %v3776_v47, %v8854_v19  ;;  %v8164_v60 = vadd.f32 %v8124_v2, %v3775_v54  ;;  %v6740_v47 = vld [vmem:[#allocation2 + $0x6a4] ss:$24 sps:$4 sm:$0xff]  }
 0x4ee   :  { %4205 = vmatmul.mubr.bf16.gmra.mxu1 %v8016_v25  ;;  %v3780_v9 = vpop.f32.mrf.mxu1  ;;  %v6739_v25 = vld [vmem:[#allocation2 + $0x6d0] ss:$24 sps:$4 sm:$0xff]  }
 0x4ef   :  { %v8168_v13 = vadd.f32 %v8126_v48, %v3777_v26  ;;  %4309 = vmatpush1.bf16.msra.mxu1 %v6737_v4  ;;  %v3781_v24 = vadd.f32 %v3780_v9, %v8853_v41  ;;  %4214 = vmatprep.mubr.bf16.mxu1 %v8021_v58  ;;  %v6741_v9 = vld [vmem:[#allocation2 + $0x6a0] ss:$24 sps:$4 sm:$0xff]  }
 0x4f0   :  { %4310 = vmatprep.subr.bf16.mxu1 %v6738_v0  ;;  %v3782_v17 = vpop.f32.mrf.mxu1 }
 0x4f1   :  { %v3783_v53 = vadd.f32 %v3782_v17, %v8854_v19  ;;  %v8174_v2 = vadd.f32 %v8129_v56, %v3781_v24 }
 0x4f2   :  { %v3784_v54 = vpop.f32.mrf.mxu1 }
 0x4f3   :  { %4311 = vmatpush1.bf16.msra.mxu1 %v6739_v25  ;;  %v3785_v48 = vadd.f32 %v3784_v54, %v8853_v41  ;;  %v8178_v1 = vadd.f32 %v8132_v29, %v3783_v53  ;;  %v6742_v29 = vld [vmem:[#allocation2 + $0x674] ss:$24 sps:$4 sm:$0xff]  }
 0x4f4   :  { %4312 = vmatprep.subr.bf16.mxu1 %v6740_v47  ;;  %v3786_v32 = vpop.f32.mrf.mxu1 }
 0x4f5   :  { %v3787_v58 = vadd.f32 %v3786_v32, %v8854_v19  ;;  %v8182_v26 = vadd.f32 %v8134_v52, %v3785_v48  ;;  %v6745_v32 = vld [vmem:[#allocation2 + $0x640] ss:$24 sps:$4 sm:$0xff]  }
 0x4f6   :  { %4215 = vmatmul.mubr.bf16.gmra.mxu1 %v8031_v5  ;;  %v3790_v56 = vpop.f32.mrf.mxu1  ;;  %v6743_v5 = vld [vmem:[#allocation2 + $0x670] ss:$24 sps:$4 sm:$0xff]  }
 0x4f7   :  { %4313 = vmatpush1.bf16.msra.mxu1 %v6741_v9  ;;  %v3791_v4 = vadd.f32 %v3790_v56, %v8853_v41  ;;  %v8187_v24 = vadd.f32 %v8136_v7, %v3787_v58  ;;  %4224 = vmatprep.mubr.bf16.mxu1 %v8033_v12  ;;  %v6744_v7 = vld [vmem:[#allocation2 + $0x644] ss:$24 sps:$4 sm:$0xff]  }
 0x4f8   :  { %4314 = vmatprep.subr.bf16.mxu1 %v6742_v29  ;;  %v3792_v0 = vpop.f32.mrf.mxu1 }
 0x4f9   :  { %v3793_v17 = vadd.f32 %v3792_v0, %v8854_v19  ;;  %v8192_v52 = vadd.f32 %v8139_v10, %v3791_v4 }
 0x4fa   :  { %v3794_v53 = vpop.f32.mrf.mxu1 }
 0x4fb   :  { %4315 = vmatpush1.bf16.msra.mxu1 %v6743_v5  ;;  %v3795_v54 = vadd.f32 %v3794_v53, %v8853_v41  ;;  %v8196_v25 = vadd.f32 %v8142_v16, %v3793_v17  ;;  %v6746_v16 = vld [vmem:[#allocation2 + $0x614] ss:$24 sps:$4 sm:$0xff]   ;;  %v6749_v17 = vld [vmem:[#allocation2 + $0x8e0] ss:$24 sps:$4 sm:$0xff]  }
 0x4fc   :  { %4316 = vmatprep.subr.bf16.mxu1 %v6744_v7  ;;  %v3796_v48 = vpop.f32.mrf.mxu1 }
 0x4fd   :  { %v3797_v12 = vadd.f32 %v3796_v48, %v8854_v19  ;;  %v8200_v47 = vadd.f32 %v8144_v44, %v3795_v54  ;;  %v6754_v48 = vld [vmem:[#allocation2 + $0x854] ss:$24 sps:$4 sm:$0xff]  }
 0x4fe   :  { %4225 = vmatmul.mubr.bf16.gmra.mxu1 %v8037_v3  ;;  %v3800_v10 = vpop.f32.mrf.mxu1  ;;  %v6747_v3 = vld [vmem:[#allocation2 + $0x610] ss:$24 sps:$4 sm:$0xff]  }
 0x4ff   :  { %4317 = vmatpush1.bf16.msra.mxu1 %v6745_v32  ;;  %v3801_v58 = vadd.f32 %v3800_v10, %v8853_v41  ;;  %v8205_v56 = vadd.f32 %v8146_v28, %v3797_v12  ;;  %4336 = vmatprep.mubr.bf16.mxu1 %v8042_v22  ;;  %v6748_v41 = vld [vmem:[#allocation2 + $0x8e4] ss:$24 sps:$4 sm:$0xff]   ;;  %v6750_v22 = vld [vmem:[#allocation2 + $0x8b4] ss:$24 sps:$4 sm:$0xff]   ;;  %v6755_v32 = vld [vmem:[#allocation2 + $0x850] ss:$24 sps:$4 sm:$0xff]  }
 0x500   :  { %4318 = vmatprep.subr.bf16.mxu1 %v6746_v16  ;;  %v3802_v9 = vpop.f32.mrf.mxu1 }
 0x501   :  { %v3803_v4 = vadd.f32 %v3802_v9, %v8854_v19  ;;  %v8210_v44 = vadd.f32 %v8149_v38, %v3801_v58  ;;  %v6751_v19 = vld [vmem:[#allocation2 + $0x8b0] ss:$24 sps:$4 sm:$0xff]   ;;  %v6752_v38 = vld [vmem:[#allocation2 + $0x884] ss:$24 sps:$4 sm:$0xff]  }
 0x502   :  { %v3804_v29 = vpop.f32.mrf.mxu1  ;;  %v6756_v58 = vld [vmem:[#allocation2 + $0x824] ss:$24 sps:$4 sm:$0xff]  }
 0x503   :  { %4319 = vmatpush1.bf16.msra.mxu1 %v6747_v3  ;;  %v8213_v0 = vadd.f32 %v8151_v39, %v3803_v4  ;;  %v6753_v39 = vld [vmem:[#allocation2 + $0x880] ss:$24 sps:$4 sm:$0xff]   ;;  %v6758_v29 = vld [vmem:[#allocation2 + $0x7f4] ss:$24 sps:$4 sm:$0xff]  }
 0x504   :  { %4320 = vmatprep.subr.bf16.mxu1 %v6748_v41  ;;  %v3805_v28 = vpop.f32.mrf.mxu1  ;;  %v6757_v4 = vld [vmem:[#allocation2 + $0x820] ss:$24 sps:$4 sm:$0xff]  }
 0x505   :  { %v6759_v28 = vld [vmem:[#allocation2 + $0x7f0] ss:$24 sps:$4 sm:$0xff]  }
 0x507   :  { %4321 = vmatpush2.bf16.msra.mxu1 %v6749_v17  ;;  %v8215_v53 = vpop.f32.mrf.mxu0  ;;  %v6760_v17 = vld [vmem:[#allocation2 + $0x7c4] ss:$24 sps:$4 sm:$0xff]  }
 0x508   :  { %4322 = vmatprep.subr.bf16.mxu1 %v6750_v22 }
 0x509   :  { %v8217_v5 = vpop.f32.mrf.mxu0 }
 0x50b   :  { %4323 = vmatpush2.bf16.msra.mxu1 %v6751_v19  ;;  %v8219_v54 = vpop.f32.mrf.mxu0 }
 0x50c   :  { %4324 = vmatprep.subr.bf16.mxu1 %v6752_v38  ;;  %v6761_v38 = vld [vmem:[#allocation2 + $0x7c0] ss:$24 sps:$4 sm:$0xff]  }
 0x50d   :  { %v8221_v7 = vpop.f32.mrf.mxu0 }
 0x50f   :  { %4325 = vmatpush2.bf16.msra.mxu1 %v6753_v39  ;;  %v8223_v12 = vpop.f32.mrf.mxu0  ;;  %v6762_v39 = vld [vmem:[#allocation2 + $0x794] ss:$24 sps:$4 sm:$0xff]  }
 0x510   :  { %4326 = vmatprep.subr.bf16.mxu1 %v6754_v48 }
 0x511   :  { %v8225_v10 = vpop.f32.mrf.mxu0 }
 0x513   :  { %4327 = vmatpush2.bf16.msra.mxu1 %v6755_v32  ;;  %v8227_v16 = vpop.f32.mrf.mxu0 }
 0x514   :  { %4328 = vmatprep.subr.bf16.mxu1 %v6756_v58  ;;  %v6763_v58 = vld [vmem:[#allocation2 + $0x790] ss:$24 sps:$4 sm:$0xff]  }
 0x515   :  { %v8229_v9 = vpop.f32.mrf.mxu0 }
 0x517   :  { %4329 = vmatpush2.bf16.msra.mxu1 %v6757_v4  ;;  %v8231_v3 = vpop.f32.mrf.mxu0 }
 0x518   :  { %4330 = vmatprep.subr.bf16.mxu1 %v6758_v29 }
 0x519   :  { %v8233_v41 = vpop.f32.mrf.mxu0 }
 0x51b   :  { %4331 = vmatpush2.bf16.msra.mxu1 %v6759_v28  ;;  %v8235_v22 = vpop.f32.mrf.mxu0 }
 0x51c   :  { %4332 = vmatprep.subr.bf16.mxu1 %v6760_v17 }
 0x51d   :  { %v8237_v19 = vpop.f32.mrf.mxu0 }
 0x51f   :  { %4333 = vmatpush2.bf16.msra.mxu1 %v6761_v38  ;;  %v8239_v48 = vpop.f32.mrf.mxu0 }
 0x520   :  { %4334 = vmatprep.subr.bf16.mxu1 %v6762_v39 }
 0x521   :  { %v8241_v32 = vpop.f32.mrf.mxu0 }
 0x523   :  { %4335 = vmatpush2.bf16.msra.mxu1 %v6763_v58  ;;  %v4017_v4 = vpop.f32.mrf.mxu0 }
 0x525   :  { %v4018_v28 = vpop.f32.mrf.mxu0 }
 0x526   :  { %v3912_v29 = vpop.f32.mrf.mxu1  ;;  %4337 = vmatmul.mubr.bf16.vlgmr.msra.gmra.mxu1 %v8057_v18 }
 0x527   :  { %v3913_v17 = vadd.f32 %v3912_v29, %v8157_v36  ;;  %4346 = vmatprep.mubr.bf16.mxu1 %v8062_v27  ;;  %v8855_v29 = vld [vmem:[#allocation24_spill] sm:$0xff] }
 0x528   :  { %v3914_v20 = vpop.f32.mrf.mxu1  ;;  %v8856_v28 = vunpack.c.l.bf16 %v8855_v29 }
 0x529   :  { %v3915_v38 = vadd.f32 %v3914_v20, %v8160_v6  ;;  %v4432_v39 = vmul.f32 %v3913_v17, %v3913_v17 }
 0x52a   :  { %v3916_v37 = vpop.f32.mrf.mxu1 }
 0x52b   :  { %v8247_v57 = vadd.f32 %v3915_v38, %v3913_v17  ;;  %v4433_v46 = vmul.f32 %v3915_v38, %v3915_v38  ;;  %v8250_v59 = vadd.f32 %v3916_v37, %v8164_v60 }
 0x52c   :  { %v3918_v58 = vpop.f32.mrf.mxu1 }
 0x52d   :  { %v8252_v4 = vadd.f32 %v4433_v46, %v4432_v39  ;;  %v8255_v18 = vadd.f32 %v3918_v58, %v8168_v13  ;;  %v8859_v58 = vld [vmem:[#allocation26_spill] sm:$0xff] }
 0x52e   :  { %v3922_v36 = vpop.f32.mrf.mxu1  ;;  %4347 = vmatmul.mubr.bf16.gmra.mxu1 %v8069_v45  ;;  %v4543_v45 = vmul.f32 %v8250_v59, %v8856_v28  ;;  %v8865_v55 = vunpack.c.h.bf16 %v8859_v58 }
 0x52f   :  { %v8259_v27 = vadd.f32 %v3922_v36, %v8174_v2  ;;  %4356 = vmatprep.mubr.bf16.mxu1 %v8074_v34  ;;  %v8860_v36 = vunpack.c.l.bf16 %v8859_v58  ;;  %v8869_v58 = vld [vmem:[#allocation29_spill] sm:$0xff] }
 0x530   :  { %v3924_v20 = vpop.f32.mrf.mxu1 }
 0x531   :  { %v8263_v6 = vadd.f32 %v3924_v20, %v8178_v1  ;;  %v8857_v1 = vld [vmem:[#allocation25_spill] sm:$0xff] }
 0x532   :  { %v3926_v37 = vpop.f32.mrf.mxu1  ;;  %v8858_v39 = vunpack.c.l.bf16 %v8857_v1 }
 0x533   :  { %v8266_v60 = vadd.f32 %v3926_v37, %v8182_v26  ;;  %v8861_v37 = vunpack.c.h.bf16 %v8855_v29 }
 0x534   :  { %v3928_v46 = vpop.f32.mrf.mxu1  ;;  %v4537_v26 = vmul.f32 %v3913_v17, %v8858_v39  ;;  %v8864_v17 = vunpack.c.h.bf16 %v8857_v1 }
 0x535   :  { %v8269_v13 = vadd.f32 %v3928_v46, %v8187_v24  ;;  %v4549_v24 = vmul.f32 %v8259_v27, %v8860_v36  ;;  %v4544_v46 = vmul.f32 %v8255_v18, %v8861_v37  ;;  %v4550_v36 = vmul.f32 %v8263_v6, %v8865_v55 }
 0x536   :  { %v3932_v2 = vpop.f32.mrf.mxu1  ;;  %4357 = vmatmul.mubr.bf16.gmra.mxu1 %v8084_v40  ;;  %v4579_v40 = vadd.f32 %v4543_v45, %v4537_v26  ;;  %v4538_v39 = vmul.f32 %v3915_v38, %v8864_v17  ;;  %v8870_v55 = vunpack.c.l.bf16 %v8869_v58 }
 0x537   :  { %v8276_v34 = vadd.f32 %v3932_v2, %v8192_v52  ;;  %4366 = vmatprep.mubr.bf16.mxu1 %v8086_v21  ;;  %v8862_v52 = vld [vmem:[#allocation27_spill] sm:$0xff] }
 0x538   :  { %v3934_v20 = vpop.f32.mrf.mxu1  ;;  %v8863_v2 = vunpack.c.l.bf16 %v8862_v52  ;;  %v4580_v37 = vadd.f32 %v4579_v40, %v4549_v24  ;;  %v8871_v40 = vunpack.c.h.bf16 %v8866_v11 }
 0x539   :  { %v8288_v28 = vadd.f32 %v3934_v20, %v8196_v25  ;;  %v8867_v25 = vunpack.c.l.bf16 %v8866_v11  ;;  %v4592_v20 = vadd.f32 %v4544_v46, %v4538_v39 }
 0x53a   :  { %v4555_v21 = vmul.f32 %v8266_v60, %v8863_v2  ;;  %v3936_v49 = vpop.f32.mrf.mxu1  ;;  %v8868_v2 = vunpack.c.h.bf16 %v8862_v52 }
 0x53b   :  { %v8299_v29 = vadd.f32 %v3936_v49, %v8200_v47  ;;  %v4561_v45 = vmul.f32 %v8276_v34, %v8867_v25  ;;  %v4593_v24 = vadd.f32 %v4592_v20, %v4550_v36  ;;  %v4562_v46 = vmul.f32 %v8288_v28, %v8871_v40  ;;  %v8874_v25 = vld [vmem:[#allocation30_spill] sm:$0xff] }
 0x53c   :  { %v3938_v26 = vpop.f32.mrf.mxu1  ;;  %v4556_v42 = vmul.f32 %v8269_v13, %v8868_v2  ;;  %v4581_v1 = vadd.f32 %v4580_v37, %v4555_v21  ;;  %v8873_v21 = vunpack.c.h.bf16 %v8869_v58 }
 0x53d   :  { %v8308_v38 = vadd.f32 %v3938_v26, %v8205_v56  ;;  %v4567_v49 = vmul.f32 %v8299_v29, %v8870_v55  ;;  %v8875_v26 = vunpack.c.l.bf16 %v8874_v25 }
 0x53e   :  { %v3942_v47 = vpop.f32.mrf.mxu1  ;;  %4367 = vmatmul.mubr.bf16.gmra.mxu1 %v8090_v35  ;;  %v4582_v17 = vadd.f32 %v4581_v1, %v4561_v45  ;;  %v4594_v56 = vadd.f32 %v4593_v24, %v4556_v42  ;;  %v8878_v42 = vunpack.c.h.bf16 %v8874_v25 }
 0x53f   :  { %v8318_v52 = vadd.f32 %v3942_v47, %v8210_v44  ;;  %v4568_v37 = vmul.f32 %v8308_v38, %v8873_v21 }
 0x540   :  { %v3944_v39 = vpop.f32.mrf.mxu1  ;;  %v4583_v35 = vadd.f32 %v4582_v17, %v4567_v49  ;;  %v4595_v20 = vadd.f32 %v4594_v56, %v4562_v46 }
 0x541   :  { %8872 = vst [vmem:[#allocation22_spill] sm:$0xff] %v8318_v52  ;;  %v4573_v2 = vmul.f32 %v8318_v52, %v8875_v26  ;;  %v8327_v36 = vadd.f32 %v3944_v39, %v8213_v0 }
 0x542   :  { %v3946_v11 = vpop.f32.mrf.mxu1  ;;  %v4596_v58 = vadd.f32 %v4595_v20, %v4568_v37  ;;  %v8880_v20 = vld [vmem:[#allocation33_spill] sm:$0xff] }
 0x543   :  { %8876 = vst [vmem:[#allocation23_spill] sm:$0xff] %v8327_v36  ;;  %v4584_v44 = vsel %vm2710_vm0, %v4573_v2, 0.0  ;;  %v4574_v45 = vmul.f32 %v8327_v36, %v8878_v42  ;;  %v3988_v50 = vadd.f32 %v8219_v54, %v8880_v20 }
 0x544   :  { %v8330_v55 = vadd.f32 %v4584_v44, %v4583_v35  ;;  %v3947_v1 = vpop.f32.mrf.mxu1  ;;  %v3984_v44 = vadd.f32 %v8215_v53, %v8880_v20  ;;  %v3994_v53 = vadd.f32 %v8223_v12, %v8880_v20  ;;  %v3998_v12 = vadd.f32 %v8227_v16, %v8880_v20 }
 0x545   :  { %v4597_v47 = vsel %vm2710_vm0, %v4574_v45, 0.0  ;;  %v8881_v45 = vld [vmem:[#allocation34_spill] sm:$0xff] }
 0x546   :  { %8877 = vst [vmem:[#allocation24_spill] sm:$0xff] %v8330_v55  ;;  %v8336_v24 = vadd.f32 %v4597_v47, %v4596_v58  ;;  %v3986_v1 = vadd.f32 %v8217_v5, %v8881_v45  ;;  %v3990_v62 = vadd.f32 %v8221_v7, %v8881_v45 }
 0x547   :  { %v4125_v49 = vpop.f32.mrf.mxu0 }
 0x548   :  { %8879 = vst [vmem:[#allocation25_spill] sm:$0xff] %v8336_v24 }
 0x549   :  { %v4127_v40 = vpop.f32.mrf.mxu0 }
 0x54b   :  { %v4129_v0 = vpop.f32.mrf.mxu0 }
 0x54d   :  { %v4131_v17 = vpop.f32.mrf.mxu0 }
 0x54f   :  { %v4135_v39 = vpop.f32.mrf.mxu0 }
 0x551   :  { %v4137_v46 = vpop.f32.mrf.mxu0 }
 0x553   :  { %v4139_v56 = vpop.f32.mrf.mxu0 }
 0x555   :  { %v4141_v21 = vpop.f32.mrf.mxu0 }
 0x557   :  { %v4145_v26 = vpop.f32.mrf.mxu0 }
 0x559   :  { %v4147_v2 = vpop.f32.mrf.mxu0 }
 0x55b   :  { %v8338_v35 = vpop.f32.mrf.mxu0 }
 0x55d   :  { %v8340_v25 = vpop.f32.mrf.mxu0 }
 0x55f   :  { %v8342_v11 = vpop.f32.mrf.mxu0 }
 0x561   :  { %v8344_v37 = vpop.f32.mrf.mxu0 }
 0x563   :  { %v4159_v42 = vpop.f32.mrf.mxu0 }
 0x565   :  { %v4160_v47 = vpop.f32.mrf.mxu0 }
 0x566   :  { %v4054_v58 = vpop.f32.mrf.mxu1 }
 0x567   :  { %v4055_v14 = vadd.f32 %v4054_v58, %v3984_v44  ;;  %v3996_v44 = vadd.f32 %v8225_v10, %v8881_v45  ;;  %v4000_v10 = vadd.f32 %v8229_v9, %v8881_v45  ;;  %v4008_v9 = vadd.f32 %v8235_v22, %v8880_v20 }
 0x568   :  { %v4056_v8 = vpop.f32.mrf.mxu1 }
 0x569   :  { %v4057_v63 = vadd.f32 %v4056_v8, %v3986_v1  ;;  %v4126_v23 = vadd.f32 %v4125_v49, %v4055_v14 }
 0x56a   :  { %v4058_v24 = vpop.f32.mrf.mxu1 }
 0x56b   :  { %v4376_v42 = vadd.f32 %v8247_v57, %v4126_v23  ;;  %v4434_v55 = vmul.f32 %v4126_v23, %v4126_v23  ;;  %v4059_v5 = vadd.f32 %v4058_v24, %v3988_v50  ;;  %v4128_v36 = vadd.f32 %v4127_v40, %v4057_v63 }
 0x56c   :  { %v4060_v47 = vpop.f32.mrf.mxu1  ;;  %v4004_v24 = vadd.f32 %v8231_v3, %v8880_v20 }
 0x56d   :  { %v4475_v54 = vadd.f32 %v8252_v4, %v4434_v55  ;;  %v4061_v8 = vadd.f32 %v4060_v47, %v3990_v62  ;;  %v8360_v14 = vadd.f32 %v4129_v0, %v4059_v5  ;;  %v8362_v49 = vadd.f32 %v4376_v42, %v4128_v36  ;;  %v8882_v47 = vld [vmem:[#allocation35_spill] sm:$0xff] }
 0x56e   :  { %v4435_v7 = vmul.f32 %v4128_v36, %v4128_v36  ;;  %v4064_v1 = vpop.f32.mrf.mxu1 }
 0x56f   :  { %v4065_v57 = vadd.f32 %v4064_v1, %v3994_v53  ;;  %v8366_v58 = vadd.f32 %v4131_v17, %v4061_v8  ;;  %v4006_v17 = vadd.f32 %v8233_v41, %v8881_v45  ;;  %v4010_v8 = vadd.f32 %v8237_v19, %v8881_v45 }
 0x570   :  { %v8368_v63 = vadd.f32 %v4475_v54, %v4435_v7  ;;  %v4066_v50 = vpop.f32.mrf.mxu1 }
 0x571   :  { %v4067_v4 = vadd.f32 %v4066_v50, %v3996_v44  ;;  %v8372_v62 = vadd.f32 %v4135_v39, %v4065_v57  ;;  %v8883_v44 = vunpack.c.l.bf16 %v8882_v47  ;;  %v8886_v57 = vld [vmem:[#allocation37_spill] sm:$0xff] }
 0x572   :  { %v4068_v55 = vpop.f32.mrf.mxu1  ;;  %v8887_v50 = vunpack.c.l.bf16 %v8886_v57 }
 0x573   :  { %v4069_v40 = vadd.f32 %v4068_v55, %v3998_v12  ;;  %v8376_v0 = vadd.f32 %v4137_v46, %v4067_v4  ;;  %v4545_v54 = vmul.f32 %v8360_v14, %v8883_v44  ;;  %v4014_v4 = vadd.f32 %v8239_v48, %v8880_v20 }
 0x574   :  { %v4070_v16 = vpop.f32.mrf.mxu1  ;;  %v4551_v22 = vmul.f32 %v8372_v62, %v8887_v50  ;;  %v8892_v48 = vunpack.c.h.bf16 %v8886_v57 }
 0x575   :  { %v4071_v53 = vadd.f32 %v4070_v16, %v4000_v10  ;;  %v8380_v42 = vadd.f32 %v4139_v56, %v4069_v40  ;;  %v8884_v56 = vld [vmem:[#allocation36_spill] sm:$0xff]  ;;  %v8889_v40 = vld [vmem:[#allocation38_spill] sm:$0xff] }
 0x576   :  { %v4074_v5 = vpop.f32.mrf.mxu1  ;;  %v8885_v1 = vunpack.c.l.bf16 %v8884_v56  ;;  %v8890_v16 = vunpack.c.l.bf16 %v8889_v40  ;;  %v4552_v20 = vmul.f32 %v8376_v0, %v8892_v48 }
 0x577   :  { %v4075_v39 = vadd.f32 %v4074_v5, %v4004_v24  ;;  %v8387_v3 = vadd.f32 %v4141_v21, %v4071_v53  ;;  %v8888_v21 = vunpack.c.h.bf16 %v8882_v47  ;;  %v4016_v53 = vadd.f32 %v8241_v32, %v8881_v45 }
 0x578   :  { %v4076_v46 = vpop.f32.mrf.mxu1  ;;  %v4539_v12 = vmul.f32 %v4126_v23, %v8885_v1  ;;  %v4557_v23 = vmul.f32 %v8380_v42, %v8890_v16  ;;  %v8891_v5 = vunpack.c.h.bf16 %v8884_v56  ;;  %v8895_v32 = vunpack.c.h.bf16 %v8889_v40 }
 0x579   :  { %v4077_v7 = vadd.f32 %v4076_v46, %v4006_v17  ;;  %v8391_v41 = vadd.f32 %v4145_v26, %v4075_v39  ;;  %v4546_v55 = vmul.f32 %v8366_v58, %v8888_v21 }
 0x57a   :  { %v4078_v10 = vpop.f32.mrf.mxu1  ;;  %v4605_v26 = vadd.f32 %v4545_v54, %v4539_v12  ;;  %v4540_v39 = vmul.f32 %v4128_v36, %v8891_v5  ;;  %v4558_v45 = vmul.f32 %v8387_v3, %v8895_v32 }
 0x57b   :  { %v4079_v24 = vadd.f32 %v4078_v10, %v4008_v9  ;;  %v8403_v19 = vadd.f32 %v4147_v2, %v4077_v7  ;;  %v8893_v2 = vld [vmem:[#allocation39_spill] sm:$0xff] }
 0x57c   :  { %v4080_v17 = vpop.f32.mrf.mxu1  ;;  %v4606_v9 = vadd.f32 %v4605_v26, %v4551_v22  ;;  %v8894_v44 = vunpack.c.l.bf16 %v8893_v2  ;;  %v4618_v1 = vadd.f32 %v4546_v55, %v4540_v39 }
 0x57d   :  { %v4081_v47 = vadd.f32 %v4080_v17, %v4010_v8  ;;  %v8419_v46 = vadd.f32 %v8338_v35, %v4079_v24  ;;  %v8896_v8 = vld [vmem:[#allocation40_spill] sm:$0xff]  ;;  %v8898_v35 = vunpack.c.h.bf16 %v8893_v2 }
 0x57e   :  { %v4563_v54 = vmul.f32 %v8391_v41, %v8894_v44  ;;  %v4084_v7 = vpop.f32.mrf.mxu1  ;;  %v4607_v12 = vadd.f32 %v4606_v9, %v4557_v23  ;;  %v8897_v57 = vunpack.c.l.bf16 %v8896_v8  ;;  %v4619_v10 = vadd.f32 %v4618_v1, %v4552_v20  ;;  %v8901_v23 = vld [vmem:[#allocation41_spill] sm:$0xff] }
 0x57f   :  { %v4085_v36 = vadd.f32 %v4084_v7, %v4014_v4  ;;  %v8425_v56 = vadd.f32 %v8340_v25, %v4081_v47  ;;  %v4564_v21 = vmul.f32 %v8403_v19, %v8898_v35  ;;  %v8900_v25 = vunpack.c.h.bf16 %v8896_v8 }
 0x580   :  { %v4569_v50 = vmul.f32 %v8419_v46, %v8897_v57  ;;  %v4086_v22 = vpop.f32.mrf.mxu1  ;;  %v4608_v26 = vadd.f32 %v4607_v12, %v4563_v54  ;;  %v4620_v40 = vadd.f32 %v4619_v10, %v4558_v45  ;;  %v8902_v17 = vunpack.c.l.bf16 %v8901_v23 }
 0x581   :  { %v4087_v55 = vadd.f32 %v4086_v22, %v4016_v53  ;;  %v8434_v24 = vadd.f32 %v8342_v11, %v4085_v36  ;;  %v4570_v16 = vmul.f32 %v8425_v56, %v8900_v25  ;;  %v8905_v9 = vunpack.c.h.bf16 %v8901_v23  ;;  %v8907_v23 = vld [vmem:[#allocation44_spill] sm:$0xff] }
 0x582   :  { %v4088_v4 = vpop.f32.mrf.mxu1  ;;  %v4609_v39 = vadd.f32 %v4608_v26, %v4569_v50  ;;  %v4621_v53 = vadd.f32 %v4620_v40, %v4564_v21 }
 0x583   :  { %8899 = vst [vmem:[#allocation26_spill] sm:$0xff] %v8434_v24  ;;  %v4575_v5 = vmul.f32 %v8434_v24, %v8902_v17  ;;  %v8443_v48 = vadd.f32 %v8344_v37, %v4087_v55 }
 0x584   :  { %v4089_v20 = vpop.f32.mrf.mxu1  ;;  %v4622_v44 = vadd.f32 %v4621_v53, %v4570_v16 }
 0x585   :  { %8903 = vst [vmem:[#allocation27_spill] sm:$0xff] %v8443_v48  ;;  %v4610_v11 = vsel %vm2710_vm0, %v4575_v5, 0.0  ;;  %v4576_v2 = vmul.f32 %v8443_v48, %v8905_v9 }
 0x586   :  { %v8446_v47 = vadd.f32 %v4610_v11, %v4609_v39  ;;  %v8908_v39 = vld [vmem:[#allocation45_spill] sm:$0xff] }
 0x587   :  { %v4623_v54 = vsel %vm2710_vm0, %v4576_v2, 0.0  ;;  %v4267_v7 = vpop.f32.mrf.mxu0 }
 0x588   :  { %8904 = vst [vmem:[#allocation28_spill] sm:$0xff] %v8446_v47  ;;  %v8452_v1 = vadd.f32 %v4623_v54, %v4622_v44 }
 0x589   :  { %v4269_v32 = vpop.f32.mrf.mxu0 }
 0x58a   :  { %8906 = vst [vmem:[#allocation29_spill] sm:$0xff] %v8452_v1 }
 0x58b   :  { %v4271_v45 = vpop.f32.mrf.mxu0 }
 0x58d   :  { %v4273_v37 = vpop.f32.mrf.mxu0 }
 0x58f   :  { %v4277_v36 = vpop.f32.mrf.mxu0 }
 0x591   :  { %v4279_v12 = vpop.f32.mrf.mxu0 }
 0x593   :  { %v4281_v8 = vpop.f32.mrf.mxu0 }
 0x595   :  { %v4283_v57 = vpop.f32.mrf.mxu0 }
 0x597   :  { %v4287_v50 = vpop.f32.mrf.mxu0 }
 0x599   :  { %v4289_v22 = vpop.f32.mrf.mxu0 }
 0x59b   :  { %v4291_v10 = vpop.f32.mrf.mxu0 }
 0x59d   :  { %v4293_v35 = vpop.f32.mrf.mxu0 }
 0x59f   :  { %v4297_v21 = vpop.f32.mrf.mxu0 }
 0x5a1   :  { %v4299_v55 = vpop.f32.mrf.mxu0 }
 0x5a3   :  { %v4301_v26 = vpop.f32.mrf.mxu0 }
 0x5a5   :  { %v4302_v40 = vpop.f32.mrf.mxu0 }
 0x5a6   :  { %v4196_v4 = vpop.f32.mrf.mxu1 }
 0x5a8   :  { %v4198_v25 = vpop.f32.mrf.mxu1 }
 0x5aa   :  { %v4200_v16 = vpop.f32.mrf.mxu1 }
 0x5ab   :  { %v4201_v17 = vadd.f32 %v4200_v16, %v8907_v23 }
 0x5ac   :  { %v4202_v5 = vpop.f32.mrf.mxu1 }
 0x5ad   :  { %v4203_v20 = vadd.f32 %v4202_v5, %v8908_v39  ;;  %v4272_v53 = vadd.f32 %v4271_v45, %v4201_v17 }
 0x5ae   :  { %v4206_v11 = vpop.f32.mrf.mxu1 }
 0x5af   :  { %v4274_v9 = vadd.f32 %v4273_v37, %v4203_v20  ;;  %v4207_v2 = vadd.f32 %v4206_v11, %v8907_v23 }
 0x5b0   :  { %v4208_v44 = vpop.f32.mrf.mxu1 }
 0x5b1   :  { %v4209_v54 = vadd.f32 %v4208_v44, %v8908_v39  ;;  %v4278_v1 = vadd.f32 %v4277_v36, %v4207_v2 }
 0x5b2   :  { %v4210_v47 = vpop.f32.mrf.mxu1 }
 0x5b3   :  { %v4211_v26 = vadd.f32 %v4210_v47, %v8907_v23  ;;  %v4280_v40 = vadd.f32 %v4279_v12, %v4209_v54 }
 0x5b4   :  { %v4212_v48 = vpop.f32.mrf.mxu1 }
 0x5b5   :  { %v4213_v24 = vadd.f32 %v4212_v48, %v8908_v39  ;;  %v8460_v16 = vadd.f32 %v4281_v8, %v4211_v26 }
 0x5b6   :  { %v4216_v52 = vpop.f32.mrf.mxu1 }
 0x5b7   :  { %v4217_v45 = vadd.f32 %v4216_v52, %v8907_v23  ;;  %v8463_v17 = vadd.f32 %v4283_v57, %v4213_v24 }
 0x5b8   :  { %v4218_v37 = vpop.f32.mrf.mxu1 }
 0x5b9   :  { %v4219_v5 = vadd.f32 %v4218_v37, %v8908_v39  ;;  %v8466_v20 = vadd.f32 %v4287_v50, %v4217_v45  ;;  %v4197_v45 = vadd.f32 %v4196_v4, %v8907_v23  ;;  %v4199_v37 = vadd.f32 %v4198_v25, %v8908_v39 }
 0x5ba   :  { %v4220_v36 = vpop.f32.mrf.mxu1  ;;  %v4438_v4 = vmul.f32 %v8250_v59, %v8250_v59 }
 0x5bb   :  { %v4221_v11 = vadd.f32 %v4220_v36, %v8907_v23  ;;  %v8469_v47 = vadd.f32 %v4289_v22, %v4219_v5  ;;  %v4270_v36 = vadd.f32 %v4269_v32, %v4199_v37 }
 0x5bc   :  { %v4222_v12 = vpop.f32.mrf.mxu1 }
 0x5bd   :  { %v4223_v48 = vadd.f32 %v4222_v12, %v8908_v39  ;;  %v8472_v8 = vadd.f32 %v4291_v10, %v4221_v11  ;;  %v4268_v10 = vadd.f32 %v4267_v7, %v4197_v45 }
 0x5be   :  { %v4226_v2 = vpop.f32.mrf.mxu1 }
 0x5bf   :  { %v4227_v52 = vadd.f32 %v4226_v2, %v8907_v23  ;;  %v8475_v24 = vadd.f32 %v4293_v35, %v4223_v48  ;;  %v4439_v23 = vmul.f32 %v8255_v18, %v8255_v18 }
 0x5c0   :  { %v4228_v57 = vpop.f32.mrf.mxu1 }
 0x5c1   :  { %v4229_v44 = vadd.f32 %v4228_v57, %v8908_v39  ;;  %v8478_v50 = vadd.f32 %v4297_v21, %v4227_v52 }
 0x5c2   :  { %v4230_v54 = vpop.f32.mrf.mxu1 }
 0x5c3   :  { %v8480_v26 = vadd.f32 %v4299_v55, %v4229_v44 }
 0x5c4   :  { %v4231_v22 = vpop.f32.mrf.mxu1 }
 0x5c5   :  { %v8910_v22 = vunpack.c.l.bf16 %v7670_v30 }
 0x5e6   :  { %v4338_v5 = vpop.f32.mrf.mxu1 }
 0x5e7   :  { %v4339_v11 = vadd.f32 %v4338_v5, %v4268_v10  ;;  %v8911_v10 = vunpack.c.h.bf16 %v7668_v43 }
 0x5e8   :  { %v4340_v12 = vpop.f32.mrf.mxu1 }
 0x5e9   :  { %v4378_v35 = vadd.f32 %v8362_v49, %v4339_v11  ;;  %v4436_v48 = vmul.f32 %v4339_v11, %v4339_v11  ;;  %v4341_v2 = vadd.f32 %v4340_v12, %v4270_v36  ;;  %v8909_v49 = vunpack.c.l.bf16 %v7668_v43 }
 0x5ea   :  { %v4342_v57 = vpop.f32.mrf.mxu1  ;;  %v4441_v43 = vmul.f32 %v8366_v58, %v8366_v58 }
 0x5eb   :  { %v4477_v21 = vadd.f32 %v8368_v63, %v4436_v48  ;;  %v4379_v52 = vadd.f32 %v4378_v35, %v4341_v2  ;;  %v4437_v55 = vmul.f32 %v4341_v2, %v4341_v2  ;;  %v4343_v44 = vadd.f32 %v4342_v57, %v4272_v53 }
 0x5ec   :  { %v4344_v54 = vpop.f32.mrf.mxu1  ;;  %v4541_v39 = vmul.f32 %v4339_v11, %v8909_v49  ;;  %v4542_v5 = vmul.f32 %v4341_v2, %v8911_v10  ;;  %v8916_v10 = vunpack.c.h.bf16 %v7698_v31 }
 0x5ed   :  { %v4380_v7 = vadd.f32 %v4379_v52, %v8250_v59  ;;  %v4478_v25 = vadd.f32 %v4477_v21, %v4437_v55  ;;  %v4345_v32 = vadd.f32 %v4344_v54, %v4274_v9  ;;  %v4547_v63 = vmul.f32 %v4343_v44, %v8910_v22 }
 0x5ee   :  { %v4348_v45 = vpop.f32.mrf.mxu1  ;;  %v8912_v59 = vunpack.c.h.bf16 %v7670_v30  ;;  %v4440_v9 = vmul.f32 %v8360_v14, %v8360_v14 }
 0x5ef   :  { %v4381_v53 = vadd.f32 %v4380_v7, %v8255_v18  ;;  %v4479_v37 = vadd.f32 %v4478_v25, %v4438_v4  ;;  %v4631_v12 = vadd.f32 %v4547_v63, %v4541_v39  ;;  %v4349_v35 = vadd.f32 %v4348_v45, %v4278_v1 }
 0x5f0   :  { %v4548_v36 = vmul.f32 %v4345_v32, %v8912_v59  ;;  %v4350_v48 = vpop.f32.mrf.mxu1  ;;  %v8913_v18 = vunpack.c.l.bf16 %v7678_v61  ;;  %v8914_v4 = vunpack.c.h.bf16 %v7678_v61  ;;  %v4442_v1 = vmul.f32 %v4343_v44, %v4343_v44 }
 0x5f1   :  { %v4480_v11 = vadd.f32 %v4479_v37, %v4439_v23  ;;  %v4382_v57 = vadd.f32 %v4381_v53, %v8360_v14  ;;  %v4351_v52 = vadd.f32 %v4350_v48, %v4280_v40  ;;  %v8915_v63 = vunpack.c.l.bf16 %v7698_v31 }
 0x5f2   :  { %v4644_v21 = vadd.f32 %v4548_v36, %v4542_v5  ;;  %v4553_v55 = vmul.f32 %v4349_v35, %v8913_v18  ;;  %v4352_v54 = vpop.f32.mrf.mxu1  ;;  %v4443_v37 = vmul.f32 %v4345_v32, %v4345_v32  ;;  %v8918_v18 = vunpack.c.h.bf16 %v7720_v15 }
 0x5f3   :  { %v4383_v30 = vadd.f32 %v4382_v57, %v8366_v58  ;;  %v4481_v2 = vadd.f32 %v4480_v11, %v4440_v9  ;;  %v4554_v7 = vmul.f32 %v4351_v52, %v8914_v4  ;;  %v8511_v23 = vadd.f32 %v4352_v54, %v8460_v16 }
 0x5f4   :  { %v4632_v25 = vadd.f32 %v4631_v12, %v4553_v55  ;;  %v4354_v14 = vpop.f32.mrf.mxu1  ;;  %v4445_v57 = vmul.f32 %v8263_v6, %v8263_v6  ;;  %v4446_v55 = vmul.f32 %v8372_v62, %v8372_v62 }
 0x5f5   :  { %v4384_v40 = vadd.f32 %v4383_v30, %v4343_v44  ;;  %v4482_v49 = vadd.f32 %v4481_v2, %v4441_v43  ;;  %v4645_v39 = vadd.f32 %v4644_v21, %v4554_v7  ;;  %v8514_v22 = vadd.f32 %v4354_v14, %v8463_v17 }
 0x5f6   :  { %v4559_v58 = vmul.f32 %v8511_v23, %v8915_v63  ;;  %v4358_v45 = vpop.f32.mrf.mxu1  ;;  %v4444_v44 = vmul.f32 %v8259_v27, %v8259_v27 }
 0x5f7   :  { %v4483_v53 = vadd.f32 %v4482_v49, %v4442_v1  ;;  %v4385_v61 = vadd.f32 %v4384_v40, %v4345_v32  ;;  %v4560_v16 = vmul.f32 %v8514_v22, %v8916_v10  ;;  %v8525_v59 = vadd.f32 %v4358_v45, %v8466_v20 }
 0x5f8   :  { %v4633_v5 = vadd.f32 %v4632_v25, %v4559_v58  ;;  %v4360_v17 = vpop.f32.mrf.mxu1  ;;  %v8917_v32 = vunpack.c.l.bf16 %v7720_v15  ;;  %v4447_v25 = vmul.f32 %v8376_v0, %v8376_v0  ;;  %v8920_v40 = vunpack.c.h.bf16 %v7736_v33 }
 0x5f9   :  { %v4386_v36 = vadd.f32 %v4385_v61, %v8259_v27  ;;  %v4484_v9 = vadd.f32 %v4483_v53, %v4443_v37  ;;  %v4646_v12 = vadd.f32 %v4645_v39, %v4560_v16  ;;  %v8529_v48 = vadd.f32 %v4360_v17, %v8469_v47 }
 0x5fa   :  { %v4565_v31 = vmul.f32 %v8525_v59, %v8917_v32  ;;  %v4362_v11 = vpop.f32.mrf.mxu1  ;;  %v8921_v37 = vunpack.c.l.bf16 %v7758_v51 }
 0x5fb   :  { %v4387_v21 = vadd.f32 %v4386_v36, %v8263_v6  ;;  %v4485_v20 = vadd.f32 %v4484_v9, %v4444_v44  ;;  %v4566_v27 = vmul.f32 %v8529_v48, %v8918_v18  ;;  %v8543_v54 = vadd.f32 %v4362_v11, %v8472_v8 }
 0x5fc   :  { %v4634_v47 = vadd.f32 %v4633_v5, %v4565_v31  ;;  %v4364_v43 = vpop.f32.mrf.mxu1  ;;  %v8919_v6 = vunpack.c.l.bf16 %v7736_v33  ;;  %v4449_v44 = vmul.f32 %v4351_v52, %v4351_v52  ;;  %v8922_v5 = vunpack.c.h.bf16 %v7758_v51 }
 0x5fd   :  { %v4486_v30 = vadd.f32 %v4485_v20, %v4445_v57  ;;  %v4388_v2 = vadd.f32 %v4387_v21, %v8372_v62  ;;  %v4647_v4 = vadd.f32 %v4646_v12, %v4566_v27  ;;  %v8547_v7 = vadd.f32 %v4364_v43, %v8475_v24 }
 0x5fe   :  { %v4571_v15 = vmul.f32 %v8543_v54, %v8919_v6  ;;  %v4368_v1 = vpop.f32.mrf.mxu1  ;;  %v4448_v62 = vmul.f32 %v4349_v35, %v4349_v35  ;;  %v4451_v51 = vmul.f32 %v8269_v13, %v8269_v13  ;;  %v4452_v57 = vmul.f32 %v8380_v42, %v8380_v42 }
 0x5ff   :  { %v4389_v14 = vadd.f32 %v4388_v2, %v8376_v0  ;;  %v4487_v8 = vadd.f32 %v4486_v30, %v4446_v55  ;;  %v4572_v49 = vmul.f32 %v8547_v7, %v8920_v40  ;;  %v8559_v24 = vadd.f32 %v4368_v1, %v8478_v50 }
 0x600   :  { %v4635_v39 = vadd.f32 %v4634_v47, %v4571_v15  ;;  %v4370_v63 = vpop.f32.mrf.mxu1  ;;  %v4454_v47 = vmul.f32 %v8511_v23, %v8511_v23  ;;  %v4455_v2 = vmul.f32 %v8514_v22, %v8514_v22 }
 0x601   :  { %v4390_v58 = vadd.f32 %v4389_v14, %v4349_v35  ;;  %v4488_v45 = vadd.f32 %v4487_v8, %v4447_v25  ;;  %v4648_v53 = vadd.f32 %v4647_v4, %v4572_v49  ;;  %v8562_v61 = vadd.f32 %v4370_v63, %v8480_v26 }
 0x602   :  { %v4577_v0 = vmul.f32 %v8559_v24, %v8921_v37  ;;  %v4372_v10 = vpop.f32.mrf.mxu1  ;;  %v4450_v35 = vmul.f32 %v8266_v60, %v8266_v60  ;;  %v4460_v49 = vmul.f32 %v8525_v59, %v8525_v59  ;;  %v4461_v63 = vmul.f32 %v8529_v48, %v8529_v48 }
 0x603   :  { %v4489_v33 = vadd.f32 %v4488_v45, %v4448_v62  ;;  %v4391_v16 = vadd.f32 %v4390_v58, %v4351_v52  ;;  %v4578_v50 = vmul.f32 %v8562_v61, %v8922_v5 }
 0x604   :  { %v4636_v17 = vsel %vm2710_vm0, %v4577_v0, 0.0  ;;  %v4373_v36 = vpop.f32.mrf.mxu1 }
 0x605   :  { %v4392_v26 = vadd.f32 %v4391_v16, %v8266_v60  ;;  %v4490_v9 = vadd.f32 %v4489_v33, %v4449_v44  ;;  %v8574_v12 = vadd.f32 %v4636_v17, %v4635_v39  ;;  %v4649_v32 = vsel %vm2710_vm0, %v4578_v50, 0.0 }
 0x606   :  { %v8577_v31 = vadd.f32 %v4649_v32, %v4648_v53  ;;  %v4453_v60 = vmul.f32 %v8387_v3, %v8387_v3  ;;  %v4466_v44 = vmul.f32 %v8543_v54, %v8543_v54 }
 0x607   :  { %v4393_v52 = vadd.f32 %v4392_v26, %v8269_v13  ;;  %v4491_v11 = vadd.f32 %v4490_v9, %v4450_v35 }
 0x609   :  { %v4492_v21 = vadd.f32 %v4491_v11, %v4451_v51  ;;  %v4394_v20 = vadd.f32 %v4393_v52, %v8380_v42  ;;  %v4456_v42 = vmul.f32 %v8276_v34, %v8276_v34  ;;  %v8925_v52 = vld [vmem:[#allocation26_spill] sm:$0xff] }
 0x60a   :  { %v4470_v11 = vmul.f32 %v8925_v52, %v8925_v52 }
 0x60b   :  { %v4395_v18 = vadd.f32 %v4394_v20, %v8387_v3  ;;  %v4493_v27 = vadd.f32 %v4492_v21, %v4452_v57  ;;  %v4457_v3 = vmul.f32 %v8288_v28, %v8288_v28  ;;  %v4414_v20 = vsel %vm2710_vm0, %v8925_v52, 0.0  ;;  %v6430_v52 = vld [vmem:[#allocation11 + $0x48] sm:$0xff]  }
 0x60d   :  { %v4396_v55 = vadd.f32 %v4395_v18, %v8511_v23  ;;  %v4494_v43 = vadd.f32 %v4493_v27, %v4453_v60  ;;  %v4458_v23 = vmul.f32 %v8391_v41, %v8391_v41  ;;  %v8926_v60 = vld [vmem:[#allocation27_spill] sm:$0xff] }
 0x60e   :  { %v4471_v18 = vmul.f32 %v8926_v60, %v8926_v60 }
 0x60f   :  { %v4495_v13 = vadd.f32 %v4494_v43, %v4454_v47  ;;  %v4397_v30 = vadd.f32 %v4396_v55, %v8514_v22  ;;  %v4459_v22 = vmul.f32 %v8403_v19, %v8403_v19  ;;  %v4513_v47 = vsel %vm2710_vm0, %v4470_v11, 0.0 }
 0x610   :  { %v4472_v43 = vmul.f32 %v8559_v24, %v8559_v24 }
 0x611   :  { %v4398_v4 = vadd.f32 %v4397_v30, %v8276_v34  ;;  %v4496_v6 = vadd.f32 %v4495_v13, %v4455_v2  ;;  %v4416_v13 = vsel %vm2710_vm0, %v8926_v60, 0.0  ;;  %v6434_v60 = vld [vmem:[#allocation11 + $0x40] sm:$0xff]  }
 0x613   :  { %v4399_v15 = vadd.f32 %v4398_v4, %v8288_v28  ;;  %v4497_v1 = vadd.f32 %v4496_v6, %v4456_v42  ;;  %v4418_v42 = vsel %vm2710_vm0, %v8559_v24, 0.0  ;;  %v4473_v4 = vmul.f32 %v8562_v61, %v8562_v61  ;;  %v6406_v24 = vld [vmem:[#allocation11 + $0x78] sm:$0xff]  }
 0x614   :  { %v4515_v6 = vsel %vm2710_vm0, %v4471_v18, 0.0  ;;  %5768 = vmatprep.subr.bf16.mxu0 %v6406_v24  ;;  %v6435_v18 = vld [vmem:[#allocation11] sm:$0xff]  }
 0x615   :  { %v4498_v25 = vadd.f32 %v4497_v1, %v4457_v3  ;;  %v4400_v14 = vadd.f32 %v4399_v15, %v8391_v41  ;;  %v4462_v41 = vmul.f32 %v8299_v29, %v8299_v29  ;;  %v4420_v1 = vsel %vm2710_vm0, %v8562_v61, 0.0  ;;  %v6411_v61 = vld [vmem:[#allocation11 + $0x30] sm:$0xff]  }
 0x617   :  { %v4401_v8 = vadd.f32 %v4400_v14, %v8403_v19  ;;  %v4499_v40 = vadd.f32 %v4498_v25, %v4458_v23  ;;  %v4463_v19 = vmul.f32 %v8308_v38, %v8308_v38  ;;  %v4517_v23 = vsel %vm2710_vm0, %v4472_v43, 0.0  ;;  %v8927_v43 = vld [vmem:[#allocation24_spill] sm:$0xff] }
 0x619   :  { %v4402_v34 = vadd.f32 %v4401_v8, %v8525_v59  ;;  %v4500_v62 = vadd.f32 %v4499_v40, %v4459_v22  ;;  %v4464_v59 = vmul.f32 %v8419_v46, %v8419_v46  ;;  %v4519_v22 = vsel %vm2710_vm0, %v4473_v4, 0.0  ;;  %v6407_v40 = vld [vmem:[#allocation11 + $0x38] sm:$0xff]  }
 0x61a   :  { %5769 = vmatpush3.bf16.msra.mxu0 %v6407_v40 }
 0x61b   :  { %v4501_v28 = vadd.f32 %v4500_v62, %v4460_v49  ;;  %v4403_v39 = vadd.f32 %v4402_v34, %v8529_v48  ;;  %v4465_v48 = vmul.f32 %v8425_v56, %v8425_v56  ;;  %v6408_v34 = vld [vmem:[#allocation11 + $0x178] sm:$0xff]   ;;  %v6410_v62 = vld [vmem:[#allocation11 + $0x70] sm:$0xff]  }
 0x61c   :  { %v6409_v49 = vld [vmem:[#allocation11 + $0x138] sm:$0xff]   ;;  %5812 = vmatprep.subr.bf16.mxu1 %v6408_v34  ;;  %5770 = vmatprep.subr.bf16.mxu0 %v6410_v62 }
 0x61d   :  { %v4404_v58 = vadd.f32 %v4403_v39, %v8299_v29  ;;  %v4502_v45 = vadd.f32 %v4501_v28, %v4461_v63  ;;  %v6412_v28 = vld [vmem:[#allocation11 + $0x170] sm:$0xff]   ;;  %5813 = vmatpush3.bf16.msra.mxu1 %v6409_v49  ;;  %v6414_v63 = vld [vmem:[#allocation11 + $0x68] sm:$0xff]  }
 0x61e   :  { %v6413_v39 = vld [vmem:[#allocation11 + $0x130] sm:$0xff]   ;;  %5814 = vmatprep.subr.bf16.mxu1 %v6412_v28  ;;  %5771 = vmatpush3.bf16.msra.mxu0 %v6411_v61 }
 0x61f   :  { %v4405_v53 = vadd.f32 %v4404_v58, %v8308_v38  ;;  %v4503_v37 = vadd.f32 %v4502_v45, %v4462_v41  ;;  %v8923_v38 = vld [vmem:[#allocation22_spill] sm:$0xff]  ;;  %v6416_v41 = vld [vmem:[#allocation11 + $0x168] sm:$0xff]   ;;  %5772 = vmatprep.subr.bf16.mxu0 %v6414_v63 }
 0x620   :  { %v4468_v50 = vmul.f32 %v8923_v38, %v8923_v38  ;;  %v4410_v36 = vsel %vm2710_vm0, %v8923_v38, 0.0  ;;  %v6415_v58 = vld [vmem:[#allocation11 + $0x28] sm:$0xff]  }
 0x621   :  { %v4504_v0 = vadd.f32 %v4503_v37, %v4463_v19  ;;  %v4406_v10 = vadd.f32 %v4405_v53, %v8419_v46  ;;  %v4467_v46 = vmul.f32 %v8547_v7, %v8547_v7  ;;  %5815 = vmatpush3.bf16.msra.mxu1 %v6413_v39  ;;  %v6417_v45 = vld [vmem:[#allocation11 + $0x128] sm:$0xff]   ;;  %v6418_v19 = vld [vmem:[#allocation11 + $0x60] sm:$0xff]  }
 0x622   :  { %5816 = vmatprep.subr.bf16.mxu1 %v6416_v41  ;;  %v6420_v53 = vld [vmem:[#allocation11 + $0x160] sm:$0xff]   ;;  %5773 = vmatpush3.bf16.msra.mxu0 %v6415_v58 }
 0x623   :  { %v4407_v33 = vadd.f32 %v4406_v10, %v8425_v56  ;;  %v4505_v16 = vadd.f32 %v4504_v0, %v4464_v59  ;;  %v8924_v56 = vld [vmem:[#allocation23_spill] sm:$0xff]  ;;  %5774 = vmatprep.subr.bf16.mxu0 %v6418_v19 }
 0x624   :  { %v4469_v26 = vmul.f32 %v8924_v56, %v8924_v56  ;;  %v4412_v51 = vsel %vm2710_vm0, %v8924_v56, 0.0  ;;  %v6419_v37 = vld [vmem:[#allocation11 + $0x20] sm:$0xff]   ;;  %v6422_v0 = vld [vmem:[#allocation11 + $0x58] sm:$0xff]  }
 0x625   :  { %v4408_v29 = vadd.f32 %v4407_v33, %v8543_v54  ;;  %v4506_v5 = vadd.f32 %v4505_v16, %v4465_v48  ;;  %v4509_v54 = vsel %vm2710_vm0, %v4468_v50, 0.0  ;;  %5817 = vmatpush3.bf16.msra.mxu1 %v6417_v45  ;;  %v6421_v59 = vld [vmem:[#allocation11 + $0x120] sm:$0xff]   ;;  %v6424_v10 = vld [vmem:[#allocation11 + $0x158] sm:$0xff]  }
 0x626   :  { %5818 = vmatprep.subr.bf16.mxu1 %v6420_v53  ;;  %5775 = vmatpush3.bf16.msra.mxu0 %v6419_v37  ;;  %v6423_v48 = vld [vmem:[#allocation11 + $0x18] sm:$0xff]  }
 0x627   :  { %v4507_v35 = vadd.f32 %v4506_v5, %v4466_v44  ;;  %v4409_v17 = vadd.f32 %v4408_v29, %v8547_v7  ;;  %v4511_v7 = vsel %vm2710_vm0, %v4469_v26, 0.0  ;;  %v6425_v33 = vld [vmem:[#allocation11 + $0x118] sm:$0xff]   ;;  %5776 = vmatprep.subr.bf16.mxu0 %v6422_v0  ;;  %v6427_v26 = vld [vmem:[#allocation11 + $0x10] sm:$0xff]  }
 0x629   :  { %v4411_v9 = vadd.f32 %v4410_v36, %v4409_v17  ;;  %v4508_v32 = vadd.f32 %v4507_v35, %v4467_v46  ;;  %5819 = vmatpush3.bf16.msra.mxu1 %v6421_v59  ;;  %v6426_v46 = vld [vmem:[#allocation11 + $0x50] sm:$0xff]  }
 0x62a   :  { %5820 = vmatprep.subr.bf16.mxu1 %v6424_v10  ;;  %5777 = vmatpush3.bf16.msra.mxu0 %v6423_v48  ;;  %v6764_v48 = vld [vmem:[#allocation8] sm:$0x3f] }
 0x62b   :  { %v4510_v57 = vadd.f32 %v4509_v54, %v4508_v32  ;;  %v4413_v21 = vadd.f32 %v4412_v51, %v4411_v9  ;;  %v6428_v9 = vld [vmem:[#allocation11 + $0x150] sm:$0xff]   ;;  %5778 = vmatprep.subr.bf16.mxu0 %v6426_v46 }
 0x62c   :  { %v6429_v32 = vld [vmem:[#allocation11 + $0x110] sm:$0xff]  }
 0x62d   :  { %v4415_v27 = vadd.f32 %v4414_v20, %v4413_v21  ;;  %v4512_v55 = vadd.f32 %v4511_v7, %v4510_v57  ;;  %5821 = vmatpush3.bf16.msra.mxu1 %v6425_v33  ;;  %v6431_v57 = vld [vmem:[#allocation11 + $0x8] sm:$0xff]   ;;  %v8933_v46 = vld [vmem:[#allocation42_spill] sm:$0xff] }
 0x62e   :  { %5779 = vmatpush3.bf16.msra.mxu0 %v6427_v26  ;;  %5822 = vmatprep.subr.bf16.mxu1 %v6428_v9  ;;  %v6432_v21 = vld [vmem:[#allocation11 + $0x148] sm:$0xff]  }
 0x62f   :  { %v4417_v30 = vadd.f32 %v4416_v13, %v4415_v27  ;;  %v4514_v2 = vadd.f32 %v4513_v47, %v4512_v55  ;;  %5780 = vmatprep.subr.bf16.mxu0 %v6430_v52  ;;  %v6433_v7 = vld [vmem:[#allocation11 + $0x108] sm:$0xff]   ;;  %v6436_v27 = vld [vmem:[#allocation11 + $0x140] sm:$0xff]   ;;  %v6438_v47 = vld [vmem:[#allocation11 + $0xf8] sm:$0xff]   ;;  %v4586_v13 = vrot.slane %v8927_v43, 4 }
 0x630   :  { %v6437_v55 = vld [vmem:[#allocation11 + $0x100] sm:$0xff]  }
 0x631   :  { %v4419_v3 = vadd.f32 %v4418_v42, %v4417_v30  ;;  %v4516_v15 = vadd.f32 %v4515_v6, %v4514_v2  ;;  %5823 = vmatpush3.bf16.msra.mxu1 %v6429_v32  ;;  %v8928_v30 = vld [vmem:[#allocation25_spill] sm:$0xff]  ;;  %v8929_v42 = vld [vmem:[#allocation28_spill] sm:$0xff]  ;;  %v4638_v6 = vrot.slane %v8574_v12, 4  ;;  %v8935_v32 = vld [vmem:[#allocation43_spill] sm:$0xff] }
 0x632   :  { %5781 = vmatpush3.bf16.msra.mxu0 %v6431_v57  ;;  %5824 = vmatprep.subr.bf16.mxu1 %v6432_v21  ;;  %v4599_v2 = vrot.slane %v8928_v30, 4  ;;  %v4612_v4 = vrot.slane %v8929_v42, 4  ;;  %v8936_v52 = vld [vmem:[#allocation32_spill] sm:$0xff] }
 0x633   :  { %v4421_v25 = vadd.f32 %v4420_v1, %v4419_v3  ;;  %v4518_v14 = vadd.f32 %v4517_v23, %v4516_v15  ;;  %5782 = vmatprep.subr.bf16.mxu0 %v6434_v60  ;;  %v8930_v3 = vld [vmem:[#allocation29_spill] sm:$0xff]  ;;  %v4651_v1 = vrot.slane %v8577_v31, 4  ;;  %v4587_v23 = vadd.f32 %v4586_v13, %v8927_v43 }
 0x634   :  { %v4625_v15 = vrot.slane %v8930_v3, 4 }
 0x635   :  { %4422 = vadd.xlane.f32.xlu1 %v4421_v25  ;;  %v4520_v8 = vadd.f32 %v4519_v22, %v4518_v14  ;;  %5825 = vmatpush3.bf16.msra.mxu1 %v6433_v7  ;;  %v4600_v25 = vadd.f32 %v4599_v2, %v8928_v30  ;;  %v4613_v14 = vadd.f32 %v4612_v4, %v8929_v42  ;;  %v4588_v40 = vrot.slane %v4587_v23, 2  ;;  %v8937_v4 = vld [vmem:[#allocation46_spill] sm:$0xff] }
 0x636   :  { %5783 = vmatpush3.bf16.msra.mxu0 %v6435_v18  ;;  %5826 = vmatprep.subr.bf16.mxu1 %v6436_v27  ;;  %v4639_v22 = vadd.f32 %v4638_v6, %v8574_v12  ;;  %v4652_v24 = vadd.f32 %v4651_v1, %v8577_v31  ;;  %v8939_v1 = vld [vmem:[#allocation48_spill] sm:$0xff] }
 0x637   :  { %5790 = vmatprep.subr.bf16.mxu0 %v6438_v47  ;;  %v4601_v34 = vrot.slane %v4600_v25, 2  ;;  %v4614_v49 = vrot.slane %v4613_v14, 2  ;;  %v4589_v39 = vadd.f32 %v4588_v40, %v4587_v23 }
 0x638   :  { %v4640_v62 = vrot.slane %v4639_v22, 2  ;;  %v4653_v61 = vrot.slane %v4652_v24, 2 }
 0x639   :  { %4521 = vadd.xlane.f32.xlu1 %v4520_v8  ;;  %5827 = vmatpush3.bf16.msra.mxu1 %v6437_v55  ;;  %v4626_v8 = vadd.f32 %v4625_v15, %v8930_v3  ;;  %v4602_v63 = vadd.f32 %v4601_v34, %v4600_v25  ;;  %v4615_v41 = vadd.f32 %v4614_v49, %v4613_v14  ;;  %v4590_v53 = vrot.slane %v4589_v39, 1  ;;  %v8938_v3 = vld [vmem:[#allocation47_spill] sm:$0xff]  ;;  %v8940_v25 = vld [vmem:[#allocation49_spill] sm:$0xff] }
 0x63a   :  { %v4641_v58 = vadd.f32 %v4640_v62, %v4639_v22  ;;  %v4654_v19 = vadd.f32 %v4653_v61, %v4652_v24  ;;  %v8941_v22 = vld [vmem:[#allocation50_spill] sm:$0xff] }
 0x63b   :  { %v4627_v28 = vrot.slane %v4626_v8, 2  ;;  %v4616_v37 = vrot.slane %v4615_v41, 1  ;;  %v4603_v59 = vrot.slane %v4602_v63, 1 }
 0x63c   :  { %v4642_v12 = vrot.slane %v4641_v58, 1  ;;  %v4655_v31 = vrot.slane %v4654_v19, 1 }
 0x63d   :  { %v4628_v45 = vadd.f32 %v4627_v28, %v4626_v8 }
 0x63e   :  { %v4656_v9 = vadd.f32 %v4655_v31, %v4654_v19  ;;  %v6441_v19 = vld [vmem:[#allocation11 + $0xb0] sm:$0xff]   ;;  %v6447_v31 = vld [vmem:[#allocation11 + $0x98] sm:$0xff]  }
 0x63f   :  { %v4629_v10 = vrot.slane %v4628_v45, 1 }
 0x6be   :  { %v4423_v16 = vpop.xlane.xlu1 %4422 }
 0x6bf   :  { %v4424_v29 = vrot.slane %v4423_v16, 4 }
 0x6c1   :  { %v4425_v44 = vadd.f32 %v4424_v29, %v4423_v16  ;;  %v4591_v16 = vadd.f32 %v4590_v53, %v4589_v39  ;;  %v4617_v29 = vadd.f32 %v4616_v37, %v4615_v41  ;;  %v6442_v53 = vld [vmem:[#allocation11 + $0xe8] sm:$0xff]  }
 0x6c2   :  { %v4522_v5 = vpop.xlane.xlu1 %4521  ;;  %v6443_v37 = vld [vmem:[#allocation11 + $0xa8] sm:$0xff]  }
 0x6c3   :  { %v4426_v38 = vrot.slane %v4425_v44, 2  ;;  %v4523_v50 = vrot.slane %v4522_v5, 4 }
 0x6c5   :  { %v4524_v35 = vadd.f32 %v4523_v50, %v4522_v5  ;;  %v4427_v17 = vadd.f32 %v4426_v38, %v4425_v44  ;;  %v4643_v44 = vadd.f32 %v4642_v12, %v4641_v58  ;;  %v4604_v5 = vadd.f32 %v4603_v59, %v4602_v63  ;;  %v8931_v38 = vld [vmem:[#allocation20_spill] sm:$0xff]  ;;  %v6439_v63 = vld [vmem:[#allocation11 + $0xb8] sm:$0xff]   ;;  %v6440_v58 = vld [vmem:[#allocation11 + $0xf0] sm:$0xff]  }
 0x6c6   :  { %v6444_v12 = vld [vmem:[#allocation11 + $0xe0] sm:$0xff]  }
 0x6c7   :  { %v4525_v36 = vrot.slane %v4524_v35, 2  ;;  %v4428_v56 = vrot.slane %v4427_v17, 1  ;;  %v6445_v59 = vld [vmem:[#allocation11 + $0xa0] sm:$0xff]  }
 0x6c9   :  { %v4526_v54 = vadd.f32 %v4525_v36, %v4524_v35  ;;  %v4429_v51 = vadd.f32 %v4428_v56, %v4427_v17  ;;  %v8932_v35 = vld [vmem:[#allocation31_spill] sm:$0xff]  ;;  %v8934_v56 = vld [vmem:[#allocation21_spill] sm:$0xff] }
 0x6cb   :  { %5840 = vpush %v4429_v51  ;;  %v4527_v11 = vrot.slane %v4526_v54, 1  ;;  %v4630_v51 = vadd.f32 %v4629_v10, %v4628_v45  ;;  %v6448_v10 = vld [vmem:[#allocation11 + $0xd0] sm:$0xff]  }
 0x6cd   :  { %v4528_v20 = vadd.f32 %v4527_v11, %v4526_v54 }
 0x6cf   :  { %5842 = vpush %v4528_v20 }
 0x6fc   :  { %s5841_s1 = spop %5840 }
 0x6fd   :  { %s4431_s13 = smul.f32 2.6573129e-05, %s5841_s1 }
 0x6ff   :  { %v4658_v0 = vstv %s4431_s13  ;;  %s4531_s14 = smul.f32 %s4431_s13, %s4431_s13 }
 0x700   :  { %v4659_v33 = vmul.f32 %v6764_v48, %v4658_v0  ;;  %s5843_s15 = spop %5842  ;;  %v6446_v0 = vld [vmem:[#allocation11 + $0xd8] sm:$0xff]   ;;  %v6449_v48 = vld [vmem:[#allocation11 + $0x90] sm:$0xff]  }
 0x701   :  { %s4530_s16 = smul.f32 2.6573129e-05, %s5843_s15 }
 0x702   :  { %v4664_v50 = vrot.slane %v4659_v33, %v8931_v38  ;;  %v4672_v17 = vrot.slane %v4659_v33, %v8932_v35  ;;  %v4680_v36 = vrot.slane %v4659_v33, %v8933_v46  ;;  %v4668_v26 = vrot.slane %v4659_v33, %v8934_v56  ;;  %v6452_v38 = vld [vmem:[#allocation11 + $0xc0] sm:$0xff]  }
 0x703   :  { %s4532_s2 = ssub.f32 %s4530_s16, %s4531_s14  ;;  %v4684_v54 = vrot.slane %v4659_v33, %v8935_v32  ;;  %v4676_v11 = vrot.slane %v4659_v33, %v8936_v52 }
 0x704   :  { %v4691_v57 = vsub.f32 %v4591_v16, %v4664_v50  ;;  %v4693_v21 = vsub.f32 %v4617_v29, %v4672_v17  ;;  %v4695_v7 = vsub.f32 %v4643_v44, %v4680_v36  ;;  %v4692_v20 = vsub.f32 %v4604_v5, %v4668_v26  ;;  %v6450_v16 = vld [vmem:[#allocation11 + $0xc8] sm:$0xff]   ;;  %v8942_v44 = vld [vmem:[#allocation51_spill] sm:$0xff] }
 0x705   :  { %s4533_s17 = sadd.f32 1e-05, %s4532_s2  ;;  %v4696_v60 = vsub.f32 %v4656_v9, %v4684_v54  ;;  %v4694_v18 = vsub.f32 %v4630_v51, %v4676_v11  ;;  %v6451_v29 = vld [vmem:[#allocation11 + $0x88] sm:$0xff]   ;;  %v6453_v50 = vld [vmem:[#allocation11 + $0x80] sm:$0xff]  }
 0x706   :  { %v4818_v11 = vld [vmem:[#allocation13] sm:$0x1] }
 0x707   :  { %v4534_v27 = vstv %s4533_s17 }
 0x708   :  { %6456 = vrsqrt.f32 %v4534_v27 }
 0x715   :  { %v6457_v55 = vpop.eup %6456 }
 0x716   :  { %5844 = vpush %v6457_v55 }
 0x747   :  { %s5845_s18 = spop %5844 }
 0x748   :  { %s4657_s19 = smul.f32 0.020408163, %s5845_s18 }
 0x74a   :  { %v4697_v47 = vstv %s4657_s19 }
 0x74b   :  { %v4698_v43 = vmul.f32 %v4697_v47, %v4691_v57  ;;  %v4702_v13 = vmul.f32 %v4697_v47, %v4695_v7  ;;  %v4699_v30 = vmul.f32 %v4697_v47, %v4692_v20  ;;  %v4703_v2 = vmul.f32 %v4697_v47, %v4696_v60 }
 0x74c   :  { %v4701_v42 = vmul.f32 %v4697_v47, %v4694_v18  ;;  %v4700_v33 = vmul.f32 %v4697_v47, %v4693_v21 }
 0x74d   :  { %v4704_v6 = vadd.f32 %v4698_v43, %v8937_v4  ;;  %v4708_v15 = vadd.f32 %v4702_v13, %v8938_v3  ;;  %v4705_v23 = vadd.f32 %v4699_v30, %v8939_v1  ;;  %v4709_v14 = vadd.f32 %v4703_v2, %v8940_v25 }
 0x74e   :  { %v4707_v8 = vadd.f32 %v4701_v42, %v8941_v22  ;;  %v4706_v5 = vadd.f32 %v4700_v33, %v8942_v44 }
 0x74f   :  { %v4710_v24 = vmax.f32 %v4704_v6, 0.0  ;;  %v4714_v40 = vmax.f32 %v4708_v15, 0.0  ;;  %v4711_v34 = vmax.f32 %v4705_v23, 0.0  ;;  %v4715_v49 = vmax.f32 %v4709_v14, 0.0 }
 0x750   :  { %v4713_v62 = vmax.f32 %v4707_v8, 0.0  ;;  %v4712_v35 = vmax.f32 %v4706_v5, 0.0 }
 0x751   :  { %v4716_v28 = vpack.c.bf16 %v4710_v24, %v4710_v24  ;;  %v4720_v61 = vpack.c.bf16 %v4714_v40, %v4714_v40  ;;  %v4717_v39 = vpack.c.bf16 %v4711_v34, %v4711_v34  ;;  %v4721_v41 = vpack.c.bf16 %v4715_v49, %v4715_v49 }
 0x752   :  { %v4719_v45 = vpack.c.bf16 %v4713_v62, %v4713_v62  ;;  %v4718_v17 = vpack.c.bf16 %v4712_v35, %v4712_v35 }
 0x753   :  { %5139 = vmatprep.mubr.bf16.mxu0 %v4717_v39  ;;  %5219 = vmatprep.mubr.bf16.mxu1 %v4721_v41 }
 0x754   :  { %5140 = vmatmul.mubr.bf16.vlgmr.msra.gmra.mxu0 %v4716_v28  ;;  %5220 = vmatmul.mubr.bf16.vlgmr.msra.gmra.mxu1 %v4720_v61 }
 0x755   :  { %5791 = vmatpush3.bf16.msra.mxu0 %v6439_v63  ;;  %5179 = vmatprep.mubr.bf16.mxu0 %v4719_v45 }
 0x756   :  { %5792 = vmatprep.subr.bf16.mxu0 %v6440_v58 }
 0x759   :  { %5793 = vmatpush3.bf16.msra.mxu0 %v6441_v19 }
 0x75a   :  { %5794 = vmatprep.subr.bf16.mxu0 %v6442_v53 }
 0x75d   :  { %5795 = vmatpush3.bf16.msra.mxu0 %v6443_v37 }
 0x75e   :  { %5796 = vmatprep.subr.bf16.mxu0 %v6444_v12 }
 0x761   :  { %5797 = vmatpush3.bf16.msra.mxu0 %v6445_v59 }
 0x762   :  { %5798 = vmatprep.subr.bf16.mxu0 %v6446_v0 }
 0x765   :  { %5799 = vmatpush3.bf16.msra.mxu0 %v6447_v31 }
 0x766   :  { %5800 = vmatprep.subr.bf16.mxu0 %v6448_v10 }
 0x769   :  { %5801 = vmatpush3.bf16.msra.mxu0 %v6449_v48 }
 0x76a   :  { %5802 = vmatprep.subr.bf16.mxu0 %v6450_v16 }
 0x76d   :  { %5803 = vmatpush3.bf16.msra.mxu0 %v6451_v29 }
 0x76e   :  { %5804 = vmatprep.subr.bf16.mxu0 %v6452_v38 }
 0x771   :  { %5805 = vmatpush3.bf16.msra.mxu0 %v6453_v50 }
 0x774   :  { %5180 = vmatmul.mubr.bf16.vlgmr.msra.gmra.mxu0 %v4718_v17 }
 0x814   :  { %v5784_v46 = vpop.f32.mrf.mxu0  ;;  %v5828_v36 = vpop.f32.mrf.mxu1 }
 0x816   :  { %v5785_v56 = vpop.f32.mrf.mxu0  ;;  %v5829_v26 = vpop.f32.mrf.mxu1 }
 0x817   :  { %v5786_v52 = vadd.f32 %v5785_v56, %v5784_v46  ;;  %v5830_v18 = vadd.f32 %v5829_v26, %v5828_v36 }
 0x818   :  { %v5787_v9 = vpop.f32.mrf.mxu0  ;;  %v5831_v32 = vpop.f32.mrf.mxu1 }
 0x819   :  { %v5142_v7 = vadd.f32 %v5786_v52, %v4818_v11 }
 0x81a   :  { %v5788_v54 = vpop.f32.mrf.mxu0  ;;  %v5832_v51 = vpop.f32.mrf.mxu1 }
 0x834   :  { %v5806_v57 = vpop.f32.mrf.mxu0 }
 0x836   :  { %v5807_v21 = vpop.f32.mrf.mxu0 }
 0x837   :  { %v5808_v20 = vadd.f32 %v5807_v21, %v5806_v57 }
 0x838   :  { %v5809_v60 = vpop.f32.mrf.mxu0 }
 0x839   :  { %v5182_v27 = vadd.f32 %v5808_v20, %v5142_v7 }
 0x83a   :  { %v5810_v55 = vpop.f32.mrf.mxu0 }
 0x83b   :  { %v5222_v47 = vadd.f32 %v5830_v18, %v5182_v27 }
 0x83d   :  { %5228 = vst [vmem:[#allocation14 + $0x1] sm:$0x1] %v5222_v47 }
 0x83e   :  { %6916 = shalt.err (!%p6913_p11)
}
 0x83f   :  { %s6947_s3 = smov 16   ;;  %s6948_s6 = smov 1  }
 0x840   :  { %5240 = dma.vmem_to_hbm [thread:$0]  %s5235_s21, 32, %s8696_s9, [#allocation4], %s6947_s3, %s6947_s3, %s6948_s6  }
 0x841   :  { %6933 = dma.done.wait [#allocation4], 32  }
 0x842   :  { %6934 = vsyncadd [#allocation4], 4294967264 }
 0x843   :  { %5244 = vsyncpa [#allocation3], 1 }
 0x844   :  { %5245 = vsyncpa [#allocation6], 1 }
 0x845   :  { %5246 = vsyncpa [#allocation9], 1 }
 0x846   :  { %5247 = vsyncpa [#allocation12], 1 }
 0x847   :  { %5248 = vsyncpa [#allocation4], 1 }

// kernel: _forward_jit.1
= control target key start
LH: loop header
LB: loop body
LE: loop exit
PB: predicated region body
PF: predicated region fallthrough
CT: control target
= control target key end

     0   :  { %14 = vsyncpa [#allocation3], 0  ;;  %s8687_s0 = inlined_call_operand.vmem [shape: bf16[2,49,512], index: 0, kind: input, shape index: {}]   ;;  %s8688_s1 = inlined_call_operand.vmem [shape: bf16[2,49,256], index: 1, kind: input, shape index: {}]   ;;  %s8689_s2 = inlined_call_operand.hbm [shape: bf16[768,768], index: 2, kind: input, shape index: {}]   ;;  %s8690_s3 = inlined_call_operand.hbm [shape: f32[1,768], index: 3, kind: input, shape index: {}]   ;;  %s8691_s4 = inlined_call_operand.hbm [shape: bf16[49,768], index: 4, kind: input, shape index: {}]   ;;  %s8692_s5 = inlined_call_operand.hbm [shape: f32[1,768], index: 5, kind: input, shape index: {}]   ;;  %s8693_s6 = inlined_call_operand.hbm [shape: f32[1,768], index: 6, kind: input, shape index: {}]   ;;  %s8694_s7 = inlined_call_operand.hbm [shape: bf16[768,128], index: 7, kind: input, shape index: {}]   ;;  %s8695_s8 = inlined_call_operand.hbm [shape: f32[1,128], index: 8, kind: input, shape index: {}]   ;;  %s8696_s9 = inlined_call_operand.hbm [shape: f32[2,1,128], index: 9, kind: output, shape index: {}]  }
   0x1   :  { %15 = vsyncpa [#allocation6], 0 }
   0x2   :  { %16 = vsyncpa [#allocation9], 0 }
   0x3   :  { %17 = vsyncpa [#allocation12], 0 }
   0x4   :  { %18 = vsyncpa [#allocation4], 0  ;;  %s6935_s30 = smov [#allocation5]   ;;  %s6936_s11 = smov [#allocation8]  }
   0x5   :  { %s41_s10 = sshll.u32 %s6935_s30, 4  ;;  %s63_s12 = sshll.u32 %s6936_s11, 4  ;;  %s42_s10 = int_to_ptr.vmem [resolvable:$true] %s41_s10  ;;  %s64_s12 = int_to_ptr.vmem [resolvable:$true] %s63_s12 }
   0x6   :  { %s6773_s13 = scalar_lea.vmem %s42_s10, 96  ;;  %p6778_p1 = scmp.lt.s32.totalorder %s42_s10, %s42_s10 }
   0x7   :  { %p6774_p0 = scmp.ne.s32.totalorder %s42_s10, %s6773_s13  ;;  %p6779_p2 = scmp.lt.s32.totalorder %s6773_s13, %s6773_s13 }
   0x9   :  { %p6780_p3 = por %p6779_p2, %p6778_p1 }
   0xb   :  { %p6781_p4 = pnand %p6780_p3, %p6774_p0 }
   0xd   :  { %6784 = shalt.err (!%p6781_p4)
}
   0xe   :  { %44 = dma.hbm_to_vmem [thread:$0]  %s8690_s3, 96, %s42_s10, [#allocation6]  }
   0xf   :  { %s6793_s16 = scalar_lea.vmem %s64_s12, 96  ;;  %p6798_p6 = scmp.lt.s32.totalorder %s64_s12, %s64_s12 }
  0x10   :  { %p6794_p5 = scmp.ne.s32.totalorder %s64_s12, %s6793_s16  ;;  %p6799_p7 = scmp.lt.s32.totalorder %s6793_s16, %s6793_s16 }
  0x12   :  { %p6800_p8 = por %p6799_p7, %p6798_p6 }
  0x14   :  { %p6801_p9 = pnand %p6800_p8, %p6794_p5 }
  0x16   :  { %6804 = shalt.err (!%p6801_p9)
}
  0x17   :  { %66 = dma.hbm_to_vmem [thread:$0]  %s8692_s5, 96, %s64_s12, [#allocation9]  }
  0x18   :  { %s6937_s19 = smov [#allocation11]  }
  0x19   :  { %s82_s20 = sshll.u32 %s6937_s19, 4  ;;  %s83_s20 = int_to_ptr.vmem [resolvable:$true] %s82_s20 }
  0x1a   :  { %s6813_s21 = scalar_lea.vmem %s83_s20, 6144  ;;  %p6818_p11 = scmp.lt.s32.totalorder %s83_s20, %s83_s20 }
  0x1b   :  { %p6814_p10 = scmp.ne.s32.totalorder %s83_s20, %s6813_s21  ;;  %p6819_p12 = scmp.lt.s32.totalorder %s6813_s21, %s6813_s21 }
  0x1d   :  { %p6820_p13 = por %p6819_p12, %p6818_p11 }
  0x1f   :  { %p6821_p0 = pnand %p6820_p13, %p6814_p10 }
  0x21   :  { %6824 = shalt.err (!%p6821_p0)
}
  0x22   :  { %s6938_s3 = smov 64   ;;  %s6939_s22 = smov 4  }
  0x23   :  { %88 = dma.hbm_to_vmem [thread:$0]  %s8694_s7, 6144, %s83_s20, [#allocation12], %s6938_s3, %s6938_s3, %s6939_s22  }
  0x24   :  { %s6940_s25 = smov [#allocation2]  }
  0x25   :  { %s28_s26 = sshll.u32 %s6940_s25, 4  ;;  %s29_s26 = int_to_ptr.vmem [resolvable:$true] %s28_s26 }
  0x26   :  { %s6833_s5 = scalar_lea.vmem %s29_s26, 36864  ;;  %p6838_p2 = scmp.lt.s32.totalorder %s29_s26, %s29_s26 }
  0x27   :  { %p6834_p1 = scmp.ne.s32.totalorder %s29_s26, %s6833_s5  ;;  %p6839_p3 = scmp.lt.s32.totalorder %s6833_s5, %s6833_s5 }
  0x29   :  { %p6840_p4 = por %p6839_p3, %p6838_p2 }
  0x2b   :  { %p6841_p5 = pnand %p6840_p4, %p6834_p1 }
  0x2d   :  { %6844 = shalt.err (!%p6841_p5)
}
  0x2e   :  { %s6941_s27 = smov 384   ;;  %s6942_s28 = smov 24  }
  0x2f   :  { %34 = dma.hbm_to_vmem [thread:$0]  %s8689_s2, 36864, %s29_s26, [#allocation3], %s6941_s27, %s6941_s27, %s6942_s28  }
  0x30   :  { %s6943_s10 = smov [#allocation7]   ;;  %s6944_s12 = smov [#allocation10]  }
  0x31   :  { %s50_s11 = sshll.u32 %s6943_s10, 4  ;;  %s73_s7 = sshll.u32 %s6944_s12, 4  ;;  %s51_s11 = int_to_ptr.vmem [resolvable:$true] %s50_s11  ;;  %s74_s7 = int_to_ptr.vmem [resolvable:$true] %s73_s7 }
  0x32   :  { %s6853_s13 = scalar_lea.vmem %s51_s11, 2688  ;;  %p6858_p7 = scmp.lt.s32.totalorder %s51_s11, %s51_s11 }
  0x33   :  { %p6854_p6 = scmp.ne.s32.totalorder %s51_s11, %s6853_s13  ;;  %p6859_p8 = scmp.lt.s32.totalorder %s6853_s13, %s6853_s13 }
  0x35   :  { %p6860_p9 = por %p6859_p8, %p6858_p7 }
  0x37   :  { %p6861_p10 = pnand %p6860_p9, %p6854_p6 }
  0x39   :  { %6864 = shalt.err (!%p6861_p10)
}
  0x3a   :  { %56 = dma.hbm_to_vmem [thread:$0]  %s8691_s4, 2688, %s51_s11, [#allocation6], %s6941_s27, %s6941_s27, %s6942_s28  }
  0x3b   :  { %s6873_s16 = scalar_lea.vmem %s74_s7, 96  ;;  %p6878_p12 = scmp.lt.s32.totalorder %s74_s7, %s74_s7 }
  0x3c   :  { %p6874_p11 = scmp.ne.s32.totalorder %s74_s7, %s6873_s16  ;;  %p6879_p13 = scmp.lt.s32.totalorder %s6873_s16, %s6873_s16 }
  0x3e   :  { %p6880_p0 = por %p6879_p13, %p6878_p12 }
  0x40   :  { %p6881_p1 = pnand %p6880_p0, %p6874_p11 }
  0x42   :  { %6884 = shalt.err (!%p6881_p1)
}
  0x43   :  { %76 = dma.hbm_to_vmem [thread:$0]  %s8693_s6, 96, %s74_s7, [#allocation9]  }
  0x44   :  { %s6945_s18 = smov [#allocation13]  }
  0x45   :  { %s95_s19 = sshll.u32 %s6945_s18, 4  ;;  %s96_s19 = int_to_ptr.vmem [resolvable:$true] %s95_s19 }
  0x46   :  { %s6893_s20 = scalar_lea.vmem %s96_s19, 16  ;;  %s6897_s21 = scalar_lea.vmem %s96_s19, 32 }
  0x47   :  { %p6894_p2 = scmp.ne.s32.totalorder %s96_s19, %s6893_s20  ;;  %p6898_p3 = scmp.lt.s32.totalorder %s96_s19, %s96_s19 }
  0x48   :  { %p6899_p4 = scmp.lt.s32.totalorder %s6897_s21, %s6893_s20 }
  0x4a   :  { %p6900_p5 = por %p6899_p4, %p6898_p3 }
  0x4c   :  { %p6901_p6 = pnand %p6900_p5, %p6894_p2 }
  0x4e   :  { %6904 = shalt.err (!%p6901_p6)
}
  0x4f   :  { %98 = dma.hbm_to_vmem [thread:$0]  %s8695_s8, 16, %s96_s19, [#allocation12]  }
  0x50   :  { %6925 = dma.done.wait [#allocation3], 36864  }
  0x51   :  { %6926 = vsyncadd [#allocation3], 4294930432 }
  0x52   :  { %6927 = dma.done.wait [#allocation6], 2784  }
  0x53   :  { %6928 = vsyncadd [#allocation6], 4294964512 }
  0x54   :  { %6929 = dma.done.wait [#allocation9], 192  }
  0x55   :  { %6930 = vsyncadd [#allocation9], 4294967104 }
  0x56   :  { %6931 = dma.done.wait [#allocation12], 6160  }
  0x57   :  { %6932 = vsyncadd [#allocation12], 4294961136  ;;  %v5860_v0 = vld [vmem:[#allocation2 + $0x154] ss:$24 sps:$4 sm:$0xff]   ;;  %v5862_v1 = vld [vmem:[#allocation2 + $0x150] ss:$24 sps:$4 sm:$0xff]  }
  0x58   :  { %2036 = vmatprep.subr.bf16.mxu0 %v5860_v0  ;;  %v5863_v2 = vld [vmem:[#allocation2 + $0x454] ss:$24 sps:$4 sm:$0xff]   ;;  %v5865_v3 = vld [vmem:[#allocation2 + $0x450] ss:$24 sps:$4 sm:$0xff]   ;;  %v5866_v4 = vld [vmem:[#allocation2 + $0x124] ss:$24 sps:$4 sm:$0xff]  }
  0x59   :  { %2037 = vmatpush1.bf16.msra.mxu0 %v5862_v1  ;;  %v5868_v5 = vld [vmem:[#allocation2 + $0x120] ss:$24 sps:$4 sm:$0xff]   ;;  %2107 = vmatprep.subr.bf16.mxu1 %v5863_v2  ;;  %v5869_v6 = vld [vmem:[#allocation2 + $0x424] ss:$24 sps:$4 sm:$0xff]   ;;  %v5872_v8 = vld [vmem:[#allocation2 + $0xf4] ss:$24 sps:$4 sm:$0xff]  }
  0x5a   :  { %2108 = vmatpush1.bf16.msra.mxu1 %v5865_v3  ;;  %2038 = vmatprep.subr.bf16.mxu0 %v5866_v4  ;;  %v5871_v7 = vld [vmem:[#allocation2 + $0x420] ss:$24 sps:$4 sm:$0xff]   ;;  %v5874_v9 = vld [vmem:[#allocation2 + $0xf0] ss:$24 sps:$4 sm:$0xff]   ;;  %v5875_v10 = vld [vmem:[#allocation2 + $0x3f4] ss:$24 sps:$4 sm:$0xff]  }
  0x5b   :  { %2109 = vmatprep.subr.bf16.mxu1 %v5869_v6  ;;  %v5878_v11 = vld [vmem:[#allocation2 + $0xc4] ss:$24 sps:$4 sm:$0xff]   ;;  %v5877_v12 = vld [vmem:[#allocation2 + $0x3f0] ss:$24 sps:$4 sm:$0xff]   ;;  %v5880_v14 = vld [vmem:[#allocation2 + $0xc0] ss:$24 sps:$4 sm:$0xff]  }
  0x5c   :  { %v5881_v13 = vld [vmem:[#allocation2 + $0x3c4] ss:$24 sps:$4 sm:$0xff]   ;;  %v5884_v15 = vld [vmem:[#allocation2 + $0x94] ss:$24 sps:$4 sm:$0xff]   ;;  %v5883_v16 = vld [vmem:[#allocation2 + $0x3c0] ss:$24 sps:$4 sm:$0xff]  }
  0x5d   :  { %2039 = vmatpush1.bf16.msra.mxu0 %v5868_v5  ;;  %v5887_v17 = vld [vmem:[#allocation2 + $0x394] ss:$24 sps:$4 sm:$0xff]   ;;  %v5886_v18 = vld [vmem:[#allocation2 + $0x90] ss:$24 sps:$4 sm:$0xff]   ;;  %v5890_v19 = vld [vmem:[#allocation2 + $0x64] ss:$24 sps:$4 sm:$0xff]  }
  0x5e   :  { %2040 = vmatprep.subr.bf16.mxu0 %v5872_v8  ;;  %2110 = vmatpush1.bf16.msra.mxu1 %v5871_v7  ;;  %v5889_v20 = vld [vmem:[#allocation2 + $0x390] ss:$24 sps:$4 sm:$0xff]   ;;  %v5893_v21 = vld [vmem:[#allocation2 + $0x364] ss:$24 sps:$4 sm:$0xff]   ;;  %v5892_v22 = vld [vmem:[#allocation2 + $0x60] ss:$24 sps:$4 sm:$0xff]  }
  0x5f   :  { %2111 = vmatprep.subr.bf16.mxu1 %v5875_v10  ;;  %v5896_v23 = vld [vmem:[#allocation2 + $0x34] ss:$24 sps:$4 sm:$0xff]   ;;  %v5895_v24 = vld [vmem:[#allocation2 + $0x360] ss:$24 sps:$4 sm:$0xff]   ;;  %v5898_v26 = vld [vmem:[#allocation2 + $0x30] ss:$24 sps:$4 sm:$0xff]  }
  0x60   :  { %v5899_v25 = vld [vmem:[#allocation2 + $0x334] ss:$24 sps:$4 sm:$0xff]   ;;  %v5902_v27 = vld [vmem:[#allocation2 + $0x4] ss:$24 sps:$4 sm:$0xff]   ;;  %v5901_v28 = vld [vmem:[#allocation2 + $0x330] ss:$24 sps:$4 sm:$0xff]  }
  0x61   :  { %2041 = vmatpush1.bf16.msra.mxu0 %v5874_v9  ;;  %v5905_v29 = vld [vmem:[#allocation2 + $0x304] ss:$24 sps:$4 sm:$0xff]   ;;  %v5904_v30 = vld [vmem:[#allocation2] ss:$24 sps:$4 sm:$0xff]   ;;  %v5908_v31 = vld [vmem:[#allocation2 + $0x2d4] ss:$24 sps:$4 sm:$0xff]  }
  0x62   :  { %2042 = vmatprep.subr.bf16.mxu0 %v5878_v11  ;;  %2112 = vmatpush1.bf16.msra.mxu1 %v5877_v12  ;;  %v5907_v32 = vld [vmem:[#allocation2 + $0x300] ss:$24 sps:$4 sm:$0xff]   ;;  %v5911_v33 = vld [vmem:[#allocation2 + $0x5d4] ss:$24 sps:$4 sm:$0xff]   ;;  %v5910_v34 = vld [vmem:[#allocation2 + $0x2d0] ss:$24 sps:$4 sm:$0xff]  }
  0x63   :  { %2113 = vmatprep.subr.bf16.mxu1 %v5881_v13  ;;  %v5914_v35 = vld [vmem:[#allocation2 + $0x2a4] ss:$24 sps:$4 sm:$0xff]   ;;  %v5913_v36 = vld [vmem:[#allocation2 + $0x5d0] ss:$24 sps:$4 sm:$0xff]   ;;  %v5916_v38 = vld [vmem:[#allocation2 + $0x2a0] ss:$24 sps:$4 sm:$0xff]  }
  0x64   :  { %v5917_v37 = vld [vmem:[#allocation2 + $0x5a4] ss:$24 sps:$4 sm:$0xff]   ;;  %v5920_v39 = vld [vmem:[#allocation2 + $0x274] ss:$24 sps:$4 sm:$0xff]   ;;  %v5919_v40 = vld [vmem:[#allocation2 + $0x5a0] ss:$24 sps:$4 sm:$0xff]  }
  0x65   :  { %2043 = vmatpush1.bf16.msra.mxu0 %v5880_v14  ;;  %v5923_v41 = vld [vmem:[#allocation2 + $0x574] ss:$24 sps:$4 sm:$0xff]   ;;  %v5922_v42 = vld [vmem:[#allocation2 + $0x270] ss:$24 sps:$4 sm:$0xff]   ;;  %v5926_v43 = vld [vmem:[#allocation2 + $0x244] ss:$24 sps:$4 sm:$0xff]  }
  0x66   :  { %2044 = vmatprep.subr.bf16.mxu0 %v5884_v15  ;;  %2114 = vmatpush1.bf16.msra.mxu1 %v5883_v16  ;;  %v5925_v44 = vld [vmem:[#allocation2 + $0x570] ss:$24 sps:$4 sm:$0xff]   ;;  %v5929_v45 = vld [vmem:[#allocation2 + $0x544] ss:$24 sps:$4 sm:$0xff]   ;;  %v5928_v46 = vld [vmem:[#allocation2 + $0x240] ss:$24 sps:$4 sm:$0xff]  }
  0x67   :  { %2115 = vmatprep.subr.bf16.mxu1 %v5887_v17  ;;  %v7023_v47 = vld [vmem:[%s8687_s0 + $0x4] ss:$16 sps:$4 sm:$0xff]   ;;  %v5931_v49 = vld [vmem:[#allocation2 + $0x540] ss:$24 sps:$4 sm:$0xff]   ;;  %v7029_v51 = vld [vmem:[%s8687_s0 + $0xc] ss:$16 sps:$4 sm:$0xff]  }
  0x68   :  { %v5932_v48 = vld [vmem:[#allocation2 + $0x214] ss:$24 sps:$4 sm:$0xff]   ;;  %2068 = vmatprep.mubr.bf16.mxu0 %v7023_v47  ;;  %v5934_v52 = vld [vmem:[#allocation2 + $0x210] ss:$24 sps:$4 sm:$0xff]   ;;  %v5938_v53 = vld [vmem:[#allocation2 + $0x1e4] ss:$24 sps:$4 sm:$0xff]   ;;  %2139 = vmatprep.mubr.bf16.mxu1 %v7029_v51 }
  0x69   :  { %2045 = vmatpush1.bf16.msra.mxu0 %v5886_v18  ;;  %v5935_v50 = vld [vmem:[#allocation2 + $0x514] ss:$24 sps:$4 sm:$0xff]   ;;  %v5937_v54 = vld [vmem:[#allocation2 + $0x510] ss:$24 sps:$4 sm:$0xff]   ;;  %v5941_v55 = vld [vmem:[#allocation2 + $0x4e4] ss:$24 sps:$4 sm:$0xff]  }
  0x6a   :  { %2046 = vmatprep.subr.bf16.mxu0 %v5890_v19  ;;  %2116 = vmatpush1.bf16.msra.mxu1 %v5889_v20  ;;  %v5940_v56 = vld [vmem:[#allocation2 + $0x1e0] ss:$24 sps:$4 sm:$0xff]   ;;  %v5944_v57 = vld [vmem:[#allocation2 + $0x1b4] ss:$24 sps:$4 sm:$0xff]   ;;  %v5946_v60 = vld [vmem:[#allocation2 + $0x1b0] ss:$24 sps:$4 sm:$0xff]  }
  0x6b   :  { %2117 = vmatprep.subr.bf16.mxu1 %v5893_v21  ;;  %v5943_v58 = vld [vmem:[#allocation2 + $0x4e0] ss:$24 sps:$4 sm:$0xff]   ;;  %v5947_v59 = vld [vmem:[#allocation2 + $0x4b4] ss:$24 sps:$4 sm:$0xff]   ;;  %v5950_v61 = vld [vmem:[#allocation2 + $0x184] ss:$24 sps:$4 sm:$0xff]  }
  0x6c   :  { %v5949_v62 = vld [vmem:[#allocation2 + $0x4b0] ss:$24 sps:$4 sm:$0xff]   ;;  %v5953_v63 = vld [vmem:[#allocation2 + $0x484] ss:$24 sps:$4 sm:$0xff]   ;;  %v5952_v0 = vld [vmem:[#allocation2 + $0x180] ss:$24 sps:$4 sm:$0xff]  }
  0x6d   :  { %2047 = vmatpush1.bf16.msra.mxu0 %v5892_v22  ;;  %v5961_v1 = vld [vmem:[#allocation2 + $0x754] ss:$24 sps:$4 sm:$0xff]   ;;  %v5957_v2 = vld [vmem:[#allocation2 + $0x480] ss:$24 sps:$4 sm:$0xff]   ;;  %v5959_v5 = vld [vmem:[#allocation2 + $0x750] ss:$24 sps:$4 sm:$0xff]  }
  0x6e   :  { %2048 = vmatprep.subr.bf16.mxu0 %v5896_v23  ;;  %2118 = vmatpush1.bf16.msra.mxu1 %v5895_v24  ;;  %v7035_v3 = vld [vmem:[%s8687_s0] ss:$16 sps:$4 sm:$0xff]   ;;  %v5967_v4 = vld [vmem:[#allocation2 + $0x15c] ss:$24 sps:$4 sm:$0xff]   ;;  %v7040_v6 = vld [vmem:[%s8687_s0 + $0x8] ss:$16 sps:$4 sm:$0xff]  }
  0x6f   :  { %2119 = vmatprep.subr.bf16.mxu1 %v5899_v25  ;;  %v5970_v7 = vld [vmem:[#allocation2 + $0x724] ss:$24 sps:$4 sm:$0xff]   ;;  %v5965_v8 = vld [vmem:[#allocation2 + $0x158] ss:$24 sps:$4 sm:$0xff]   ;;  %v5971_v11 = vld [vmem:[#allocation2 + $0x128] ss:$24 sps:$4 sm:$0xff]  }
  0x70   :  { %v5968_v9 = vld [vmem:[#allocation2 + $0x720] ss:$24 sps:$4 sm:$0xff]   ;;  %v5973_v10 = vld [vmem:[#allocation2 + $0x12c] ss:$24 sps:$4 sm:$0xff]   ;;  %v5974_v14 = vld [vmem:[#allocation2 + $0x6f0] ss:$24 sps:$4 sm:$0xff]  }
  0x71   :  { %2049 = vmatpush1.bf16.msra.mxu0 %v5898_v26  ;;  %v5976_v12 = vld [vmem:[#allocation2 + $0x6f4] ss:$24 sps:$4 sm:$0xff]   ;;  %v7053_v16 = vld [vmem:[%s8687_s0 + $0x20] ss:$16 sps:$4 sm:$0xff]   ;;  %v5982_v19 = vld [vmem:[#allocation2 + $0x6c4] ss:$24 sps:$4 sm:$0xff]  }
  0x72   :  { %2050 = vmatprep.subr.bf16.mxu0 %v5902_v27  ;;  %2120 = vmatpush1.bf16.msra.mxu1 %v5901_v28  ;;  %v7047_v13 = vld [vmem:[%s8687_s0 + $0x24] ss:$16 sps:$4 sm:$0xff]   ;;  %v7058_v17 = vld [vmem:[%s8687_s0 + $0x2c] ss:$16 sps:$4 sm:$0xff]   ;;  %v5977_v18 = vld [vmem:[#allocation2 + $0xf8] ss:$24 sps:$4 sm:$0xff]  }
  0x73   :  { %2121 = vmatprep.subr.bf16.mxu1 %v5905_v29  ;;  %v5979_v15 = vld [vmem:[#allocation2 + $0xfc] ss:$24 sps:$4 sm:$0xff]   ;;  %v7064_v20 = vld [vmem:[%s8687_s0 + $0x28] ss:$16 sps:$4 sm:$0xff]   ;;  %v5985_v22 = vld [vmem:[#allocation2 + $0xcc] ss:$24 sps:$4 sm:$0xff]  }
  0x74   :  { %v5980_v21 = vld [vmem:[#allocation2 + $0x6c0] ss:$24 sps:$4 sm:$0xff]   ;;  %v5988_v24 = vld [vmem:[#allocation2 + $0x694] ss:$24 sps:$4 sm:$0xff]   ;;  %v5986_v26 = vld [vmem:[#allocation2 + $0x690] ss:$24 sps:$4 sm:$0xff]  }
  0x75   :  { %2051 = vmatpush1.bf16.msra.mxu0 %v5904_v30  ;;  %v5983_v23 = vld [vmem:[#allocation2 + $0xc8] ss:$24 sps:$4 sm:$0xff]   ;;  %v7071_v25 = vld [vmem:[%s8687_s0 + $0x44] ss:$16 sps:$4 sm:$0xff]   ;;  %v7082_v29 = vld [vmem:[%s8687_s0 + $0x4c] ss:$16 sps:$4 sm:$0xff]  }
  0x76   :  { %2052 = vmatprep.subr.bf16.mxu0 %v5908_v31  ;;  %2122 = vmatpush1.bf16.msra.mxu1 %v5907_v32  ;;  %v5991_v27 = vld [vmem:[#allocation2 + $0x9c] ss:$24 sps:$4 sm:$0xff]   ;;  %v7077_v28 = vld [vmem:[%s8687_s0 + $0x40] ss:$16 sps:$4 sm:$0xff]   ;;  %v7088_v32 = vld [vmem:[%s8687_s0 + $0x48] ss:$16 sps:$4 sm:$0xff]  }
  0x77   :  { %2123 = vmatprep.subr.bf16.mxu1 %v5911_v33  ;;  %v5989_v30 = vld [vmem:[#allocation2 + $0x98] ss:$24 sps:$4 sm:$0xff]   ;;  %v5994_v31 = vld [vmem:[#allocation2 + $0x664] ss:$24 sps:$4 sm:$0xff]   ;;  %vm2710_vm0 = vcmask 1040384  }
  0x78   :  { %v5997_v33 = vld [vmem:[#allocation2 + $0x6c] ss:$24 sps:$4 sm:$0xff]  }
  0x79   :  { %2053 = vmatpush2.bf16.msra.mxu0 %v5910_v34  ;;  %v5992_v34 = vld [vmem:[#allocation2 + $0x660] ss:$24 sps:$4 sm:$0xff]  }
  0x7a   :  { %2054 = vmatprep.subr.bf16.mxu0 %v5914_v35  ;;  %2124 = vmatpush2.bf16.msra.mxu1 %v5913_v36  ;;  %v6000_v35 = vld [vmem:[#allocation2 + $0x634] ss:$24 sps:$4 sm:$0xff]   ;;  %v445_v36 = vld [vmem:[%s8687_s0 + $0x60] sm:$0x11] }
  0x7b   :  { %2125 = vmatprep.subr.bf16.mxu1 %v5917_v37  ;;  %v5995_v37 = vld [vmem:[#allocation2 + $0x68] ss:$24 sps:$4 sm:$0xff]  }
  0x7d   :  { %2055 = vmatpush2.bf16.msra.mxu0 %v5916_v38  ;;  %v7095_v38 = vcombine.high %v445_v36, %v445_v36 }
  0x7e   :  { %2056 = vmatprep.subr.bf16.mxu0 %v5920_v39  ;;  %2126 = vmatpush2.bf16.msra.mxu1 %v5919_v40  ;;  %v6003_v39 = vld [vmem:[#allocation2 + $0x3c] ss:$24 sps:$4 sm:$0xff]   ;;  %v7097_v40 = vcombine.low %v445_v36, %v445_v36  ;;  %v6080_v36 = vld [vmem:[#allocation2 + $0x758] ss:$24 sps:$4 sm:$0xff]  }
  0x7f   :  { %2127 = vmatprep.subr.bf16.mxu1 %v5923_v41  ;;  %v5998_v41 = vld [vmem:[#allocation2 + $0x630] ss:$24 sps:$4 sm:$0xff]  }
  0x81   :  { %2057 = vmatpush2.bf16.msra.mxu0 %v5922_v42  ;;  %v6006_v42 = vld [vmem:[#allocation2 + $0x604] ss:$24 sps:$4 sm:$0xff]  }
  0x82   :  { %2058 = vmatprep.subr.bf16.mxu0 %v5926_v43  ;;  %2128 = vmatpush2.bf16.msra.mxu1 %v5925_v44  ;;  %v446_v43 = vld [vmem:[%s8687_s0 + $0x68] sm:$0x11]  ;;  %v6001_v44 = vld [vmem:[#allocation2 + $0x38] ss:$24 sps:$4 sm:$0xff]  }
  0x83   :  { %2129 = vmatprep.subr.bf16.mxu1 %v5929_v45  ;;  %v7103_v45 = vcombine.high %v446_v43, %v446_v43 }
  0x85   :  { %2059 = vmatpush2.bf16.msra.mxu0 %v5928_v46  ;;  %v7105_v46 = vcombine.low %v446_v43, %v446_v43  ;;  %v7133_v43 = vld [vmem:[%s8688_s1 + $0x10] ss:$8 sps:$4 sm:$0xff]  }
  0x86   :  { %2060 = vmatprep.subr.bf16.mxu0 %v5932_v48  ;;  %2130 = vmatpush2.bf16.msra.mxu1 %v5931_v49  ;;  %v6009_v48 = vld [vmem:[#allocation2 + $0xc] ss:$24 sps:$4 sm:$0xff]   ;;  %v6004_v49 = vld [vmem:[#allocation2 + $0x600] ss:$24 sps:$4 sm:$0xff]  }
  0x87   :  { %2131 = vmatprep.subr.bf16.mxu1 %v5935_v50  ;;  %v6012_v50 = vld [vmem:[#allocation2 + $0x8d4] ss:$24 sps:$4 sm:$0xff]  }
  0x89   :  { %2061 = vmatpush2.bf16.msra.mxu0 %v5934_v52  ;;  %v6007_v52 = vld [vmem:[#allocation2 + $0x8] ss:$24 sps:$4 sm:$0xff]  }
  0x8a   :  { %2062 = vmatprep.subr.bf16.mxu0 %v5938_v53  ;;  %2132 = vmatpush2.bf16.msra.mxu1 %v5937_v54  ;;  %v6010_v53 = vld [vmem:[#allocation2 + $0x8d0] ss:$24 sps:$4 sm:$0xff]   ;;  %v6017_v54 = vld [vmem:[#allocation2 + $0x2dc] ss:$24 sps:$4 sm:$0xff]  }
  0x8b   :  { %2133 = vmatprep.subr.bf16.mxu1 %v5941_v55  ;;  %v7114_v55 = vld [vmem:[%s8688_s1 + $0x4] ss:$8 sps:$4 sm:$0xff]  }
  0x8d   :  { %2063 = vmatpush2.bf16.msra.mxu0 %v5940_v56  ;;  %v6023_v56 = vld [vmem:[#allocation2 + $0x8a4] ss:$24 sps:$4 sm:$0xff]  }
  0x8e   :  { %2064 = vmatprep.subr.bf16.mxu0 %v5944_v57  ;;  %2134 = vmatpush2.bf16.msra.mxu1 %v5943_v58  ;;  %v6015_v57 = vld [vmem:[#allocation2 + $0x2d8] ss:$24 sps:$4 sm:$0xff]   ;;  %v6027_v58 = vld [vmem:[#allocation2 + $0x2ac] ss:$24 sps:$4 sm:$0xff]  }
  0x8f   :  { %2135 = vmatprep.subr.bf16.mxu1 %v5947_v59  ;;  %v6021_v59 = vld [vmem:[#allocation2 + $0x8a0] ss:$24 sps:$4 sm:$0xff]  }
  0x91   :  { %2065 = vmatpush2.bf16.msra.mxu0 %v5946_v60  ;;  %v6025_v60 = vld [vmem:[#allocation2 + $0x2a8] ss:$24 sps:$4 sm:$0xff]  }
  0x92   :  { %2066 = vmatprep.subr.bf16.mxu0 %v5950_v61  ;;  %2136 = vmatpush2.bf16.msra.mxu1 %v5949_v62  ;;  %v6035_v61 = vld [vmem:[#allocation2 + $0x27c] ss:$24 sps:$4 sm:$0xff]   ;;  %v6028_v62 = vld [vmem:[#allocation2 + $0x870] ss:$24 sps:$4 sm:$0xff]  }
  0x93   :  { %2137 = vmatprep.subr.bf16.mxu1 %v5953_v63  ;;  %v6041_v63 = vld [vmem:[#allocation2 + $0x844] ss:$24 sps:$4 sm:$0xff]  }
  0x95   :  { %2067 = vmatpush2.bf16.msra.mxu0 %v5952_v0  ;;  %v6033_v0 = vld [vmem:[#allocation2 + $0x278] ss:$24 sps:$4 sm:$0xff]  }
  0x96   :  { %2178 = vmatprep.subr.bf16.mxu0 %v5961_v1  ;;  %2138 = vmatpush2.bf16.msra.mxu1 %v5957_v2  ;;  %v6045_v1 = vld [vmem:[#allocation2 + $0x24c] ss:$24 sps:$4 sm:$0xff]   ;;  %v6039_v2 = vld [vmem:[#allocation2 + $0x840] ss:$24 sps:$4 sm:$0xff]  }
  0x97   :  { %2249 = vmatprep.subr.bf16.mxu1 %v5967_v4  ;;  %v6048_v4 = vld [vmem:[#allocation2 + $0x814] ss:$24 sps:$4 sm:$0xff]  }
  0x98   :  { %2069 = vmatmul.mubr.bf16.vlgmr.msra.gmra.mxu0 %v7035_v3 }
  0x99   :  { %2179 = vmatpush1.bf16.msra.mxu0 %v5959_v5  ;;  %2140 = vmatmul.mubr.bf16.vlgmr.msra.gmra.mxu1 %v7040_v6  ;;  %v6043_v5 = vld [vmem:[#allocation2 + $0x248] ss:$24 sps:$4 sm:$0xff]  }
  0x9a   :  { %2180 = vmatprep.subr.bf16.mxu0 %v5970_v7  ;;  %2250 = vmatpush1.bf16.msra.mxu1 %v5965_v8  ;;  %v6052_v7 = vld [vmem:[#allocation2 + $0x21c] ss:$24 sps:$4 sm:$0xff]   ;;  %v6046_v8 = vld [vmem:[#allocation2 + $0x810] ss:$24 sps:$4 sm:$0xff]  }
  0x9b   :  { %2251 = vmatprep.subr.bf16.mxu1 %v5973_v10  ;;  %2078 = vmatprep.mubr.bf16.mxu0 %v7047_v13  ;;  %v6050_v10 = vld [vmem:[#allocation2 + $0x218] ss:$24 sps:$4 sm:$0xff]  }
  0x9c   :  { %2149 = vmatprep.mubr.bf16.mxu1 %v7058_v17 }
  0x9d   :  { %2181 = vmatpush1.bf16.msra.mxu0 %v5968_v9  ;;  %v6056_v9 = vld [vmem:[#allocation2 + $0x7e4] ss:$24 sps:$4 sm:$0xff]  }
  0x9e   :  { %2182 = vmatprep.subr.bf16.mxu0 %v5976_v12  ;;  %2252 = vmatpush1.bf16.msra.mxu1 %v5971_v11  ;;  %v6059_v11 = vld [vmem:[#allocation2 + $0x1ec] ss:$24 sps:$4 sm:$0xff]   ;;  %v6054_v12 = vld [vmem:[#allocation2 + $0x7e0] ss:$24 sps:$4 sm:$0xff]  }
  0x9f   :  { %2253 = vmatprep.subr.bf16.mxu1 %v5979_v15  ;;  %v6057_v15 = vld [vmem:[#allocation2 + $0x1e8] ss:$24 sps:$4 sm:$0xff]  }
  0xa0   :  { %2079 = vmatmul.mubr.bf16.gmra.mxu0 %v7053_v16 }
  0xa1   :  { %2183 = vmatpush1.bf16.msra.mxu0 %v5974_v14  ;;  %2150 = vmatmul.mubr.bf16.gmra.mxu1 %v7064_v20  ;;  %v6063_v14 = vld [vmem:[#allocation2 + $0x7b4] ss:$24 sps:$4 sm:$0xff]  }
  0xa2   :  { %2184 = vmatprep.subr.bf16.mxu0 %v5982_v19  ;;  %2254 = vmatpush1.bf16.msra.mxu1 %v5977_v18  ;;  %v6067_v18 = vld [vmem:[#allocation2 + $0x1bc] ss:$24 sps:$4 sm:$0xff]   ;;  %v6061_v19 = vld [vmem:[#allocation2 + $0x7b0] ss:$24 sps:$4 sm:$0xff]  }
  0xa3   :  { %2255 = vmatprep.subr.bf16.mxu1 %v5985_v22  ;;  %2088 = vmatprep.mubr.bf16.mxu0 %v7071_v25  ;;  %v6065_v22 = vld [vmem:[#allocation2 + $0x1b8] ss:$24 sps:$4 sm:$0xff]  }
  0xa4   :  { %2159 = vmatprep.mubr.bf16.mxu1 %v7082_v29 }
  0xa5   :  { %2185 = vmatpush1.bf16.msra.mxu0 %v5980_v21  ;;  %v6070_v21 = vld [vmem:[#allocation2 + $0x784] ss:$24 sps:$4 sm:$0xff]  }
  0xa6   :  { %2186 = vmatprep.subr.bf16.mxu0 %v5988_v24  ;;  %2256 = vmatpush1.bf16.msra.mxu1 %v5983_v23  ;;  %v6073_v23 = vld [vmem:[#allocation2 + $0x18c] ss:$24 sps:$4 sm:$0xff]   ;;  %v6068_v24 = vld [vmem:[#allocation2 + $0x780] ss:$24 sps:$4 sm:$0xff]  }
  0xa7   :  { %2257 = vmatprep.subr.bf16.mxu1 %v5991_v27  ;;  %v6079_v27 = vld [vmem:[#allocation2 + $0x45c] ss:$24 sps:$4 sm:$0xff]  }
  0xa8   :  { %2089 = vmatmul.mubr.bf16.gmra.mxu0 %v7077_v28 }
  0xa9   :  { %2187 = vmatpush1.bf16.msra.mxu0 %v5986_v26  ;;  %2160 = vmatmul.mubr.bf16.gmra.mxu1 %v7088_v32  ;;  %v6071_v26 = vld [vmem:[#allocation2 + $0x188] ss:$24 sps:$4 sm:$0xff]  }
  0xaa   :  { %2188 = vmatprep.subr.bf16.mxu0 %v5994_v31  ;;  %2258 = vmatpush1.bf16.msra.mxu1 %v5989_v30  ;;  %v7120_v30 = vld [vmem:[%s8688_s1] ss:$8 sps:$4 sm:$0xff]   ;;  %v6082_v31 = vld [vmem:[#allocation2 + $0x75c] ss:$24 sps:$4 sm:$0xff]  }
  0xab   :  { %2259 = vmatprep.subr.bf16.mxu1 %v5997_v33  ;;  %2098 = vmatprep.mubr.bf16.mxu0 %v7095_v38  ;;  %v6077_v33 = vld [vmem:[#allocation2 + $0x458] ss:$24 sps:$4 sm:$0xff]  }
  0xac   :  { %2169 = vmatprep.mubr.bf16.mxu1 %v7103_v45 }
  0xad   :  { %2189 = vmatpush1.bf16.msra.mxu0 %v5992_v34  ;;  %v7125_v34 = vld [vmem:[%s8688_s1 + $0x14] ss:$8 sps:$4 sm:$0xff]  }
  0xae   :  { %2190 = vmatprep.subr.bf16.mxu0 %v6000_v35  ;;  %2260 = vmatpush1.bf16.msra.mxu1 %v5995_v37  ;;  %v6085_v35 = vld [vmem:[#allocation2 + $0x42c] ss:$24 sps:$4 sm:$0xff]  }
  0xaf   :  { %2261 = vmatprep.subr.bf16.mxu1 %v6003_v39  ;;  %v6088_v37 = vld [vmem:[#allocation2 + $0x72c] ss:$24 sps:$4 sm:$0xff]   ;;  %v6083_v39 = vld [vmem:[#allocation2 + $0x428] ss:$24 sps:$4 sm:$0xff]  }
  0xb0   :  { %2099 = vmatmul.mubr.bf16.gmra.mxu0 %v7097_v40 }
  0xb1   :  { %2191 = vmatpush1.bf16.msra.mxu0 %v5998_v41  ;;  %2170 = vmatmul.mubr.bf16.gmra.mxu1 %v7105_v46  ;;  %v6086_v41 = vld [vmem:[#allocation2 + $0x728] ss:$24 sps:$4 sm:$0xff]  }
  0xb2   :  { %2192 = vmatprep.subr.bf16.mxu0 %v6006_v42  ;;  %2262 = vmatpush1.bf16.msra.mxu1 %v6001_v44  ;;  %v6094_v42 = vld [vmem:[#allocation2 + $0x3fc] ss:$24 sps:$4 sm:$0xff]  }
  0xb3   :  { %2281 = vmatprep.mubr.bf16.mxu1 %v7023_v47  ;;  %2263 = vmatprep.subr.bf16.mxu1 %v6009_v48  ;;  %v6030_v47 = vld [vmem:[#allocation2 + $0x874] ss:$24 sps:$4 sm:$0xff]   ;;  %v6092_v48 = vld [vmem:[#allocation2 + $0x3f8] ss:$24 sps:$4 sm:$0xff]  }
  0xb4   :  { %2210 = vmatprep.mubr.bf16.mxu0 %v7114_v55  ;;  %v6097_v44 = vld [vmem:[#allocation2 + $0x6fc] ss:$24 sps:$4 sm:$0xff]  }
  0xb5   :  { %2193 = vmatpush1.bf16.msra.mxu0 %v6004_v49  ;;  %v7139_v49 = vld [vmem:[%s8688_s1 + $0x24] ss:$8 sps:$4 sm:$0xff]  }
  0xb6   :  { %2194 = vmatprep.subr.bf16.mxu0 %v6012_v50  ;;  %2264 = vmatpush1.bf16.msra.mxu1 %v6007_v52  ;;  %v6095_v50 = vld [vmem:[#allocation2 + $0x6f8] ss:$24 sps:$4 sm:$0xff]   ;;  %v6103_v52 = vld [vmem:[#allocation2 + $0x6cc] ss:$24 sps:$4 sm:$0xff]  }
  0xb7   :  { %2265 = vmatprep.subr.bf16.mxu1 %v6017_v54  ;;  %v6109_v54 = vld [vmem:[#allocation2 + $0x39c] ss:$24 sps:$4 sm:$0xff]  }
  0xb9   :  { %2195 = vmatpush2.bf16.msra.mxu0 %v6010_v53  ;;  %v6098_v53 = vld [vmem:[#allocation2 + $0x3c8] ss:$24 sps:$4 sm:$0xff]  }
  0xba   :  { %2196 = vmatprep.subr.bf16.mxu0 %v6023_v56  ;;  %2266 = vmatpush2.bf16.msra.mxu1 %v6015_v57  ;;  %v453_v56 = vld [vmem:[%s8688_s1 + $0x30] sm:$0x11]  ;;  %v7150_v57 = vld [vmem:[%s8688_s1 + $0x20] ss:$8 sps:$4 sm:$0xff]  }
  0xbb   :  { %2267 = vmatprep.subr.bf16.mxu1 %v6027_v58  ;;  %v6112_v58 = vld [vmem:[#allocation2 + $0x69c] ss:$24 sps:$4 sm:$0xff]  }
  0xbd   :  { %2197 = vmatpush2.bf16.msra.mxu0 %v6021_v59  ;;  %v6107_v59 = vld [vmem:[#allocation2 + $0x398] ss:$24 sps:$4 sm:$0xff]  }
  0xbe   :  { %2198 = vmatprep.subr.bf16.mxu0 %v6030_v47  ;;  %2268 = vmatpush2.bf16.msra.mxu1 %v6025_v60  ;;  %v7153_v47 = vcombine.high %v453_v56, %v453_v56  ;;  %v6115_v60 = vld [vmem:[#allocation2 + $0x36c] ss:$24 sps:$4 sm:$0xff]  }
  0xbf   :  { %2269 = vmatprep.subr.bf16.mxu1 %v6035_v61  ;;  %v6110_v61 = vld [vmem:[#allocation2 + $0x698] ss:$24 sps:$4 sm:$0xff]  }
  0xc1   :  { %2199 = vmatpush2.bf16.msra.mxu0 %v6028_v62  ;;  %v6113_v62 = vld [vmem:[#allocation2 + $0x368] ss:$24 sps:$4 sm:$0xff]  }
  0xc2   :  { %2200 = vmatprep.subr.bf16.mxu0 %v6041_v63  ;;  %2270 = vmatpush2.bf16.msra.mxu1 %v6033_v0  ;;  %v6116_v63 = vld [vmem:[#allocation2 + $0x668] ss:$24 sps:$4 sm:$0xff]   ;;  %v7159_v0 = vcombine.low %v453_v56, %v453_v56 }
  0xc3   :  { %2271 = vmatprep.subr.bf16.mxu1 %v6045_v1  ;;  %v6126_v1 = vld [vmem:[#allocation2 + $0x63c] ss:$24 sps:$4 sm:$0xff]   ;;  %v6178_v56 = vld [vmem:[#allocation2 + $0x788] ss:$24 sps:$4 sm:$0xff]  }
  0xc5   :  { %2201 = vmatpush2.bf16.msra.mxu0 %v6039_v2  ;;  %v6121_v2 = vld [vmem:[#allocation2 + $0x338] ss:$24 sps:$4 sm:$0xff]  }
  0xc6   :  { %2202 = vmatprep.subr.bf16.mxu0 %v6048_v4  ;;  %2272 = vmatpush2.bf16.msra.mxu1 %v6043_v5  ;;  %v6129_v4 = vld [vmem:[#allocation2 + $0x30c] ss:$24 sps:$4 sm:$0xff]   ;;  %v6124_v5 = vld [vmem:[#allocation2 + $0x638] ss:$24 sps:$4 sm:$0xff]  }
  0xc7   :  { %2273 = vmatprep.subr.bf16.mxu1 %v6052_v7  ;;  %v6132_v7 = vld [vmem:[#allocation2 + $0x60c] ss:$24 sps:$4 sm:$0xff]  }
  0xc9   :  { %2203 = vmatpush2.bf16.msra.mxu0 %v6046_v8  ;;  %v6135_v8 = vld [vmem:[#allocation2 + $0x5dc] ss:$24 sps:$4 sm:$0xff]  }
  0xca   :  { %2204 = vmatprep.subr.bf16.mxu0 %v6056_v9  ;;  %2274 = vmatpush2.bf16.msra.mxu1 %v6050_v10  ;;  %v6130_v9 = vld [vmem:[#allocation2 + $0x608] ss:$24 sps:$4 sm:$0xff]   ;;  %v6138_v10 = vld [vmem:[#allocation2 + $0x8dc] ss:$24 sps:$4 sm:$0xff]  }
  0xcb   :  { %2275 = vmatprep.subr.bf16.mxu1 %v6059_v11  ;;  %v6133_v11 = vld [vmem:[#allocation2 + $0x5d8] ss:$24 sps:$4 sm:$0xff]  }
  0xcd   :  { %2205 = vmatpush2.bf16.msra.mxu0 %v6054_v12  ;;  %v6141_v12 = vld [vmem:[#allocation2 + $0x5ac] ss:$24 sps:$4 sm:$0xff]  }
  0xce   :  { %2206 = vmatprep.subr.bf16.mxu0 %v6063_v14  ;;  %2276 = vmatpush2.bf16.msra.mxu1 %v6057_v15  ;;  %v6136_v14 = vld [vmem:[#allocation2 + $0x8d8] ss:$24 sps:$4 sm:$0xff]   ;;  %v6144_v15 = vld [vmem:[#allocation2 + $0x8ac] ss:$24 sps:$4 sm:$0xff]  }
  0xcf   :  { %2277 = vmatprep.subr.bf16.mxu1 %v6067_v18  ;;  %v6147_v18 = vld [vmem:[#allocation2 + $0x57c] ss:$24 sps:$4 sm:$0xff]  }
  0xd1   :  { %2207 = vmatpush2.bf16.msra.mxu0 %v6061_v19  ;;  %v6142_v19 = vld [vmem:[#allocation2 + $0x8a8] ss:$24 sps:$4 sm:$0xff]  }
  0xd2   :  { %2208 = vmatprep.subr.bf16.mxu0 %v6070_v21  ;;  %2278 = vmatpush2.bf16.msra.mxu1 %v6065_v22  ;;  %v6150_v21 = vld [vmem:[#allocation2 + $0x87c] ss:$24 sps:$4 sm:$0xff]   ;;  %v6153_v22 = vld [vmem:[#allocation2 + $0x54c] ss:$24 sps:$4 sm:$0xff]  }
  0xd3   :  { %2279 = vmatprep.subr.bf16.mxu1 %v6073_v23  ;;  %v6148_v23 = vld [vmem:[#allocation2 + $0x878] ss:$24 sps:$4 sm:$0xff]  }
  0xd5   :  { %2209 = vmatpush2.bf16.msra.mxu0 %v6068_v24  ;;  %v6156_v24 = vld [vmem:[#allocation2 + $0x84c] ss:$24 sps:$4 sm:$0xff]  }
  0xd6   :  { %2320 = vmatprep.subr.bf16.mxu0 %v6079_v27  ;;  %2280 = vmatpush2.bf16.msra.mxu1 %v6071_v26  ;;  %v6151_v26 = vld [vmem:[#allocation2 + $0x548] ss:$24 sps:$4 sm:$0xff]   ;;  %v6159_v27 = vld [vmem:[#allocation2 + $0x51c] ss:$24 sps:$4 sm:$0xff]  }
  0xd7   :  { %2391 = vmatprep.subr.bf16.mxu1 %v6082_v31  ;;  %v6154_v31 = vld [vmem:[#allocation2 + $0x848] ss:$24 sps:$4 sm:$0xff]  }
  0xd8   :  { %2211 = vmatmul.mubr.bf16.vlgmr.msra.gmra.mxu0 %v7120_v30 }
  0xd9   :  { %2321 = vmatpush1.bf16.msra.mxu0 %v6077_v33  ;;  %2220 = vmatprep.mubr.bf16.mxu0 %v7125_v34  ;;  %v6162_v33 = vld [vmem:[#allocation2 + $0x81c] ss:$24 sps:$4 sm:$0xff]  }
  0xda   :  { %2282 = vmatmul.mubr.bf16.vlgmr.msra.gmra.mxu1 %v7035_v3  ;;  %2322 = vmatprep.subr.bf16.mxu0 %v6085_v35  ;;  %v6100_v3 = vld [vmem:[#allocation2 + $0x3cc] ss:$24 sps:$4 sm:$0xff]   ;;  %v6157_v35 = vld [vmem:[#allocation2 + $0x518] ss:$24 sps:$4 sm:$0xff]  }
  0xdb   :  { %2392 = vmatpush1.bf16.msra.mxu1 %v6080_v36  ;;  %2291 = vmatprep.mubr.bf16.mxu1 %v7047_v13  ;;  %v6101_v13 = vld [vmem:[#allocation2 + $0x6c8] ss:$24 sps:$4 sm:$0xff]   ;;  %v6165_v36 = vld [vmem:[#allocation2 + $0x4ec] ss:$24 sps:$4 sm:$0xff]  }
  0xdc   :  { %2393 = vmatprep.subr.bf16.mxu1 %v6088_v37  ;;  %v6160_v37 = vld [vmem:[#allocation2 + $0x818] ss:$24 sps:$4 sm:$0xff]  }
  0xdd   :  { %2323 = vmatpush1.bf16.msra.mxu0 %v6083_v39  ;;  %v6168_v39 = vld [vmem:[#allocation2 + $0x7ec] ss:$24 sps:$4 sm:$0xff]  }
  0xde   :  { %2324 = vmatprep.subr.bf16.mxu0 %v6094_v42  ;;  %v6171_v42 = vld [vmem:[#allocation2 + $0x4bc] ss:$24 sps:$4 sm:$0xff]  }
  0xdf   :  { %2394 = vmatpush1.bf16.msra.mxu1 %v6086_v41  ;;  %v6163_v41 = vld [vmem:[#allocation2 + $0x4e8] ss:$24 sps:$4 sm:$0xff]  }
  0xe0   :  { %2221 = vmatmul.mubr.bf16.gmra.mxu0 %v7133_v43  ;;  %2395 = vmatprep.subr.bf16.mxu1 %v6097_v44  ;;  %v6166_v44 = vld [vmem:[#allocation2 + $0x7e8] ss:$24 sps:$4 sm:$0xff]  }
  0xe1   :  { %2325 = vmatpush1.bf16.msra.mxu0 %v6092_v48  ;;  %2230 = vmatprep.mubr.bf16.mxu0 %v7139_v49  ;;  %v6174_v48 = vld [vmem:[#allocation2 + $0x7bc] ss:$24 sps:$4 sm:$0xff]  }
  0xe2   :  { %2326 = vmatprep.subr.bf16.mxu0 %v6100_v3  ;;  %2292 = vmatmul.mubr.bf16.gmra.mxu1 %v7053_v16  ;;  %v6118_v16 = vld [vmem:[#allocation2 + $0x66c] ss:$24 sps:$4 sm:$0xff]   ;;  %v6169_v3 = vld [vmem:[#allocation2 + $0x4b8] ss:$24 sps:$4 sm:$0xff]  }
  0xe3   :  { %2396 = vmatpush1.bf16.msra.mxu1 %v6095_v50  ;;  %2301 = vmatprep.mubr.bf16.mxu1 %v7071_v25  ;;  %v6123_v25 = vld [vmem:[#allocation2 + $0x33c] ss:$24 sps:$4 sm:$0xff]   ;;  %v6177_v50 = vld [vmem:[#allocation2 + $0x48c] ss:$24 sps:$4 sm:$0xff]  }
  0xe4   :  { %2397 = vmatprep.subr.bf16.mxu1 %v6103_v52  ;;  %v6172_v52 = vld [vmem:[#allocation2 + $0x7b8] ss:$24 sps:$4 sm:$0xff]  }
  0xe5   :  { %2327 = vmatpush1.bf16.msra.mxu0 %v6098_v53  ;;  %v6180_v53 = vld [vmem:[#allocation2 + $0x78c] ss:$24 sps:$4 sm:$0xff]  }
  0xe6   :  { %2328 = vmatprep.subr.bf16.mxu0 %v6109_v54  ;;  %v6183_v54 = vld [vmem:[#allocation2 + $0x164] ss:$24 sps:$4 sm:$0xff]  }
  0xe7   :  { %2398 = vmatpush1.bf16.msra.mxu1 %v6101_v13  ;;  %v6175_v13 = vld [vmem:[#allocation2 + $0x488] ss:$24 sps:$4 sm:$0xff]  }
  0xe8   :  { %2231 = vmatmul.mubr.bf16.gmra.mxu0 %v7150_v57  ;;  %2399 = vmatprep.subr.bf16.mxu1 %v6112_v58  ;;  %v6186_v58 = vld [vmem:[#allocation2 + $0x464] ss:$24 sps:$4 sm:$0xff]  }
  0xe9   :  { %2329 = vmatpush1.bf16.msra.mxu0 %v6107_v59  ;;  %2240 = vmatprep.mubr.bf16.mxu0 %v7153_v47  ;;  %v6181_v59 = vld [vmem:[#allocation2 + $0x160] ss:$24 sps:$4 sm:$0xff]  }
  0xea   :  { %2330 = vmatprep.subr.bf16.mxu0 %v6115_v60  ;;  %2302 = vmatmul.mubr.bf16.gmra.mxu1 %v7077_v28  ;;  %v6127_v28 = vld [vmem:[#allocation2 + $0x308] ss:$24 sps:$4 sm:$0xff]   ;;  %v6189_v60 = vld [vmem:[#allocation2 + $0x134] ss:$24 sps:$4 sm:$0xff]  }
  0xeb   :  { %2400 = vmatpush1.bf16.msra.mxu1 %v6110_v61  ;;  %2311 = vmatprep.mubr.bf16.mxu1 %v7095_v38  ;;  %v6184_v61 = vld [vmem:[#allocation2 + $0x460] ss:$24 sps:$4 sm:$0xff]  }
  0xec   :  { %2401 = vmatprep.subr.bf16.mxu1 %v6118_v16  ;;  %v6192_v16 = vld [vmem:[#allocation2 + $0x434] ss:$24 sps:$4 sm:$0xff]  }
  0xed   :  { %2331 = vmatpush1.bf16.msra.mxu0 %v6113_v62  ;;  %v6187_v62 = vld [vmem:[#allocation2 + $0x130] ss:$24 sps:$4 sm:$0xff]  }
  0xee   :  { %2332 = vmatprep.subr.bf16.mxu0 %v6123_v25  ;;  %v6195_v25 = vld [vmem:[#allocation2 + $0x104] ss:$24 sps:$4 sm:$0xff]  }
  0xef   :  { %2402 = vmatpush1.bf16.msra.mxu1 %v6116_v63  ;;  %v6190_v63 = vld [vmem:[#allocation2 + $0x430] ss:$24 sps:$4 sm:$0xff]  }
  0xf0   :  { %2241 = vmatmul.mubr.bf16.gmra.mxu0 %v7159_v0  ;;  %2403 = vmatprep.subr.bf16.mxu1 %v6126_v1  ;;  %v6198_v1 = vld [vmem:[#allocation2 + $0x404] ss:$24 sps:$4 sm:$0xff]  }
  0xf1   :  { %2333 = vmatpush1.bf16.msra.mxu0 %v6121_v2  ;;  %2352 = vmatprep.mubr.bf16.mxu0 %v7029_v51  ;;  %v6139_v51 = vld [vmem:[#allocation2 + $0x5a8] ss:$24 sps:$4 sm:$0xff]  }
  0xf2   :  { %2334 = vmatprep.subr.bf16.mxu0 %v6129_v4  ;;  %2312 = vmatmul.mubr.bf16.gmra.mxu1 %v7097_v40  ;;  %v6193_v2 = vld [vmem:[#allocation2 + $0x100] ss:$24 sps:$4 sm:$0xff]  }
  0xf3   :  { %2404 = vmatpush1.bf16.msra.mxu1 %v6124_v5  ;;  %2423 = vmatprep.mubr.bf16.mxu1 %v7114_v55  ;;  %v6145_v55 = vld [vmem:[#allocation2 + $0x578] ss:$24 sps:$4 sm:$0xff]  }
  0xf4   :  { %2405 = vmatprep.subr.bf16.mxu1 %v6132_v7  ;;  %v6196_v4 = vld [vmem:[#allocation2 + $0x400] ss:$24 sps:$4 sm:$0xff]   ;;  %v6202_v5 = vld [vmem:[#allocation2 + $0x3d0] ss:$24 sps:$4 sm:$0xff]  }
  0xf5   :  { %2335 = vmatpush1.bf16.msra.mxu0 %v6127_v28  ;;  %v6205_v7 = vld [vmem:[#allocation2 + $0xa0] ss:$24 sps:$4 sm:$0xff]   ;;  %v6210_v28 = vld [vmem:[#allocation2 + $0x3a4] ss:$24 sps:$4 sm:$0xff]  }
  0xf6   :  { %2336 = vmatprep.subr.bf16.mxu0 %v6135_v8  ;;  %v6213_v8 = vld [vmem:[#allocation2 + $0x74] ss:$24 sps:$4 sm:$0xff]  }
  0xf7   :  { %2406 = vmatpush1.bf16.msra.mxu1 %v6130_v9  ;;  %v6216_v9 = vld [vmem:[#allocation2 + $0x374] ss:$24 sps:$4 sm:$0xff]  }
  0xf8   :  { %2407 = vmatprep.subr.bf16.mxu1 %v6138_v10  ;;  %v6211_v10 = vld [vmem:[#allocation2 + $0x70] ss:$24 sps:$4 sm:$0xff]  }
  0xf9   :  { %2337 = vmatpush2.bf16.msra.mxu0 %v6133_v11  ;;  %v6217_v11 = vld [vmem:[#allocation2 + $0x40] ss:$24 sps:$4 sm:$0xff]  }
  0xfa   :  { %2338 = vmatprep.subr.bf16.mxu0 %v6141_v12  ;;  %v6225_v12 = vld [vmem:[#allocation2 + $0x14] ss:$24 sps:$4 sm:$0xff]  }
  0xfb   :  { %2408 = vmatpush2.bf16.msra.mxu1 %v6136_v14  ;;  %v6220_v14 = vld [vmem:[#allocation2 + $0x340] ss:$24 sps:$4 sm:$0xff]  }
  0xfc   :  { %2409 = vmatprep.subr.bf16.mxu1 %v6144_v15  ;;  %v6223_v15 = vld [vmem:[#allocation2 + $0x10] ss:$24 sps:$4 sm:$0xff]  }
  0xfd   :  { %2339 = vmatpush2.bf16.msra.mxu0 %v6139_v51  ;;  %v6231_v51 = vld [vmem:[#allocation2 + $0x2e4] ss:$24 sps:$4 sm:$0xff]  }
  0xfe   :  { %2340 = vmatprep.subr.bf16.mxu0 %v6147_v18  ;;  %v6458_v18 = vld [vmem:[%s8687_s0 + $0x4] ss:$16 sps:$4 sm:$0xff]  }
  0xff   :  { %2410 = vmatpush2.bf16.msra.mxu1 %v6142_v19  ;;  %v6234_v19 = vld [vmem:[#allocation2 + $0x5e4] ss:$24 sps:$4 sm:$0xff]  }
 0x100   :  { %2411 = vmatprep.subr.bf16.mxu1 %v6150_v21  ;;  %v6229_v21 = vld [vmem:[#allocation2 + $0x2e0] ss:$24 sps:$4 sm:$0xff]  }
 0x101   :  { %2341 = vmatpush2.bf16.msra.mxu0 %v6145_v55  ;;  %v6459_v55 = vld [vmem:[%s8687_s0 + $0xc] ss:$16 sps:$4 sm:$0xff]  }
 0x102   :  { %2342 = vmatprep.subr.bf16.mxu0 %v6153_v22  ;;  %v6237_v22 = vld [vmem:[#allocation2 + $0x2b4] ss:$24 sps:$4 sm:$0xff]  }
 0x103   :  { %2412 = vmatpush2.bf16.msra.mxu1 %v6148_v23  ;;  %v6232_v23 = vld [vmem:[#allocation2 + $0x5e0] ss:$24 sps:$4 sm:$0xff]  }
 0x104   :  { %2413 = vmatprep.subr.bf16.mxu1 %v6156_v24  ;;  %v6240_v24 = vld [vmem:[#allocation2 + $0x5b4] ss:$24 sps:$4 sm:$0xff]  }
 0x105   :  { %2343 = vmatpush2.bf16.msra.mxu0 %v6151_v26  ;;  %v6235_v26 = vld [vmem:[#allocation2 + $0x2b0] ss:$24 sps:$4 sm:$0xff]  }
 0x106   :  { %2344 = vmatprep.subr.bf16.mxu0 %v6159_v27  ;;  %v6243_v27 = vld [vmem:[#allocation2 + $0x284] ss:$24 sps:$4 sm:$0xff]  }
 0x107   :  { %2414 = vmatpush2.bf16.msra.mxu1 %v6154_v31  ;;  %v6238_v31 = vld [vmem:[#allocation2 + $0x5b0] ss:$24 sps:$4 sm:$0xff]  }
 0x108   :  { %2415 = vmatprep.subr.bf16.mxu1 %v6162_v33  ;;  %v6246_v33 = vld [vmem:[#allocation2 + $0x584] ss:$24 sps:$4 sm:$0xff]  }
 0x109   :  { %2345 = vmatpush2.bf16.msra.mxu0 %v6157_v35  ;;  %v6241_v35 = vld [vmem:[#allocation2 + $0x280] ss:$24 sps:$4 sm:$0xff]  }
 0x10a   :  { %2346 = vmatprep.subr.bf16.mxu0 %v6165_v36  ;;  %v6249_v36 = vld [vmem:[#allocation2 + $0x254] ss:$24 sps:$4 sm:$0xff]  }
 0x10b   :  { %2416 = vmatpush2.bf16.msra.mxu1 %v6160_v37  ;;  %v6244_v37 = vld [vmem:[#allocation2 + $0x580] ss:$24 sps:$4 sm:$0xff]  }
 0x10c   :  { %2417 = vmatprep.subr.bf16.mxu1 %v6168_v39  ;;  %v6252_v39 = vld [vmem:[#allocation2 + $0x554] ss:$24 sps:$4 sm:$0xff]  }
 0x10d   :  { %2347 = vmatpush2.bf16.msra.mxu0 %v6163_v41  ;;  %v6247_v41 = vld [vmem:[#allocation2 + $0x250] ss:$24 sps:$4 sm:$0xff]  }
 0x10e   :  { %2348 = vmatprep.subr.bf16.mxu0 %v6171_v42  ;;  %v6250_v42 = vld [vmem:[#allocation2 + $0x550] ss:$24 sps:$4 sm:$0xff]  }
 0x10f   :  { %2418 = vmatpush2.bf16.msra.mxu1 %v6166_v44  ;;  %v6255_v44 = vld [vmem:[#allocation2 + $0x224] ss:$24 sps:$4 sm:$0xff]  }
 0x110   :  { %2419 = vmatprep.subr.bf16.mxu1 %v6174_v48  ;;  %v6258_v48 = vld [vmem:[#allocation2 + $0x524] ss:$24 sps:$4 sm:$0xff]  }
 0x111   :  { %2349 = vmatpush2.bf16.msra.mxu0 %v6169_v3  ;;  %v6253_v3 = vld [vmem:[#allocation2 + $0x220] ss:$24 sps:$4 sm:$0xff]  }
 0x112   :  { %2350 = vmatprep.subr.bf16.mxu0 %v6177_v50  ;;  %v566_v50 = vlaneseq }
 0x113   :  { %2420 = vmatpush2.bf16.msra.mxu1 %v6172_v52  ;;  %v6261_v52 = vld [vmem:[#allocation2 + $0x1f4] ss:$24 sps:$4 sm:$0xff]  }
 0x114   :  { %2421 = vmatprep.subr.bf16.mxu1 %v6180_v53  ;;  %v6256_v53 = vld [vmem:[#allocation2 + $0x520] ss:$24 sps:$4 sm:$0xff]  }
 0x115   :  { %2351 = vmatpush2.bf16.msra.mxu0 %v6175_v13  ;;  %v6264_v13 = vld [vmem:[#allocation2 + $0x4f4] ss:$24 sps:$4 sm:$0xff]  }
 0x116   :  { %2462 = vmatprep.subr.bf16.mxu0 %v6183_v54  ;;  %v6259_v54 = vld [vmem:[#allocation2 + $0x1f0] ss:$24 sps:$4 sm:$0xff]  }
 0x117   :  { %2422 = vmatpush2.bf16.msra.mxu1 %v6178_v56  ;;  %v7185_v56 = vshrl.u32 %v566_v50, 7  ;;  %v6294_v50 = vld [vmem:[#allocation2 + $0x674] ss:$24 sps:$4 sm:$0xff]  }
 0x118   :  { %2353 = vmatmul.mubr.bf16.vlgmr.msra.gmra.mxu0 %v7040_v6  ;;  %2533 = vmatprep.subr.bf16.mxu1 %v6186_v58  ;;  %v6201_v6 = vld [vmem:[#allocation2 + $0xd4] ss:$24 sps:$4 sm:$0xff]   ;;  %v6267_v58 = vld [vmem:[#allocation2 + $0x1c4] ss:$24 sps:$4 sm:$0xff]  }
 0x119   :  { %2463 = vmatpush1.bf16.msra.mxu0 %v6181_v59  ;;  %2362 = vmatprep.mubr.bf16.mxu0 %v7058_v17  ;;  %v6204_v17 = vld [vmem:[#allocation2 + $0x3d4] ss:$24 sps:$4 sm:$0xff]   ;;  %v6262_v59 = vld [vmem:[#allocation2 + $0x4f0] ss:$24 sps:$4 sm:$0xff]  }
 0x11a   :  { %2424 = vmatmul.mubr.bf16.vlgmr.msra.gmra.mxu1 %v7120_v30  ;;  %2464 = vmatprep.subr.bf16.mxu0 %v6189_v60  ;;  %v6199_v30 = vld [vmem:[#allocation2 + $0xd0] ss:$24 sps:$4 sm:$0xff]   ;;  %v6270_v60 = vld [vmem:[#allocation2 + $0x4c4] ss:$24 sps:$4 sm:$0xff]  }
 0x11b   :  { %2534 = vmatpush1.bf16.msra.mxu1 %v6184_v61  ;;  %2433 = vmatprep.mubr.bf16.mxu1 %v7125_v34  ;;  %v6207_v34 = vld [vmem:[#allocation2 + $0xa4] ss:$24 sps:$4 sm:$0xff]   ;;  %v6265_v61 = vld [vmem:[#allocation2 + $0x1c0] ss:$24 sps:$4 sm:$0xff]  }
 0x11c   :  { %2535 = vmatprep.subr.bf16.mxu1 %v6192_v16  ;;  %v7188_v16 = vsub.s32 0, %v7185_v56 }
 0x11d   :  { %2465 = vmatpush1.bf16.msra.mxu0 %v6187_v62  ;;  %v7191_v62 = vsub.s32 1, %v7185_v56 }
 0x11e   :  { %2466 = vmatprep.subr.bf16.mxu0 %v6195_v25  ;;  %8800 = vst [vmem:[#allocation20_spill] sm:$0xff] %v7188_v16  ;;  %v6273_v25 = vld [vmem:[#allocation2 + $0x194] ss:$24 sps:$4 sm:$0xff]  }
 0x11f   :  { %2536 = vmatpush1.bf16.msra.mxu1 %v6190_v63  ;;  %8801 = vst [vmem:[#allocation21_spill] sm:$0xff] %v7191_v62  ;;  %v6268_v63 = vld [vmem:[#allocation2 + $0x4c0] ss:$24 sps:$4 sm:$0xff]  }
 0x120   :  { %2363 = vmatmul.mubr.bf16.gmra.mxu0 %v7064_v20  ;;  %2537 = vmatprep.subr.bf16.mxu1 %v6198_v1  ;;  %v6208_v20 = vld [vmem:[#allocation2 + $0x3a0] ss:$24 sps:$4 sm:$0xff]   ;;  %v6276_v1 = vld [vmem:[#allocation2 + $0x494] ss:$24 sps:$4 sm:$0xff]  }
 0x121   :  { %2467 = vmatpush1.bf16.msra.mxu0 %v6193_v2  ;;  %2372 = vmatprep.mubr.bf16.mxu0 %v7082_v29  ;;  %v6219_v29 = vld [vmem:[#allocation2 + $0x44] ss:$24 sps:$4 sm:$0xff]   ;;  %v6271_v2 = vld [vmem:[#allocation2 + $0x190] ss:$24 sps:$4 sm:$0xff]  }
 0x122   :  { %2434 = vmatmul.mubr.bf16.gmra.mxu1 %v7133_v43  ;;  %2468 = vmatprep.subr.bf16.mxu0 %v6201_v6  ;;  %v6214_v43 = vld [vmem:[#allocation2 + $0x370] ss:$24 sps:$4 sm:$0xff]   ;;  %v7193_v6 = vld [vmem:[#allocation5] sm:$0x3f] }
 0x123   :  { %2538 = vmatpush1.bf16.msra.mxu1 %v6196_v4  ;;  %2443 = vmatprep.mubr.bf16.mxu1 %v7139_v49  ;;  %v6222_v49 = vld [vmem:[#allocation2 + $0x344] ss:$24 sps:$4 sm:$0xff]  }
 0x124   :  { %2539 = vmatprep.subr.bf16.mxu1 %v6204_v17  ;;  %v6279_v4 = vld [vmem:[#allocation2 + $0x764] ss:$24 sps:$4 sm:$0xff]   ;;  %v6274_v17 = vld [vmem:[#allocation2 + $0x490] ss:$24 sps:$4 sm:$0xff]  }
 0x125   :  { %2469 = vmatpush1.bf16.msra.mxu0 %v6199_v30  ;;  %v6277_v30 = vld [vmem:[#allocation2 + $0x760] ss:$24 sps:$4 sm:$0xff]  }
 0x126   :  { %2470 = vmatprep.subr.bf16.mxu0 %v6207_v34  ;;  %v6282_v34 = vld [vmem:[#allocation2 + $0x734] ss:$24 sps:$4 sm:$0xff]  }
 0x127   :  { %2540 = vmatpush1.bf16.msra.mxu1 %v6202_v5  ;;  %v7197_v5 = vrot.slane %v7193_v6, %v7188_v16 }
 0x128   :  { %2373 = vmatmul.mubr.bf16.gmra.mxu0 %v7088_v32  ;;  %2541 = vmatprep.subr.bf16.mxu1 %v6210_v28  ;;  %v6228_v32 = vld [vmem:[#allocation2 + $0x314] ss:$24 sps:$4 sm:$0xff]   ;;  %v6280_v28 = vld [vmem:[#allocation2 + $0x730] ss:$24 sps:$4 sm:$0xff]  }
 0x129   :  { %2471 = vmatpush1.bf16.msra.mxu0 %v6205_v7  ;;  %2382 = vmatprep.mubr.bf16.mxu0 %v7103_v45  ;;  %8802 = vst [vmem:[#allocation22_spill] sm:$0xff] %v7197_v5  ;;  %v7201_v7 = vrot.slane %v7193_v6, %v7191_v62 }
 0x12a   :  { %2444 = vmatmul.mubr.bf16.gmra.mxu1 %v7150_v57  ;;  %2472 = vmatprep.subr.bf16.mxu0 %v6213_v8  ;;  %v6226_v57 = vld [vmem:[#allocation2 + $0x310] ss:$24 sps:$4 sm:$0xff]  }
 0x12b   :  { %2542 = vmatpush1.bf16.msra.mxu1 %v6208_v20  ;;  %2453 = vmatprep.mubr.bf16.mxu1 %v7153_v47  ;;  %8803 = vst [vmem:[#allocation23_spill] sm:$0xff] %v7201_v7  ;;  %v6460_v20 = vld [vmem:[%s8687_s0] ss:$16 sps:$4 sm:$0xff]  }
 0x12c   :  { %2543 = vmatprep.subr.bf16.mxu1 %v6216_v9  ;;  %v6285_v9 = vld [vmem:[#allocation2 + $0x704] ss:$24 sps:$4 sm:$0xff]  }
 0x12d   :  { %2473 = vmatpush1.bf16.msra.mxu0 %v6211_v10 }
 0x12e   :  { %2474 = vmatprep.subr.bf16.mxu0 %v6219_v29  ;;  %v6461_v29 = vld [vmem:[%s8687_s0 + $0x24] ss:$16 sps:$4 sm:$0xff]  }
 0x12f   :  { %2544 = vmatpush1.bf16.msra.mxu1 %v6214_v43 }
 0x130   :  { %2383 = vmatmul.mubr.bf16.gmra.mxu0 %v7105_v46  ;;  %2545 = vmatprep.subr.bf16.mxu1 %v6222_v49 }
 0x131   :  { %2475 = vmatpush1.bf16.msra.mxu0 %v6217_v11  ;;  %2494 = vmatprep.mubr.bf16.mxu0 %v6458_v18  ;;  %v6462_v11 = vld [vmem:[%s8687_s0 + $0x8] ss:$16 sps:$4 sm:$0xff]   ;;  %v6288_v18 = vld [vmem:[#allocation2 + $0x6d4] ss:$24 sps:$4 sm:$0xff]  }
 0x132   :  { %2454 = vmatmul.mubr.bf16.gmra.mxu1 %v7159_v0  ;;  %2476 = vmatprep.subr.bf16.mxu0 %v6225_v12 }
 0x133   :  { %2546 = vmatpush1.bf16.msra.mxu1 %v6220_v14  ;;  %2565 = vmatprep.mubr.bf16.mxu1 %v6459_v55 }
 0x134   :  { %2547 = vmatprep.subr.bf16.mxu1 %v6228_v32  ;;  %v6283_v32 = vld [vmem:[#allocation2 + $0x700] ss:$24 sps:$4 sm:$0xff]  }
 0x135   :  { %2477 = vmatpush1.bf16.msra.mxu0 %v6223_v15  ;;  %v6463_v15 = vld [vmem:[%s8687_s0 + $0x2c] ss:$16 sps:$4 sm:$0xff]  }
 0x136   :  { %2478 = vmatprep.subr.bf16.mxu0 %v6231_v51 }
 0x137   :  { %2548 = vmatpush1.bf16.msra.mxu1 %v6226_v57 }
 0x138   :  { %2549 = vmatprep.subr.bf16.mxu1 %v6234_v19 }
 0x139   :  { %2479 = vmatpush2.bf16.msra.mxu0 %v6229_v21 }
 0x13a   :  { %2480 = vmatprep.subr.bf16.mxu0 %v6237_v22 }
 0x13b   :  { %2550 = vmatpush2.bf16.msra.mxu1 %v6232_v23 }
 0x13c   :  { %2551 = vmatprep.subr.bf16.mxu1 %v6240_v24  ;;  %v6286_v24 = vld [vmem:[#allocation2 + $0x6d0] ss:$24 sps:$4 sm:$0xff]  }
 0x13d   :  { %2481 = vmatpush2.bf16.msra.mxu0 %v6235_v26 }
 0x13e   :  { %2482 = vmatprep.subr.bf16.mxu0 %v6243_v27  ;;  %v6291_v27 = vld [vmem:[#allocation2 + $0x6a4] ss:$24 sps:$4 sm:$0xff]  }
 0x13f   :  { %2552 = vmatpush2.bf16.msra.mxu1 %v6238_v31  ;;  %v6464_v31 = vld [vmem:[%s8687_s0 + $0x20] ss:$16 sps:$4 sm:$0xff]  }
 0x140   :  { %2553 = vmatprep.subr.bf16.mxu1 %v6246_v33 }
 0x141   :  { %2483 = vmatpush2.bf16.msra.mxu0 %v6241_v35 }
 0x142   :  { %2484 = vmatprep.subr.bf16.mxu0 %v6249_v36  ;;  %v6465_v36 = vld [vmem:[%s8687_s0 + $0x44] ss:$16 sps:$4 sm:$0xff]  }
 0x143   :  { %2554 = vmatpush2.bf16.msra.mxu1 %v6244_v37  ;;  %v6466_v37 = vld [vmem:[%s8687_s0 + $0x28] ss:$16 sps:$4 sm:$0xff]  }
 0x144   :  { %2555 = vmatprep.subr.bf16.mxu1 %v6252_v39 }
 0x145   :  { %2485 = vmatpush2.bf16.msra.mxu0 %v6247_v41 }
 0x146   :  { %2486 = vmatprep.subr.bf16.mxu0 %v6255_v44 }
 0x147   :  { %2556 = vmatpush2.bf16.msra.mxu1 %v6250_v42  ;;  %v6289_v42 = vld [vmem:[#allocation2 + $0x6a0] ss:$24 sps:$4 sm:$0xff]  }
 0x148   :  { %2557 = vmatprep.subr.bf16.mxu1 %v6258_v48 }
 0x149   :  { %2487 = vmatpush2.bf16.msra.mxu0 %v6253_v3  ;;  %v6467_v3 = vld [vmem:[%s8687_s0 + $0x4c] ss:$16 sps:$4 sm:$0xff]  }
 0x14a   :  { %2488 = vmatprep.subr.bf16.mxu0 %v6261_v52 }
 0x14b   :  { %2558 = vmatpush2.bf16.msra.mxu1 %v6256_v53 }
 0x14c   :  { %2559 = vmatprep.subr.bf16.mxu1 %v6264_v13 }
 0x14d   :  { %2489 = vmatpush2.bf16.msra.mxu0 %v6259_v54 }
 0x14e   :  { %2490 = vmatprep.subr.bf16.mxu0 %v6267_v58 }
 0x14f   :  { %2560 = vmatpush2.bf16.msra.mxu1 %v6262_v59 }
 0x150   :  { %2561 = vmatprep.subr.bf16.mxu1 %v6270_v60  ;;  %v6292_v60 = vld [vmem:[#allocation2 + $0x670] ss:$24 sps:$4 sm:$0xff]  }
 0x151   :  { %2491 = vmatpush2.bf16.msra.mxu0 %v6265_v61 }
 0x152   :  { %2492 = vmatprep.subr.bf16.mxu0 %v6273_v25  ;;  %v6297_v25 = vld [vmem:[#allocation2 + $0x644] ss:$24 sps:$4 sm:$0xff]  }
 0x153   :  { %2562 = vmatpush2.bf16.msra.mxu1 %v6268_v63  ;;  %v6468_v63 = vld [vmem:[%s8687_s0 + $0x40] ss:$16 sps:$4 sm:$0xff]  }
 0x154   :  { %2563 = vmatprep.subr.bf16.mxu1 %v6276_v1 }
 0x155   :  { %2493 = vmatpush2.bf16.msra.mxu0 %v6271_v2 }
 0x156   :  { %2604 = vmatprep.subr.bf16.mxu0 %v6279_v4 }
 0x157   :  { %2564 = vmatpush2.bf16.msra.mxu1 %v6274_v17  ;;  %v6469_v17 = vld [vmem:[%s8687_s0 + $0x48] ss:$16 sps:$4 sm:$0xff]  }
 0x158   :  { %v2070_v8 = vpop.f32.mrf.mxu0  ;;  %2495 = vmatmul.mubr.bf16.vlgmr.msra.gmra.mxu0 %v6460_v20 }
 0x159   :  { %v2071_v10 = vadd.f32 %v2070_v8, %v7197_v5  ;;  %2605 = vmatpush1.bf16.msra.mxu0 %v6277_v30  ;;  %2504 = vmatprep.mubr.bf16.mxu0 %v6461_v29  ;;  %v2141_v49 = vpop.f32.mrf.mxu1 }
 0x15a   :  { %v2072_v43 = vpop.f32.mrf.mxu0  ;;  %2566 = vmatmul.mubr.bf16.vlgmr.msra.gmra.mxu1 %v6462_v11  ;;  %2606 = vmatprep.subr.bf16.mxu0 %v6282_v34 }
 0x15b   :  { %v2073_v12 = vadd.f32 %v2072_v43, %v7201_v7  ;;  %v7214_v14 = vadd.f32 %v2141_v49, %v2071_v10  ;;  %2575 = vmatprep.mubr.bf16.mxu1 %v6463_v15  ;;  %v2143_v57 = vpop.f32.mrf.mxu1  ;;  %v6295_v10 = vld [vmem:[#allocation2 + $0x640] ss:$24 sps:$4 sm:$0xff]   ;;  %v6300_v43 = vld [vmem:[#allocation2 + $0x614] ss:$24 sps:$4 sm:$0xff]  }
 0x15c   :  { %v2074_v51 = vpop.f32.mrf.mxu0 }
 0x15d   :  { %v2075_v19 = vadd.f32 %v2074_v51, %v7197_v5  ;;  %v7220_v21 = vadd.f32 %v2143_v57, %v2073_v12  ;;  %2607 = vmatpush1.bf16.msra.mxu0 %v6280_v28  ;;  %v2145_v22 = vpop.f32.mrf.mxu1  ;;  %v6470_v57 = vld [vmem:[%s8688_s1 + $0x4] ss:$8 sps:$4 sm:$0xff]  }
 0x15e   :  { %v7222_v55 = vpop.f32.mrf.mxu0  ;;  %2608 = vmatprep.subr.bf16.mxu0 %v6285_v9 }
 0x15f   :  { %v7224_v23 = vadd.f32 %v2145_v22, %v2075_v19  ;;  %v7226_v26 = vpop.f32.mrf.mxu1 }
 0x160   :  { %2505 = vmatmul.mubr.bf16.gmra.mxu0 %v6464_v31  ;;  %v2080_v33 = vpop.f32.mrf.mxu0 }
 0x161   :  { %2609 = vmatpush1.bf16.msra.mxu0 %v6283_v32  ;;  %v2081_v35 = vadd.f32 %v2080_v33, %v7197_v5  ;;  %2514 = vmatprep.mubr.bf16.mxu0 %v6465_v36  ;;  %v2151_v41 = vpop.f32.mrf.mxu1  ;;  %v6301_v33 = vld [vmem:[#allocation2 + $0x8e0] ss:$24 sps:$4 sm:$0xff]   ;;  %v6306_v36 = vld [vmem:[#allocation2 + $0x8b4] ss:$24 sps:$4 sm:$0xff]  }
 0x162   :  { %2610 = vmatprep.subr.bf16.mxu0 %v6288_v18  ;;  %2576 = vmatmul.mubr.bf16.gmra.mxu1 %v6466_v37  ;;  %v2082_v39 = vpop.f32.mrf.mxu0  ;;  %v6303_v18 = vld [vmem:[#allocation2 + $0x8e4] ss:$24 sps:$4 sm:$0xff]  }
 0x163   :  { %v2083_v44 = vadd.f32 %v2082_v39, %v7201_v7  ;;  %v7239_v48 = vadd.f32 %v2151_v41, %v2081_v35  ;;  %2585 = vmatprep.mubr.bf16.mxu1 %v6467_v3  ;;  %v2153_v53 = vpop.f32.mrf.mxu1  ;;  %v6312_v3 = vld [vmem:[#allocation2 + $0x854] ss:$24 sps:$4 sm:$0xff]  }
 0x164   :  { %v2084_v52 = vpop.f32.mrf.mxu0 }
 0x165   :  { %2611 = vmatpush1.bf16.msra.mxu0 %v6286_v24  ;;  %v2085_v13 = vadd.f32 %v2084_v52, %v7197_v5  ;;  %v7245_v54 = vadd.f32 %v2153_v53, %v2083_v44  ;;  %v2155_v59 = vpop.f32.mrf.mxu1  ;;  %v6307_v44 = vld [vmem:[#allocation2 + $0x880] ss:$24 sps:$4 sm:$0xff]   ;;  %v6315_v52 = vld [vmem:[#allocation2 + $0x824] ss:$24 sps:$4 sm:$0xff]  }
 0x166   :  { %2612 = vmatprep.subr.bf16.mxu0 %v6291_v27  ;;  %v7247_v58 = vpop.f32.mrf.mxu0  ;;  %v6313_v53 = vld [vmem:[#allocation2 + $0x820] ss:$24 sps:$4 sm:$0xff]  }
 0x167   :  { %v7249_v61 = vadd.f32 %v2155_v59, %v2085_v13  ;;  %v7254_v2 = vpop.f32.mrf.mxu1  ;;  %v6318_v13 = vld [vmem:[#allocation2 + $0x7f4] ss:$24 sps:$4 sm:$0xff]   ;;  %v6316_v59 = vld [vmem:[#allocation2 + $0x7f0] ss:$24 sps:$4 sm:$0xff]  }
 0x168   :  { %2515 = vmatmul.mubr.bf16.gmra.mxu0 %v6468_v63  ;;  %v2090_v1 = vpop.f32.mrf.mxu0  ;;  %v6324_v63 = vld [vmem:[#allocation2 + $0x794] ss:$24 sps:$4 sm:$0xff]  }
 0x169   :  { %2613 = vmatpush1.bf16.msra.mxu0 %v6289_v42  ;;  %v2091_v4 = vadd.f32 %v2090_v1, %v7197_v5  ;;  %2524 = vmatprep.mubr.bf16.mxu0 %v7095_v38  ;;  %v2161_v34 = vpop.f32.mrf.mxu1  ;;  %v6304_v42 = vld [vmem:[#allocation2 + $0x8b0] ss:$24 sps:$4 sm:$0xff]  }
 0x16a   :  { %2614 = vmatprep.subr.bf16.mxu0 %v6294_v50  ;;  %2586 = vmatmul.mubr.bf16.gmra.mxu1 %v6469_v17  ;;  %v2092_v30 = vpop.f32.mrf.mxu0  ;;  %v6310_v50 = vld [vmem:[#allocation2 + $0x850] ss:$24 sps:$4 sm:$0xff]  }
 0x16b   :  { %v2093_v28 = vadd.f32 %v2092_v30, %v7201_v7  ;;  %v7262_v8 = vadd.f32 %v2161_v34, %v2091_v4  ;;  %2595 = vmatprep.mubr.bf16.mxu1 %v7103_v45  ;;  %v2163_v9 = vpop.f32.mrf.mxu1  ;;  %v6298_v45 = vld [vmem:[#allocation2 + $0x610] ss:$24 sps:$4 sm:$0xff]   ;;  %v6472_v34 = vld [vmem:[%s8688_s1 + $0x14] ss:$8 sps:$4 sm:$0xff]  }
 0x16c   :  { %v2094_v20 = vpop.f32.mrf.mxu0  ;;  %v6322_v1 = vld [vmem:[#allocation2 + $0x790] ss:$24 sps:$4 sm:$0xff]  }
 0x16d   :  { %2615 = vmatpush1.bf16.msra.mxu0 %v6292_v60  ;;  %v2095_v38 = vadd.f32 %v2094_v20, %v7197_v5  ;;  %v7266_v29 = vadd.f32 %v2163_v9, %v2093_v28  ;;  %v2165_v11 = vpop.f32.mrf.mxu1  ;;  %v6321_v60 = vld [vmem:[#allocation2 + $0x7c4] ss:$24 sps:$4 sm:$0xff]   ;;  %v6471_v17 = vld [vmem:[%s8688_s1] ss:$8 sps:$4 sm:$0xff]  }
 0x16e   :  { %2616 = vmatprep.subr.bf16.mxu0 %v6297_v25  ;;  %v7268_v49 = vpop.f32.mrf.mxu0  ;;  %v6319_v25 = vld [vmem:[#allocation2 + $0x7c0] ss:$24 sps:$4 sm:$0xff]  }
 0x16f   :  { %v7270_v12 = vadd.f32 %v2165_v11, %v2095_v38  ;;  %v7273_v15 = vpop.f32.mrf.mxu1 }
 0x170   :  { %2525 = vmatmul.mubr.bf16.gmra.mxu0 %v7097_v40  ;;  %v2100_v32 = vpop.f32.mrf.mxu0 }
 0x171   :  { %2617 = vmatpush1.bf16.msra.mxu0 %v6295_v10  ;;  %v2101_v51 = vadd.f32 %v2100_v32, %v7197_v5  ;;  %2636 = vmatprep.mubr.bf16.mxu0 %v6470_v57  ;;  %v2171_v22 = vpop.f32.mrf.mxu1 }
 0x172   :  { %2618 = vmatprep.subr.bf16.mxu0 %v6300_v43  ;;  %v2102_v19 = vpop.f32.mrf.mxu0  ;;  %2596 = vmatmul.mubr.bf16.gmra.mxu1 %v7105_v46  ;;  %v6309_v46 = vld [vmem:[#allocation2 + $0x884] ss:$24 sps:$4 sm:$0xff]  }
 0x173   :  { %v2103_v40 = vadd.f32 %v2102_v19, %v7201_v7  ;;  %v7281_v24 = vadd.f32 %v2171_v22, %v2101_v51  ;;  %v2173_v31 = vpop.f32.mrf.mxu1  ;;  %v2077_v22 = vadd.f32 %v7222_v55, %v7201_v7 }
 0x174   :  { %v2104_v27 = vpop.f32.mrf.mxu0 }
 0x175   :  { %2619 = vmatpush1.bf16.msra.mxu0 %v6298_v45  ;;  %v7283_v35 = vadd.f32 %v2173_v31, %v2103_v40  ;;  %v2175_v39 = vpop.f32.mrf.mxu1  ;;  %v7318_v40 = vld [vmem:[#allocation7 + $0x18] sm:$0xff] }
 0x176   :  { %2620 = vmatprep.subr.bf16.mxu0 %v6303_v18  ;;  %v2105_v37 = vpop.f32.mrf.mxu0  ;;  %v6473_v18 = vld [vmem:[%s8688_s1 + $0x10] ss:$8 sps:$4 sm:$0xff]   ;;  %8804 = vst [vmem:[#allocation24_spill] sm:$0xff] %v7318_v40  ;;  %v6474_v27 = vld [vmem:[%s8688_s1 + $0x24] ss:$8 sps:$4 sm:$0xff]   ;;  %v8710_v55 = vunpack.c.l.bf16 %v7318_v40 }
 0x177   :  { %v2176_v41 = vpop.f32.mrf.mxu1  ;;  %v7330_v37 = vld [vmem:[#allocation7 + $0x30] sm:$0xff] }
 0x178   :  { %8806 = vst [vmem:[#allocation26_spill] sm:$0xff] %v7330_v37 }
 0x179   :  { %2621 = vmatpush2.bf16.msra.mxu0 %v6301_v33 }
 0x17a   :  { %2622 = vmatprep.subr.bf16.mxu0 %v6306_v36  ;;  %v7328_v36 = vld [vmem:[#allocation7] sm:$0xff] }
 0x17b   :  { %8805 = vst [vmem:[#allocation25_spill] sm:$0xff] %v7328_v36 }
 0x17d   :  { %2623 = vmatpush2.bf16.msra.mxu0 %v6304_v42  ;;  %v2148_v42 = vadd.f32 %v7226_v26, %v2077_v22  ;;  %v7353_v26 = vld [vmem:[#allocation7 + $0x60] sm:$0xff] }
 0x17e   :  { %2624 = vmatprep.subr.bf16.mxu0 %v6309_v46  ;;  %v2087_v46 = vadd.f32 %v7247_v58, %v7201_v7  ;;  %8808 = vst [vmem:[#allocation28_spill] sm:$0xff] %v7353_v26  ;;  %v8697_v58 = vunpack.c.h.bf16 %v7328_v36 }
 0x181   :  { %2625 = vmatpush2.bf16.msra.mxu0 %v6307_v44  ;;  %v7341_v44 = vld [vmem:[#allocation7 + $0x48] sm:$0xff] }
 0x182   :  { %2626 = vmatprep.subr.bf16.mxu0 %v6312_v3  ;;  %8807 = vst [vmem:[#allocation27_spill] sm:$0xff] %v7341_v44 }
 0x185   :  { %2627 = vmatpush2.bf16.msra.mxu0 %v6310_v50  ;;  %v8709_v50 = vunpack.c.l.bf16 %v7328_v36 }
 0x186   :  { %2628 = vmatprep.subr.bf16.mxu0 %v6315_v52 }
 0x189   :  { %2629 = vmatpush2.bf16.msra.mxu0 %v6313_v53 }
 0x18a   :  { %2630 = vmatprep.subr.bf16.mxu0 %v6318_v13 }
 0x18d   :  { %2631 = vmatpush2.bf16.msra.mxu0 %v6316_v59  ;;  %v8707_v59 = vunpack.c.h.bf16 %v7318_v40 }
 0x18e   :  { %2632 = vmatprep.subr.bf16.mxu0 %v6321_v60  ;;  %v8706_v60 = vunpack.c.l.bf16 %v7341_v44 }
 0x191   :  { %2633 = vmatpush2.bf16.msra.mxu0 %v6319_v25 }
 0x192   :  { %2634 = vmatprep.subr.bf16.mxu0 %v6324_v63  ;;  %v6475_v63 = vld [vmem:[%s8688_s1 + $0x20] ss:$8 sps:$4 sm:$0xff]  }
 0x195   :  { %2635 = vmatpush2.bf16.msra.mxu0 %v6322_v1 }
 0x198   :  { %v2212_v4 = vpop.f32.mrf.mxu0  ;;  %2637 = vmatmul.mubr.bf16.vlgmr.msra.gmra.mxu0 %v6471_v17  ;;  %v2097_v17 = vadd.f32 %v7268_v49, %v7201_v7 }
 0x199   :  { %v2213_v30 = vadd.f32 %v2212_v4, %v7214_v14  ;;  %2646 = vmatprep.mubr.bf16.mxu0 %v6472_v34  ;;  %v2158_v4 = vadd.f32 %v7254_v2, %v2087_v46  ;;  %v8699_v34 = vunpack.c.h.bf16 %v7330_v37  ;;  %v8698_v2 = vunpack.c.l.bf16 %v7353_v26 }
 0x19a   :  { %v2214_v28 = vpop.f32.mrf.mxu0  ;;  %v7292_v20 = vpop.f32.mrf.mxu1 }
 0x19b   :  { %v7295_v9 = vadd.f32 %v2214_v28, %v7220_v21  ;;  %v2733_v43 = vmul.f32 %v2213_v30, %v2213_v30 }
 0x19c   :  { %v2216_v10 = vpop.f32.mrf.mxu0  ;;  %v7297_v38 = vpop.f32.mrf.mxu1 }
 0x19d   :  { %v7300_v11 = vadd.f32 %v7295_v9, %v2213_v30  ;;  %v2734_v14 = vmul.f32 %v7295_v9, %v7295_v9  ;;  %v7305_v32 = vadd.f32 %v2216_v10, %v7224_v23  ;;  %v7372_v10 = vld [vmem:[#allocation7 + $0x78] sm:$0xff] }
 0x19e   :  { %v2218_v45 = vpop.f32.mrf.mxu0  ;;  %v7307_v51 = vpop.f32.mrf.mxu1  ;;  %8809 = vst [vmem:[#allocation29_spill] sm:$0xff] %v7372_v10 }
 0x19f   :  { %v7309_v57 = vadd.f32 %v2734_v14, %v2733_v43  ;;  %v7350_v13 = vadd.f32 %v2218_v45, %v2148_v42  ;;  %v2880_v43 = vmul.f32 %v8709_v50, %v2213_v30  ;;  %v7397_v42 = vld [vmem:[#allocation7 + $0x90] sm:$0x11] }
 0x1a0   :  { %v2222_v21 = vpop.f32.mrf.mxu0  ;;  %2647 = vmatmul.mubr.bf16.gmra.mxu0 %v6473_v18  ;;  %v7314_v19 = vpop.f32.mrf.mxu1  ;;  %8810 = vst [vmem:[#allocation30_spill] sm:$0xff] %v7397_v42 }
 0x1a1   :  { %v7321_v23 = vadd.f32 %v2222_v21, %v7239_v48  ;;  %2656 = vmatprep.mubr.bf16.mxu0 %v6474_v27  ;;  %v8701_v27 = vunpack.c.h.bf16 %v7353_v26 }
 0x1a2   :  { %v2224_v31 = vpop.f32.mrf.mxu0  ;;  %v7326_v33 = vpop.f32.mrf.mxu1 }
 0x1a3   :  { %v7333_v39 = vadd.f32 %v2224_v31, %v7245_v54  ;;  %v8708_v54 = vunpack.c.l.bf16 %v7330_v37 }
 0x1a4   :  { %v2226_v41 = vpop.f32.mrf.mxu0  ;;  %v7336_v48 = vpop.f32.mrf.mxu1 }
 0x1a5   :  { %v7344_v3 = vadd.f32 %v2226_v41, %v7249_v61  ;;  %v2886_v61 = vmul.f32 %v8710_v55, %v7305_v32  ;;  %v2892_v14 = vmul.f32 %v8708_v54, %v7321_v23  ;;  %v8700_v41 = vunpack.c.l.bf16 %v7372_v10 }
 0x1a6   :  { %v2228_v52 = vpop.f32.mrf.mxu0  ;;  %v7348_v53 = vpop.f32.mrf.mxu1 }
 0x1a7   :  { %v7386_v21 = vadd.f32 %v2228_v52, %v2158_v4  ;;  %v2922_v30 = vadd.f32 %v2886_v61, %v2880_v43  ;;  %v2898_v22 = vmul.f32 %v8706_v60, %v7344_v3  ;;  %v2168_v52 = vadd.f32 %v7273_v15, %v2097_v17 }
 0x1a8   :  { %v2232_v25 = vpop.f32.mrf.mxu0  ;;  %2657 = vmatmul.mubr.bf16.gmra.mxu0 %v6475_v63  ;;  %v7363_v1 = vpop.f32.mrf.mxu1  ;;  %v2893_v61 = vmul.f32 %v8699_v34, %v7333_v39 }
 0x1a9   :  { %v7370_v28 = vadd.f32 %v2232_v25, %v7262_v8  ;;  %2666 = vmatprep.mubr.bf16.mxu0 %v7153_v47  ;;  %v2887_v8 = vmul.f32 %v8707_v59, %v7350_v13  ;;  %v8703_v47 = vunpack.c.h.bf16 %v7341_v44  ;;  %v2923_v63 = vadd.f32 %v2922_v30, %v2892_v14 }
 0x1aa   :  { %v2234_v45 = vpop.f32.mrf.mxu0  ;;  %v7381_v49 = vpop.f32.mrf.mxu1 }
 0x1ab   :  { %v7390_v18 = vadd.f32 %v2234_v45, %v7266_v29  ;;  %v2881_v29 = vmul.f32 %v8697_v58, %v7295_v9  ;;  %v2904_v4 = vmul.f32 %v8698_v2, %v7370_v28  ;;  %v8702_v45 = vunpack.c.h.bf16 %v7372_v10 }
 0x1ac   :  { %v2236_v31 = vpop.f32.mrf.mxu0  ;;  %v7399_v46 = vpop.f32.mrf.mxu1  ;;  %v2899_v9 = vmul.f32 %v8703_v47, %v7386_v21 }
 0x1ad   :  { %v7409_v25 = vadd.f32 %v2236_v31, %v7270_v12  ;;  %v2935_v17 = vadd.f32 %v2887_v8, %v2881_v29  ;;  %v8704_v12 = vunpack.c.l.bf16 %v7397_v42  ;;  %v2924_v31 = vadd.f32 %v2923_v63, %v2898_v22 }
 0x1ae   :  { %v2238_v43 = vpop.f32.mrf.mxu0  ;;  %v7415_v15 = vpop.f32.mrf.mxu1  ;;  %v2905_v8 = vmul.f32 %v8701_v27, %v7390_v18  ;;  %v8705_v22 = vunpack.c.h.bf16 %v7397_v42 }
 0x1af   :  { %v7420_v58 = vadd.f32 %v2238_v43, %v2168_v52  ;;  %v2910_v14 = vmul.f32 %v8700_v41, %v7409_v25  ;;  %v2936_v34 = vadd.f32 %v2935_v17, %v2893_v61  ;;  %v2925_v29 = vadd.f32 %v2924_v31, %v2904_v4 }
 0x1b0   :  { %v2242_v30 = vpop.f32.mrf.mxu0  ;;  %2667 = vmatmul.mubr.bf16.gmra.mxu0 %v7159_v0  ;;  %v7427_v2 = vpop.f32.mrf.mxu1 }
 0x1b1   :  { %v7433_v52 = vadd.f32 %v2242_v30, %v7281_v24  ;;  %v2937_v41 = vadd.f32 %v2936_v34, %v2899_v9  ;;  %v2911_v0 = vmul.f32 %v8702_v45, %v7420_v58  ;;  %v2926_v17 = vadd.f32 %v2925_v29, %v2910_v14 }
 0x1b2   :  { %v2244_v43 = vpop.f32.mrf.mxu0  ;;  %v7436_v63 = vpop.f32.mrf.mxu1 }
 0x1b3   :  { %v2916_v61 = vmul.f32 %v8704_v12, %v7433_v52  ;;  %v7445_v24 = vadd.f32 %v2244_v43, %v7283_v35  ;;  %v2938_v30 = vadd.f32 %v2937_v41, %v2905_v8  ;;  %v7459_v43 = vsub.s32 2, %v7185_v56 }
 0x1b4   :  { %v2246_v4 = vpop.f32.mrf.mxu0  ;;  %v7447_v31 = vpop.f32.mrf.mxu1  ;;  %v7462_v41 = vsub.s32 3, %v7185_v56 }
 0x1b5   :  { %v2927_v27 = vsel %vm2710_vm0, %v2916_v61, 0.0  ;;  %v2917_v9 = vmul.f32 %v8705_v22, %v7445_v24  ;;  %v2939_v12 = vadd.f32 %v2938_v30, %v2911_v0  ;;  %8811 = vst [vmem:[#allocation31_spill] sm:$0xff] %v7459_v43 }
 0x1b6   :  { %v7450_v34 = vadd.f32 %v2927_v27, %v2926_v17  ;;  %v2247_v45 = vpop.f32.mrf.mxu0  ;;  %v2317_v47 = vpop.f32.mrf.mxu1  ;;  %8812 = vst [vmem:[#allocation32_spill] sm:$0xff] %v7462_v41  ;;  %v7466_v27 = vrot.slane %v7193_v6, %v7459_v43  ;;  %v7668_v43 = vld [vmem:[#allocation7 + $0x10] sm:$0xff] }
 0x1b7   :  { %v2940_v14 = vsel %vm2710_vm0, %v2917_v9, 0.0  ;;  %v7470_v45 = vrot.slane %v7193_v6, %v7462_v41 }
 0x1b8   :  { %v2318_v29 = vpop.f32.mrf.mxu1  ;;  %v7456_v35 = vadd.f32 %v2940_v14, %v2939_v12  ;;  %8813 = vst [vmem:[#allocation33_spill] sm:$0xff] %v7466_v27  ;;  %v2284_v47 = vadd.f32 %v7292_v20, %v7466_v27  ;;  %v2288_v4 = vadd.f32 %v7307_v51, %v7466_v27  ;;  %v2294_v22 = vadd.f32 %v7326_v33, %v7466_v27 }
 0x1b9   :  { %8814 = vst [vmem:[#allocation34_spill] sm:$0xff] %v7470_v45  ;;  %v2286_v12 = vadd.f32 %v7297_v38, %v7470_v45  ;;  %v2296_v51 = vadd.f32 %v7336_v48, %v7470_v45  ;;  %v2310_v44 = vadd.f32 %v7427_v2, %v7470_v45 }
 0x1d8   :  { %v2354_v8 = vpop.f32.mrf.mxu0 }
 0x1d9   :  { %v2355_v0 = vadd.f32 %v2354_v8, %v2284_v47 }
 0x1da   :  { %v2356_v61 = vpop.f32.mrf.mxu0  ;;  %v2425_v17 = vpop.f32.mrf.mxu1 }
 0x1db   :  { %v2357_v30 = vadd.f32 %v2356_v61, %v2286_v12  ;;  %v7478_v9 = vadd.f32 %v2425_v17, %v2355_v0 }
 0x1dc   :  { %v2358_v14 = vpop.f32.mrf.mxu0  ;;  %v2427_v29 = vpop.f32.mrf.mxu1 }
 0x1dd   :  { %v2676_v20 = vadd.f32 %v7300_v11, %v7478_v9  ;;  %v2735_v38 = vmul.f32 %v7478_v9, %v7478_v9  ;;  %v2359_v47 = vadd.f32 %v2358_v14, %v2288_v4  ;;  %v7486_v8 = vadd.f32 %v2427_v29, %v2357_v30 }
 0x1de   :  { %v2360_v60 = vpop.f32.mrf.mxu0  ;;  %v2429_v59 = vpop.f32.mrf.mxu1  ;;  %v2298_v4 = vadd.f32 %v7348_v53, %v7466_v27  ;;  %v2304_v53 = vadd.f32 %v7381_v49, %v7466_v27 }
 0x1df   :  { %v2776_v12 = vadd.f32 %v7309_v57, %v2735_v38  ;;  %v7491_v0 = vadd.f32 %v2429_v59, %v2359_v47  ;;  %v7494_v33 = vadd.f32 %v2676_v20, %v7486_v8  ;;  %v2736_v11 = vmul.f32 %v7486_v8, %v7486_v8  ;;  %v7504_v59 = vld [vmem:[#allocation7 + $0x20] sm:$0xff] }
 0x1e0   :  { %v2364_v61 = vpop.f32.mrf.mxu0  ;;  %v2431_v17 = vpop.f32.mrf.mxu1  ;;  %v2290_v57 = vadd.f32 %v7314_v19, %v7470_v45  ;;  %8815 = vst [vmem:[#allocation35_spill] sm:$0xff] %v7504_v59  ;;  %v2300_v38 = vadd.f32 %v7363_v1, %v7470_v45  ;;  %v2306_v1 = vadd.f32 %v7399_v46, %v7470_v45 }
 0x1e1   :  { %v2365_v30 = vadd.f32 %v2364_v61, %v2294_v22  ;;  %v7500_v14 = vadd.f32 %v2776_v12, %v2736_v11  ;;  %v7512_v22 = vld [vmem:[#allocation7 + $0x8] sm:$0xff]  ;;  %v7514_v11 = vld [vmem:[#allocation7 + $0x38] sm:$0xff] }
 0x1e2   :  { %v2366_v29 = vpop.f32.mrf.mxu0  ;;  %v2435_v48 = vpop.f32.mrf.mxu1  ;;  %8816 = vst [vmem:[#allocation36_spill] sm:$0xff] %v7512_v22  ;;  %v2361_v12 = vadd.f32 %v2360_v60, %v2290_v57  ;;  %8817 = vst [vmem:[#allocation37_spill] sm:$0xff] %v7514_v11  ;;  %v7564_v57 = vld [vmem:[#allocation7 + $0x98] sm:$0x11] }
 0x1e3   :  { %v2367_v20 = vadd.f32 %v2366_v29, %v2296_v51  ;;  %v7508_v47 = vadd.f32 %v2435_v48, %v2365_v30  ;;  %v7521_v30 = vld [vmem:[#allocation7 + $0x50] sm:$0xff]  ;;  %v2308_v51 = vadd.f32 %v7415_v15, %v7466_v27  ;;  %8825 = vst [vmem:[#allocation41_spill] sm:$0xff] %v7564_v57 }
 0x1e4   :  { %v2368_v54 = vpop.f32.mrf.mxu0  ;;  %v2437_v50 = vpop.f32.mrf.mxu1  ;;  %8818 = vst [vmem:[#allocation38_spill] sm:$0xff] %v7521_v30  ;;  %v7533_v46 = vadd.f32 %v2431_v17, %v2361_v12  ;;  %v2314_v12 = vadd.f32 %v7436_v63, %v7466_v27 }
 0x1e5   :  { %v2369_v61 = vadd.f32 %v2368_v54, %v2298_v4  ;;  %v7516_v19 = vadd.f32 %v2437_v50, %v2367_v20  ;;  %v7529_v20 = vld [vmem:[#allocation7 + $0x68] sm:$0xff] }
 0x1e6   :  { %v2370_v29 = vpop.f32.mrf.mxu0  ;;  %v2439_v55 = vpop.f32.mrf.mxu1  ;;  %8819 = vst [vmem:[#allocation39_spill] sm:$0xff] %v7529_v20 }
 0x1e7   :  { %v7523_v48 = vadd.f32 %v2439_v55, %v2369_v61  ;;  %v2371_v42 = vadd.f32 %v2370_v29, %v2300_v38  ;;  %v8820_v61 = vunpack.c.l.bf16 %v7504_v59  ;;  %v8822_v29 = vunpack.c.l.bf16 %v7512_v22 }
 0x1e8   :  { %v2374_v54 = vpop.f32.mrf.mxu0  ;;  %v2441_v4 = vpop.f32.mrf.mxu1 }
 0x1e9   :  { %v2375_v55 = vadd.f32 %v2374_v54, %v2304_v53  ;;  %v2888_v49 = vmul.f32 %v8820_v61, %v7491_v0  ;;  %v7546_v53 = vld [vmem:[#allocation7 + $0x80] sm:$0xff]  ;;  %v2882_v54 = vmul.f32 %v8822_v29, %v7478_v9  ;;  %v8823_v61 = vunpack.c.l.bf16 %v7514_v11 }
 0x1ea   :  { %v2376_v10 = vpop.f32.mrf.mxu0  ;;  %v2445_v26 = vpop.f32.mrf.mxu1  ;;  %8821 = vst [vmem:[#allocation40_spill] sm:$0xff] %v7546_v53  ;;  %v8826_v29 = vunpack.c.l.bf16 %v7521_v30 }
 0x1eb   :  { %v2377_v15 = vadd.f32 %v2376_v10, %v2306_v1  ;;  %v7543_v17 = vadd.f32 %v2445_v26, %v2375_v55  ;;  %v2894_v50 = vmul.f32 %v8823_v61, %v7508_v47  ;;  %v8824_v10 = vunpack.c.h.bf16 %v7504_v59 }
 0x1ec   :  { %v2378_v60 = vpop.f32.mrf.mxu0  ;;  %v2447_v2 = vpop.f32.mrf.mxu1  ;;  %v7560_v55 = vadd.f32 %v2441_v4, %v2371_v42  ;;  %v2948_v9 = vadd.f32 %v2888_v49, %v2882_v54  ;;  %v2900_v61 = vmul.f32 %v8826_v29, %v7523_v48  ;;  %v2316_v42 = vadd.f32 %v7447_v31, %v7470_v45 }
 0x1ed   :  { %v2889_v1 = vmul.f32 %v8824_v10, %v7533_v46  ;;  %v2379_v38 = vadd.f32 %v2378_v60, %v2308_v51  ;;  %v7562_v63 = vadd.f32 %v2447_v2, %v2377_v15  ;;  %v8827_v51 = vunpack.c.h.bf16 %v7512_v22 }
 0x1ee   :  { %v2380_v27 = vpop.f32.mrf.mxu0  ;;  %v2449_v37 = vpop.f32.mrf.mxu1  ;;  %v8828_v49 = vunpack.c.h.bf16 %v7514_v11  ;;  %v2949_v54 = vadd.f32 %v2948_v9, %v2894_v50  ;;  %v8829_v2 = vunpack.c.l.bf16 %v7529_v20 }
 0x1ef   :  { %v2883_v60 = vmul.f32 %v8827_v51, %v7486_v8  ;;  %v2381_v15 = vadd.f32 %v2380_v27, %v2310_v44  ;;  %v7582_v29 = vadd.f32 %v2449_v37, %v2379_v38  ;;  %v8830_v8 = vunpack.c.h.bf16 %v7521_v30 }
 0x1f0   :  { %v2895_v4 = vmul.f32 %v8828_v49, %v7516_v19  ;;  %v2906_v10 = vmul.f32 %v8829_v2, %v7543_v17  ;;  %v2384_v36 = vpop.f32.mrf.mxu0  ;;  %v2451_v26 = vpop.f32.mrf.mxu1  ;;  %v2950_v44 = vadd.f32 %v2949_v54, %v2900_v61  ;;  %v8831_v27 = vunpack.c.l.bf16 %v7546_v53 }
 0x1f1   :  { %v2961_v59 = vadd.f32 %v2889_v1, %v2883_v60  ;;  %v2901_v51 = vmul.f32 %v8830_v8, %v7560_v55  ;;  %v2385_v22 = vadd.f32 %v2384_v36, %v2314_v12  ;;  %v7588_v11 = vadd.f32 %v2451_v26, %v2381_v15 }
 0x1f2   :  { %v2912_v50 = vmul.f32 %v8831_v27, %v7582_v29  ;;  %v2386_v9 = vpop.f32.mrf.mxu0  ;;  %v2455_v37 = vpop.f32.mrf.mxu1  ;;  %v8832_v49 = vunpack.c.h.bf16 %v7529_v20  ;;  %v2951_v31 = vadd.f32 %v2950_v44, %v2906_v10  ;;  %v8731_v36 = vunpack.c.h.bf16 %v7564_v57 }
 0x1f3   :  { %v2962_v38 = vadd.f32 %v2961_v59, %v2895_v4  ;;  %v2387_v1 = vadd.f32 %v2386_v9, %v2316_v42  ;;  %v7596_v60 = vadd.f32 %v2455_v37, %v2385_v22  ;;  %v8833_v61 = vunpack.c.h.bf16 %v7546_v53 }
 0x1f4   :  { %v2907_v2 = vmul.f32 %v8832_v49, %v7562_v63  ;;  %v2457_v8 = vpop.f32.mrf.mxu1  ;;  %v2388_v12 = vpop.f32.mrf.mxu0  ;;  %v8834_v59 = vunpack.c.l.bf16 %v7564_v57  ;;  %v2952_v54 = vadd.f32 %v2951_v31, %v2912_v50  ;;  %v7617_v31 = vsub.s32 4, %v7185_v56 }
 0x1f5   :  { %v2963_v26 = vadd.f32 %v2962_v38, %v2901_v51  ;;  %v2913_v15 = vmul.f32 %v8833_v61, %v7588_v11  ;;  %v7605_v27 = vadd.f32 %v2457_v8, %v2387_v1 }
 0x1f6   :  { %v2918_v4 = vmul.f32 %v8834_v59, %v7596_v60  ;;  %v2389_v42 = vpop.f32.mrf.mxu0  ;;  %v2459_v22 = vpop.f32.mrf.mxu1  ;;  %8835 = vst [vmem:[#allocation42_spill] sm:$0xff] %v7617_v31 }
 0x1f7   :  { %v2964_v9 = vadd.f32 %v2963_v26, %v2907_v2  ;;  %v2919_v51 = vmul.f32 %v8731_v36, %v7605_v27  ;;  %v7620_v2 = vsub.s32 5, %v7185_v56  ;;  %v7624_v26 = vrot.slane %v7193_v6, %v7617_v31 }
 0x1f8   :  { %v2953_v10 = vsel %vm2710_vm0, %v2918_v4, 0.0  ;;  %v2460_v37 = vpop.f32.mrf.mxu1 }
 0x1f9   :  { %v7608_v44 = vadd.f32 %v2953_v10, %v2952_v54  ;;  %v2965_v38 = vadd.f32 %v2964_v9, %v2913_v15  ;;  %v2966_v49 = vsel %vm2710_vm0, %v2919_v51, 0.0  ;;  %8836 = vst [vmem:[#allocation43_spill] sm:$0xff] %v7620_v2  ;;  %8837 = vst [vmem:[#allocation44_spill] sm:$0xff] %v7624_v26  ;;  %v7628_v15 = vrot.slane %v7193_v6, %v7620_v2 }
 0x1fb   :  { %v7614_v12 = vadd.f32 %v2966_v49, %v2965_v38  ;;  %8838 = vst [vmem:[#allocation45_spill] sm:$0xff] %v7628_v15 }
 0x218   :  { %v2496_v50 = vpop.f32.mrf.mxu0 }
 0x21a   :  { %v2498_v1 = vpop.f32.mrf.mxu0  ;;  %v2567_v8 = vpop.f32.mrf.mxu1 }
 0x21b   :  { %v2499_v31 = vadd.f32 %v2498_v1, %v7628_v15 }
 0x21c   :  { %v2500_v61 = vpop.f32.mrf.mxu0  ;;  %v2569_v59 = vpop.f32.mrf.mxu1 }
 0x21d   :  { %v2501_v4 = vadd.f32 %v2500_v61, %v7624_v26 }
 0x21e   :  { %v2502_v54 = vpop.f32.mrf.mxu0  ;;  %v2571_v42 = vpop.f32.mrf.mxu1 }
 0x21f   :  { %v2503_v22 = vadd.f32 %v2502_v54, %v7628_v15  ;;  %v7632_v56 = vadd.f32 %v2571_v42, %v2501_v4 }
 0x220   :  { %v2573_v9 = vpop.f32.mrf.mxu1  ;;  %v2506_v10 = vpop.f32.mrf.mxu0 }
 0x221   :  { %v7634_v51 = vadd.f32 %v2573_v9, %v2503_v22  ;;  %v2507_v37 = vadd.f32 %v2506_v10, %v7624_v26 }
 0x222   :  { %v2508_v38 = vpop.f32.mrf.mxu0  ;;  %v2577_v49 = vpop.f32.mrf.mxu1 }
 0x223   :  { %v2509_v36 = vadd.f32 %v2508_v38, %v7628_v15  ;;  %v7638_v6 = vadd.f32 %v2577_v49, %v2507_v37 }
 0x224   :  { %v2510_v57 = vpop.f32.mrf.mxu0  ;;  %v2579_v61 = vpop.f32.mrf.mxu1 }
 0x225   :  { %v2511_v53 = vadd.f32 %v2510_v57, %v7624_v26  ;;  %v7641_v20 = vadd.f32 %v2579_v61, %v2509_v36 }
 0x226   :  { %v2512_v4 = vpop.f32.mrf.mxu0  ;;  %v2581_v54 = vpop.f32.mrf.mxu1 }
 0x227   :  { %v2513_v42 = vadd.f32 %v2512_v4, %v7628_v15  ;;  %v7644_v22 = vadd.f32 %v2581_v54, %v2511_v53 }
 0x228   :  { %v2516_v9 = vpop.f32.mrf.mxu0  ;;  %v2583_v10 = vpop.f32.mrf.mxu1 }
 0x229   :  { %v2517_v30 = vadd.f32 %v2516_v9, %v7624_v26  ;;  %v7647_v45 = vadd.f32 %v2583_v10, %v2513_v42 }
 0x22a   :  { %v2518_v37 = vpop.f32.mrf.mxu0  ;;  %v2587_v38 = vpop.f32.mrf.mxu1 }
 0x22b   :  { %v2519_v49 = vadd.f32 %v2518_v37, %v7628_v15  ;;  %v7650_v40 = vadd.f32 %v2587_v38, %v2517_v30 }
 0x22c   :  { %v2520_v57 = vpop.f32.mrf.mxu0  ;;  %v2589_v36 = vpop.f32.mrf.mxu1 }
 0x22d   :  { %v2521_v61 = vadd.f32 %v2520_v57, %v7624_v26  ;;  %v7653_v7 = vadd.f32 %v2589_v36, %v2519_v49 }
 0x22e   :  { %v2522_v53 = vpop.f32.mrf.mxu0  ;;  %v2591_v4 = vpop.f32.mrf.mxu1 }
 0x22f   :  { %v2523_v54 = vadd.f32 %v2522_v53, %v7628_v15  ;;  %v7656_v5 = vadd.f32 %v2591_v4, %v2521_v61  ;;  %v2497_v4 = vadd.f32 %v2496_v50, %v7624_v26 }
 0x230   :  { %v2526_v42 = vpop.f32.mrf.mxu0  ;;  %v2593_v9 = vpop.f32.mrf.mxu1 }
 0x231   :  { %v2527_v10 = vadd.f32 %v2526_v42, %v7624_v26  ;;  %v7659_v41 = vadd.f32 %v2593_v9, %v2523_v54  ;;  %v2568_v42 = vadd.f32 %v2567_v8, %v2497_v4  ;;  %v2570_v9 = vadd.f32 %v2569_v59, %v2499_v31 }
 0x232   :  { %v2528_v30 = vpop.f32.mrf.mxu0  ;;  %v2597_v37 = vpop.f32.mrf.mxu1  ;;  %v8839_v26 = vunpack.c.h.bf16 %v7668_v43 }
 0x233   :  { %v2529_v38 = vadd.f32 %v2528_v30, %v7628_v15  ;;  %v7662_v2 = vadd.f32 %v2597_v37, %v2527_v10  ;;  %v7670_v30 = vld [vmem:[#allocation7 + $0x28] sm:$0xff] }
 0x234   :  { %v2530_v49 = vpop.f32.mrf.mxu0  ;;  %v2599_v57 = vpop.f32.mrf.mxu1  ;;  %v8764_v1 = vunpack.c.l.bf16 %v7670_v30 }
 0x235   :  { %v7664_v36 = vadd.f32 %v2599_v57, %v2529_v38 }
 0x236   :  { %v2531_v62 = vpop.f32.mrf.mxu0  ;;  %v2601_v53 = vpop.f32.mrf.mxu1 }
 0x237   :  { %v8765_v62 = vunpack.c.l.bf16 %v7668_v43 }
 0x238   :  { %v2602_v61 = vpop.f32.mrf.mxu1 }
 0x239   :  { %v7678_v61 = vld [vmem:[#allocation7 + $0x40] sm:$0xff] }
 0x23a   :  { %v8775_v57 = vunpack.c.l.bf16 %v7678_v61 }
 0x258   :  { %v2638_v54 = vpop.f32.mrf.mxu0 }
 0x259   :  { %v2639_v16 = vadd.f32 %v2638_v54, %v2568_v42  ;;  %v2740_v54 = vmul.f32 %v7350_v13, %v7350_v13 }
 0x25a   :  { %v2640_v10 = vpop.f32.mrf.mxu0 }
 0x25b   :  { %v2678_v37 = vadd.f32 %v7494_v33, %v2639_v16  ;;  %v2737_v38 = vmul.f32 %v2639_v16, %v2639_v16  ;;  %v2641_v49 = vadd.f32 %v2640_v10, %v2570_v9  ;;  %v2739_v33 = vmul.f32 %v7305_v32, %v7305_v32 }
 0x25c   :  { %v2642_v50 = vpop.f32.mrf.mxu0 }
 0x25d   :  { %v2778_v8 = vadd.f32 %v7500_v14, %v2737_v38  ;;  %v2679_v31 = vadd.f32 %v2678_v37, %v2641_v49  ;;  %v2738_v59 = vmul.f32 %v2641_v49, %v2641_v49  ;;  %v2643_v4 = vadd.f32 %v2642_v50, %v7632_v56 }
 0x25e   :  { %v2644_v42 = vpop.f32.mrf.mxu0  ;;  %v2884_v37 = vmul.f32 %v8765_v62, %v2639_v16  ;;  %v8766_v56 = vunpack.c.h.bf16 %v7678_v61  ;;  %v2741_v16 = vmul.f32 %v7491_v0, %v7491_v0 }
 0x25f   :  { %v2680_v9 = vadd.f32 %v2679_v31, %v7305_v32  ;;  %v2779_v10 = vadd.f32 %v2778_v8, %v2738_v59  ;;  %v2645_v14 = vadd.f32 %v2644_v42, %v7634_v51  ;;  %v2890_v38 = vmul.f32 %v8764_v1, %v2643_v4  ;;  %v7698_v31 = vld [vmem:[#allocation7 + $0x58] sm:$0xff] }
 0x260   :  { %v2648_v53 = vpop.f32.mrf.mxu0  ;;  %v2885_v32 = vmul.f32 %v8839_v26, %v2641_v49  ;;  %v8840_v8 = vunpack.c.h.bf16 %v7670_v30  ;;  %v2742_v26 = vmul.f32 %v7533_v46, %v7533_v46 }
 0x261   :  { %v2681_v50 = vadd.f32 %v2680_v9, %v7350_v13  ;;  %v2780_v15 = vadd.f32 %v2779_v10, %v2739_v33  ;;  %v2974_v59 = vadd.f32 %v2890_v38, %v2884_v37  ;;  %v7703_v42 = vadd.f32 %v2648_v53, %v7638_v6 }
 0x262   :  { %v2891_v51 = vmul.f32 %v8840_v8, %v2645_v14  ;;  %v2650_v1 = vpop.f32.mrf.mxu0  ;;  %v8774_v37 = vunpack.c.l.bf16 %v7698_v31 }
 0x263   :  { %v2781_v62 = vadd.f32 %v2780_v15, %v2740_v54  ;;  %v2682_v13 = vadd.f32 %v2681_v50, %v7491_v0  ;;  %v7707_v9 = vadd.f32 %v2650_v1, %v7641_v20  ;;  %v2896_v49 = vmul.f32 %v8775_v57, %v7703_v42  ;;  %v7720_v15 = vld [vmem:[#allocation7 + $0x70] sm:$0xff] }
 0x264   :  { %v2987_v33 = vadd.f32 %v2891_v51, %v2885_v32  ;;  %v2652_v10 = vpop.f32.mrf.mxu0  ;;  %v8773_v20 = vunpack.c.h.bf16 %v7698_v31  ;;  %v2743_v1 = vmul.f32 %v2643_v4, %v2643_v4 }
 0x265   :  { %v2683_v6 = vadd.f32 %v2682_v13, %v7533_v46  ;;  %v2782_v53 = vadd.f32 %v2781_v62, %v2741_v16  ;;  %v2897_v0 = vmul.f32 %v8766_v56, %v7707_v9  ;;  %v2975_v54 = vadd.f32 %v2974_v59, %v2896_v49 }
 0x266   :  { %v7723_v38 = vadd.f32 %v2652_v10, %v7644_v22  ;;  %v2654_v50 = vpop.f32.mrf.mxu0  ;;  %v8772_v13 = vunpack.c.l.bf16 %v7720_v15  ;;  %v8767_v56 = vunpack.c.h.bf16 %v7720_v15  ;;  %v2744_v22 = vmul.f32 %v2645_v14, %v2645_v14 }
 0x267   :  { %v2684_v32 = vadd.f32 %v2683_v6, %v2643_v4  ;;  %v2783_v8 = vadd.f32 %v2782_v53, %v2742_v26  ;;  %v2988_v51 = vadd.f32 %v2987_v33, %v2897_v0  ;;  %v7726_v46 = vadd.f32 %v2654_v50, %v7647_v45  ;;  %v7736_v33 = vld [vmem:[#allocation7 + $0x88] sm:$0xff] }
 0x268   :  { %v2902_v62 = vmul.f32 %v8774_v37, %v7723_v38  ;;  %v2658_v16 = vpop.f32.mrf.mxu0  ;;  %v2745_v45 = vmul.f32 %v7321_v23, %v7321_v23  ;;  %v2746_v50 = vmul.f32 %v7333_v39, %v7333_v39 }
 0x269   :  { %v2784_v59 = vadd.f32 %v2783_v8, %v2743_v1  ;;  %v2685_v49 = vadd.f32 %v2684_v32, %v2645_v14  ;;  %v2903_v4 = vmul.f32 %v8773_v20, %v7726_v46  ;;  %v7741_v10 = vadd.f32 %v2658_v16, %v7650_v40 }
 0x26a   :  { %v2976_v26 = vadd.f32 %v2975_v54, %v2902_v62  ;;  %v2660_v6 = vpop.f32.mrf.mxu0  ;;  %v8771_v54 = vunpack.c.l.bf16 %v7736_v33  ;;  %v2747_v16 = vmul.f32 %v7508_v47, %v7508_v47 }
 0x26b   :  { %v2686_v53 = vadd.f32 %v2685_v49, %v7321_v23  ;;  %v2785_v0 = vadd.f32 %v2784_v59, %v2744_v22  ;;  %v2989_v1 = vadd.f32 %v2988_v51, %v2903_v4  ;;  %v7745_v14 = vadd.f32 %v2660_v6, %v7653_v7  ;;  %v7758_v51 = vld [vmem:[#allocation7 + $0xa0] sm:$0x11] }
 0x26c   :  { %v2908_v32 = vmul.f32 %v8772_v13, %v7741_v10  ;;  %v2662_v8 = vpop.f32.mrf.mxu0  ;;  %v8768_v7 = vunpack.c.h.bf16 %v7736_v33  ;;  %v6692_v13 = vld [vmem:[#allocation2 + $0x5b0] ss:$24 sps:$4 sm:$0xff]  }
 0x26d   :  { %v2687_v40 = vadd.f32 %v2686_v53, %v7333_v39  ;;  %v2786_v62 = vadd.f32 %v2785_v0, %v2745_v45  ;;  %v2909_v23 = vmul.f32 %v8767_v56, %v7745_v14  ;;  %v7763_v49 = vadd.f32 %v2662_v8, %v7656_v5 }
 0x26e   :  { %v2977_v59 = vadd.f32 %v2976_v26, %v2908_v32  ;;  %v2664_v22 = vpop.f32.mrf.mxu0  ;;  %v2748_v53 = vmul.f32 %v7516_v19, %v7516_v19  ;;  %v8770_v26 = vunpack.c.l.bf16 %v7758_v51 }
 0x26f   :  { %v2787_v4 = vadd.f32 %v2786_v62, %v2746_v50  ;;  %v2688_v39 = vadd.f32 %v2687_v40, %v7508_v47  ;;  %v2990_v45 = vadd.f32 %v2989_v1, %v2909_v23  ;;  %v7767_v6 = vadd.f32 %v2664_v22, %v7659_v41 }
 0x270   :  { %v2914_v0 = vmul.f32 %v8771_v54, %v7763_v49  ;;  %v2668_v56 = vpop.f32.mrf.mxu0  ;;  %v8769_v41 = vunpack.c.h.bf16 %v7758_v51  ;;  %v2749_v1 = vmul.f32 %v7703_v42, %v7703_v42 }
 0x271   :  { %v2689_v5 = vadd.f32 %v2688_v39, %v7516_v19  ;;  %v2788_v32 = vadd.f32 %v2787_v4, %v2747_v16  ;;  %v2915_v47 = vmul.f32 %v8768_v7, %v7767_v6  ;;  %v7783_v8 = vadd.f32 %v2668_v56, %v7662_v2 }
 0x272   :  { %v2978_v50 = vadd.f32 %v2977_v59, %v2914_v0  ;;  %v2670_v40 = vpop.f32.mrf.mxu0  ;;  %v2750_v2 = vmul.f32 %v7707_v9, %v7707_v9 }
 0x273   :  { %v2690_v62 = vadd.f32 %v2689_v5, %v7703_v42  ;;  %v2789_v23 = vadd.f32 %v2788_v32, %v2748_v53  ;;  %v2991_v22 = vadd.f32 %v2990_v45, %v2915_v47  ;;  %v7787_v19 = vadd.f32 %v2670_v40, %v7664_v36 }
 0x274   :  { %v2920_v16 = vmul.f32 %v8770_v26, %v7783_v8  ;;  %v2672_v4 = vpop.f32.mrf.mxu0  ;;  %v2751_v42 = vmul.f32 %v7344_v3, %v7344_v3  ;;  %v2753_v40 = vmul.f32 %v7523_v48, %v7523_v48  ;;  %v6663_v26 = vld [vmem:[#allocation2 + $0x54c] ss:$24 sps:$4 sm:$0xff]  }
 0x275   :  { %v2790_v39 = vadd.f32 %v2789_v23, %v2749_v1  ;;  %v2691_v7 = vadd.f32 %v2690_v62, %v7707_v9  ;;  %v2921_v56 = vmul.f32 %v8769_v41, %v7787_v19  ;;  %v2752_v9 = vmul.f32 %v7386_v21, %v7386_v21  ;;  %v6662_v41 = vld [vmem:[#allocation2 + $0x578] ss:$24 sps:$4 sm:$0xff]  }
 0x276   :  { %v2979_v36 = vsel %vm2710_vm0, %v2920_v16, 0.0  ;;  %v2673_v59 = vpop.f32.mrf.mxu0  ;;  %v2755_v16 = vmul.f32 %v7723_v38, %v7723_v38 }
 0x277   :  { %v2692_v45 = vadd.f32 %v2691_v7, %v7344_v3  ;;  %v2791_v53 = vadd.f32 %v2790_v39, %v2750_v2  ;;  %v7802_v0 = vadd.f32 %v2979_v36, %v2978_v50  ;;  %v2992_v5 = vsel %vm2710_vm0, %v2921_v56, 0.0 }
 0x278   :  { %v7805_v32 = vadd.f32 %v2992_v5, %v2991_v22  ;;  %v2754_v3 = vmul.f32 %v7560_v55, %v7560_v55  ;;  %v2756_v2 = vmul.f32 %v7726_v46, %v7726_v46 }
 0x279   :  { %v2693_v47 = vadd.f32 %v2692_v45, %v7386_v21  ;;  %v2792_v1 = vadd.f32 %v2791_v53, %v2751_v42 }
 0x27b   :  { %v2793_v62 = vadd.f32 %v2792_v1, %v2752_v9  ;;  %v2694_v23 = vadd.f32 %v2693_v47, %v7523_v48  ;;  %v2757_v48 = vmul.f32 %v7370_v28, %v7370_v28  ;;  %v2761_v47 = vmul.f32 %v7741_v10, %v7741_v10 }
 0x27d   :  { %v2695_v7 = vadd.f32 %v2694_v23, %v7560_v55  ;;  %v2794_v50 = vadd.f32 %v2793_v62, %v2753_v40  ;;  %v2758_v55 = vmul.f32 %v7390_v18, %v7390_v18  ;;  %v2762_v62 = vmul.f32 %v7745_v14, %v7745_v14 }
 0x27f   :  { %v2696_v22 = vadd.f32 %v2695_v7, %v7723_v38  ;;  %v2795_v4 = vadd.f32 %v2794_v50, %v2754_v3  ;;  %v2759_v38 = vmul.f32 %v7543_v17, %v7543_v17 }
 0x281   :  { %v2796_v21 = vadd.f32 %v2795_v4, %v2755_v16  ;;  %v2697_v39 = vadd.f32 %v2696_v22, %v7726_v46  ;;  %v2760_v46 = vmul.f32 %v7562_v63, %v7562_v63 }
 0x283   :  { %v2698_v56 = vadd.f32 %v2697_v39, %v7370_v28  ;;  %v2797_v42 = vadd.f32 %v2796_v21, %v2756_v2  ;;  %v2767_v39 = vmul.f32 %v7763_v49, %v7763_v49 }
 0x285   :  { %v2699_v36 = vadd.f32 %v2698_v56, %v7390_v18  ;;  %v2798_v59 = vadd.f32 %v2797_v42, %v2757_v48  ;;  %v2711_v42 = vsel %vm2710_vm0, %v7433_v52, 0.0 }
 0x287   :  { %v2799_v45 = vadd.f32 %v2798_v59, %v2758_v55  ;;  %v2700_v53 = vadd.f32 %v2699_v36, %v7543_v17  ;;  %v2763_v17 = vmul.f32 %v7409_v25, %v7409_v25  ;;  %v2713_v59 = vsel %vm2710_vm0, %v7445_v24, 0.0 }
 0x289   :  { %v2701_v5 = vadd.f32 %v2700_v53, %v7562_v63  ;;  %v2800_v9 = vadd.f32 %v2799_v45, %v2759_v38  ;;  %v2764_v63 = vmul.f32 %v7420_v58, %v7420_v58  ;;  %v2771_v38 = vmul.f32 %v7596_v60, %v7596_v60 }
 0x28b   :  { %v2702_v28 = vadd.f32 %v2701_v5, %v7741_v10  ;;  %v2801_v1 = vadd.f32 %v2800_v9, %v2760_v46  ;;  %v2765_v10 = vmul.f32 %v7582_v29, %v7582_v29  ;;  %v2772_v46 = vmul.f32 %v7605_v27, %v7605_v27 }
 0x28d   :  { %v2802_v18 = vadd.f32 %v2801_v1, %v2761_v47  ;;  %v2703_v40 = vadd.f32 %v2702_v28, %v7745_v14  ;;  %v2766_v14 = vmul.f32 %v7588_v11, %v7588_v11  ;;  %v2814_v28 = vsel %vm2710_vm0, %v2771_v38, 0.0 }
 0x28e   :  { %v2717_v47 = vsel %vm2710_vm0, %v7605_v27, 0.0 }
 0x28f   :  { %v2704_v23 = vadd.f32 %v2703_v40, %v7409_v25  ;;  %v2803_v3 = vadd.f32 %v2802_v18, %v2762_v62  ;;  %v2719_v40 = vsel %vm2710_vm0, %v7783_v8, 0.0  ;;  %v2816_v62 = vsel %vm2710_vm0, %v2772_v46, 0.0 }
 0x291   :  { %v2705_v7 = vadd.f32 %v2704_v23, %v7420_v58  ;;  %v2804_v50 = vadd.f32 %v2803_v3, %v2763_v17  ;;  %v2769_v58 = vmul.f32 %v7433_v52, %v7433_v52  ;;  %v2715_v52 = vsel %vm2710_vm0, %v7596_v60, 0.0 }
 0x292   :  { %v2774_v60 = vmul.f32 %v7787_v19, %v7787_v19  ;;  %v2721_v3 = vsel %vm2710_vm0, %v7787_v19, 0.0  ;;  %v6330_v19 = vld [vmem:[#allocation11 + $0x30] sm:$0xff]  }
 0x293   :  { %v2805_v22 = vadd.f32 %v2804_v50, %v2764_v63  ;;  %v2706_v16 = vadd.f32 %v2705_v7, %v7582_v29  ;;  %v2768_v29 = vmul.f32 %v7767_v6, %v7767_v6 }
 0x294   :  { %v2820_v27 = vsel %vm2710_vm0, %v2774_v60, 0.0 }
 0x295   :  { %v2707_v4 = vadd.f32 %v2706_v16, %v7588_v11  ;;  %v2806_v21 = vadd.f32 %v2805_v22, %v2765_v10  ;;  %v2770_v11 = vmul.f32 %v7445_v24, %v7445_v24  ;;  %v2773_v24 = vmul.f32 %v7783_v8, %v7783_v8  ;;  %v6325_v8 = vld [vmem:[#allocation11 + $0x78] sm:$0xff]  }
 0x296   :  { %v6326_v22 = vld [vmem:[#allocation11 + $0x38] sm:$0xff]   ;;  %5702 = vmatprep.subr.bf16.mxu1 %v6325_v8  ;;  %v6355_v8 = vld [vmem:[#allocation11 + $0x140] sm:$0xff]  }
 0x297   :  { %v2708_v25 = vadd.f32 %v2707_v4, %v7763_v49  ;;  %v2807_v2 = vadd.f32 %v2806_v21, %v2766_v14  ;;  %v2810_v49 = vsel %vm2710_vm0, %v2769_v58, 0.0  ;;  %v2818_v63 = vsel %vm2710_vm0, %v2773_v24, 0.0  ;;  %v6327_v16 = vld [vmem:[#allocation11 + $0x178] sm:$0xff]   ;;  %v6329_v4 = vld [vmem:[#allocation11 + $0x70] sm:$0xff]   ;;  %5703 = vmatpush3.bf16.msra.mxu1 %v6326_v22  ;;  %v6334_v58 = vld [vmem:[#allocation11 + $0x28] sm:$0xff]  }
 0x298   :  { %v6328_v14 = vld [vmem:[#allocation11 + $0x138] sm:$0xff]   ;;  %5746 = vmatprep.subr.bf16.mxu0 %v6327_v16  ;;  %v6331_v21 = vld [vmem:[#allocation11 + $0x170] sm:$0xff]   ;;  %5704 = vmatprep.subr.bf16.mxu1 %v6329_v4  ;;  %v6356_v22 = vld [vmem:[#allocation11 + $0x100] sm:$0xff]   ;;  %v2929_v4 = vrot.slane %v7450_v34, 4 }
 0x299   :  { %v2808_v48 = vadd.f32 %v2807_v2, %v2767_v39  ;;  %v2709_v56 = vadd.f32 %v2708_v25, %v7767_v6  ;;  %v2812_v6 = vsel %vm2710_vm0, %v2770_v11, 0.0  ;;  %5747 = vmatpush3.bf16.msra.mxu0 %v6328_v14  ;;  %v6332_v25 = vld [vmem:[#allocation11 + $0x130] sm:$0xff]   ;;  %v6333_v39 = vld [vmem:[#allocation11 + $0x68] sm:$0xff]   ;;  %v6340_v11 = vld [vmem:[#allocation11 + $0x120] sm:$0xff]  }
 0x29a   :  { %5748 = vmatprep.subr.bf16.mxu0 %v6331_v21  ;;  %v6335_v2 = vld [vmem:[#allocation11 + $0x168] sm:$0xff]   ;;  %v6357_v16 = vld [vmem:[#allocation11 + $0xf8] sm:$0xff]   ;;  %v2942_v21 = vrot.slane %v7456_v35, 4 }
 0x29b   :  { %v2712_v55 = vadd.f32 %v2711_v42, %v2709_v56  ;;  %v2809_v36 = vadd.f32 %v2808_v48, %v2768_v29  ;;  %5705 = vmatpush3.bf16.msra.mxu1 %v6330_v19  ;;  %v6336_v48 = vld [vmem:[#allocation11 + $0x128] sm:$0xff]   ;;  %v6337_v56 = vld [vmem:[#allocation11 + $0x60] sm:$0xff]   ;;  %v6476_v14 = vld [vmem:[#allocation2 + $0x454] ss:$24 sps:$4 sm:$0xff]   ;;  %v2955_v19 = vrot.slane %v7608_v44, 4 }
 0x29c   :  { %5706 = vmatprep.subr.bf16.mxu1 %v6333_v39  ;;  %v6339_v29 = vld [vmem:[#allocation11 + $0x160] sm:$0xff]   ;;  %v2968_v39 = vrot.slane %v7614_v12, 4 }
 0x29d   :  { %v2811_v45 = vadd.f32 %v2810_v49, %v2809_v36  ;;  %v2714_v53 = vadd.f32 %v2713_v59, %v2712_v55  ;;  %5749 = vmatpush3.bf16.msra.mxu0 %v6332_v25  ;;  %v6338_v42 = vld [vmem:[#allocation11 + $0x20] sm:$0xff]   ;;  %v6341_v55 = vld [vmem:[#allocation11 + $0x58] sm:$0xff]   ;;  %v2981_v25 = vrot.slane %v7802_v0, 4 }
 0x29e   :  { %5750 = vmatprep.subr.bf16.mxu0 %v6335_v2  ;;  %v6343_v36 = vld [vmem:[#allocation11 + $0x158] sm:$0xff]   ;;  %v2994_v2 = vrot.slane %v7805_v32, 4 }
 0x29f   :  { %v2716_v5 = vadd.f32 %v2715_v52, %v2714_v53  ;;  %v2813_v9 = vadd.f32 %v2812_v6, %v2811_v45  ;;  %5707 = vmatpush3.bf16.msra.mxu1 %v6334_v58  ;;  %v6342_v49 = vld [vmem:[#allocation11 + $0x18] sm:$0xff]   ;;  %v2930_v58 = vadd.f32 %v2929_v4, %v7450_v34 }
 0x2a0   :  { %5708 = vmatprep.subr.bf16.mxu1 %v6337_v56  ;;  %v6344_v59 = vld [vmem:[#allocation11 + $0x118] sm:$0xff]   ;;  %v2956_v56 = vadd.f32 %v2955_v19, %v7608_v44 }
 0x2a1   :  { %v2718_v1 = vadd.f32 %v2717_v47, %v2716_v5  ;;  %v2815_v18 = vadd.f32 %v2814_v28, %v2813_v9  ;;  %5751 = vmatpush3.bf16.msra.mxu0 %v6336_v48  ;;  %v6345_v28 = vld [vmem:[#allocation11 + $0x50] sm:$0xff]   ;;  %v2943_v48 = vadd.f32 %v2942_v21, %v7456_v35 }
 0x2a2   :  { %5752 = vmatprep.subr.bf16.mxu0 %v6339_v29  ;;  %v2982_v29 = vadd.f32 %v2981_v25, %v7802_v0 }
 0x2a3   :  { %v2720_v17 = vadd.f32 %v2719_v40, %v2718_v1  ;;  %v2817_v23 = vadd.f32 %v2816_v62, %v2815_v18  ;;  %5709 = vmatpush3.bf16.msra.mxu1 %v6338_v42  ;;  %v6346_v1 = vld [vmem:[#allocation11 + $0x10] sm:$0xff]   ;;  %v2969_v42 = vadd.f32 %v2968_v39, %v7614_v12 }
 0x2a4   :  { %5710 = vmatprep.subr.bf16.mxu1 %v6341_v55  ;;  %v6347_v18 = vld [vmem:[#allocation11 + $0x150] sm:$0xff]   ;;  %v2931_v55 = vrot.slane %v2930_v58, 2 }
 0x2a5   :  { %v2722_v7 = vadd.f32 %v2721_v3, %v2720_v17  ;;  %v2819_v50 = vadd.f32 %v2818_v63, %v2817_v23  ;;  %5753 = vmatpush3.bf16.msra.mxu0 %v6340_v11  ;;  %v6348_v40 = vld [vmem:[#allocation11 + $0x110] sm:$0xff]   ;;  %v6349_v17 = vld [vmem:[#allocation11 + $0x48] sm:$0xff]   ;;  %v2995_v11 = vadd.f32 %v2994_v2, %v7805_v32 }
 0x2a6   :  { %5754 = vmatprep.subr.bf16.mxu0 %v6343_v36  ;;  %v6350_v3 = vld [vmem:[#allocation11 + $0x8] sm:$0xff]   ;;  %v2944_v36 = vrot.slane %v2943_v48, 2  ;;  %v431_v12 = vld [vmem:[#allocation8] sm:$0x3f] }
 0x2a7   :  { %2723 = vadd.xlane.f32.xlu0 %v2722_v7  ;;  %v2821_v10 = vadd.f32 %v2820_v27, %v2819_v50  ;;  %5711 = vmatpush3.bf16.msra.mxu1 %v6342_v49  ;;  %v6351_v63 = vld [vmem:[#allocation11 + $0x148] sm:$0xff]   ;;  %v6353_v27 = vld [vmem:[#allocation11 + $0x40] sm:$0xff]   ;;  %v2957_v49 = vrot.slane %v2956_v56, 2 }
 0x2a8   :  { %5712 = vmatprep.subr.bf16.mxu1 %v6345_v28  ;;  %v6352_v7 = vld [vmem:[#allocation11 + $0x108] sm:$0xff]  }
 0x2a9   :  { %5755 = vmatpush3.bf16.msra.mxu0 %v6344_v59  ;;  %v2983_v59 = vrot.slane %v2982_v29, 2 }
 0x2aa   :  { %5756 = vmatprep.subr.bf16.mxu0 %v6347_v18 }
 0x2ab   :  { %2822 = vadd.xlane.f32.xlu0 %v2821_v10  ;;  %5713 = vmatpush3.bf16.msra.mxu1 %v6346_v1  ;;  %v6354_v10 = vld [vmem:[#allocation11] sm:$0xff]   ;;  %v2984_v34 = vadd.f32 %v2983_v59, %v2982_v29  ;;  %v7908_v29 = vld [vmem:[#allocation10] sm:$0x3f] }
 0x2ac   :  { %5714 = vmatprep.subr.bf16.mxu1 %v6349_v17 }
 0x2ad   :  { %5757 = vmatpush3.bf16.msra.mxu0 %v6348_v40 }
 0x2ae   :  { %5758 = vmatprep.subr.bf16.mxu0 %v6351_v63  ;;  %v8843_v63 = vld [vmem:[#allocation42_spill] sm:$0xff] }
 0x2af   :  { %5715 = vmatpush3.bf16.msra.mxu1 %v6350_v3 }
 0x2b0   :  { %5716 = vmatprep.subr.bf16.mxu1 %v6353_v27 }
 0x2b1   :  { %5759 = vmatpush3.bf16.msra.mxu0 %v6352_v7 }
 0x2b2   :  { %5760 = vmatprep.subr.bf16.mxu0 %v6355_v8  ;;  %v8845_v8 = vld [vmem:[#allocation43_spill] sm:$0xff] }
 0x2b3   :  { %5717 = vmatpush3.bf16.msra.mxu1 %v6354_v10 }
 0x2b4   :  { %5724 = vmatprep.subr.bf16.mxu1 %v6357_v16 }
 0x2b5   :  { %5761 = vmatpush3.bf16.msra.mxu0 %v6356_v22 }
 0x2b6   :  { %3807 = vmatprep.subr.bf16.mxu0 %v6476_v14  ;;  %v8846_v14 = vld [vmem:[#allocation32_spill] sm:$0xff] }
 0x2b7   :  { %v7930_v59 = vrot.slane %v7908_v29, %v8846_v14 }
 0x2b9   :  { %8851 = vst [vmem:[#allocation50_spill] sm:$0xff] %v7930_v59 }
 0x330   :  { %v2724_v38 = vpop.xlane.xlu0 %2723 }
 0x331   :  { %v2725_v45 = vrot.slane %v2724_v38, 4 }
 0x333   :  { %v2726_v53 = vadd.f32 %v2725_v45, %v2724_v38  ;;  %v2970_v38 = vrot.slane %v2969_v42, 2  ;;  %v2996_v45 = vrot.slane %v2995_v11, 2 }
 0x334   :  { %v2823_v6 = vpop.xlane.xlu0 %2822 }
 0x335   :  { %v2727_v52 = vrot.slane %v2726_v53, 2  ;;  %v2824_v46 = vrot.slane %v2823_v6, 4  ;;  %v2997_v35 = vadd.f32 %v2996_v45, %v2995_v11  ;;  %v7916_v11 = vrot.slane %v7908_v29, %v8843_v63 }
 0x337   :  { %v2825_v5 = vadd.f32 %v2824_v46, %v2823_v6  ;;  %v2728_v9 = vadd.f32 %v2727_v52, %v2726_v53  ;;  %v2932_v53 = vadd.f32 %v2931_v55, %v2930_v58  ;;  %v2945_v6 = vadd.f32 %v2944_v36, %v2943_v48  ;;  %8848 = vst [vmem:[#allocation47_spill] sm:$0xff] %v7916_v11 }
 0x338   :  { %v2958_v52 = vadd.f32 %v2957_v49, %v2956_v56  ;;  %v2971_v46 = vadd.f32 %v2970_v38, %v2969_v42  ;;  %v2998_v28 = vrot.slane %v2997_v35, 1  ;;  %v7926_v49 = vrot.slane %v7908_v29, %v8845_v8 }
 0x339   :  { %v2826_v24 = vrot.slane %v2825_v5, 2  ;;  %v2729_v47 = vrot.slane %v2728_v9, 1  ;;  %v2946_v44 = vrot.slane %v2945_v6, 1 }
 0x33a   :  { %v2959_v0 = vrot.slane %v2958_v52, 1  ;;  %v2999_v10 = vadd.f32 %v2998_v28, %v2997_v35  ;;  %8850 = vst [vmem:[#allocation49_spill] sm:$0xff] %v7926_v49 }
 0x33b   :  { %v2827_v60 = vadd.f32 %v2826_v24, %v2825_v5  ;;  %v2730_v62 = vadd.f32 %v2729_v47, %v2728_v9  ;;  %v2933_v5 = vrot.slane %v2932_v53, 1  ;;  %v2985_v9 = vrot.slane %v2984_v34, 1 }
 0x33c   :  { %v2972_v24 = vrot.slane %v2971_v46, 1  ;;  %v2960_v18 = vadd.f32 %v2959_v0, %v2958_v52 }
 0x33d   :  { %5834 = vpush %v2730_v62  ;;  %v2828_v23 = vrot.slane %v2827_v60, 1  ;;  %v2934_v1 = vadd.f32 %v2933_v5, %v2932_v53  ;;  %v2986_v40 = vadd.f32 %v2985_v9, %v2984_v34  ;;  %v8841_v62 = vld [vmem:[#allocation20_spill] sm:$0xff] }
 0x33e   :  { %v2973_v16 = vadd.f32 %v2972_v24, %v2971_v46  ;;  %v7912_v42 = vrot.slane %v7908_v29, %v8841_v62 }
 0x33f   :  { %v2829_v50 = vadd.f32 %v2828_v23, %v2827_v60  ;;  %v2947_v60 = vadd.f32 %v2946_v44, %v2945_v6  ;;  %v8842_v23 = vld [vmem:[#allocation31_spill] sm:$0xff] }
 0x340   :  { %8847 = vst [vmem:[#allocation46_spill] sm:$0xff] %v7912_v42 }
 0x341   :  { %5836 = vpush %v2829_v50  ;;  %v8844_v50 = vld [vmem:[#allocation21_spill] sm:$0xff] }
 0x342   :  { %v7920_v55 = vrot.slane %v7908_v29, %v8844_v50 }
 0x344   :  { %8849 = vst [vmem:[#allocation48_spill] sm:$0xff] %v7920_v55 }
 0x36e   :  { %s5835_s18 = spop %5834 }
 0x36f   :  { %s2732_s19 = smul.f32 2.6573129e-05, %s5835_s18 }
 0x371   :  { %v3001_v32 = vstv %s2732_s19  ;;  %s2832_s20 = smul.f32 %s2732_s19, %s2732_s19 }
 0x372   :  { %v3002_v47 = vmul.f32 %v3001_v32, %v431_v12  ;;  %s5837_s21 = spop %5836 }
 0x373   :  { %s2831_s4 = smul.f32 2.6573129e-05, %s5837_s21 }
 0x374   :  { %v3007_v17 = vrot.slane %v3002_v47, %v8841_v62  ;;  %v3015_v3 = vrot.slane %v3002_v47, %v8842_v23  ;;  %v3023_v7 = vrot.slane %v3002_v47, %v8843_v63  ;;  %v3011_v27 = vrot.slane %v3002_v47, %v8844_v50 }
 0x375   :  { %s2833_s3 = ssub.f32 %s2831_s4, %s2832_s20  ;;  %v3027_v22 = vrot.slane %v3002_v47, %v8845_v8  ;;  %v3019_v4 = vrot.slane %v3002_v47, %v8846_v14  ;;  %s6946_s20 = smov [#allocation14]  }
 0x376   :  { %v3034_v21 = vsub.f32 %v2934_v1, %v3007_v17  ;;  %v7906_v19 = vsub.f32 %v2960_v18, %v3015_v3  ;;  %v3038_v25 = vsub.f32 %v2986_v40, %v3023_v7  ;;  %v3035_v39 = vsub.f32 %v2947_v60, %v3011_v27  ;;  %v6358_v1 = vld [vmem:[#allocation11 + $0xb8] sm:$0xff]   ;;  %v6359_v60 = vld [vmem:[#allocation11 + $0xf0] sm:$0xff]   ;;  %v6361_v27 = vld [vmem:[#allocation11 + $0xe8] sm:$0xff]   ;;  %s5234_s21 = sshll.u32 %s6946_s20, 4  ;;  %s5235_s21 = int_to_ptr.vmem [resolvable:$true] %s5234_s21 }
 0x377   :  { %s2834_s6 = sadd.f32 1e-05, %s2833_s3  ;;  %v3039_v2 = vsub.f32 %v2999_v10, %v3027_v22  ;;  %v3037_v58 = vsub.f32 %v2973_v16, %v3019_v4  ;;  %v7945_v17 = vld [vmem:[%s8687_s0 + $0x7c] ss:$16 sps:$4 sm:$0xff]   ;;  %v6477_v10 = vld [vmem:[#allocation2 + $0x450] ss:$24 sps:$4 sm:$0xff]   ;;  %p6910_p8 = scmp.lt.s32.totalorder %s5235_s21, %s5235_s21 }
 0x378   :  { %v6360_v7 = vld [vmem:[#allocation11 + $0xb0] sm:$0xff]   ;;  %v6478_v22 = vld [vmem:[#allocation2 + $0x424] ss:$24 sps:$4 sm:$0xff]   ;;  %s6905_s4 = scalar_lea.vmem %s5235_s21, 32 }
 0x379   :  { %v2835_v48 = vstv %s2834_s6  ;;  %v6362_v16 = vld [vmem:[#allocation11 + $0xa8] sm:$0xff]   ;;  %v6363_v4 = vld [vmem:[#allocation11 + $0xe0] sm:$0xff]   ;;  %p6906_p7 = scmp.ne.s32.totalorder %s5235_s21, %s6905_s4  ;;  %p6911_p9 = scmp.lt.s32.totalorder %s6905_s4, %s6905_s4 }
 0x37a   :  { %6454 = vrsqrt.f32 %v2835_v48  ;;  %v6482_v48 = vld [vmem:[#allocation2 + $0x3c4] ss:$24 sps:$4 sm:$0xff]  }
 0x37b   :  { %p6912_p10 = por %p6911_p9, %p6910_p8 }
 0x37d   :  { %p6913_p11 = pnand %p6912_p10, %p6906_p7 }
 0x387   :  { %v6455_v56 = vpop.eup %6454 }
 0x388   :  { %5838 = vpush %v6455_v56  ;;  %v6366_v56 = vld [vmem:[#allocation11 + $0x98] sm:$0xff]  }
 0x3b9   :  { %s5839_s8 = spop %5838 }
 0x3ba   :  { %s3000_s22 = smul.f32 0.020408163, %s5839_s8 }
 0x3bc   :  { %v7922_v36 = vstv %s3000_s22 }
 0x3bd   :  { %v3041_v38 = vmul.f32 %v7922_v36, %v3034_v21  ;;  %v3045_v45 = vmul.f32 %v7922_v36, %v3038_v25  ;;  %v3042_v53 = vmul.f32 %v7922_v36, %v3035_v39  ;;  %v3046_v6 = vmul.f32 %v7922_v36, %v3039_v2  ;;  %v6479_v21 = vld [vmem:[#allocation2 + $0x420] ss:$24 sps:$4 sm:$0xff]   ;;  %v6480_v25 = vld [vmem:[#allocation2 + $0x3f4] ss:$24 sps:$4 sm:$0xff]  }
 0x3be   :  { %v3044_v52 = vmul.f32 %v7922_v36, %v3037_v58  ;;  %v6364_v39 = vld [vmem:[#allocation11 + $0xa0] sm:$0xff]   ;;  %v6365_v2 = vld [vmem:[#allocation11 + $0xd8] sm:$0xff]  }
 0x3bf   :  { %v3078_v34 = vadd.f32 %v7912_v42, %v3041_v38  ;;  %v3082_v46 = vadd.f32 %v7916_v11, %v3045_v45  ;;  %v3079_v35 = vadd.f32 %v7920_v55, %v3042_v53  ;;  %v3083_v5 = vadd.f32 %v7926_v49, %v3046_v6  ;;  %v6481_v58 = vld [vmem:[#allocation2 + $0x3f0] ss:$24 sps:$4 sm:$0xff]   ;;  %v6483_v45 = vld [vmem:[#allocation2 + $0x3c0] ss:$24 sps:$4 sm:$0xff]   ;;  %v6484_v53 = vld [vmem:[#allocation2 + $0x394] ss:$24 sps:$4 sm:$0xff]  }
 0x3c0   :  { %v3081_v44 = vadd.f32 %v7930_v59, %v3044_v52  ;;  %v6367_v38 = vld [vmem:[#allocation11 + $0xd0] sm:$0xff]   ;;  %v3043_v52 = vmul.f32 %v7922_v36, %v7906_v19  ;;  %v6372_v19 = vld [vmem:[#allocation11 + $0x80] sm:$0xff]  }
 0x3c1   :  { %v3085_v0 = vmax.f32 %v3079_v35, 0.0  ;;  %v3084_v9 = vmax.f32 %v3078_v34, 0.0  ;;  %v3088_v12 = vmax.f32 %v3082_v46, 0.0  ;;  %v3089_v32 = vmax.f32 %v3083_v5, 0.0  ;;  %v6368_v6 = vld [vmem:[#allocation11 + $0x90] sm:$0xff]   ;;  %v6369_v34 = vld [vmem:[#allocation11 + $0xc8] sm:$0xff]  }
 0x3c2   :  { %v3087_v28 = vmax.f32 %v3081_v44, 0.0  ;;  %v7952_v46 = vrot.slane %v7908_v29, %v8842_v23  ;;  %v6485_v35 = vld [vmem:[#allocation2 + $0x390] ss:$24 sps:$4 sm:$0xff]   ;;  %v6486_v5 = vld [vmem:[#allocation2 + $0x364] ss:$24 sps:$4 sm:$0xff]  }
 0x3c3   :  { %v3091_v24 = vpack.c.bf16 %v3085_v0, %v3085_v0  ;;  %v3090_v47 = vpack.c.bf16 %v3084_v9, %v3084_v9  ;;  %v3094_v18 = vpack.c.bf16 %v3088_v12, %v3088_v12  ;;  %v3095_v40 = vpack.c.bf16 %v3089_v32, %v3089_v32  ;;  %v6370_v44 = vld [vmem:[#allocation11 + $0x88] sm:$0xff]   ;;  %v6371_v0 = vld [vmem:[#allocation11 + $0xc0] sm:$0xff]   ;;  %v6488_v32 = vld [vmem:[#allocation2 + $0x334] ss:$24 sps:$4 sm:$0xff]  }
 0x3c4   :  { %v3093_v3 = vpack.c.bf16 %v3087_v28, %v3087_v28  ;;  %8852 = vst [vmem:[#allocation51_spill] sm:$0xff] %v7952_v46  ;;  %v3080_v9 = vadd.f32 %v7952_v46, %v3043_v52  ;;  %v6487_v12 = vld [vmem:[#allocation2 + $0x360] ss:$24 sps:$4 sm:$0xff]   ;;  %v6489_v29 = vld [vmem:[#allocation2 + $0x330] ss:$24 sps:$4 sm:$0xff]  }
 0x3c5   :  { %3513 = vmatprep.mubr.bf16.mxu1 %v3091_v24  ;;  %3593 = vmatprep.mubr.bf16.mxu0 %v3095_v40  ;;  %v6490_v28 = vld [vmem:[#allocation2 + $0x304] ss:$24 sps:$4 sm:$0xff]   ;;  %v6493_v40 = vld [vmem:[#allocation2 + $0x5d4] ss:$24 sps:$4 sm:$0xff]  }
 0x3c6   :  { %3514 = vmatmul.mubr.bf16.vlgmr.msra.gmra.mxu1 %v3090_v47  ;;  %3594 = vmatmul.mubr.bf16.vlgmr.msra.gmra.mxu0 %v3094_v18  ;;  %v3086_v36 = vmax.f32 %v3080_v9, 0.0  ;;  %v7958_v24 = vld [vmem:[%s8687_s0 + $0x74] ss:$16 sps:$4 sm:$0xff]   ;;  %v6492_v18 = vld [vmem:[#allocation2 + $0x300] ss:$24 sps:$4 sm:$0xff]  }
 0x3c7   :  { %5725 = vmatpush3.bf16.msra.mxu1 %v6358_v1  ;;  %3553 = vmatprep.mubr.bf16.mxu1 %v3093_v3  ;;  %v6491_v1 = vld [vmem:[#allocation2 + $0x154] ss:$24 sps:$4 sm:$0xff]   ;;  %v6495_v3 = vld [vmem:[#allocation2 + $0x124] ss:$24 sps:$4 sm:$0xff]  }
 0x3c8   :  { %5726 = vmatprep.subr.bf16.mxu1 %v6359_v60  ;;  %3808 = vmatpush1.bf16.msra.mxu0 %v6477_v10  ;;  %v3092_v47 = vpack.c.bf16 %v3086_v36, %v3086_v36  ;;  %v6494_v60 = vld [vmem:[#allocation2 + $0x150] ss:$24 sps:$4 sm:$0xff]   ;;  %v6498_v10 = vld [vmem:[#allocation2 + $0x120] ss:$24 sps:$4 sm:$0xff]   ;;  %v6513_v52 = vld [vmem:[#allocation2 + $0x4e4] ss:$24 sps:$4 sm:$0xff]  }
 0x3c9   :  { %3839 = vmatprep.mubr.bf16.mxu0 %v7945_v17  ;;  %3809 = vmatprep.subr.bf16.mxu0 %v6478_v22  ;;  %v6499_v22 = vld [vmem:[#allocation2 + $0xf4] ss:$24 sps:$4 sm:$0xff]   ;;  %v6519_v9 = vld [vmem:[#allocation2 + $0x4] ss:$24 sps:$4 sm:$0xff]  }
 0x3ca   :  { %v6523_v36 = vld [vmem:[#allocation2 + $0x2d4] ss:$24 sps:$4 sm:$0xff]   ;;  %v8866_v11 = vld [vmem:[#allocation28_spill] sm:$0xff] }
 0x3cb   :  { %5727 = vmatpush3.bf16.msra.mxu1 %v6360_v7  ;;  %v6496_v7 = vld [vmem:[#allocation2 + $0x5d0] ss:$24 sps:$4 sm:$0xff]  }
 0x3cc   :  { %5728 = vmatprep.subr.bf16.mxu1 %v6361_v27  ;;  %3810 = vmatpush1.bf16.msra.mxu0 %v6479_v21  ;;  %v6497_v27 = vld [vmem:[#allocation2 + $0x5a4] ss:$24 sps:$4 sm:$0xff]   ;;  %v6502_v21 = vld [vmem:[#allocation2 + $0xf0] ss:$24 sps:$4 sm:$0xff]  }
 0x3cd   :  { %3811 = vmatprep.subr.bf16.mxu0 %v6480_v25  ;;  %v6503_v25 = vld [vmem:[#allocation2 + $0xc4] ss:$24 sps:$4 sm:$0xff]  }
 0x3cf   :  { %5729 = vmatpush3.bf16.msra.mxu1 %v6362_v16  ;;  %v6500_v16 = vld [vmem:[#allocation2 + $0x5a0] ss:$24 sps:$4 sm:$0xff]  }
 0x3d0   :  { %5730 = vmatprep.subr.bf16.mxu1 %v6363_v4  ;;  %3812 = vmatpush1.bf16.msra.mxu0 %v6481_v58  ;;  %v6501_v4 = vld [vmem:[#allocation2 + $0x574] ss:$24 sps:$4 sm:$0xff]   ;;  %v6506_v58 = vld [vmem:[#allocation2 + $0xc0] ss:$24 sps:$4 sm:$0xff]  }
 0x3d1   :  { %3813 = vmatprep.subr.bf16.mxu0 %v6482_v48  ;;  %v6507_v48 = vld [vmem:[#allocation2 + $0x94] ss:$24 sps:$4 sm:$0xff]  }
 0x3d3   :  { %5731 = vmatpush3.bf16.msra.mxu1 %v6364_v39  ;;  %v6504_v39 = vld [vmem:[#allocation2 + $0x570] ss:$24 sps:$4 sm:$0xff]  }
 0x3d4   :  { %5732 = vmatprep.subr.bf16.mxu1 %v6365_v2  ;;  %3814 = vmatpush1.bf16.msra.mxu0 %v6483_v45  ;;  %v6505_v2 = vld [vmem:[#allocation2 + $0x544] ss:$24 sps:$4 sm:$0xff]   ;;  %v6510_v45 = vld [vmem:[#allocation2 + $0x90] ss:$24 sps:$4 sm:$0xff]  }
 0x3d5   :  { %3815 = vmatprep.subr.bf16.mxu0 %v6484_v53  ;;  %v6511_v53 = vld [vmem:[#allocation2 + $0x64] ss:$24 sps:$4 sm:$0xff]  }
 0x3d7   :  { %5733 = vmatpush3.bf16.msra.mxu1 %v6366_v56  ;;  %v6508_v56 = vld [vmem:[#allocation2 + $0x540] ss:$24 sps:$4 sm:$0xff]  }
 0x3d8   :  { %5734 = vmatprep.subr.bf16.mxu1 %v6367_v38  ;;  %3816 = vmatpush1.bf16.msra.mxu0 %v6485_v35  ;;  %v6509_v38 = vld [vmem:[#allocation2 + $0x514] ss:$24 sps:$4 sm:$0xff]  }
 0x3d9   :  { %3817 = vmatprep.subr.bf16.mxu0 %v6486_v5  ;;  %v6515_v35 = vld [vmem:[#allocation2 + $0x34] ss:$24 sps:$4 sm:$0xff]   ;;  %v6516_v5 = vld [vmem:[#allocation2 + $0x4e0] ss:$24 sps:$4 sm:$0xff]  }
 0x3db   :  { %5735 = vmatpush3.bf16.msra.mxu1 %v6368_v6  ;;  %v6512_v6 = vld [vmem:[#allocation2 + $0x510] ss:$24 sps:$4 sm:$0xff]  }
 0x3dc   :  { %5736 = vmatprep.subr.bf16.mxu1 %v6369_v34  ;;  %3818 = vmatpush1.bf16.msra.mxu0 %v6487_v12  ;;  %v6514_v34 = vld [vmem:[#allocation2 + $0x60] ss:$24 sps:$4 sm:$0xff]   ;;  %v6520_v12 = vld [vmem:[#allocation2 + $0x4b0] ss:$24 sps:$4 sm:$0xff]  }
 0x3dd   :  { %3819 = vmatprep.subr.bf16.mxu0 %v6488_v32  ;;  %v6521_v32 = vld [vmem:[#allocation2 + $0x484] ss:$24 sps:$4 sm:$0xff]  }
 0x3df   :  { %5737 = vmatpush3.bf16.msra.mxu1 %v6370_v44  ;;  %v6517_v44 = vld [vmem:[#allocation2 + $0x4b4] ss:$24 sps:$4 sm:$0xff]  }
 0x3e0   :  { %5738 = vmatprep.subr.bf16.mxu1 %v6371_v0  ;;  %3820 = vmatpush1.bf16.msra.mxu0 %v6489_v29  ;;  %v6518_v0 = vld [vmem:[#allocation2 + $0x30] ss:$24 sps:$4 sm:$0xff]  }
 0x3e1   :  { %3821 = vmatprep.subr.bf16.mxu0 %v6490_v28  ;;  %v7964_v29 = vld [vmem:[%s8687_s0 + $0x78] ss:$16 sps:$4 sm:$0xff]  }
 0x3e2   :  { %v6524_v28 = vld [vmem:[#allocation2 + $0x480] ss:$24 sps:$4 sm:$0xff]  }
 0x3e3   :  { %5739 = vmatpush3.bf16.msra.mxu1 %v6372_v19  ;;  %v6522_v19 = vld [vmem:[#allocation2] ss:$24 sps:$4 sm:$0xff]  }
 0x3e4   :  { %3736 = vmatprep.subr.bf16.mxu1 %v6491_v1  ;;  %3822 = vmatpush1.bf16.msra.mxu0 %v6492_v18  ;;  %v6525_v1 = vld [vmem:[#allocation2 + $0x15c] ss:$24 sps:$4 sm:$0xff]   ;;  %v6526_v18 = vld [vmem:[#allocation2 + $0x2d0] ss:$24 sps:$4 sm:$0xff]  }
 0x3e5   :  { %3823 = vmatprep.subr.bf16.mxu0 %v6493_v40  ;;  %v6527_v40 = vld [vmem:[#allocation2 + $0x2a4] ss:$24 sps:$4 sm:$0xff]  }
 0x3e6   :  { %3554 = vmatmul.mubr.bf16.vlgmr.msra.gmra.mxu1 %v3092_v47  ;;  %v7969_v47 = vld [vmem:[%s8687_s0 + $0x9c] ss:$16 sps:$4 sm:$0xff]  }
 0x3e7   :  { %3737 = vmatpush1.bf16.msra.mxu1 %v6494_v60  ;;  %3768 = vmatprep.mubr.bf16.mxu1 %v7958_v24  ;;  %v6528_v60 = vld [vmem:[#allocation2 + $0x158] ss:$24 sps:$4 sm:$0xff]  }
 0x3e8   :  { %3738 = vmatprep.subr.bf16.mxu1 %v6495_v3  ;;  %3824 = vmatpush2.bf16.msra.mxu0 %v6496_v7  ;;  %v6529_v3 = vld [vmem:[#allocation2 + $0x12c] ss:$24 sps:$4 sm:$0xff]   ;;  %v6530_v7 = vld [vmem:[#allocation2 + $0x2a0] ss:$24 sps:$4 sm:$0xff]  }
 0x3e9   :  { %3825 = vmatprep.subr.bf16.mxu0 %v6497_v27  ;;  %v6531_v27 = vld [vmem:[#allocation2 + $0x274] ss:$24 sps:$4 sm:$0xff]  }
 0x3eb   :  { %3739 = vmatpush1.bf16.msra.mxu1 %v6498_v10  ;;  %v7976_v10 = vld [vmem:[%s8687_s0 + $0x98] ss:$16 sps:$4 sm:$0xff]  }
 0x3ec   :  { %3740 = vmatprep.subr.bf16.mxu1 %v6499_v22  ;;  %3826 = vmatpush2.bf16.msra.mxu0 %v6500_v16  ;;  %v6532_v22 = vld [vmem:[#allocation2 + $0x128] ss:$24 sps:$4 sm:$0xff]   ;;  %v7981_v16 = vld [vmem:[%s8687_s0 + $0xbc] ss:$16 sps:$4 sm:$0xff]  }
 0x3ed   :  { %3827 = vmatprep.subr.bf16.mxu0 %v6501_v4  ;;  %v6533_v4 = vld [vmem:[#allocation2 + $0xfc] ss:$24 sps:$4 sm:$0xff]  }
 0x3ef   :  { %3741 = vmatpush1.bf16.msra.mxu1 %v6502_v21  ;;  %v6534_v21 = vld [vmem:[#allocation2 + $0x270] ss:$24 sps:$4 sm:$0xff]  }
 0x3f0   :  { %3742 = vmatprep.subr.bf16.mxu1 %v6503_v25  ;;  %3828 = vmatpush2.bf16.msra.mxu0 %v6504_v39  ;;  %v6535_v25 = vld [vmem:[#allocation2 + $0x244] ss:$24 sps:$4 sm:$0xff]   ;;  %v6536_v39 = vld [vmem:[#allocation2 + $0xf8] ss:$24 sps:$4 sm:$0xff]  }
 0x3f1   :  { %3829 = vmatprep.subr.bf16.mxu0 %v6505_v2  ;;  %v6537_v2 = vld [vmem:[#allocation2 + $0xcc] ss:$24 sps:$4 sm:$0xff]  }
 0x3f3   :  { %3743 = vmatpush1.bf16.msra.mxu1 %v6506_v58  ;;  %v5622_v58 = vld [vmem:[%s8687_s0 + $0xd8] sm:$0x11] }
 0x3f4   :  { %3744 = vmatprep.subr.bf16.mxu1 %v6507_v48  ;;  %3830 = vmatpush2.bf16.msra.mxu0 %v6508_v56  ;;  %v6538_v48 = vld [vmem:[#allocation2 + $0x240] ss:$24 sps:$4 sm:$0xff]   ;;  %v6539_v56 = vld [vmem:[#allocation2 + $0x214] ss:$24 sps:$4 sm:$0xff]  }
 0x3f5   :  { %3831 = vmatprep.subr.bf16.mxu0 %v6509_v38  ;;  %v7991_v38 = vld [vmem:[%s8687_s0 + $0xb8] ss:$16 sps:$4 sm:$0xff]  }
 0x3f7   :  { %3745 = vmatpush1.bf16.msra.mxu1 %v6510_v45  ;;  %v6540_v45 = vld [vmem:[#allocation2 + $0xc8] ss:$24 sps:$4 sm:$0xff]  }
 0x3f8   :  { %3746 = vmatprep.subr.bf16.mxu1 %v6511_v53  ;;  %3832 = vmatpush2.bf16.msra.mxu0 %v6512_v6  ;;  %v7993_v53 = vcombine.high %v5622_v58, %v5622_v58  ;;  %v6541_v6 = vld [vmem:[#allocation2 + $0x9c] ss:$24 sps:$4 sm:$0xff]  }
 0x3f9   :  { %3833 = vmatprep.subr.bf16.mxu0 %v6513_v52  ;;  %v6542_v52 = vld [vmem:[#allocation2 + $0x210] ss:$24 sps:$4 sm:$0xff]  }
 0x3fb   :  { %3747 = vmatpush1.bf16.msra.mxu1 %v6514_v34  ;;  %v6543_v34 = vld [vmem:[#allocation2 + $0x1e4] ss:$24 sps:$4 sm:$0xff]  }
 0x3fc   :  { %3748 = vmatprep.subr.bf16.mxu1 %v6515_v35  ;;  %3834 = vmatpush2.bf16.msra.mxu0 %v6516_v5  ;;  %v6544_v35 = vld [vmem:[#allocation2 + $0x98] ss:$24 sps:$4 sm:$0xff]   ;;  %v6545_v5 = vld [vmem:[#allocation2 + $0x6c] ss:$24 sps:$4 sm:$0xff]  }
 0x3fd   :  { %3835 = vmatprep.subr.bf16.mxu0 %v6517_v44  ;;  %v6546_v44 = vld [vmem:[#allocation2 + $0x1e0] ss:$24 sps:$4 sm:$0xff]  }
 0x3ff   :  { %3749 = vmatpush1.bf16.msra.mxu1 %v6518_v0  ;;  %v6547_v0 = vld [vmem:[#allocation2 + $0x1b4] ss:$24 sps:$4 sm:$0xff]  }
 0x400   :  { %3750 = vmatprep.subr.bf16.mxu1 %v6519_v9  ;;  %3836 = vmatpush2.bf16.msra.mxu0 %v6520_v12  ;;  %v7997_v9 = vcombine.low %v5622_v58, %v5622_v58  ;;  %v6548_v12 = vld [vmem:[#allocation2 + $0x68] ss:$24 sps:$4 sm:$0xff]   ;;  %v8021_v58 = vld [vmem:[%s8687_s0 + $0xb4] ss:$16 sps:$4 sm:$0xff]  }
 0x401   :  { %3837 = vmatprep.subr.bf16.mxu0 %v6521_v32  ;;  %v6549_v32 = vld [vmem:[#allocation2 + $0x3c] ss:$24 sps:$4 sm:$0xff]  }
 0x403   :  { %3751 = vmatpush1.bf16.msra.mxu1 %v6522_v19  ;;  %v6550_v19 = vld [vmem:[#allocation2 + $0x1b0] ss:$24 sps:$4 sm:$0xff]  }
 0x404   :  { %3752 = vmatprep.subr.bf16.mxu1 %v6523_v36  ;;  %3838 = vmatpush2.bf16.msra.mxu0 %v6524_v28  ;;  %v6551_v36 = vld [vmem:[#allocation2 + $0x184] ss:$24 sps:$4 sm:$0xff]   ;;  %v6552_v28 = vld [vmem:[#allocation2 + $0x38] ss:$24 sps:$4 sm:$0xff]  }
 0x405   :  { %3949 = vmatprep.subr.bf16.mxu0 %v6525_v1  ;;  %v8004_v1 = vld [vmem:[%s8687_s0 + $0x70] ss:$16 sps:$4 sm:$0xff]  }
 0x407   :  { %3753 = vmatpush2.bf16.msra.mxu1 %v6526_v18  ;;  %3840 = vmatmul.mubr.bf16.vlgmr.msra.gmra.mxu0 %v7964_v29  ;;  %v6553_v18 = vld [vmem:[#allocation2 + $0xc] ss:$24 sps:$4 sm:$0xff]  }
 0x408   :  { %3754 = vmatprep.subr.bf16.mxu1 %v6527_v40  ;;  %3950 = vmatpush1.bf16.msra.mxu0 %v6528_v60  ;;  %v6554_v40 = vld [vmem:[#allocation2 + $0x180] ss:$24 sps:$4 sm:$0xff]   ;;  %v8009_v60 = vld [vmem:[%s8687_s0 + $0x94] ss:$16 sps:$4 sm:$0xff]  }
 0x409   :  { %3849 = vmatprep.mubr.bf16.mxu0 %v7969_v47  ;;  %3951 = vmatprep.subr.bf16.mxu0 %v6529_v3  ;;  %v6555_v3 = vld [vmem:[#allocation2 + $0x754] ss:$24 sps:$4 sm:$0xff]  }
 0x40b   :  { %3755 = vmatpush2.bf16.msra.mxu1 %v6530_v7  ;;  %v6556_v7 = vld [vmem:[#allocation2 + $0x8] ss:$24 sps:$4 sm:$0xff]  }
 0x40c   :  { %3756 = vmatprep.subr.bf16.mxu1 %v6531_v27  ;;  %3952 = vmatpush1.bf16.msra.mxu0 %v6532_v22  ;;  %v6557_v27 = vld [vmem:[#allocation2 + $0x2dc] ss:$24 sps:$4 sm:$0xff]   ;;  %v6558_v22 = vld [vmem:[#allocation2 + $0x750] ss:$24 sps:$4 sm:$0xff]  }
 0x40d   :  { %3953 = vmatprep.subr.bf16.mxu0 %v6533_v4  ;;  %v6559_v4 = vld [vmem:[#allocation2 + $0x724] ss:$24 sps:$4 sm:$0xff]  }
 0x40f   :  { %3757 = vmatpush2.bf16.msra.mxu1 %v6534_v21  ;;  %3850 = vmatmul.mubr.bf16.gmra.mxu0 %v7976_v10  ;;  %v6560_v21 = vld [vmem:[#allocation2 + $0x2d8] ss:$24 sps:$4 sm:$0xff]  }
 0x410   :  { %3758 = vmatprep.subr.bf16.mxu1 %v6535_v25  ;;  %3954 = vmatpush1.bf16.msra.mxu0 %v6536_v39  ;;  %v8016_v25 = vld [vmem:[%s8687_s0 + $0x90] ss:$16 sps:$4 sm:$0xff]   ;;  %v6561_v39 = vld [vmem:[#allocation2 + $0x2ac] ss:$24 sps:$4 sm:$0xff]  }
 0x411   :  { %3859 = vmatprep.mubr.bf16.mxu0 %v7981_v16  ;;  %3955 = vmatprep.subr.bf16.mxu0 %v6537_v2  ;;  %v6562_v2 = vld [vmem:[#allocation2 + $0x720] ss:$24 sps:$4 sm:$0xff]  }
 0x413   :  { %3759 = vmatpush2.bf16.msra.mxu1 %v6538_v48  ;;  %v6563_v48 = vld [vmem:[#allocation2 + $0x6f4] ss:$24 sps:$4 sm:$0xff]  }
 0x414   :  { %3760 = vmatprep.subr.bf16.mxu1 %v6539_v56  ;;  %3956 = vmatpush1.bf16.msra.mxu0 %v6540_v45  ;;  %v6564_v56 = vld [vmem:[#allocation2 + $0x2a8] ss:$24 sps:$4 sm:$0xff]   ;;  %v6565_v45 = vld [vmem:[#allocation2 + $0x27c] ss:$24 sps:$4 sm:$0xff]  }
 0x415   :  { %3957 = vmatprep.subr.bf16.mxu0 %v6541_v6  ;;  %v6566_v6 = vld [vmem:[#allocation2 + $0x6f0] ss:$24 sps:$4 sm:$0xff]  }
 0x417   :  { %3761 = vmatpush2.bf16.msra.mxu1 %v6542_v52  ;;  %3860 = vmatmul.mubr.bf16.gmra.mxu0 %v7991_v38  ;;  %v6567_v52 = vld [vmem:[#allocation2 + $0x6c4] ss:$24 sps:$4 sm:$0xff]  }
 0x418   :  { %3762 = vmatprep.subr.bf16.mxu1 %v6543_v34  ;;  %3958 = vmatpush1.bf16.msra.mxu0 %v6544_v35  ;;  %v5621_v34 = vld [vmem:[%s8687_s0 + $0xd0] sm:$0x11] }
 0x419   :  { %3869 = vmatprep.mubr.bf16.mxu0 %v7993_v53  ;;  %3959 = vmatprep.subr.bf16.mxu0 %v6545_v5  ;;  %v6568_v35 = vld [vmem:[#allocation2 + $0x278] ss:$24 sps:$4 sm:$0xff]  }
 0x41a   :  { %v8031_v5 = vld [vmem:[%s8687_s0 + $0xb0] ss:$16 sps:$4 sm:$0xff]  }
 0x41b   :  { %3763 = vmatpush2.bf16.msra.mxu1 %v6546_v44  ;;  %v6569_v44 = vld [vmem:[#allocation2 + $0x24c] ss:$24 sps:$4 sm:$0xff]  }
 0x41c   :  { %3764 = vmatprep.subr.bf16.mxu1 %v6547_v0  ;;  %3960 = vmatpush1.bf16.msra.mxu0 %v6548_v12  ;;  %v6570_v0 = vld [vmem:[#allocation2 + $0x6c0] ss:$24 sps:$4 sm:$0xff]   ;;  %v8033_v12 = vcombine.high %v5621_v34, %v5621_v34 }
 0x41d   :  { %3961 = vmatprep.subr.bf16.mxu0 %v6549_v32  ;;  %v6571_v32 = vld [vmem:[#allocation2 + $0x694] ss:$24 sps:$4 sm:$0xff]  }
 0x41f   :  { %3765 = vmatpush2.bf16.msra.mxu1 %v6550_v19  ;;  %3870 = vmatmul.mubr.bf16.gmra.mxu0 %v7997_v9  ;;  %v6572_v19 = vld [vmem:[#allocation2 + $0x248] ss:$24 sps:$4 sm:$0xff]  }
 0x420   :  { %3766 = vmatprep.subr.bf16.mxu1 %v6551_v36  ;;  %3962 = vmatpush1.bf16.msra.mxu0 %v6552_v28  ;;  %v6573_v36 = vld [vmem:[#allocation2 + $0x21c] ss:$24 sps:$4 sm:$0xff]   ;;  %v6574_v28 = vld [vmem:[#allocation2 + $0x690] ss:$24 sps:$4 sm:$0xff]  }
 0x421   :  { %3981 = vmatprep.mubr.bf16.mxu0 %v7958_v24  ;;  %3963 = vmatprep.subr.bf16.mxu0 %v6553_v18  ;;  %v6575_v18 = vld [vmem:[#allocation2 + $0x664] ss:$24 sps:$4 sm:$0xff]  }
 0x423   :  { %3767 = vmatpush2.bf16.msra.mxu1 %v6554_v40  ;;  %v6576_v40 = vld [vmem:[#allocation2 + $0x218] ss:$24 sps:$4 sm:$0xff]  }
 0x424   :  { %3878 = vmatprep.subr.bf16.mxu1 %v6555_v3  ;;  %3964 = vmatpush1.bf16.msra.mxu0 %v6556_v7  ;;  %v8037_v3 = vcombine.low %v5621_v34, %v5621_v34  ;;  %v6577_v7 = vld [vmem:[#allocation2 + $0x1ec] ss:$24 sps:$4 sm:$0xff]   ;;  %v6588_v34 = vld [vmem:[#allocation2 + $0x188] ss:$24 sps:$4 sm:$0xff]  }
 0x425   :  { %3965 = vmatprep.subr.bf16.mxu0 %v6557_v27  ;;  %v6578_v27 = vld [vmem:[#allocation2 + $0x660] ss:$24 sps:$4 sm:$0xff]  }
 0x426   :  { %3769 = vmatmul.mubr.bf16.vlgmr.msra.gmra.mxu1 %v8004_v1 }
 0x427   :  { %3879 = vmatpush1.bf16.msra.mxu1 %v6558_v22  ;;  %3778 = vmatprep.mubr.bf16.mxu1 %v8009_v60  ;;  %v8042_v22 = vld [vmem:[%s8688_s1 + $0x3c] ss:$8 sps:$4 sm:$0xff]  }
 0x428   :  { %3880 = vmatprep.subr.bf16.mxu1 %v6559_v4  ;;  %3966 = vmatpush2.bf16.msra.mxu0 %v6560_v21  ;;  %v6579_v4 = vld [vmem:[#allocation2 + $0x634] ss:$24 sps:$4 sm:$0xff]   ;;  %v6580_v21 = vld [vmem:[#allocation2 + $0x1e8] ss:$24 sps:$4 sm:$0xff]  }
 0x429   :  { %3967 = vmatprep.subr.bf16.mxu0 %v6561_v39  ;;  %v6581_v39 = vld [vmem:[#allocation2 + $0x1bc] ss:$24 sps:$4 sm:$0xff]  }
 0x42b   :  { %3881 = vmatpush1.bf16.msra.mxu1 %v6562_v2  ;;  %v6582_v2 = vld [vmem:[#allocation2 + $0x630] ss:$24 sps:$4 sm:$0xff]  }
 0x42c   :  { %3882 = vmatprep.subr.bf16.mxu1 %v6563_v48  ;;  %3968 = vmatpush2.bf16.msra.mxu0 %v6564_v56  ;;  %v6583_v48 = vld [vmem:[#allocation2 + $0x604] ss:$24 sps:$4 sm:$0xff]   ;;  %v6584_v56 = vld [vmem:[#allocation2 + $0x1b8] ss:$24 sps:$4 sm:$0xff]  }
 0x42d   :  { %3969 = vmatprep.subr.bf16.mxu0 %v6565_v45  ;;  %v6585_v45 = vld [vmem:[#allocation2 + $0x18c] ss:$24 sps:$4 sm:$0xff]  }
 0x42e   :  { %3779 = vmatmul.mubr.bf16.gmra.mxu1 %v8016_v25 }
 0x42f   :  { %3883 = vmatpush1.bf16.msra.mxu1 %v6566_v6  ;;  %3788 = vmatprep.mubr.bf16.mxu1 %v8021_v58  ;;  %v6586_v6 = vld [vmem:[#allocation2 + $0x600] ss:$24 sps:$4 sm:$0xff]  }
 0x430   :  { %3884 = vmatprep.subr.bf16.mxu1 %v6567_v52  ;;  %3970 = vmatpush2.bf16.msra.mxu0 %v6568_v35  ;;  %v6587_v52 = vld [vmem:[#allocation2 + $0x8d4] ss:$24 sps:$4 sm:$0xff]  }
 0x431   :  { %3971 = vmatprep.subr.bf16.mxu0 %v6569_v44  ;;  %v6589_v35 = vld [vmem:[#allocation2 + $0x75c] ss:$24 sps:$4 sm:$0xff]   ;;  %v6590_v44 = vld [vmem:[#allocation2 + $0x8d0] ss:$24 sps:$4 sm:$0xff]  }
 0x433   :  { %3885 = vmatpush1.bf16.msra.mxu1 %v6570_v0  ;;  %v6591_v0 = vld [vmem:[#allocation2 + $0x8a4] ss:$24 sps:$4 sm:$0xff]  }
 0x434   :  { %3886 = vmatprep.subr.bf16.mxu1 %v6571_v32  ;;  %3972 = vmatpush2.bf16.msra.mxu0 %v6572_v19  ;;  %v6592_v32 = vld [vmem:[#allocation2 + $0x758] ss:$24 sps:$4 sm:$0xff]   ;;  %v6593_v19 = vld [vmem:[#allocation2 + $0x72c] ss:$24 sps:$4 sm:$0xff]  }
 0x435   :  { %3973 = vmatprep.subr.bf16.mxu0 %v6573_v36  ;;  %v6594_v36 = vld [vmem:[#allocation2 + $0x8a0] ss:$24 sps:$4 sm:$0xff]  }
 0x436   :  { %3789 = vmatmul.mubr.bf16.gmra.mxu1 %v8031_v5 }
 0x437   :  { %3887 = vmatpush1.bf16.msra.mxu1 %v6574_v28  ;;  %3798 = vmatprep.mubr.bf16.mxu1 %v8033_v12  ;;  %v6595_v28 = vld [vmem:[#allocation2 + $0x874] ss:$24 sps:$4 sm:$0xff]  }
 0x438   :  { %3888 = vmatprep.subr.bf16.mxu1 %v6575_v18  ;;  %3974 = vmatpush2.bf16.msra.mxu0 %v6576_v40  ;;  %v6596_v18 = vld [vmem:[#allocation2 + $0x728] ss:$24 sps:$4 sm:$0xff]   ;;  %v6597_v40 = vld [vmem:[#allocation2 + $0x6fc] ss:$24 sps:$4 sm:$0xff]  }
 0x439   :  { %3975 = vmatprep.subr.bf16.mxu0 %v6577_v7  ;;  %v6598_v7 = vld [vmem:[#allocation2 + $0x870] ss:$24 sps:$4 sm:$0xff]  }
 0x43b   :  { %3889 = vmatpush1.bf16.msra.mxu1 %v6578_v27  ;;  %v6599_v27 = vld [vmem:[#allocation2 + $0x844] ss:$24 sps:$4 sm:$0xff]  }
 0x43c   :  { %3890 = vmatprep.subr.bf16.mxu1 %v6579_v4  ;;  %3976 = vmatpush2.bf16.msra.mxu0 %v6580_v21  ;;  %v6600_v4 = vld [vmem:[#allocation2 + $0x6f8] ss:$24 sps:$4 sm:$0xff]   ;;  %v6601_v21 = vld [vmem:[#allocation2 + $0x6cc] ss:$24 sps:$4 sm:$0xff]  }
 0x43d   :  { %3977 = vmatprep.subr.bf16.mxu0 %v6581_v39  ;;  %v6602_v39 = vld [vmem:[#allocation2 + $0x840] ss:$24 sps:$4 sm:$0xff]  }
 0x43e   :  { %3799 = vmatmul.mubr.bf16.gmra.mxu1 %v8037_v3 }
 0x43f   :  { %3891 = vmatpush1.bf16.msra.mxu1 %v6582_v2  ;;  %3910 = vmatprep.mubr.bf16.mxu1 %v8042_v22  ;;  %v6603_v2 = vld [vmem:[#allocation2 + $0x814] ss:$24 sps:$4 sm:$0xff]  }
 0x440   :  { %3892 = vmatprep.subr.bf16.mxu1 %v6583_v48  ;;  %3978 = vmatpush2.bf16.msra.mxu0 %v6584_v56  ;;  %v6604_v48 = vld [vmem:[#allocation2 + $0x6c8] ss:$24 sps:$4 sm:$0xff]   ;;  %v6605_v56 = vld [vmem:[#allocation2 + $0x69c] ss:$24 sps:$4 sm:$0xff]  }
 0x441   :  { %3979 = vmatprep.subr.bf16.mxu0 %v6585_v45  ;;  %v6606_v45 = vld [vmem:[#allocation2 + $0x810] ss:$24 sps:$4 sm:$0xff]  }
 0x443   :  { %3893 = vmatpush1.bf16.msra.mxu1 %v6586_v6  ;;  %v6607_v6 = vld [vmem:[#allocation2 + $0x7e4] ss:$24 sps:$4 sm:$0xff]  }
 0x444   :  { %3894 = vmatprep.subr.bf16.mxu1 %v6587_v52  ;;  %3980 = vmatpush2.bf16.msra.mxu0 %v6588_v34  ;;  %v6608_v52 = vld [vmem:[#allocation2 + $0x698] ss:$24 sps:$4 sm:$0xff]   ;;  %v6609_v34 = vld [vmem:[#allocation2 + $0x66c] ss:$24 sps:$4 sm:$0xff]  }
 0x445   :  { %4091 = vmatprep.subr.bf16.mxu0 %v6589_v35  ;;  %v6610_v35 = vld [vmem:[#allocation2 + $0x7e0] ss:$24 sps:$4 sm:$0xff]  }
 0x447   :  { %3895 = vmatpush2.bf16.msra.mxu1 %v6590_v44  ;;  %3982 = vmatmul.mubr.bf16.vlgmr.msra.gmra.mxu0 %v8004_v1  ;;  %v6611_v44 = vld [vmem:[#allocation2 + $0x7b4] ss:$24 sps:$4 sm:$0xff]  }
 0x448   :  { %3896 = vmatprep.subr.bf16.mxu1 %v6591_v0  ;;  %4092 = vmatpush1.bf16.msra.mxu0 %v6592_v32  ;;  %v6612_v0 = vld [vmem:[#allocation2 + $0x668] ss:$24 sps:$4 sm:$0xff]   ;;  %v6613_v32 = vld [vmem:[#allocation2 + $0x63c] ss:$24 sps:$4 sm:$0xff]  }
 0x449   :  { %3991 = vmatprep.mubr.bf16.mxu0 %v8009_v60  ;;  %4093 = vmatprep.subr.bf16.mxu0 %v6593_v19  ;;  %v6614_v19 = vld [vmem:[#allocation2 + $0x7b0] ss:$24 sps:$4 sm:$0xff]  }
 0x44b   :  { %3897 = vmatpush2.bf16.msra.mxu1 %v6594_v36  ;;  %v6615_v36 = vld [vmem:[#allocation2 + $0x784] ss:$24 sps:$4 sm:$0xff]  }
 0x44c   :  { %3898 = vmatprep.subr.bf16.mxu1 %v6595_v28  ;;  %4094 = vmatpush1.bf16.msra.mxu0 %v6596_v18  ;;  %v6616_v28 = vld [vmem:[#allocation2 + $0x638] ss:$24 sps:$4 sm:$0xff]  }
 0x44d   :  { %4095 = vmatprep.subr.bf16.mxu0 %v6597_v40  ;;  %v8057_v18 = vld [vmem:[%s8688_s1 + $0x38] ss:$8 sps:$4 sm:$0xff]   ;;  %v6617_v40 = vld [vmem:[#allocation2 + $0x60c] ss:$24 sps:$4 sm:$0xff]  }
 0x44f   :  { %3899 = vmatpush2.bf16.msra.mxu1 %v6598_v7  ;;  %3992 = vmatmul.mubr.bf16.gmra.mxu0 %v8016_v25  ;;  %v6618_v7 = vld [vmem:[#allocation2 + $0x780] ss:$24 sps:$4 sm:$0xff]  }
 0x450   :  { %3900 = vmatprep.subr.bf16.mxu1 %v6599_v27  ;;  %4096 = vmatpush1.bf16.msra.mxu0 %v6600_v4  ;;  %v8062_v27 = vld [vmem:[%s8688_s1 + $0x4c] ss:$8 sps:$4 sm:$0xff]  }
 0x451   :  { %4001 = vmatprep.mubr.bf16.mxu0 %v8021_v58  ;;  %4097 = vmatprep.subr.bf16.mxu0 %v6601_v21  ;;  %v6619_v4 = vld [vmem:[#allocation2 + $0x45c] ss:$24 sps:$4 sm:$0xff]   ;;  %v6620_v21 = vld [vmem:[#allocation2 + $0x608] ss:$24 sps:$4 sm:$0xff]  }
 0x453   :  { %3901 = vmatpush2.bf16.msra.mxu1 %v6602_v39  ;;  %v6621_v39 = vld [vmem:[#allocation2 + $0x8dc] ss:$24 sps:$4 sm:$0xff]  }
 0x454   :  { %3902 = vmatprep.subr.bf16.mxu1 %v6603_v2  ;;  %4098 = vmatpush1.bf16.msra.mxu0 %v6604_v48  ;;  %v6622_v2 = vld [vmem:[#allocation2 + $0x458] ss:$24 sps:$4 sm:$0xff]   ;;  %v6623_v48 = vld [vmem:[#allocation2 + $0x42c] ss:$24 sps:$4 sm:$0xff]  }
 0x455   :  { %4099 = vmatprep.subr.bf16.mxu0 %v6605_v56  ;;  %v6624_v56 = vld [vmem:[#allocation2 + $0x8d8] ss:$24 sps:$4 sm:$0xff]  }
 0x457   :  { %3903 = vmatpush2.bf16.msra.mxu1 %v6606_v45  ;;  %4002 = vmatmul.mubr.bf16.gmra.mxu0 %v8031_v5  ;;  %v8069_v45 = vld [vmem:[%s8688_s1 + $0x48] ss:$8 sps:$4 sm:$0xff]  }
 0x458   :  { %3904 = vmatprep.subr.bf16.mxu1 %v6607_v6  ;;  %4100 = vmatpush1.bf16.msra.mxu0 %v6608_v52  ;;  %v6625_v6 = vld [vmem:[#allocation2 + $0x8ac] ss:$24 sps:$4 sm:$0xff]   ;;  %v6626_v52 = vld [vmem:[#allocation2 + $0x428] ss:$24 sps:$4 sm:$0xff]  }
 0x459   :  { %4011 = vmatprep.mubr.bf16.mxu0 %v8033_v12  ;;  %4101 = vmatprep.subr.bf16.mxu0 %v6609_v34  ;;  %v8074_v34 = vld [vmem:[%s8688_s1 + $0x5c] ss:$8 sps:$4 sm:$0xff]  }
 0x45b   :  { %3905 = vmatpush2.bf16.msra.mxu1 %v6610_v35  ;;  %v6627_v35 = vld [vmem:[#allocation2 + $0x3fc] ss:$24 sps:$4 sm:$0xff]  }
 0x45c   :  { %3906 = vmatprep.subr.bf16.mxu1 %v6611_v44  ;;  %4102 = vmatpush1.bf16.msra.mxu0 %v6612_v0  ;;  %v6628_v44 = vld [vmem:[#allocation2 + $0x8a8] ss:$24 sps:$4 sm:$0xff]   ;;  %v6629_v0 = vld [vmem:[#allocation2 + $0x87c] ss:$24 sps:$4 sm:$0xff]  }
 0x45d   :  { %4103 = vmatprep.subr.bf16.mxu0 %v6613_v32  ;;  %v6630_v32 = vld [vmem:[#allocation2 + $0x3f8] ss:$24 sps:$4 sm:$0xff]  }
 0x45f   :  { %3907 = vmatpush2.bf16.msra.mxu1 %v6614_v19  ;;  %4012 = vmatmul.mubr.bf16.gmra.mxu0 %v8037_v3  ;;  %v6631_v19 = vld [vmem:[#allocation2 + $0x3cc] ss:$24 sps:$4 sm:$0xff]  }
 0x460   :  { %3908 = vmatprep.subr.bf16.mxu1 %v6615_v36  ;;  %4104 = vmatpush1.bf16.msra.mxu0 %v6616_v28  ;;  %v5629_v36 = vld [vmem:[%s8688_s1 + $0x68] sm:$0x11]  ;;  %v6632_v28 = vld [vmem:[#allocation2 + $0x878] ss:$24 sps:$4 sm:$0xff]  }
 0x461   :  { %4123 = vmatprep.mubr.bf16.mxu0 %v8042_v22  ;;  %4105 = vmatprep.subr.bf16.mxu0 %v6617_v40  ;;  %v8084_v40 = vld [vmem:[%s8688_s1 + $0x58] ss:$8 sps:$4 sm:$0xff]  }
 0x463   :  { %3909 = vmatpush2.bf16.msra.mxu1 %v6618_v7  ;;  %v6633_v7 = vld [vmem:[#allocation2 + $0x84c] ss:$24 sps:$4 sm:$0xff]  }
 0x464   :  { %4020 = vmatprep.subr.bf16.mxu1 %v6619_v4  ;;  %4106 = vmatpush1.bf16.msra.mxu0 %v6620_v21  ;;  %v6634_v4 = vld [vmem:[#allocation2 + $0x3c8] ss:$24 sps:$4 sm:$0xff]   ;;  %v8086_v21 = vcombine.high %v5629_v36, %v5629_v36 }
 0x465   :  { %4107 = vmatprep.subr.bf16.mxu0 %v6621_v39  ;;  %v6635_v39 = vld [vmem:[#allocation2 + $0x39c] ss:$24 sps:$4 sm:$0xff]  }
 0x466   :  { %3911 = vmatmul.mubr.bf16.vlgmr.msra.gmra.mxu1 %v8057_v18 }
 0x467   :  { %4021 = vmatpush1.bf16.msra.mxu1 %v6622_v2  ;;  %3920 = vmatprep.mubr.bf16.mxu1 %v8062_v27  ;;  %v6636_v2 = vld [vmem:[#allocation2 + $0x848] ss:$24 sps:$4 sm:$0xff]  }
 0x468   :  { %4022 = vmatprep.subr.bf16.mxu1 %v6623_v48  ;;  %4108 = vmatpush2.bf16.msra.mxu0 %v6624_v56  ;;  %v6637_v48 = vld [vmem:[#allocation2 + $0x81c] ss:$24 sps:$4 sm:$0xff]   ;;  %v6638_v56 = vld [vmem:[#allocation2 + $0x398] ss:$24 sps:$4 sm:$0xff]  }
 0x469   :  { %4109 = vmatprep.subr.bf16.mxu0 %v6625_v6  ;;  %v6639_v6 = vld [vmem:[#allocation2 + $0x36c] ss:$24 sps:$4 sm:$0xff]  }
 0x46b   :  { %4023 = vmatpush1.bf16.msra.mxu1 %v6626_v52  ;;  %v6640_v52 = vld [vmem:[#allocation2 + $0x818] ss:$24 sps:$4 sm:$0xff]  }
 0x46c   :  { %4024 = vmatprep.subr.bf16.mxu1 %v6627_v35  ;;  %4110 = vmatpush2.bf16.msra.mxu0 %v6628_v44  ;;  %v8090_v35 = vcombine.low %v5629_v36, %v5629_v36  ;;  %v6641_v44 = vld [vmem:[#allocation2 + $0x7ec] ss:$24 sps:$4 sm:$0xff]   ;;  %v6648_v36 = vld [vmem:[#allocation2 + $0x7b8] ss:$24 sps:$4 sm:$0xff]  }
 0x46d   :  { %4111 = vmatprep.subr.bf16.mxu0 %v6629_v0  ;;  %v6642_v0 = vld [vmem:[#allocation2 + $0x368] ss:$24 sps:$4 sm:$0xff]  }
 0x46e   :  { %3921 = vmatmul.mubr.bf16.gmra.mxu1 %v8069_v45 }
 0x46f   :  { %4025 = vmatpush1.bf16.msra.mxu1 %v6630_v32  ;;  %3930 = vmatprep.mubr.bf16.mxu1 %v8074_v34  ;;  %v6643_v32 = vld [vmem:[#allocation2 + $0x33c] ss:$24 sps:$4 sm:$0xff]  }
 0x470   :  { %4026 = vmatprep.subr.bf16.mxu1 %v6631_v19  ;;  %4112 = vmatpush2.bf16.msra.mxu0 %v6632_v28  ;;  %v6644_v19 = vld [vmem:[#allocation2 + $0x7e8] ss:$24 sps:$4 sm:$0xff]   ;;  %v6645_v28 = vld [vmem:[#allocation2 + $0x7bc] ss:$24 sps:$4 sm:$0xff]  }
 0x471   :  { %4113 = vmatprep.subr.bf16.mxu0 %v6633_v7  ;;  %v6646_v7 = vld [vmem:[#allocation2 + $0x338] ss:$24 sps:$4 sm:$0xff]  }
 0x473   :  { %4027 = vmatpush1.bf16.msra.mxu1 %v6634_v4  ;;  %v6647_v4 = vld [vmem:[#allocation2 + $0x30c] ss:$24 sps:$4 sm:$0xff]  }
 0x474   :  { %4028 = vmatprep.subr.bf16.mxu1 %v6635_v39  ;;  %4114 = vmatpush2.bf16.msra.mxu0 %v6636_v2  ;;  %v6649_v39 = vld [vmem:[#allocation2 + $0x78c] ss:$24 sps:$4 sm:$0xff]   ;;  %v6650_v2 = vld [vmem:[#allocation2 + $0x308] ss:$24 sps:$4 sm:$0xff]  }
 0x475   :  { %4115 = vmatprep.subr.bf16.mxu0 %v6637_v48  ;;  %v6651_v48 = vld [vmem:[#allocation2 + $0x5dc] ss:$24 sps:$4 sm:$0xff]  }
 0x476   :  { %3931 = vmatmul.mubr.bf16.gmra.mxu1 %v8084_v40 }
 0x477   :  { %4029 = vmatpush1.bf16.msra.mxu1 %v6638_v56  ;;  %3940 = vmatprep.mubr.bf16.mxu1 %v8086_v21  ;;  %v6652_v56 = vld [vmem:[#allocation2 + $0x788] ss:$24 sps:$4 sm:$0xff]  }
 0x478   :  { %4030 = vmatprep.subr.bf16.mxu1 %v6639_v6  ;;  %4116 = vmatpush2.bf16.msra.mxu0 %v6640_v52  ;;  %v6653_v52 = vld [vmem:[#allocation2 + $0x464] ss:$24 sps:$4 sm:$0xff]  }
 0x479   :  { %4117 = vmatprep.subr.bf16.mxu0 %v6641_v44 }
 0x47b   :  { %4031 = vmatpush1.bf16.msra.mxu1 %v6642_v0  ;;  %v6654_v0 = vld [vmem:[#allocation2 + $0x5d8] ss:$24 sps:$4 sm:$0xff]  }
 0x47c   :  { %4032 = vmatprep.subr.bf16.mxu1 %v6643_v32  ;;  %4118 = vmatpush2.bf16.msra.mxu0 %v6644_v19  ;;  %v6655_v19 = vld [vmem:[#allocation2 + $0x5ac] ss:$24 sps:$4 sm:$0xff]  }
 0x47d   :  { %4119 = vmatprep.subr.bf16.mxu0 %v6645_v28 }
 0x47e   :  { %3941 = vmatmul.mubr.bf16.gmra.mxu1 %v8090_v35 }
 0x47f   :  { %4033 = vmatpush1.bf16.msra.mxu1 %v6646_v7  ;;  %4052 = vmatprep.mubr.bf16.mxu1 %v7945_v17  ;;  %v6656_v7 = vld [vmem:[#allocation2 + $0x460] ss:$24 sps:$4 sm:$0xff]  }
 0x480   :  { %4034 = vmatprep.subr.bf16.mxu1 %v6647_v4  ;;  %4120 = vmatpush2.bf16.msra.mxu0 %v6648_v36  ;;  %v6657_v36 = vld [vmem:[#allocation2 + $0x434] ss:$24 sps:$4 sm:$0xff]  }
 0x481   :  { %4121 = vmatprep.subr.bf16.mxu0 %v6649_v39 }
 0x483   :  { %4035 = vmatpush1.bf16.msra.mxu1 %v6650_v2  ;;  %v6658_v2 = vld [vmem:[#allocation2 + $0x5a8] ss:$24 sps:$4 sm:$0xff]  }
 0x484   :  { %4036 = vmatprep.subr.bf16.mxu1 %v6651_v48  ;;  %4122 = vmatpush2.bf16.msra.mxu0 %v6652_v56  ;;  %v6659_v56 = vld [vmem:[#allocation2 + $0x57c] ss:$24 sps:$4 sm:$0xff]  }
 0x485   :  { %4233 = vmatprep.subr.bf16.mxu0 %v6653_v52 }
 0x486   :  { %v8094_v6 = vpop.f32.mrf.mxu1  ;;  %v8096_v44 = vpop.f32.mrf.mxu0 }
 0x487   :  { %4037 = vmatpush2.bf16.msra.mxu1 %v6654_v0  ;;  %4124 = vmatmul.mubr.bf16.vlgmr.msra.gmra.mxu0 %v8057_v18  ;;  %v6660_v0 = vld [vmem:[#allocation2 + $0x430] ss:$24 sps:$4 sm:$0xff]  }
 0x488   :  { %v8098_v32 = vpop.f32.mrf.mxu1  ;;  %4038 = vmatprep.subr.bf16.mxu1 %v6655_v19  ;;  %v8101_v28 = vpop.f32.mrf.mxu0  ;;  %4234 = vmatpush1.bf16.msra.mxu0 %v6656_v7  ;;  %v6661_v19 = vld [vmem:[#allocation2 + $0x404] ss:$24 sps:$4 sm:$0xff]   ;;  %v6664_v7 = vld [vmem:[#allocation2 + $0x400] ss:$24 sps:$4 sm:$0xff]  }
 0x489   :  { %4133 = vmatprep.mubr.bf16.mxu0 %v8062_v27  ;;  %4235 = vmatprep.subr.bf16.mxu0 %v6657_v36  ;;  %v6666_v36 = vld [vmem:[#allocation2 + $0x548] ss:$24 sps:$4 sm:$0xff]  }
 0x48a   :  { %v5721_v4 = vpop.f32.mrf.mxu1  ;;  %v5765_v39 = vpop.f32.mrf.mxu0 }
 0x48b   :  { %4039 = vmatpush2.bf16.msra.mxu1 %v6658_v2  ;;  %v6665_v4 = vld [vmem:[#allocation2 + $0x3d4] ss:$24 sps:$4 sm:$0xff]   ;;  %v6668_v2 = vld [vmem:[#allocation2 + $0x3d0] ss:$24 sps:$4 sm:$0xff]  }
 0x48c   :  { %v5722_v48 = vpop.f32.mrf.mxu1  ;;  %4040 = vmatprep.subr.bf16.mxu1 %v6659_v56  ;;  %v5766_v52 = vpop.f32.mrf.mxu0  ;;  %4236 = vmatpush1.bf16.msra.mxu0 %v6660_v0  ;;  %v6667_v39 = vld [vmem:[#allocation2 + $0x51c] ss:$24 sps:$4 sm:$0xff]   ;;  %v6670_v56 = vld [vmem:[#allocation2 + $0x518] ss:$24 sps:$4 sm:$0xff]   ;;  %v6674_v0 = vld [vmem:[#allocation2 + $0x4e8] ss:$24 sps:$4 sm:$0xff]  }
 0x48d   :  { %4237 = vmatprep.subr.bf16.mxu0 %v6661_v19  ;;  %v6669_v48 = vld [vmem:[#allocation2 + $0x3a4] ss:$24 sps:$4 sm:$0xff]   ;;  %v6673_v52 = vld [vmem:[#allocation2 + $0x374] ss:$24 sps:$4 sm:$0xff]  }
 0x48e   :  { %v6675_v19 = vld [vmem:[#allocation2 + $0x4bc] ss:$24 sps:$4 sm:$0xff]  }
 0x48f   :  { %4041 = vmatpush2.bf16.msra.mxu1 %v6662_v41  ;;  %4134 = vmatmul.mubr.bf16.gmra.mxu0 %v8069_v45  ;;  %v6671_v41 = vld [vmem:[#allocation2 + $0x4ec] ss:$24 sps:$4 sm:$0xff]  }
 0x490   :  { %4042 = vmatprep.subr.bf16.mxu1 %v6663_v26  ;;  %4238 = vmatpush1.bf16.msra.mxu0 %v6664_v7  ;;  %v6672_v26 = vld [vmem:[#allocation2 + $0x3a0] ss:$24 sps:$4 sm:$0xff]   ;;  %v6676_v7 = vld [vmem:[#allocation2 + $0x370] ss:$24 sps:$4 sm:$0xff]  }
 0x491   :  { %4143 = vmatprep.mubr.bf16.mxu0 %v8074_v34  ;;  %4239 = vmatprep.subr.bf16.mxu0 %v6665_v4  ;;  %v6677_v4 = vld [vmem:[#allocation2 + $0x344] ss:$24 sps:$4 sm:$0xff]  }
 0x493   :  { %4043 = vmatpush2.bf16.msra.mxu1 %v6666_v36  ;;  %v6678_v36 = vld [vmem:[#allocation2 + $0x4b8] ss:$24 sps:$4 sm:$0xff]  }
 0x494   :  { %4044 = vmatprep.subr.bf16.mxu1 %v6667_v39  ;;  %4240 = vmatpush1.bf16.msra.mxu0 %v6668_v2  ;;  %v6679_v39 = vld [vmem:[#allocation2 + $0x48c] ss:$24 sps:$4 sm:$0xff]   ;;  %v6680_v2 = vld [vmem:[#allocation2 + $0x340] ss:$24 sps:$4 sm:$0xff]  }
 0x495   :  { %4241 = vmatprep.subr.bf16.mxu0 %v6669_v48  ;;  %v6681_v48 = vld [vmem:[#allocation2 + $0x314] ss:$24 sps:$4 sm:$0xff]  }
 0x497   :  { %4045 = vmatpush2.bf16.msra.mxu1 %v6670_v56  ;;  %4144 = vmatmul.mubr.bf16.gmra.mxu0 %v8084_v40  ;;  %v6682_v56 = vld [vmem:[#allocation2 + $0x488] ss:$24 sps:$4 sm:$0xff]  }
 0x498   :  { %4046 = vmatprep.subr.bf16.mxu1 %v6671_v41  ;;  %4242 = vmatpush1.bf16.msra.mxu0 %v6672_v26  ;;  %v6683_v41 = vld [vmem:[#allocation2 + $0x164] ss:$24 sps:$4 sm:$0xff]   ;;  %v5720_v26 = vadd.f32 %v8098_v32, %v8094_v6  ;;  %v6689_v32 = vld [vmem:[#allocation2 + $0x5b4] ss:$24 sps:$4 sm:$0xff]  }
 0x499   :  { %4153 = vmatprep.mubr.bf16.mxu0 %v8086_v21  ;;  %4243 = vmatprep.subr.bf16.mxu0 %v6673_v52  ;;  %v6684_v52 = vld [vmem:[#allocation2 + $0x310] ss:$24 sps:$4 sm:$0xff]  }
 0x49b   :  { %4047 = vmatpush2.bf16.msra.mxu1 %v6674_v0  ;;  %v3192_v0 = vld [vmem:[#allocation13] sm:$0x1] }
 0x49c   :  { %4048 = vmatprep.subr.bf16.mxu1 %v6675_v19  ;;  %4244 = vmatpush1.bf16.msra.mxu0 %v6676_v7  ;;  %v6685_v7 = vld [vmem:[#allocation2 + $0x5e4] ss:$24 sps:$4 sm:$0xff]  }
 0x49d   :  { %4245 = vmatprep.subr.bf16.mxu0 %v6677_v4  ;;  %v6686_v4 = vld [vmem:[#allocation2 + $0x160] ss:$24 sps:$4 sm:$0xff]  }
 0x49f   :  { %4049 = vmatpush2.bf16.msra.mxu1 %v6678_v36  ;;  %4154 = vmatmul.mubr.bf16.gmra.mxu0 %v8090_v35  ;;  %v6687_v36 = vld [vmem:[#allocation2 + $0x134] ss:$24 sps:$4 sm:$0xff]  }
 0x4a0   :  { %4050 = vmatprep.subr.bf16.mxu1 %v6679_v39  ;;  %4246 = vmatpush1.bf16.msra.mxu0 %v6680_v2  ;;  %v3516_v39 = vadd.f32 %v5720_v26, %v3192_v0  ;;  %v6693_v26 = vld [vmem:[#allocation2 + $0x584] ss:$24 sps:$4 sm:$0xff]   ;;  %v6694_v0 = vld [vmem:[#allocation2 + $0x100] ss:$24 sps:$4 sm:$0xff]  }
 0x4a1   :  { %4265 = vmatprep.mubr.bf16.mxu0 %v7945_v17  ;;  %4247 = vmatprep.subr.bf16.mxu0 %v6681_v48  ;;  %v6688_v48 = vld [vmem:[#allocation2 + $0x5e0] ss:$24 sps:$4 sm:$0xff]  }
 0x4a3   :  { %4051 = vmatpush2.bf16.msra.mxu1 %v6682_v56  ;;  %v5764_v56 = vadd.f32 %v8101_v28, %v8096_v44  ;;  %v6696_v44 = vld [vmem:[#allocation2 + $0x580] ss:$24 sps:$4 sm:$0xff]   ;;  %v6697_v28 = vld [vmem:[#allocation2 + $0x554] ss:$24 sps:$4 sm:$0xff]  }
 0x4a4   :  { %4162 = vmatprep.subr.bf16.mxu1 %v6683_v41  ;;  %4248 = vmatpush1.bf16.msra.mxu0 %v6684_v52  ;;  %v6690_v52 = vld [vmem:[#allocation2 + $0x130] ss:$24 sps:$4 sm:$0xff]  }
 0x4a5   :  { %4249 = vmatprep.subr.bf16.mxu0 %v6685_v7 }
 0x4a6   :  { %v5740_v19 = vpop.f32.mrf.mxu1  ;;  %4053 = vmatmul.mubr.bf16.vlgmr.msra.gmra.mxu1 %v7964_v29 }
 0x4a7   :  { %4163 = vmatpush1.bf16.msra.mxu1 %v6686_v4  ;;  %4062 = vmatprep.mubr.bf16.mxu1 %v7969_v47  ;;  %v6691_v4 = vld [vmem:[#allocation2 + $0x104] ss:$24 sps:$4 sm:$0xff]  }
 0x4a8   :  { %v5741_v17 = vpop.f32.mrf.mxu1  ;;  %4164 = vmatprep.subr.bf16.mxu1 %v6687_v36  ;;  %4250 = vmatpush2.bf16.msra.mxu0 %v6688_v48  ;;  %v6699_v36 = vld [vmem:[#allocation2 + $0xa4] ss:$24 sps:$4 sm:$0xff]   ;;  %v6704_v48 = vld [vmem:[#allocation2 + $0x520] ss:$24 sps:$4 sm:$0xff]  }
 0x4a9   :  { %v5742_v2 = vadd.f32 %v5741_v17, %v5740_v19  ;;  %4251 = vmatprep.subr.bf16.mxu0 %v6689_v32  ;;  %v6695_v19 = vld [vmem:[#allocation2 + $0xd4] ss:$24 sps:$4 sm:$0xff]   ;;  %v6698_v17 = vld [vmem:[#allocation2 + $0xd0] ss:$24 sps:$4 sm:$0xff]  }
 0x4aa   :  { %v5743_v6 = vpop.f32.mrf.mxu1  ;;  %v6706_v32 = vld [vmem:[#allocation2 + $0x70] ss:$24 sps:$4 sm:$0xff]  }
 0x4ab   :  { %v3556_v41 = vadd.f32 %v5742_v2, %v3516_v39  ;;  %4165 = vmatpush1.bf16.msra.mxu1 %v6690_v52  ;;  %v6701_v39 = vld [vmem:[#allocation2 + $0x524] ss:$24 sps:$4 sm:$0xff]   ;;  %v6703_v2 = vld [vmem:[#allocation2 + $0x74] ss:$24 sps:$4 sm:$0xff]  }
 0x4ac   :  { %v5744_v7 = vpop.f32.mrf.mxu1  ;;  %4166 = vmatprep.subr.bf16.mxu1 %v6691_v4  ;;  %4252 = vmatpush2.bf16.msra.mxu0 %v6692_v13  ;;  %v6700_v13 = vld [vmem:[#allocation2 + $0x550] ss:$24 sps:$4 sm:$0xff]   ;;  %v6705_v6 = vld [vmem:[#allocation2 + $0x4f4] ss:$24 sps:$4 sm:$0xff]   ;;  %v6709_v52 = vld [vmem:[#allocation2 + $0x4c4] ss:$24 sps:$4 sm:$0xff]  }
 0x4ad   :  { %v3596_v54 = vadd.f32 %v5764_v56, %v3556_v41  ;;  %4253 = vmatprep.subr.bf16.mxu0 %v6693_v26  ;;  %v6707_v56 = vld [vmem:[#allocation2 + $0x44] ss:$24 sps:$4 sm:$0xff]   ;;  %v6708_v41 = vld [vmem:[#allocation2 + $0x4f0] ss:$24 sps:$4 sm:$0xff]   ;;  %v6710_v7 = vld [vmem:[#allocation2 + $0x40] ss:$24 sps:$4 sm:$0xff]  }
 0x4ae   :  { %4063 = vmatmul.mubr.bf16.gmra.mxu1 %v7976_v10  ;;  %v6711_v4 = vld [vmem:[#allocation2 + $0x14] ss:$24 sps:$4 sm:$0xff]   ;;  %v6712_v26 = vld [vmem:[#allocation2 + $0x4c0] ss:$24 sps:$4 sm:$0xff]  }
 0x4af   :  { %3601 = vst [vmem:[#allocation14] sm:$0x1] %v3596_v54  ;;  %4167 = vmatpush1.bf16.msra.mxu1 %v6694_v0  ;;  %4072 = vmatprep.mubr.bf16.mxu1 %v7981_v16  ;;  %v6702_v54 = vld [vmem:[#allocation2 + $0xa0] ss:$24 sps:$4 sm:$0xff]   ;;  %v6713_v0 = vld [vmem:[#allocation2 + $0x494] ss:$24 sps:$4 sm:$0xff]  }
 0x4b0   :  { %4168 = vmatprep.subr.bf16.mxu1 %v6695_v19  ;;  %4254 = vmatpush2.bf16.msra.mxu0 %v6696_v44  ;;  %v6714_v19 = vld [vmem:[#allocation2 + $0x10] ss:$24 sps:$4 sm:$0xff]   ;;  %v6715_v44 = vld [vmem:[#allocation2 + $0x2e4] ss:$24 sps:$4 sm:$0xff]  }
 0x4b1   :  { %4255 = vmatprep.subr.bf16.mxu0 %v6697_v28  ;;  %v6716_v28 = vld [vmem:[#allocation2 + $0x490] ss:$24 sps:$4 sm:$0xff]  }
 0x4b3   :  { %4169 = vmatpush1.bf16.msra.mxu1 %v6698_v17  ;;  %v6717_v17 = vld [vmem:[#allocation2 + $0x2e0] ss:$24 sps:$4 sm:$0xff]  }
 0x4b4   :  { %4170 = vmatprep.subr.bf16.mxu1 %v6699_v36  ;;  %4256 = vmatpush2.bf16.msra.mxu0 %v6700_v13  ;;  %v6718_v36 = vld [vmem:[#allocation2 + $0x2b4] ss:$24 sps:$4 sm:$0xff]  }
 0x4b5   :  { %4257 = vmatprep.subr.bf16.mxu0 %v6701_v39  ;;  %v6719_v39 = vld [vmem:[#allocation2 + $0x2b0] ss:$24 sps:$4 sm:$0xff]  }
 0x4b6   :  { %4073 = vmatmul.mubr.bf16.gmra.mxu1 %v7991_v38 }
 0x4b7   :  { %4171 = vmatpush1.bf16.msra.mxu1 %v6702_v54  ;;  %4082 = vmatprep.mubr.bf16.mxu1 %v7993_v53  ;;  %v6720_v54 = vld [vmem:[#allocation2 + $0x284] ss:$24 sps:$4 sm:$0xff]  }
 0x4b8   :  { %4172 = vmatprep.subr.bf16.mxu1 %v6703_v2  ;;  %4258 = vmatpush2.bf16.msra.mxu0 %v6704_v48 }
 0x4b9   :  { %4259 = vmatprep.subr.bf16.mxu0 %v6705_v6  ;;  %v6721_v6 = vld [vmem:[#allocation2 + $0x280] ss:$24 sps:$4 sm:$0xff]  }
 0x4bb   :  { %4173 = vmatpush1.bf16.msra.mxu1 %v6706_v32  ;;  %v6722_v32 = vld [vmem:[#allocation2 + $0x254] ss:$24 sps:$4 sm:$0xff]  }
 0x4bc   :  { %4174 = vmatprep.subr.bf16.mxu1 %v6707_v56  ;;  %4260 = vmatpush2.bf16.msra.mxu0 %v6708_v41  ;;  %v6724_v41 = vld [vmem:[#allocation2 + $0x224] ss:$24 sps:$4 sm:$0xff]  }
 0x4bd   :  { %4261 = vmatprep.subr.bf16.mxu0 %v6709_v52 }
 0x4be   :  { %4083 = vmatmul.mubr.bf16.gmra.mxu1 %v7997_v9 }
 0x4bf   :  { %4175 = vmatpush1.bf16.msra.mxu1 %v6710_v7  ;;  %4194 = vmatprep.mubr.bf16.mxu1 %v7958_v24 }
 0x4c0   :  { %4176 = vmatprep.subr.bf16.mxu1 %v6711_v4  ;;  %4262 = vmatpush2.bf16.msra.mxu0 %v6712_v26  ;;  %v6725_v4 = vld [vmem:[#allocation2 + $0x220] ss:$24 sps:$4 sm:$0xff]   ;;  %v6726_v26 = vld [vmem:[#allocation2 + $0x1f4] ss:$24 sps:$4 sm:$0xff]  }
 0x4c1   :  { %4263 = vmatprep.subr.bf16.mxu0 %v6713_v0  ;;  %v6727_v0 = vld [vmem:[#allocation2 + $0x1f0] ss:$24 sps:$4 sm:$0xff]  }
 0x4c3   :  { %4177 = vmatpush1.bf16.msra.mxu1 %v6714_v19  ;;  %v6728_v19 = vld [vmem:[#allocation2 + $0x1c4] ss:$24 sps:$4 sm:$0xff]  }
 0x4c4   :  { %4178 = vmatprep.subr.bf16.mxu1 %v6715_v44  ;;  %4264 = vmatpush2.bf16.msra.mxu0 %v6716_v28 }
 0x4c7   :  { %4179 = vmatpush2.bf16.msra.mxu1 %v6717_v17  ;;  %v3841_v13 = vpop.f32.mrf.mxu0  ;;  %4266 = vmatmul.mubr.bf16.vlgmr.msra.gmra.mxu0 %v7964_v29  ;;  %v6729_v17 = vld [vmem:[#allocation2 + $0x1c0] ss:$24 sps:$4 sm:$0xff]  }
 0x4c8   :  { %4180 = vmatprep.subr.bf16.mxu1 %v6718_v36  ;;  %4275 = vmatprep.mubr.bf16.mxu0 %v7969_v47  ;;  %v6723_v47 = vld [vmem:[#allocation2 + $0x250] ss:$24 sps:$4 sm:$0xff]   ;;  %v6730_v36 = vld [vmem:[#allocation2 + $0x194] ss:$24 sps:$4 sm:$0xff]  }
 0x4c9   :  { %v3843_v24 = vpop.f32.mrf.mxu0 }
 0x4cb   :  { %4181 = vmatpush2.bf16.msra.mxu1 %v6719_v39  ;;  %v8124_v2 = vpop.f32.mrf.mxu0 }
 0x4cc   :  { %4182 = vmatprep.subr.bf16.mxu1 %v6720_v54  ;;  %v6732_v54 = vld [vmem:[#allocation2 + $0x764] ss:$24 sps:$4 sm:$0xff]  }
 0x4cd   :  { %v8126_v48 = vpop.f32.mrf.mxu0 }
 0x4cf   :  { %4183 = vmatpush2.bf16.msra.mxu1 %v6721_v6  ;;  %4276 = vmatmul.mubr.bf16.gmra.mxu0 %v7976_v10  ;;  %v8129_v56 = vpop.f32.mrf.mxu0 }
 0x4d0   :  { %4184 = vmatprep.subr.bf16.mxu1 %v6722_v32  ;;  %4285 = vmatprep.mubr.bf16.mxu0 %v7981_v16 }
 0x4d1   :  { %v8132_v29 = vpop.f32.mrf.mxu0 }
 0x4d3   :  { %4185 = vmatpush2.bf16.msra.mxu1 %v6723_v47  ;;  %v8134_v52 = vpop.f32.mrf.mxu0 }
 0x4d4   :  { %4186 = vmatprep.subr.bf16.mxu1 %v6724_v41  ;;  %v8853_v41 = vld [vmem:[#allocation22_spill] sm:$0xff] }
 0x4d5   :  { %v8136_v7 = vpop.f32.mrf.mxu0 }
 0x4d7   :  { %4187 = vmatpush2.bf16.msra.mxu1 %v6725_v4  ;;  %4286 = vmatmul.mubr.bf16.gmra.mxu0 %v7991_v38  ;;  %v8139_v10 = vpop.f32.mrf.mxu0 }
 0x4d8   :  { %4188 = vmatprep.subr.bf16.mxu1 %v6726_v26  ;;  %4295 = vmatprep.mubr.bf16.mxu0 %v7993_v53  ;;  %v6731_v53 = vld [vmem:[#allocation2 + $0x190] ss:$24 sps:$4 sm:$0xff]   ;;  %v6733_v26 = vld [vmem:[#allocation2 + $0x760] ss:$24 sps:$4 sm:$0xff]  }
 0x4d9   :  { %v8142_v16 = vpop.f32.mrf.mxu0 }
 0x4db   :  { %4189 = vmatpush2.bf16.msra.mxu1 %v6727_v0  ;;  %v8144_v44 = vpop.f32.mrf.mxu0  ;;  %v6734_v0 = vld [vmem:[#allocation2 + $0x734] ss:$24 sps:$4 sm:$0xff]  }
 0x4dc   :  { %4190 = vmatprep.subr.bf16.mxu1 %v6728_v19  ;;  %v8854_v19 = vld [vmem:[#allocation23_spill] sm:$0xff] }
 0x4dd   :  { %v8146_v28 = vpop.f32.mrf.mxu0 }
 0x4df   :  { %4191 = vmatpush2.bf16.msra.mxu1 %v6729_v17  ;;  %4296 = vmatmul.mubr.bf16.gmra.mxu0 %v7997_v9  ;;  %v8149_v38 = vpop.f32.mrf.mxu0 }
 0x4e0   :  { %4192 = vmatprep.subr.bf16.mxu1 %v6730_v36 }
 0x4e1   :  { %v8151_v39 = vpop.f32.mrf.mxu0 }
 0x4e3   :  { %4193 = vmatpush2.bf16.msra.mxu1 %v6731_v53  ;;  %v3875_v6 = vpop.f32.mrf.mxu0 }
 0x4e4   :  { %4304 = vmatprep.subr.bf16.mxu1 %v6732_v54 }
 0x4e5   :  { %v3876_v47 = vpop.f32.mrf.mxu0 }
 0x4e6   :  { %v3770_v32 = vpop.f32.mrf.mxu1  ;;  %4195 = vmatmul.mubr.bf16.vlgmr.msra.gmra.mxu1 %v8004_v1  ;;  %v6735_v1 = vld [vmem:[#allocation2 + $0x730] ss:$24 sps:$4 sm:$0xff]  }
 0x4e7   :  { %v3771_v4 = vadd.f32 %v3770_v32, %v8853_v41  ;;  %4305 = vmatpush1.bf16.msra.mxu1 %v6733_v26  ;;  %4204 = vmatprep.mubr.bf16.mxu1 %v8009_v60  ;;  %v6736_v32 = vld [vmem:[#allocation2 + $0x704] ss:$24 sps:$4 sm:$0xff]  }
 0x4e8   :  { %v3772_v9 = vpop.f32.mrf.mxu1  ;;  %4306 = vmatprep.subr.bf16.mxu1 %v6734_v0  ;;  %v6738_v0 = vld [vmem:[#allocation2 + $0x6d4] ss:$24 sps:$4 sm:$0xff]  }
 0x4e9   :  { %v3773_v17 = vadd.f32 %v3772_v9, %v8854_v19  ;;  %v8157_v36 = vadd.f32 %v3841_v13, %v3771_v4  ;;  %v6737_v4 = vld [vmem:[#allocation2 + $0x700] ss:$24 sps:$4 sm:$0xff]  }
 0x4ea   :  { %v3774_v53 = vpop.f32.mrf.mxu1 }
 0x4eb   :  { %v3775_v54 = vadd.f32 %v3774_v53, %v8853_v41  ;;  %v8160_v6 = vadd.f32 %v3843_v24, %v3773_v17  ;;  %4307 = vmatpush1.bf16.msra.mxu1 %v6735_v1 }
 0x4ec   :  { %v3776_v47 = vpop.f32.mrf.mxu1  ;;  %4308 = vmatprep.subr.bf16.mxu1 %v6736_v32 }
 0x4ed   :  { %v3777_v26 = vadd.f32 %v3776_v47, %v8854_v19  ;;  %v8164_v60 = vadd.f32 %v8124_v2, %v3775_v54  ;;  %v6740_v47 = vld [vmem:[#allocation2 + $0x6a4] ss:$24 sps:$4 sm:$0xff]  }
 0x4ee   :  { %4205 = vmatmul.mubr.bf16.gmra.mxu1 %v8016_v25  ;;  %v3780_v9 = vpop.f32.mrf.mxu1  ;;  %v6739_v25 = vld [vmem:[#allocation2 + $0x6d0] ss:$24 sps:$4 sm:$0xff]  }
 0x4ef   :  { %v8168_v13 = vadd.f32 %v8126_v48, %v3777_v26  ;;  %4309 = vmatpush1.bf16.msra.mxu1 %v6737_v4  ;;  %v3781_v24 = vadd.f32 %v3780_v9, %v8853_v41  ;;  %4214 = vmatprep.mubr.bf16.mxu1 %v8021_v58  ;;  %v6741_v9 = vld [vmem:[#allocation2 + $0x6a0] ss:$24 sps:$4 sm:$0xff]  }
 0x4f0   :  { %4310 = vmatprep.subr.bf16.mxu1 %v6738_v0  ;;  %v3782_v17 = vpop.f32.mrf.mxu1 }
 0x4f1   :  { %v3783_v53 = vadd.f32 %v3782_v17, %v8854_v19  ;;  %v8174_v2 = vadd.f32 %v8129_v56, %v3781_v24 }
 0x4f2   :  { %v3784_v54 = vpop.f32.mrf.mxu1 }
 0x4f3   :  { %4311 = vmatpush1.bf16.msra.mxu1 %v6739_v25  ;;  %v3785_v48 = vadd.f32 %v3784_v54, %v8853_v41  ;;  %v8178_v1 = vadd.f32 %v8132_v29, %v3783_v53  ;;  %v6742_v29 = vld [vmem:[#allocation2 + $0x674] ss:$24 sps:$4 sm:$0xff]  }
 0x4f4   :  { %4312 = vmatprep.subr.bf16.mxu1 %v6740_v47  ;;  %v3786_v32 = vpop.f32.mrf.mxu1 }
 0x4f5   :  { %v3787_v58 = vadd.f32 %v3786_v32, %v8854_v19  ;;  %v8182_v26 = vadd.f32 %v8134_v52, %v3785_v48  ;;  %v6745_v32 = vld [vmem:[#allocation2 + $0x640] ss:$24 sps:$4 sm:$0xff]  }
 0x4f6   :  { %4215 = vmatmul.mubr.bf16.gmra.mxu1 %v8031_v5  ;;  %v3790_v56 = vpop.f32.mrf.mxu1  ;;  %v6743_v5 = vld [vmem:[#allocation2 + $0x670] ss:$24 sps:$4 sm:$0xff]  }
 0x4f7   :  { %4313 = vmatpush1.bf16.msra.mxu1 %v6741_v9  ;;  %v3791_v4 = vadd.f32 %v3790_v56, %v8853_v41  ;;  %v8187_v24 = vadd.f32 %v8136_v7, %v3787_v58  ;;  %4224 = vmatprep.mubr.bf16.mxu1 %v8033_v12  ;;  %v6744_v7 = vld [vmem:[#allocation2 + $0x644] ss:$24 sps:$4 sm:$0xff]  }
 0x4f8   :  { %4314 = vmatprep.subr.bf16.mxu1 %v6742_v29  ;;  %v3792_v0 = vpop.f32.mrf.mxu1 }
 0x4f9   :  { %v3793_v17 = vadd.f32 %v3792_v0, %v8854_v19  ;;  %v8192_v52 = vadd.f32 %v8139_v10, %v3791_v4 }
 0x4fa   :  { %v3794_v53 = vpop.f32.mrf.mxu1 }
 0x4fb   :  { %4315 = vmatpush1.bf16.msra.mxu1 %v6743_v5  ;;  %v3795_v54 = vadd.f32 %v3794_v53, %v8853_v41  ;;  %v8196_v25 = vadd.f32 %v8142_v16, %v3793_v17  ;;  %v6746_v16 = vld [vmem:[#allocation2 + $0x614] ss:$24 sps:$4 sm:$0xff]   ;;  %v6749_v17 = vld [vmem:[#allocation2 + $0x8e0] ss:$24 sps:$4 sm:$0xff]  }
 0x4fc   :  { %4316 = vmatprep.subr.bf16.mxu1 %v6744_v7  ;;  %v3796_v48 = vpop.f32.mrf.mxu1 }
 0x4fd   :  { %v3797_v12 = vadd.f32 %v3796_v48, %v8854_v19  ;;  %v8200_v47 = vadd.f32 %v8144_v44, %v3795_v54  ;;  %v6754_v48 = vld [vmem:[#allocation2 + $0x854] ss:$24 sps:$4 sm:$0xff]  }
 0x4fe   :  { %4225 = vmatmul.mubr.bf16.gmra.mxu1 %v8037_v3  ;;  %v3800_v10 = vpop.f32.mrf.mxu1  ;;  %v6747_v3 = vld [vmem:[#allocation2 + $0x610] ss:$24 sps:$4 sm:$0xff]  }
 0x4ff   :  { %4317 = vmatpush1.bf16.msra.mxu1 %v6745_v32  ;;  %v3801_v58 = vadd.f32 %v3800_v10, %v8853_v41  ;;  %v8205_v56 = vadd.f32 %v8146_v28, %v3797_v12  ;;  %4336 = vmatprep.mubr.bf16.mxu1 %v8042_v22  ;;  %v6748_v41 = vld [vmem:[#allocation2 + $0x8e4] ss:$24 sps:$4 sm:$0xff]   ;;  %v6750_v22 = vld [vmem:[#allocation2 + $0x8b4] ss:$24 sps:$4 sm:$0xff]   ;;  %v6755_v32 = vld [vmem:[#allocation2 + $0x850] ss:$24 sps:$4 sm:$0xff]  }
 0x500   :  { %4318 = vmatprep.subr.bf16.mxu1 %v6746_v16  ;;  %v3802_v9 = vpop.f32.mrf.mxu1 }
 0x501   :  { %v3803_v4 = vadd.f32 %v3802_v9, %v8854_v19  ;;  %v8210_v44 = vadd.f32 %v8149_v38, %v3801_v58  ;;  %v6751_v19 = vld [vmem:[#allocation2 + $0x8b0] ss:$24 sps:$4 sm:$0xff]   ;;  %v6752_v38 = vld [vmem:[#allocation2 + $0x884] ss:$24 sps:$4 sm:$0xff]  }
 0x502   :  { %v3804_v29 = vpop.f32.mrf.mxu1  ;;  %v6756_v58 = vld [vmem:[#allocation2 + $0x824] ss:$24 sps:$4 sm:$0xff]  }
 0x503   :  { %4319 = vmatpush1.bf16.msra.mxu1 %v6747_v3  ;;  %v8213_v0 = vadd.f32 %v8151_v39, %v3803_v4  ;;  %v6753_v39 = vld [vmem:[#allocation2 + $0x880] ss:$24 sps:$4 sm:$0xff]   ;;  %v6758_v29 = vld [vmem:[#allocation2 + $0x7f4] ss:$24 sps:$4 sm:$0xff]  }
 0x504   :  { %4320 = vmatprep.subr.bf16.mxu1 %v6748_v41  ;;  %v3805_v28 = vpop.f32.mrf.mxu1  ;;  %v6757_v4 = vld [vmem:[#allocation2 + $0x820] ss:$24 sps:$4 sm:$0xff]  }
 0x505   :  { %v6759_v28 = vld [vmem:[#allocation2 + $0x7f0] ss:$24 sps:$4 sm:$0xff]  }
 0x507   :  { %4321 = vmatpush2.bf16.msra.mxu1 %v6749_v17  ;;  %v8215_v53 = vpop.f32.mrf.mxu0  ;;  %v6760_v17 = vld [vmem:[#allocation2 + $0x7c4] ss:$24 sps:$4 sm:$0xff]  }
 0x508   :  { %4322 = vmatprep.subr.bf16.mxu1 %v6750_v22 }
 0x509   :  { %v8217_v5 = vpop.f32.mrf.mxu0 }
 0x50b   :  { %4323 = vmatpush2.bf16.msra.mxu1 %v6751_v19  ;;  %v8219_v54 = vpop.f32.mrf.mxu0 }
 0x50c   :  { %4324 = vmatprep.subr.bf16.mxu1 %v6752_v38  ;;  %v6761_v38 = vld [vmem:[#allocation2 + $0x7c0] ss:$24 sps:$4 sm:$0xff]  }
 0x50d   :  { %v8221_v7 = vpop.f32.mrf.mxu0 }
 0x50f   :  { %4325 = vmatpush2.bf16.msra.mxu1 %v6753_v39  ;;  %v8223_v12 = vpop.f32.mrf.mxu0  ;;  %v6762_v39 = vld [vmem:[#allocation2 + $0x794] ss:$24 sps:$4 sm:$0xff]  }
 0x510   :  { %4326 = vmatprep.subr.bf16.mxu1 %v6754_v48 }
 0x511   :  { %v8225_v10 = vpop.f32.mrf.mxu0 }
 0x513   :  { %4327 = vmatpush2.bf16.msra.mxu1 %v6755_v32  ;;  %v8227_v16 = vpop.f32.mrf.mxu0 }
 0x514   :  { %4328 = vmatprep.subr.bf16.mxu1 %v6756_v58  ;;  %v6763_v58 = vld [vmem:[#allocation2 + $0x790] ss:$24 sps:$4 sm:$0xff]  }
 0x515   :  { %v8229_v9 = vpop.f32.mrf.mxu0 }
 0x517   :  { %4329 = vmatpush2.bf16.msra.mxu1 %v6757_v4  ;;  %v8231_v3 = vpop.f32.mrf.mxu0 }
 0x518   :  { %4330 = vmatprep.subr.bf16.mxu1 %v6758_v29 }
 0x519   :  { %v8233_v41 = vpop.f32.mrf.mxu0 }
 0x51b   :  { %4331 = vmatpush2.bf16.msra.mxu1 %v6759_v28  ;;  %v8235_v22 = vpop.f32.mrf.mxu0 }
 0x51c   :  { %4332 = vmatprep.subr.bf16.mxu1 %v6760_v17 }
 0x51d   :  { %v8237_v19 = vpop.f32.mrf.mxu0 }
 0x51f   :  { %4333 = vmatpush2.bf16.msra.mxu1 %v6761_v38  ;;  %v8239_v48 = vpop.f32.mrf.mxu0 }
 0x520   :  { %4334 = vmatprep.subr.bf16.mxu1 %v6762_v39 }
 0x521   :  { %v8241_v32 = vpop.f32.mrf.mxu0 }
 0x523   :  { %4335 = vmatpush2.bf16.msra.mxu1 %v6763_v58  ;;  %v4017_v4 = vpop.f32.mrf.mxu0 }
 0x525   :  { %v4018_v28 = vpop.f32.mrf.mxu0 }
 0x526   :  { %v3912_v29 = vpop.f32.mrf.mxu1  ;;  %4337 = vmatmul.mubr.bf16.vlgmr.msra.gmra.mxu1 %v8057_v18 }
 0x527   :  { %v3913_v17 = vadd.f32 %v3912_v29, %v8157_v36  ;;  %4346 = vmatprep.mubr.bf16.mxu1 %v8062_v27  ;;  %v8855_v29 = vld [vmem:[#allocation24_spill] sm:$0xff] }
 0x528   :  { %v3914_v20 = vpop.f32.mrf.mxu1  ;;  %v8856_v28 = vunpack.c.l.bf16 %v8855_v29 }
 0x529   :  { %v3915_v38 = vadd.f32 %v3914_v20, %v8160_v6  ;;  %v4432_v39 = vmul.f32 %v3913_v17, %v3913_v17 }
 0x52a   :  { %v3916_v37 = vpop.f32.mrf.mxu1 }
 0x52b   :  { %v8247_v57 = vadd.f32 %v3915_v38, %v3913_v17  ;;  %v4433_v46 = vmul.f32 %v3915_v38, %v3915_v38  ;;  %v8250_v59 = vadd.f32 %v3916_v37, %v8164_v60 }
 0x52c   :  { %v3918_v58 = vpop.f32.mrf.mxu1 }
 0x52d   :  { %v8252_v4 = vadd.f32 %v4433_v46, %v4432_v39  ;;  %v8255_v18 = vadd.f32 %v3918_v58, %v8168_v13  ;;  %v8859_v58 = vld [vmem:[#allocation26_spill] sm:$0xff] }
 0x52e   :  { %v3922_v36 = vpop.f32.mrf.mxu1  ;;  %4347 = vmatmul.mubr.bf16.gmra.mxu1 %v8069_v45  ;;  %v4543_v45 = vmul.f32 %v8250_v59, %v8856_v28  ;;  %v8865_v55 = vunpack.c.h.bf16 %v8859_v58 }
 0x52f   :  { %v8259_v27 = vadd.f32 %v3922_v36, %v8174_v2  ;;  %4356 = vmatprep.mubr.bf16.mxu1 %v8074_v34  ;;  %v8860_v36 = vunpack.c.l.bf16 %v8859_v58  ;;  %v8869_v58 = vld [vmem:[#allocation29_spill] sm:$0xff] }
 0x530   :  { %v3924_v20 = vpop.f32.mrf.mxu1 }
 0x531   :  { %v8263_v6 = vadd.f32 %v3924_v20, %v8178_v1  ;;  %v8857_v1 = vld [vmem:[#allocation25_spill] sm:$0xff] }
 0x532   :  { %v3926_v37 = vpop.f32.mrf.mxu1  ;;  %v8858_v39 = vunpack.c.l.bf16 %v8857_v1 }
 0x533   :  { %v8266_v60 = vadd.f32 %v3926_v37, %v8182_v26  ;;  %v8861_v37 = vunpack.c.h.bf16 %v8855_v29 }
 0x534   :  { %v3928_v46 = vpop.f32.mrf.mxu1  ;;  %v4537_v26 = vmul.f32 %v3913_v17, %v8858_v39  ;;  %v8864_v17 = vunpack.c.h.bf16 %v8857_v1 }
 0x535   :  { %v8269_v13 = vadd.f32 %v3928_v46, %v8187_v24  ;;  %v4549_v24 = vmul.f32 %v8259_v27, %v8860_v36  ;;  %v4544_v46 = vmul.f32 %v8255_v18, %v8861_v37  ;;  %v4550_v36 = vmul.f32 %v8263_v6, %v8865_v55 }
 0x536   :  { %v3932_v2 = vpop.f32.mrf.mxu1  ;;  %4357 = vmatmul.mubr.bf16.gmra.mxu1 %v8084_v40  ;;  %v4579_v40 = vadd.f32 %v4543_v45, %v4537_v26  ;;  %v4538_v39 = vmul.f32 %v3915_v38, %v8864_v17  ;;  %v8870_v55 = vunpack.c.l.bf16 %v8869_v58 }
 0x537   :  { %v8276_v34 = vadd.f32 %v3932_v2, %v8192_v52  ;;  %4366 = vmatprep.mubr.bf16.mxu1 %v8086_v21  ;;  %v8862_v52 = vld [vmem:[#allocation27_spill] sm:$0xff] }
 0x538   :  { %v3934_v20 = vpop.f32.mrf.mxu1  ;;  %v8863_v2 = vunpack.c.l.bf16 %v8862_v52  ;;  %v4580_v37 = vadd.f32 %v4579_v40, %v4549_v24  ;;  %v8871_v40 = vunpack.c.h.bf16 %v8866_v11 }
 0x539   :  { %v8288_v28 = vadd.f32 %v3934_v20, %v8196_v25  ;;  %v8867_v25 = vunpack.c.l.bf16 %v8866_v11  ;;  %v4592_v20 = vadd.f32 %v4544_v46, %v4538_v39 }
 0x53a   :  { %v4555_v21 = vmul.f32 %v8266_v60, %v8863_v2  ;;  %v3936_v49 = vpop.f32.mrf.mxu1  ;;  %v8868_v2 = vunpack.c.h.bf16 %v8862_v52 }
 0x53b   :  { %v8299_v29 = vadd.f32 %v3936_v49, %v8200_v47  ;;  %v4561_v45 = vmul.f32 %v8276_v34, %v8867_v25  ;;  %v4593_v24 = vadd.f32 %v4592_v20, %v4550_v36  ;;  %v4562_v46 = vmul.f32 %v8288_v28, %v8871_v40  ;;  %v8874_v25 = vld [vmem:[#allocation30_spill] sm:$0xff] }
 0x53c   :  { %v3938_v26 = vpop.f32.mrf.mxu1  ;;  %v4556_v42 = vmul.f32 %v8269_v13, %v8868_v2  ;;  %v4581_v1 = vadd.f32 %v4580_v37, %v4555_v21  ;;  %v8873_v21 = vunpack.c.h.bf16 %v8869_v58 }
 0x53d   :  { %v8308_v38 = vadd.f32 %v3938_v26, %v8205_v56  ;;  %v4567_v49 = vmul.f32 %v8299_v29, %v8870_v55  ;;  %v8875_v26 = vunpack.c.l.bf16 %v8874_v25 }
 0x53e   :  { %v3942_v47 = vpop.f32.mrf.mxu1  ;;  %4367 = vmatmul.mubr.bf16.gmra.mxu1 %v8090_v35  ;;  %v4582_v17 = vadd.f32 %v4581_v1, %v4561_v45  ;;  %v4594_v56 = vadd.f32 %v4593_v24, %v4556_v42  ;;  %v8878_v42 = vunpack.c.h.bf16 %v8874_v25 }
 0x53f   :  { %v8318_v52 = vadd.f32 %v3942_v47, %v8210_v44  ;;  %v4568_v37 = vmul.f32 %v8308_v38, %v8873_v21 }
 0x540   :  { %v3944_v39 = vpop.f32.mrf.mxu1  ;;  %v4583_v35 = vadd.f32 %v4582_v17, %v4567_v49  ;;  %v4595_v20 = vadd.f32 %v4594_v56, %v4562_v46 }
 0x541   :  { %8872 = vst [vmem:[#allocation22_spill] sm:$0xff] %v8318_v52  ;;  %v4573_v2 = vmul.f32 %v8318_v52, %v8875_v26  ;;  %v8327_v36 = vadd.f32 %v3944_v39, %v8213_v0 }
 0x542   :  { %v3946_v11 = vpop.f32.mrf.mxu1  ;;  %v4596_v58 = vadd.f32 %v4595_v20, %v4568_v37  ;;  %v8880_v20 = vld [vmem:[#allocation33_spill] sm:$0xff] }
 0x543   :  { %8876 = vst [vmem:[#allocation23_spill] sm:$0xff] %v8327_v36  ;;  %v4584_v44 = vsel %vm2710_vm0, %v4573_v2, 0.0  ;;  %v4574_v45 = vmul.f32 %v8327_v36, %v8878_v42  ;;  %v3988_v50 = vadd.f32 %v8219_v54, %v8880_v20 }
 0x544   :  { %v8330_v55 = vadd.f32 %v4584_v44, %v4583_v35  ;;  %v3947_v1 = vpop.f32.mrf.mxu1  ;;  %v3984_v44 = vadd.f32 %v8215_v53, %v8880_v20  ;;  %v3994_v53 = vadd.f32 %v8223_v12, %v8880_v20  ;;  %v3998_v12 = vadd.f32 %v8227_v16, %v8880_v20 }
 0x545   :  { %v4597_v47 = vsel %vm2710_vm0, %v4574_v45, 0.0  ;;  %v8881_v45 = vld [vmem:[#allocation34_spill] sm:$0xff] }
 0x546   :  { %8877 = vst [vmem:[#allocation24_spill] sm:$0xff] %v8330_v55  ;;  %v8336_v24 = vadd.f32 %v4597_v47, %v4596_v58  ;;  %v3986_v1 = vadd.f32 %v8217_v5, %v8881_v45  ;;  %v3990_v62 = vadd.f32 %v8221_v7, %v8881_v45 }
 0x547   :  { %v4125_v49 = vpop.f32.mrf.mxu0 }
 0x548   :  { %8879 = vst [vmem:[#allocation25_spill] sm:$0xff] %v8336_v24 }
 0x549   :  { %v4127_v40 = vpop.f32.mrf.mxu0 }
 0x54b   :  { %v4129_v0 = vpop.f32.mrf.mxu0 }
 0x54d   :  { %v4131_v17 = vpop.f32.mrf.mxu0 }
 0x54f   :  { %v4135_v39 = vpop.f32.mrf.mxu0 }
 0x551   :  { %v4137_v46 = vpop.f32.mrf.mxu0 }
 0x553   :  { %v4139_v56 = vpop.f32.mrf.mxu0 }
 0x555   :  { %v4141_v21 = vpop.f32.mrf.mxu0 }
 0x557   :  { %v4145_v26 = vpop.f32.mrf.mxu0 }
 0x559   :  { %v4147_v2 = vpop.f32.mrf.mxu0 }
 0x55b   :  { %v8338_v35 = vpop.f32.mrf.mxu0 }
 0x55d   :  { %v8340_v25 = vpop.f32.mrf.mxu0 }
 0x55f   :  { %v8342_v11 = vpop.f32.mrf.mxu0 }
 0x561   :  { %v8344_v37 = vpop.f32.mrf.mxu0 }
 0x563   :  { %v4159_v42 = vpop.f32.mrf.mxu0 }
 0x565   :  { %v4160_v47 = vpop.f32.mrf.mxu0 }
 0x566   :  { %v4054_v58 = vpop.f32.mrf.mxu1 }
 0x567   :  { %v4055_v14 = vadd.f32 %v4054_v58, %v3984_v44  ;;  %v3996_v44 = vadd.f32 %v8225_v10, %v8881_v45  ;;  %v4000_v10 = vadd.f32 %v8229_v9, %v8881_v45  ;;  %v4008_v9 = vadd.f32 %v8235_v22, %v8880_v20 }
 0x568   :  { %v4056_v8 = vpop.f32.mrf.mxu1 }
 0x569   :  { %v4057_v63 = vadd.f32 %v4056_v8, %v3986_v1  ;;  %v4126_v23 = vadd.f32 %v4125_v49, %v4055_v14 }
 0x56a   :  { %v4058_v24 = vpop.f32.mrf.mxu1 }
 0x56b   :  { %v4376_v42 = vadd.f32 %v8247_v57, %v4126_v23  ;;  %v4434_v55 = vmul.f32 %v4126_v23, %v4126_v23  ;;  %v4059_v5 = vadd.f32 %v4058_v24, %v3988_v50  ;;  %v4128_v36 = vadd.f32 %v4127_v40, %v4057_v63 }
 0x56c   :  { %v4060_v47 = vpop.f32.mrf.mxu1  ;;  %v4004_v24 = vadd.f32 %v8231_v3, %v8880_v20 }
 0x56d   :  { %v4475_v54 = vadd.f32 %v8252_v4, %v4434_v55  ;;  %v4061_v8 = vadd.f32 %v4060_v47, %v3990_v62  ;;  %v8360_v14 = vadd.f32 %v4129_v0, %v4059_v5  ;;  %v8362_v49 = vadd.f32 %v4376_v42, %v4128_v36  ;;  %v8882_v47 = vld [vmem:[#allocation35_spill] sm:$0xff] }
 0x56e   :  { %v4435_v7 = vmul.f32 %v4128_v36, %v4128_v36  ;;  %v4064_v1 = vpop.f32.mrf.mxu1 }
 0x56f   :  { %v4065_v57 = vadd.f32 %v4064_v1, %v3994_v53  ;;  %v8366_v58 = vadd.f32 %v4131_v17, %v4061_v8  ;;  %v4006_v17 = vadd.f32 %v8233_v41, %v8881_v45  ;;  %v4010_v8 = vadd.f32 %v8237_v19, %v8881_v45 }
 0x570   :  { %v8368_v63 = vadd.f32 %v4475_v54, %v4435_v7  ;;  %v4066_v50 = vpop.f32.mrf.mxu1 }
 0x571   :  { %v4067_v4 = vadd.f32 %v4066_v50, %v3996_v44  ;;  %v8372_v62 = vadd.f32 %v4135_v39, %v4065_v57  ;;  %v8883_v44 = vunpack.c.l.bf16 %v8882_v47  ;;  %v8886_v57 = vld [vmem:[#allocation37_spill] sm:$0xff] }
 0x572   :  { %v4068_v55 = vpop.f32.mrf.mxu1  ;;  %v8887_v50 = vunpack.c.l.bf16 %v8886_v57 }
 0x573   :  { %v4069_v40 = vadd.f32 %v4068_v55, %v3998_v12  ;;  %v8376_v0 = vadd.f32 %v4137_v46, %v4067_v4  ;;  %v4545_v54 = vmul.f32 %v8360_v14, %v8883_v44  ;;  %v4014_v4 = vadd.f32 %v8239_v48, %v8880_v20 }
 0x574   :  { %v4070_v16 = vpop.f32.mrf.mxu1  ;;  %v4551_v22 = vmul.f32 %v8372_v62, %v8887_v50  ;;  %v8892_v48 = vunpack.c.h.bf16 %v8886_v57 }
 0x575   :  { %v4071_v53 = vadd.f32 %v4070_v16, %v4000_v10  ;;  %v8380_v42 = vadd.f32 %v4139_v56, %v4069_v40  ;;  %v8884_v56 = vld [vmem:[#allocation36_spill] sm:$0xff]  ;;  %v8889_v40 = vld [vmem:[#allocation38_spill] sm:$0xff] }
 0x576   :  { %v4074_v5 = vpop.f32.mrf.mxu1  ;;  %v8885_v1 = vunpack.c.l.bf16 %v8884_v56  ;;  %v8890_v16 = vunpack.c.l.bf16 %v8889_v40  ;;  %v4552_v20 = vmul.f32 %v8376_v0, %v8892_v48 }
 0x577   :  { %v4075_v39 = vadd.f32 %v4074_v5, %v4004_v24  ;;  %v8387_v3 = vadd.f32 %v4141_v21, %v4071_v53  ;;  %v8888_v21 = vunpack.c.h.bf16 %v8882_v47  ;;  %v4016_v53 = vadd.f32 %v8241_v32, %v8881_v45 }
 0x578   :  { %v4076_v46 = vpop.f32.mrf.mxu1  ;;  %v4539_v12 = vmul.f32 %v4126_v23, %v8885_v1  ;;  %v4557_v23 = vmul.f32 %v8380_v42, %v8890_v16  ;;  %v8891_v5 = vunpack.c.h.bf16 %v8884_v56  ;;  %v8895_v32 = vunpack.c.h.bf16 %v8889_v40 }
 0x579   :  { %v4077_v7 = vadd.f32 %v4076_v46, %v4006_v17  ;;  %v8391_v41 = vadd.f32 %v4145_v26, %v4075_v39  ;;  %v4546_v55 = vmul.f32 %v8366_v58, %v8888_v21 }
 0x57a   :  { %v4078_v10 = vpop.f32.mrf.mxu1  ;;  %v4605_v26 = vadd.f32 %v4545_v54, %v4539_v12  ;;  %v4540_v39 = vmul.f32 %v4128_v36, %v8891_v5  ;;  %v4558_v45 = vmul.f32 %v8387_v3, %v8895_v32 }
 0x57b   :  { %v4079_v24 = vadd.f32 %v4078_v10, %v4008_v9  ;;  %v8403_v19 = vadd.f32 %v4147_v2, %v4077_v7  ;;  %v8893_v2 = vld [vmem:[#allocation39_spill] sm:$0xff] }
 0x57c   :  { %v4080_v17 = vpop.f32.mrf.mxu1  ;;  %v4606_v9 = vadd.f32 %v4605_v26, %v4551_v22  ;;  %v8894_v44 = vunpack.c.l.bf16 %v8893_v2  ;;  %v4618_v1 = vadd.f32 %v4546_v55, %v4540_v39 }
 0x57d   :  { %v4081_v47 = vadd.f32 %v4080_v17, %v4010_v8  ;;  %v8419_v46 = vadd.f32 %v8338_v35, %v4079_v24  ;;  %v8896_v8 = vld [vmem:[#allocation40_spill] sm:$0xff]  ;;  %v8898_v35 = vunpack.c.h.bf16 %v8893_v2 }
 0x57e   :  { %v4563_v54 = vmul.f32 %v8391_v41, %v8894_v44  ;;  %v4084_v7 = vpop.f32.mrf.mxu1  ;;  %v4607_v12 = vadd.f32 %v4606_v9, %v4557_v23  ;;  %v8897_v57 = vunpack.c.l.bf16 %v8896_v8  ;;  %v4619_v10 = vadd.f32 %v4618_v1, %v4552_v20  ;;  %v8901_v23 = vld [vmem:[#allocation41_spill] sm:$0xff] }
 0x57f   :  { %v4085_v36 = vadd.f32 %v4084_v7, %v4014_v4  ;;  %v8425_v56 = vadd.f32 %v8340_v25, %v4081_v47  ;;  %v4564_v21 = vmul.f32 %v8403_v19, %v8898_v35  ;;  %v8900_v25 = vunpack.c.h.bf16 %v8896_v8 }
 0x580   :  { %v4569_v50 = vmul.f32 %v8419_v46, %v8897_v57  ;;  %v4086_v22 = vpop.f32.mrf.mxu1  ;;  %v4608_v26 = vadd.f32 %v4607_v12, %v4563_v54  ;;  %v4620_v40 = vadd.f32 %v4619_v10, %v4558_v45  ;;  %v8902_v17 = vunpack.c.l.bf16 %v8901_v23 }
 0x581   :  { %v4087_v55 = vadd.f32 %v4086_v22, %v4016_v53  ;;  %v8434_v24 = vadd.f32 %v8342_v11, %v4085_v36  ;;  %v4570_v16 = vmul.f32 %v8425_v56, %v8900_v25  ;;  %v8905_v9 = vunpack.c.h.bf16 %v8901_v23  ;;  %v8907_v23 = vld [vmem:[#allocation44_spill] sm:$0xff] }
 0x582   :  { %v4088_v4 = vpop.f32.mrf.mxu1  ;;  %v4609_v39 = vadd.f32 %v4608_v26, %v4569_v50  ;;  %v4621_v53 = vadd.f32 %v4620_v40, %v4564_v21 }
 0x583   :  { %8899 = vst [vmem:[#allocation26_spill] sm:$0xff] %v8434_v24  ;;  %v4575_v5 = vmul.f32 %v8434_v24, %v8902_v17  ;;  %v8443_v48 = vadd.f32 %v8344_v37, %v4087_v55 }
 0x584   :  { %v4089_v20 = vpop.f32.mrf.mxu1  ;;  %v4622_v44 = vadd.f32 %v4621_v53, %v4570_v16 }
 0x585   :  { %8903 = vst [vmem:[#allocation27_spill] sm:$0xff] %v8443_v48  ;;  %v4610_v11 = vsel %vm2710_vm0, %v4575_v5, 0.0  ;;  %v4576_v2 = vmul.f32 %v8443_v48, %v8905_v9 }
 0x586   :  { %v8446_v47 = vadd.f32 %v4610_v11, %v4609_v39  ;;  %v8908_v39 = vld [vmem:[#allocation45_spill] sm:$0xff] }
 0x587   :  { %v4623_v54 = vsel %vm2710_vm0, %v4576_v2, 0.0  ;;  %v4267_v7 = vpop.f32.mrf.mxu0 }
 0x588   :  { %8904 = vst [vmem:[#allocation28_spill] sm:$0xff] %v8446_v47  ;;  %v8452_v1 = vadd.f32 %v4623_v54, %v4622_v44 }
 0x589   :  { %v4269_v32 = vpop.f32.mrf.mxu0 }
 0x58a   :  { %8906 = vst [vmem:[#allocation29_spill] sm:$0xff] %v8452_v1 }
 0x58b   :  { %v4271_v45 = vpop.f32.mrf.mxu0 }
 0x58d   :  { %v4273_v37 = vpop.f32.mrf.mxu0 }
 0x58f   :  { %v4277_v36 = vpop.f32.mrf.mxu0 }
 0x591   :  { %v4279_v12 = vpop.f32.mrf.mxu0 }
 0x593   :  { %v4281_v8 = vpop.f32.mrf.mxu0 }
 0x595   :  { %v4283_v57 = vpop.f32.mrf.mxu0 }
 0x597   :  { %v4287_v50 = vpop.f32.mrf.mxu0 }
 0x599   :  { %v4289_v22 = vpop.f32.mrf.mxu0 }
 0x59b   :  { %v4291_v10 = vpop.f32.mrf.mxu0 }
 0x59d   :  { %v4293_v35 = vpop.f32.mrf.mxu0 }
 0x59f   :  { %v4297_v21 = vpop.f32.mrf.mxu0 }
 0x5a1   :  { %v4299_v55 = vpop.f32.mrf.mxu0 }
 0x5a3   :  { %v4301_v26 = vpop.f32.mrf.mxu0 }
 0x5a5   :  { %v4302_v40 = vpop.f32.mrf.mxu0 }
 0x5a6   :  { %v4196_v4 = vpop.f32.mrf.mxu1 }
 0x5a8   :  { %v4198_v25 = vpop.f32.mrf.mxu1 }
 0x5aa   :  { %v4200_v16 = vpop.f32.mrf.mxu1 }
 0x5ab   :  { %v4201_v17 = vadd.f32 %v4200_v16, %v8907_v23 }
 0x5ac   :  { %v4202_v5 = vpop.f32.mrf.mxu1 }
 0x5ad   :  { %v4203_v20 = vadd.f32 %v4202_v5, %v8908_v39  ;;  %v4272_v53 = vadd.f32 %v4271_v45, %v4201_v17 }
 0x5ae   :  { %v4206_v11 = vpop.f32.mrf.mxu1 }
 0x5af   :  { %v4274_v9 = vadd.f32 %v4273_v37, %v4203_v20  ;;  %v4207_v2 = vadd.f32 %v4206_v11, %v8907_v23 }
 0x5b0   :  { %v4208_v44 = vpop.f32.mrf.mxu1 }
 0x5b1   :  { %v4209_v54 = vadd.f32 %v4208_v44, %v8908_v39  ;;  %v4278_v1 = vadd.f32 %v4277_v36, %v4207_v2 }
 0x5b2   :  { %v4210_v47 = vpop.f32.mrf.mxu1 }
 0x5b3   :  { %v4211_v26 = vadd.f32 %v4210_v47, %v8907_v23  ;;  %v4280_v40 = vadd.f32 %v4279_v12, %v4209_v54 }
 0x5b4   :  { %v4212_v48 = vpop.f32.mrf.mxu1 }
 0x5b5   :  { %v4213_v24 = vadd.f32 %v4212_v48, %v8908_v39  ;;  %v8460_v16 = vadd.f32 %v4281_v8, %v4211_v26 }
 0x5b6   :  { %v4216_v52 = vpop.f32.mrf.mxu1 }
 0x5b7   :  { %v4217_v45 = vadd.f32 %v4216_v52, %v8907_v23  ;;  %v8463_v17 = vadd.f32 %v4283_v57, %v4213_v24 }
 0x5b8   :  { %v4218_v37 = vpop.f32.mrf.mxu1 }
 0x5b9   :  { %v4219_v5 = vadd.f32 %v4218_v37, %v8908_v39  ;;  %v8466_v20 = vadd.f32 %v4287_v50, %v4217_v45  ;;  %v4197_v45 = vadd.f32 %v4196_v4, %v8907_v23  ;;  %v4199_v37 = vadd.f32 %v4198_v25, %v8908_v39 }
 0x5ba   :  { %v4220_v36 = vpop.f32.mrf.mxu1  ;;  %v4438_v4 = vmul.f32 %v8250_v59, %v8250_v59 }
 0x5bb   :  { %v4221_v11 = vadd.f32 %v4220_v36, %v8907_v23  ;;  %v8469_v47 = vadd.f32 %v4289_v22, %v4219_v5  ;;  %v4270_v36 = vadd.f32 %v4269_v32, %v4199_v37 }
 0x5bc   :  { %v4222_v12 = vpop.f32.mrf.mxu1 }
 0x5bd   :  { %v4223_v48 = vadd.f32 %v4222_v12, %v8908_v39  ;;  %v8472_v8 = vadd.f32 %v4291_v10, %v4221_v11  ;;  %v4268_v10 = vadd.f32 %v4267_v7, %v4197_v45 }
 0x5be   :  { %v4226_v2 = vpop.f32.mrf.mxu1 }
 0x5bf   :  { %v4227_v52 = vadd.f32 %v4226_v2, %v8907_v23  ;;  %v8475_v24 = vadd.f32 %v4293_v35, %v4223_v48  ;;  %v4439_v23 = vmul.f32 %v8255_v18, %v8255_v18 }
 0x5c0   :  { %v4228_v57 = vpop.f32.mrf.mxu1 }
 0x5c1   :  { %v4229_v44 = vadd.f32 %v4228_v57, %v8908_v39  ;;  %v8478_v50 = vadd.f32 %v4297_v21, %v4227_v52 }
 0x5c2   :  { %v4230_v54 = vpop.f32.mrf.mxu1 }
 0x5c3   :  { %v8480_v26 = vadd.f32 %v4299_v55, %v4229_v44 }
 0x5c4   :  { %v4231_v22 = vpop.f32.mrf.mxu1 }
 0x5c5   :  { %v8910_v22 = vunpack.c.l.bf16 %v7670_v30 }
 0x5e6   :  { %v4338_v5 = vpop.f32.mrf.mxu1 }
 0x5e7   :  { %v4339_v11 = vadd.f32 %v4338_v5, %v4268_v10  ;;  %v8911_v10 = vunpack.c.h.bf16 %v7668_v43 }
 0x5e8   :  { %v4340_v12 = vpop.f32.mrf.mxu1 }
 0x5e9   :  { %v4378_v35 = vadd.f32 %v8362_v49, %v4339_v11  ;;  %v4436_v48 = vmul.f32 %v4339_v11, %v4339_v11  ;;  %v4341_v2 = vadd.f32 %v4340_v12, %v4270_v36  ;;  %v8909_v49 = vunpack.c.l.bf16 %v7668_v43 }
 0x5ea   :  { %v4342_v57 = vpop.f32.mrf.mxu1  ;;  %v4441_v43 = vmul.f32 %v8366_v58, %v8366_v58 }
 0x5eb   :  { %v4477_v21 = vadd.f32 %v8368_v63, %v4436_v48  ;;  %v4379_v52 = vadd.f32 %v4378_v35, %v4341_v2  ;;  %v4437_v55 = vmul.f32 %v4341_v2, %v4341_v2  ;;  %v4343_v44 = vadd.f32 %v4342_v57, %v4272_v53 }
 0x5ec   :  { %v4344_v54 = vpop.f32.mrf.mxu1  ;;  %v4541_v39 = vmul.f32 %v4339_v11, %v8909_v49  ;;  %v4542_v5 = vmul.f32 %v4341_v2, %v8911_v10  ;;  %v8916_v10 = vunpack.c.h.bf16 %v7698_v31 }
 0x5ed   :  { %v4380_v7 = vadd.f32 %v4379_v52, %v8250_v59  ;;  %v4478_v25 = vadd.f32 %v4477_v21, %v4437_v55  ;;  %v4345_v32 = vadd.f32 %v4344_v54, %v4274_v9  ;;  %v4547_v63 = vmul.f32 %v4343_v44, %v8910_v22 }
 0x5ee   :  { %v4348_v45 = vpop.f32.mrf.mxu1  ;;  %v8912_v59 = vunpack.c.h.bf16 %v7670_v30  ;;  %v4440_v9 = vmul.f32 %v8360_v14, %v8360_v14 }
 0x5ef   :  { %v4381_v53 = vadd.f32 %v4380_v7, %v8255_v18  ;;  %v4479_v37 = vadd.f32 %v4478_v25, %v4438_v4  ;;  %v4631_v12 = vadd.f32 %v4547_v63, %v4541_v39  ;;  %v4349_v35 = vadd.f32 %v4348_v45, %v4278_v1 }
 0x5f0   :  { %v4548_v36 = vmul.f32 %v4345_v32, %v8912_v59  ;;  %v4350_v48 = vpop.f32.mrf.mxu1  ;;  %v8913_v18 = vunpack.c.l.bf16 %v7678_v61  ;;  %v8914_v4 = vunpack.c.h.bf16 %v7678_v61  ;;  %v4442_v1 = vmul.f32 %v4343_v44, %v4343_v44 }
 0x5f1   :  { %v4480_v11 = vadd.f32 %v4479_v37, %v4439_v23  ;;  %v4382_v57 = vadd.f32 %v4381_v53, %v8360_v14  ;;  %v4351_v52 = vadd.f32 %v4350_v48, %v4280_v40  ;;  %v8915_v63 = vunpack.c.l.bf16 %v7698_v31 }
 0x5f2   :  { %v4644_v21 = vadd.f32 %v4548_v36, %v4542_v5  ;;  %v4553_v55 = vmul.f32 %v4349_v35, %v8913_v18  ;;  %v4352_v54 = vpop.f32.mrf.mxu1  ;;  %v4443_v37 = vmul.f32 %v4345_v32, %v4345_v32  ;;  %v8918_v18 = vunpack.c.h.bf16 %v7720_v15 }
 0x5f3   :  { %v4383_v30 = vadd.f32 %v4382_v57, %v8366_v58  ;;  %v4481_v2 = vadd.f32 %v4480_v11, %v4440_v9  ;;  %v4554_v7 = vmul.f32 %v4351_v52, %v8914_v4  ;;  %v8511_v23 = vadd.f32 %v4352_v54, %v8460_v16 }
 0x5f4   :  { %v4632_v25 = vadd.f32 %v4631_v12, %v4553_v55  ;;  %v4354_v14 = vpop.f32.mrf.mxu1  ;;  %v4445_v57 = vmul.f32 %v8263_v6, %v8263_v6  ;;  %v4446_v55 = vmul.f32 %v8372_v62, %v8372_v62 }
 0x5f5   :  { %v4384_v40 = vadd.f32 %v4383_v30, %v4343_v44  ;;  %v4482_v49 = vadd.f32 %v4481_v2, %v4441_v43  ;;  %v4645_v39 = vadd.f32 %v4644_v21, %v4554_v7  ;;  %v8514_v22 = vadd.f32 %v4354_v14, %v8463_v17 }
 0x5f6   :  { %v4559_v58 = vmul.f32 %v8511_v23, %v8915_v63  ;;  %v4358_v45 = vpop.f32.mrf.mxu1  ;;  %v4444_v44 = vmul.f32 %v8259_v27, %v8259_v27 }
 0x5f7   :  { %v4483_v53 = vadd.f32 %v4482_v49, %v4442_v1  ;;  %v4385_v61 = vadd.f32 %v4384_v40, %v4345_v32  ;;  %v4560_v16 = vmul.f32 %v8514_v22, %v8916_v10  ;;  %v8525_v59 = vadd.f32 %v4358_v45, %v8466_v20 }
 0x5f8   :  { %v4633_v5 = vadd.f32 %v4632_v25, %v4559_v58  ;;  %v4360_v17 = vpop.f32.mrf.mxu1  ;;  %v8917_v32 = vunpack.c.l.bf16 %v7720_v15  ;;  %v4447_v25 = vmul.f32 %v8376_v0, %v8376_v0  ;;  %v8920_v40 = vunpack.c.h.bf16 %v7736_v33 }
 0x5f9   :  { %v4386_v36 = vadd.f32 %v4385_v61, %v8259_v27  ;;  %v4484_v9 = vadd.f32 %v4483_v53, %v4443_v37  ;;  %v4646_v12 = vadd.f32 %v4645_v39, %v4560_v16  ;;  %v8529_v48 = vadd.f32 %v4360_v17, %v8469_v47 }
 0x5fa   :  { %v4565_v31 = vmul.f32 %v8525_v59, %v8917_v32  ;;  %v4362_v11 = vpop.f32.mrf.mxu1  ;;  %v8921_v37 = vunpack.c.l.bf16 %v7758_v51 }
 0x5fb   :  { %v4387_v21 = vadd.f32 %v4386_v36, %v8263_v6  ;;  %v4485_v20 = vadd.f32 %v4484_v9, %v4444_v44  ;;  %v4566_v27 = vmul.f32 %v8529_v48, %v8918_v18  ;;  %v8543_v54 = vadd.f32 %v4362_v11, %v8472_v8 }
 0x5fc   :  { %v4634_v47 = vadd.f32 %v4633_v5, %v4565_v31  ;;  %v4364_v43 = vpop.f32.mrf.mxu1  ;;  %v8919_v6 = vunpack.c.l.bf16 %v7736_v33  ;;  %v4449_v44 = vmul.f32 %v4351_v52, %v4351_v52  ;;  %v8922_v5 = vunpack.c.h.bf16 %v7758_v51 }
 0x5fd   :  { %v4486_v30 = vadd.f32 %v4485_v20, %v4445_v57  ;;  %v4388_v2 = vadd.f32 %v4387_v21, %v8372_v62  ;;  %v4647_v4 = vadd.f32 %v4646_v12, %v4566_v27  ;;  %v8547_v7 = vadd.f32 %v4364_v43, %v8475_v24 }
 0x5fe   :  { %v4571_v15 = vmul.f32 %v8543_v54, %v8919_v6  ;;  %v4368_v1 = vpop.f32.mrf.mxu1  ;;  %v4448_v62 = vmul.f32 %v4349_v35, %v4349_v35  ;;  %v4451_v51 = vmul.f32 %v8269_v13, %v8269_v13  ;;  %v4452_v57 = vmul.f32 %v8380_v42, %v8380_v42 }
 0x5ff   :  { %v4389_v14 = vadd.f32 %v4388_v2, %v8376_v0  ;;  %v4487_v8 = vadd.f32 %v4486_v30, %v4446_v55  ;;  %v4572_v49 = vmul.f32 %v8547_v7, %v8920_v40  ;;  %v8559_v24 = vadd.f32 %v4368_v1, %v8478_v50 }
 0x600   :  { %v4635_v39 = vadd.f32 %v4634_v47, %v4571_v15  ;;  %v4370_v63 = vpop.f32.mrf.mxu1  ;;  %v4454_v47 = vmul.f32 %v8511_v23, %v8511_v23  ;;  %v4455_v2 = vmul.f32 %v8514_v22, %v8514_v22 }
 0x601   :  { %v4390_v58 = vadd.f32 %v4389_v14, %v4349_v35  ;;  %v4488_v45 = vadd.f32 %v4487_v8, %v4447_v25  ;;  %v4648_v53 = vadd.f32 %v4647_v4, %v4572_v49  ;;  %v8562_v61 = vadd.f32 %v4370_v63, %v8480_v26 }
 0x602   :  { %v4577_v0 = vmul.f32 %v8559_v24, %v8921_v37  ;;  %v4372_v10 = vpop.f32.mrf.mxu1  ;;  %v4450_v35 = vmul.f32 %v8266_v60, %v8266_v60  ;;  %v4460_v49 = vmul.f32 %v8525_v59, %v8525_v59  ;;  %v4461_v63 = vmul.f32 %v8529_v48, %v8529_v48 }
 0x603   :  { %v4489_v33 = vadd.f32 %v4488_v45, %v4448_v62  ;;  %v4391_v16 = vadd.f32 %v4390_v58, %v4351_v52  ;;  %v4578_v50 = vmul.f32 %v8562_v61, %v8922_v5 }
 0x604   :  { %v4636_v17 = vsel %vm2710_vm0, %v4577_v0, 0.0  ;;  %v4373_v36 = vpop.f32.mrf.mxu1 }
 0x605   :  { %v4392_v26 = vadd.f32 %v4391_v16, %v8266_v60  ;;  %v4490_v9 = vadd.f32 %v4489_v33, %v4449_v44  ;;  %v8574_v12 = vadd.f32 %v4636_v17, %v4635_v39  ;;  %v4649_v32 = vsel %vm2710_vm0, %v4578_v50, 0.0 }
 0x606   :  { %v8577_v31 = vadd.f32 %v4649_v32, %v4648_v53  ;;  %v4453_v60 = vmul.f32 %v8387_v3, %v8387_v3  ;;  %v4466_v44 = vmul.f32 %v8543_v54, %v8543_v54 }
 0x607   :  { %v4393_v52 = vadd.f32 %v4392_v26, %v8269_v13  ;;  %v4491_v11 = vadd.f32 %v4490_v9, %v4450_v35 }
 0x609   :  { %v4492_v21 = vadd.f32 %v4491_v11, %v4451_v51  ;;  %v4394_v20 = vadd.f32 %v4393_v52, %v8380_v42  ;;  %v4456_v42 = vmul.f32 %v8276_v34, %v8276_v34  ;;  %v8925_v52 = vld [vmem:[#allocation26_spill] sm:$0xff] }
 0x60a   :  { %v4470_v11 = vmul.f32 %v8925_v52, %v8925_v52 }
 0x60b   :  { %v4395_v18 = vadd.f32 %v4394_v20, %v8387_v3  ;;  %v4493_v27 = vadd.f32 %v4492_v21, %v4452_v57  ;;  %v4457_v3 = vmul.f32 %v8288_v28, %v8288_v28  ;;  %v4414_v20 = vsel %vm2710_vm0, %v8925_v52, 0.0  ;;  %v6430_v52 = vld [vmem:[#allocation11 + $0x48] sm:$0xff]  }
 0x60d   :  { %v4396_v55 = vadd.f32 %v4395_v18, %v8511_v23  ;;  %v4494_v43 = vadd.f32 %v4493_v27, %v4453_v60  ;;  %v4458_v23 = vmul.f32 %v8391_v41, %v8391_v41  ;;  %v8926_v60 = vld [vmem:[#allocation27_spill] sm:$0xff] }
 0x60e   :  { %v4471_v18 = vmul.f32 %v8926_v60, %v8926_v60 }
 0x60f   :  { %v4495_v13 = vadd.f32 %v4494_v43, %v4454_v47  ;;  %v4397_v30 = vadd.f32 %v4396_v55, %v8514_v22  ;;  %v4459_v22 = vmul.f32 %v8403_v19, %v8403_v19  ;;  %v4513_v47 = vsel %vm2710_vm0, %v4470_v11, 0.0 }
 0x610   :  { %v4472_v43 = vmul.f32 %v8559_v24, %v8559_v24 }
 0x611   :  { %v4398_v4 = vadd.f32 %v4397_v30, %v8276_v34  ;;  %v4496_v6 = vadd.f32 %v4495_v13, %v4455_v2  ;;  %v4416_v13 = vsel %vm2710_vm0, %v8926_v60, 0.0  ;;  %v6434_v60 = vld [vmem:[#allocation11 + $0x40] sm:$0xff]  }
 0x613   :  { %v4399_v15 = vadd.f32 %v4398_v4, %v8288_v28  ;;  %v4497_v1 = vadd.f32 %v4496_v6, %v4456_v42  ;;  %v4418_v42 = vsel %vm2710_vm0, %v8559_v24, 0.0  ;;  %v4473_v4 = vmul.f32 %v8562_v61, %v8562_v61  ;;  %v6406_v24 = vld [vmem:[#allocation11 + $0x78] sm:$0xff]  }
 0x614   :  { %v4515_v6 = vsel %vm2710_vm0, %v4471_v18, 0.0  ;;  %5768 = vmatprep.subr.bf16.mxu0 %v6406_v24  ;;  %v6435_v18 = vld [vmem:[#allocation11] sm:$0xff]  }
 0x615   :  { %v4498_v25 = vadd.f32 %v4497_v1, %v4457_v3  ;;  %v4400_v14 = vadd.f32 %v4399_v15, %v8391_v41  ;;  %v4462_v41 = vmul.f32 %v8299_v29, %v8299_v29  ;;  %v4420_v1 = vsel %vm2710_vm0, %v8562_v61, 0.0  ;;  %v6411_v61 = vld [vmem:[#allocation11 + $0x30] sm:$0xff]  }
 0x617   :  { %v4401_v8 = vadd.f32 %v4400_v14, %v8403_v19  ;;  %v4499_v40 = vadd.f32 %v4498_v25, %v4458_v23  ;;  %v4463_v19 = vmul.f32 %v8308_v38, %v8308_v38  ;;  %v4517_v23 = vsel %vm2710_vm0, %v4472_v43, 0.0  ;;  %v8927_v43 = vld [vmem:[#allocation24_spill] sm:$0xff] }
 0x619   :  { %v4402_v34 = vadd.f32 %v4401_v8, %v8525_v59  ;;  %v4500_v62 = vadd.f32 %v4499_v40, %v4459_v22  ;;  %v4464_v59 = vmul.f32 %v8419_v46, %v8419_v46  ;;  %v4519_v22 = vsel %vm2710_vm0, %v4473_v4, 0.0  ;;  %v6407_v40 = vld [vmem:[#allocation11 + $0x38] sm:$0xff]  }
 0x61a   :  { %5769 = vmatpush3.bf16.msra.mxu0 %v6407_v40 }
 0x61b   :  { %v4501_v28 = vadd.f32 %v4500_v62, %v4460_v49  ;;  %v4403_v39 = vadd.f32 %v4402_v34, %v8529_v48  ;;  %v4465_v48 = vmul.f32 %v8425_v56, %v8425_v56  ;;  %v6408_v34 = vld [vmem:[#allocation11 + $0x178] sm:$0xff]   ;;  %v6410_v62 = vld [vmem:[#allocation11 + $0x70] sm:$0xff]  }
 0x61c   :  { %v6409_v49 = vld [vmem:[#allocation11 + $0x138] sm:$0xff]   ;;  %5812 = vmatprep.subr.bf16.mxu1 %v6408_v34  ;;  %5770 = vmatprep.subr.bf16.mxu0 %v6410_v62 }
 0x61d   :  { %v4404_v58 = vadd.f32 %v4403_v39, %v8299_v29  ;;  %v4502_v45 = vadd.f32 %v4501_v28, %v4461_v63  ;;  %v6412_v28 = vld [vmem:[#allocation11 + $0x170] sm:$0xff]   ;;  %5813 = vmatpush3.bf16.msra.mxu1 %v6409_v49  ;;  %v6414_v63 = vld [vmem:[#allocation11 + $0x68] sm:$0xff]  }
 0x61e   :  { %v6413_v39 = vld [vmem:[#allocation11 + $0x130] sm:$0xff]   ;;  %5814 = vmatprep.subr.bf16.mxu1 %v6412_v28  ;;  %5771 = vmatpush3.bf16.msra.mxu0 %v6411_v61 }
 0x61f   :  { %v4405_v53 = vadd.f32 %v4404_v58, %v8308_v38  ;;  %v4503_v37 = vadd.f32 %v4502_v45, %v4462_v41  ;;  %v8923_v38 = vld [vmem:[#allocation22_spill] sm:$0xff]  ;;  %v6416_v41 = vld [vmem:[#allocation11 + $0x168] sm:$0xff]   ;;  %5772 = vmatprep.subr.bf16.mxu0 %v6414_v63 }
 0x620   :  { %v4468_v50 = vmul.f32 %v8923_v38, %v8923_v38  ;;  %v4410_v36 = vsel %vm2710_vm0, %v8923_v38, 0.0  ;;  %v6415_v58 = vld [vmem:[#allocation11 + $0x28] sm:$0xff]  }
 0x621   :  { %v4504_v0 = vadd.f32 %v4503_v37, %v4463_v19  ;;  %v4406_v10 = vadd.f32 %v4405_v53, %v8419_v46  ;;  %v4467_v46 = vmul.f32 %v8547_v7, %v8547_v7  ;;  %5815 = vmatpush3.bf16.msra.mxu1 %v6413_v39  ;;  %v6417_v45 = vld [vmem:[#allocation11 + $0x128] sm:$0xff]   ;;  %v6418_v19 = vld [vmem:[#allocation11 + $0x60] sm:$0xff]  }
 0x622   :  { %5816 = vmatprep.subr.bf16.mxu1 %v6416_v41  ;;  %v6420_v53 = vld [vmem:[#allocation11 + $0x160] sm:$0xff]   ;;  %5773 = vmatpush3.bf16.msra.mxu0 %v6415_v58 }
 0x623   :  { %v4407_v33 = vadd.f32 %v4406_v10, %v8425_v56  ;;  %v4505_v16 = vadd.f32 %v4504_v0, %v4464_v59  ;;  %v8924_v56 = vld [vmem:[#allocation23_spill] sm:$0xff]  ;;  %5774 = vmatprep.subr.bf16.mxu0 %v6418_v19 }
 0x624   :  { %v4469_v26 = vmul.f32 %v8924_v56, %v8924_v56  ;;  %v4412_v51 = vsel %vm2710_vm0, %v8924_v56, 0.0  ;;  %v6419_v37 = vld [vmem:[#allocation11 + $0x20] sm:$0xff]   ;;  %v6422_v0 = vld [vmem:[#allocation11 + $0x58] sm:$0xff]  }
 0x625   :  { %v4408_v29 = vadd.f32 %v4407_v33, %v8543_v54  ;;  %v4506_v5 = vadd.f32 %v4505_v16, %v4465_v48  ;;  %v4509_v54 = vsel %vm2710_vm0, %v4468_v50, 0.0  ;;  %5817 = vmatpush3.bf16.msra.mxu1 %v6417_v45  ;;  %v6421_v59 = vld [vmem:[#allocation11 + $0x120] sm:$0xff]   ;;  %v6424_v10 = vld [vmem:[#allocation11 + $0x158] sm:$0xff]  }
 0x626   :  { %5818 = vmatprep.subr.bf16.mxu1 %v6420_v53  ;;  %5775 = vmatpush3.bf16.msra.mxu0 %v6419_v37  ;;  %v6423_v48 = vld [vmem:[#allocation11 + $0x18] sm:$0xff]  }
 0x627   :  { %v4507_v35 = vadd.f32 %v4506_v5, %v4466_v44  ;;  %v4409_v17 = vadd.f32 %v4408_v29, %v8547_v7  ;;  %v4511_v7 = vsel %vm2710_vm0, %v4469_v26, 0.0  ;;  %v6425_v33 = vld [vmem:[#allocation11 + $0x118] sm:$0xff]   ;;  %5776 = vmatprep.subr.bf16.mxu0 %v6422_v0  ;;  %v6427_v26 = vld [vmem:[#allocation11 + $0x10] sm:$0xff]  }
 0x629   :  { %v4411_v9 = vadd.f32 %v4410_v36, %v4409_v17  ;;  %v4508_v32 = vadd.f32 %v4507_v35, %v4467_v46  ;;  %5819 = vmatpush3.bf16.msra.mxu1 %v6421_v59  ;;  %v6426_v46 = vld [vmem:[#allocation11 + $0x50] sm:$0xff]  }
 0x62a   :  { %5820 = vmatprep.subr.bf16.mxu1 %v6424_v10  ;;  %5777 = vmatpush3.bf16.msra.mxu0 %v6423_v48  ;;  %v6764_v48 = vld [vmem:[#allocation8] sm:$0x3f] }
 0x62b   :  { %v4510_v57 = vadd.f32 %v4509_v54, %v4508_v32  ;;  %v4413_v21 = vadd.f32 %v4412_v51, %v4411_v9  ;;  %v6428_v9 = vld [vmem:[#allocation11 + $0x150] sm:$0xff]   ;;  %5778 = vmatprep.subr.bf16.mxu0 %v6426_v46 }
 0x62c   :  { %v6429_v32 = vld [vmem:[#allocation11 + $0x110] sm:$0xff]  }
 0x62d   :  { %v4415_v27 = vadd.f32 %v4414_v20, %v4413_v21  ;;  %v4512_v55 = vadd.f32 %v4511_v7, %v4510_v57  ;;  %5821 = vmatpush3.bf16.msra.mxu1 %v6425_v33  ;;  %v6431_v57 = vld [vmem:[#allocation11 + $0x8] sm:$0xff]   ;;  %v8933_v46 = vld [vmem:[#allocation42_spill] sm:$0xff] }
 0x62e   :  { %5779 = vmatpush3.bf16.msra.mxu0 %v6427_v26  ;;  %5822 = vmatprep.subr.bf16.mxu1 %v6428_v9  ;;  %v6432_v21 = vld [vmem:[#allocation11 + $0x148] sm:$0xff]  }
 0x62f   :  { %v4417_v30 = vadd.f32 %v4416_v13, %v4415_v27  ;;  %v4514_v2 = vadd.f32 %v4513_v47, %v4512_v55  ;;  %5780 = vmatprep.subr.bf16.mxu0 %v6430_v52  ;;  %v6433_v7 = vld [vmem:[#allocation11 + $0x108] sm:$0xff]   ;;  %v6436_v27 = vld [vmem:[#allocation11 + $0x140] sm:$0xff]   ;;  %v6438_v47 = vld [vmem:[#allocation11 + $0xf8] sm:$0xff]   ;;  %v4586_v13 = vrot.slane %v8927_v43, 4 }
 0x630   :  { %v6437_v55 = vld [vmem:[#allocation11 + $0x100] sm:$0xff]  }
 0x631   :  { %v4419_v3 = vadd.f32 %v4418_v42, %v4417_v30  ;;  %v4516_v15 = vadd.f32 %v4515_v6, %v4514_v2  ;;  %5823 = vmatpush3.bf16.msra.mxu1 %v6429_v32  ;;  %v8928_v30 = vld [vmem:[#allocation25_spill] sm:$0xff]  ;;  %v8929_v42 = vld [vmem:[#allocation28_spill] sm:$0xff]  ;;  %v4638_v6 = vrot.slane %v8574_v12, 4  ;;  %v8935_v32 = vld [vmem:[#allocation43_spill] sm:$0xff] }
 0x632   :  { %5781 = vmatpush3.bf16.msra.mxu0 %v6431_v57  ;;  %5824 = vmatprep.subr.bf16.mxu1 %v6432_v21  ;;  %v4599_v2 = vrot.slane %v8928_v30, 4  ;;  %v4612_v4 = vrot.slane %v8929_v42, 4  ;;  %v8936_v52 = vld [vmem:[#allocation32_spill] sm:$0xff] }
 0x633   :  { %v4421_v25 = vadd.f32 %v4420_v1, %v4419_v3  ;;  %v4518_v14 = vadd.f32 %v4517_v23, %v4516_v15  ;;  %5782 = vmatprep.subr.bf16.mxu0 %v6434_v60  ;;  %v8930_v3 = vld [vmem:[#allocation29_spill] sm:$0xff]  ;;  %v4651_v1 = vrot.slane %v8577_v31, 4  ;;  %v4587_v23 = vadd.f32 %v4586_v13, %v8927_v43 }
 0x634   :  { %v4625_v15 = vrot.slane %v8930_v3, 4 }
 0x635   :  { %4422 = vadd.xlane.f32.xlu1 %v4421_v25  ;;  %v4520_v8 = vadd.f32 %v4519_v22, %v4518_v14  ;;  %5825 = vmatpush3.bf16.msra.mxu1 %v6433_v7  ;;  %v4600_v25 = vadd.f32 %v4599_v2, %v8928_v30  ;;  %v4613_v14 = vadd.f32 %v4612_v4, %v8929_v42  ;;  %v4588_v40 = vrot.slane %v4587_v23, 2  ;;  %v8937_v4 = vld [vmem:[#allocation46_spill] sm:$0xff] }
 0x636   :  { %5783 = vmatpush3.bf16.msra.mxu0 %v6435_v18  ;;  %5826 = vmatprep.subr.bf16.mxu1 %v6436_v27  ;;  %v4639_v22 = vadd.f32 %v4638_v6, %v8574_v12  ;;  %v4652_v24 = vadd.f32 %v4651_v1, %v8577_v31  ;;  %v8939_v1 = vld [vmem:[#allocation48_spill] sm:$0xff] }
 0x637   :  { %5790 = vmatprep.subr.bf16.mxu0 %v6438_v47  ;;  %v4601_v34 = vrot.slane %v4600_v25, 2  ;;  %v4614_v49 = vrot.slane %v4613_v14, 2  ;;  %v4589_v39 = vadd.f32 %v4588_v40, %v4587_v23 }
 0x638   :  { %v4640_v62 = vrot.slane %v4639_v22, 2  ;;  %v4653_v61 = vrot.slane %v4652_v24, 2 }
 0x639   :  { %4521 = vadd.xlane.f32.xlu1 %v4520_v8  ;;  %5827 = vmatpush3.bf16.msra.mxu1 %v6437_v55  ;;  %v4626_v8 = vadd.f32 %v4625_v15, %v8930_v3  ;;  %v4602_v63 = vadd.f32 %v4601_v34, %v4600_v25  ;;  %v4615_v41 = vadd.f32 %v4614_v49, %v4613_v14  ;;  %v4590_v53 = vrot.slane %v4589_v39, 1  ;;  %v8938_v3 = vld [vmem:[#allocation47_spill] sm:$0xff]  ;;  %v8940_v25 = vld [vmem:[#allocation49_spill] sm:$0xff] }
 0x63a   :  { %v4641_v58 = vadd.f32 %v4640_v62, %v4639_v22  ;;  %v4654_v19 = vadd.f32 %v4653_v61, %v4652_v24  ;;  %v8941_v22 = vld [vmem:[#allocation50_spill] sm:$0xff] }
 0x63b   :  { %v4627_v28 = vrot.slane %v4626_v8, 2  ;;  %v4616_v37 = vrot.slane %v4615_v41, 1  ;;  %v4603_v59 = vrot.slane %v4602_v63, 1 }
 0x63c   :  { %v4642_v12 = vrot.slane %v4641_v58, 1  ;;  %v4655_v31 = vrot.slane %v4654_v19, 1 }
 0x63d   :  { %v4628_v45 = vadd.f32 %v4627_v28, %v4626_v8 }
 0x63e   :  { %v4656_v9 = vadd.f32 %v4655_v31, %v4654_v19  ;;  %v6441_v19 = vld [vmem:[#allocation11 + $0xb0] sm:$0xff]   ;;  %v6447_v31 = vld [vmem:[#allocation11 + $0x98] sm:$0xff]  }
 0x63f   :  { %v4629_v10 = vrot.slane %v4628_v45, 1 }
 0x6be   :  { %v4423_v16 = vpop.xlane.xlu1 %4422 }
 0x6bf   :  { %v4424_v29 = vrot.slane %v4423_v16, 4 }
 0x6c1   :  { %v4425_v44 = vadd.f32 %v4424_v29, %v4423_v16  ;;  %v4591_v16 = vadd.f32 %v4590_v53, %v4589_v39  ;;  %v4617_v29 = vadd.f32 %v4616_v37, %v4615_v41  ;;  %v6442_v53 = vld [vmem:[#allocation11 + $0xe8] sm:$0xff]  }
 0x6c2   :  { %v4522_v5 = vpop.xlane.xlu1 %4521  ;;  %v6443_v37 = vld [vmem:[#allocation11 + $0xa8] sm:$0xff]  }
 0x6c3   :  { %v4426_v38 = vrot.slane %v4425_v44, 2  ;;  %v4523_v50 = vrot.slane %v4522_v5, 4 }
 0x6c5   :  { %v4524_v35 = vadd.f32 %v4523_v50, %v4522_v5  ;;  %v4427_v17 = vadd.f32 %v4426_v38, %v4425_v44  ;;  %v4643_v44 = vadd.f32 %v4642_v12, %v4641_v58  ;;  %v4604_v5 = vadd.f32 %v4603_v59, %v4602_v63  ;;  %v8931_v38 = vld [vmem:[#allocation20_spill] sm:$0xff]  ;;  %v6439_v63 = vld [vmem:[#allocation11 + $0xb8] sm:$0xff]   ;;  %v6440_v58 = vld [vmem:[#allocation11 + $0xf0] sm:$0xff]  }
 0x6c6   :  { %v6444_v12 = vld [vmem:[#allocation11 + $0xe0] sm:$0xff]  }
 0x6c7   :  { %v4525_v36 = vrot.slane %v4524_v35, 2  ;;  %v4428_v56 = vrot.slane %v4427_v17, 1  ;;  %v6445_v59 = vld [vmem:[#allocation11 + $0xa0] sm:$0xff]  }
 0x6c9   :  { %v4526_v54 = vadd.f32 %v4525_v36, %v4524_v35  ;;  %v4429_v51 = vadd.f32 %v4428_v56, %v4427_v17  ;;  %v8932_v35 = vld [vmem:[#allocation31_spill] sm:$0xff]  ;;  %v8934_v56 = vld [vmem:[#allocation21_spill] sm:$0xff] }
 0x6cb   :  { %5840 = vpush %v4429_v51  ;;  %v4527_v11 = vrot.slane %v4526_v54, 1  ;;  %v4630_v51 = vadd.f32 %v4629_v10, %v4628_v45  ;;  %v6448_v10 = vld [vmem:[#allocation11 + $0xd0] sm:$0xff]  }
 0x6cd   :  { %v4528_v20 = vadd.f32 %v4527_v11, %v4526_v54 }
 0x6cf   :  { %5842 = vpush %v4528_v20 }
 0x6fc   :  { %s5841_s1 = spop %5840 }
 0x6fd   :  { %s4431_s13 = smul.f32 2.6573129e-05, %s5841_s1 }
 0x6ff   :  { %v4658_v0 = vstv %s4431_s13  ;;  %s4531_s14 = smul.f32 %s4431_s13, %s4431_s13 }
 0x700   :  { %v4659_v33 = vmul.f32 %v6764_v48, %v4658_v0  ;;  %s5843_s15 = spop %5842  ;;  %v6446_v0 = vld [vmem:[#allocation11 + $0xd8] sm:$0xff]   ;;  %v6449_v48 = vld [vmem:[#allocation11 + $0x90] sm:$0xff]  }
 0x701   :  { %s4530_s16 = smul.f32 2.6573129e-05, %s5843_s15 }
 0x702   :  { %v4664_v50 = vrot.slane %v4659_v33, %v8931_v38  ;;  %v4672_v17 = vrot.slane %v4659_v33, %v8932_v35  ;;  %v4680_v36 = vrot.slane %v4659_v33, %v8933_v46  ;;  %v4668_v26 = vrot.slane %v4659_v33, %v8934_v56  ;;  %v6452_v38 = vld [vmem:[#allocation11 + $0xc0] sm:$0xff]  }
 0x703   :  { %s4532_s2 = ssub.f32 %s4530_s16, %s4531_s14  ;;  %v4684_v54 = vrot.slane %v4659_v33, %v8935_v32  ;;  %v4676_v11 = vrot.slane %v4659_v33, %v8936_v52 }
 0x704   :  { %v4691_v57 = vsub.f32 %v4591_v16, %v4664_v50  ;;  %v4693_v21 = vsub.f32 %v4617_v29, %v4672_v17  ;;  %v4695_v7 = vsub.f32 %v4643_v44, %v4680_v36  ;;  %v4692_v20 = vsub.f32 %v4604_v5, %v4668_v26  ;;  %v6450_v16 = vld [vmem:[#allocation11 + $0xc8] sm:$0xff]   ;;  %v8942_v44 = vld [vmem:[#allocation51_spill] sm:$0xff] }
 0x705   :  { %s4533_s17 = sadd.f32 1e-05, %s4532_s2  ;;  %v4696_v60 = vsub.f32 %v4656_v9, %v4684_v54  ;;  %v4694_v18 = vsub.f32 %v4630_v51, %v4676_v11  ;;  %v6451_v29 = vld [vmem:[#allocation11 + $0x88] sm:$0xff]   ;;  %v6453_v50 = vld [vmem:[#allocation11 + $0x80] sm:$0xff]  }
 0x706   :  { %v4818_v11 = vld [vmem:[#allocation13] sm:$0x1] }
 0x707   :  { %v4534_v27 = vstv %s4533_s17 }
 0x708   :  { %6456 = vrsqrt.f32 %v4534_v27 }
 0x715   :  { %v6457_v55 = vpop.eup %6456 }
 0x716   :  { %5844 = vpush %v6457_v55 }
 0x747   :  { %s5845_s18 = spop %5844 }
 0x748   :  { %s4657_s19 = smul.f32 0.020408163, %s5845_s18 }
 0x74a   :  { %v4697_v47 = vstv %s4657_s19 }
 0x74b   :  { %v4698_v43 = vmul.f32 %v4697_v47, %v4691_v57  ;;  %v4702_v13 = vmul.f32 %v4697_v47, %v4695_v7  ;;  %v4699_v30 = vmul.f32 %v4697_v47, %v4692_v20  ;;  %v4703_v2 = vmul.f32 %v4697_v47, %v4696_v60 }
 0x74c   :  { %v4701_v42 = vmul.f32 %v4697_v47, %v4694_v18  ;;  %v4700_v33 = vmul.f32 %v4697_v47, %v4693_v21 }
 0x74d   :  { %v4704_v6 = vadd.f32 %v4698_v43, %v8937_v4  ;;  %v4708_v15 = vadd.f32 %v4702_v13, %v8938_v3  ;;  %v4705_v23 = vadd.f32 %v4699_v30, %v8939_v1  ;;  %v4709_v14 = vadd.f32 %v4703_v2, %v8940_v25 }
 0x74e   :  { %v4707_v8 = vadd.f32 %v4701_v42, %v8941_v22  ;;  %v4706_v5 = vadd.f32 %v4700_v33, %v8942_v44 }
 0x74f   :  { %v4710_v24 = vmax.f32 %v4704_v6, 0.0  ;;  %v4714_v40 = vmax.f32 %v4708_v15, 0.0  ;;  %v4711_v34 = vmax.f32 %v4705_v23, 0.0  ;;  %v4715_v49 = vmax.f32 %v4709_v14, 0.0 }
 0x750   :  { %v4713_v62 = vmax.f32 %v4707_v8, 0.0  ;;  %v4712_v35 = vmax.f32 %v4706_v5, 0.0 }
 0x751   :  { %v4716_v28 = vpack.c.bf16 %v4710_v24, %v4710_v24  ;;  %v4720_v61 = vpack.c.bf16 %v4714_v40, %v4714_v40  ;;  %v4717_v39 = vpack.c.bf16 %v4711_v34, %v4711_v34  ;;  %v4721_v41 = vpack.c.bf16 %v4715_v49, %v4715_v49 }
 0x752   :  { %v4719_v45 = vpack.c.bf16 %v4713_v62, %v4713_v62  ;;  %v4718_v17 = vpack.c.bf16 %v4712_v35, %v4712_v35 }
 0x753   :  { %5139 = vmatprep.mubr.bf16.mxu0 %v4717_v39  ;;  %5219 = vmatprep.mubr.bf16.mxu1 %v4721_v41 }
 0x754   :  { %5140 = vmatmul.mubr.bf16.vlgmr.msra.gmra.mxu0 %v4716_v28  ;;  %5220 = vmatmul.mubr.bf16.vlgmr.msra.gmra.mxu1 %v4720_v61 }
 0x755   :  { %5791 = vmatpush3.bf16.msra.mxu0 %v6439_v63  ;;  %5179 = vmatprep.mubr.bf16.mxu0 %v4719_v45 }
 0x756   :  { %5792 = vmatprep.subr.bf16.mxu0 %v6440_v58 }
 0x759   :  { %5793 = vmatpush3.bf16.msra.mxu0 %v6441_v19 }
 0x75a   :  { %5794 = vmatprep.subr.bf16.mxu0 %v6442_v53 }
 0x75d   :  { %5795 = vmatpush3.bf16.msra.mxu0 %v6443_v37 }
 0x75e   :  { %5796 = vmatprep.subr.bf16.mxu0 %v6444_v12 }
 0x761   :  { %5797 = vmatpush3.bf16.msra.mxu0 %v6445_v59 }
 0x762   :  { %5798 = vmatprep.subr.bf16.mxu0 %v6446_v0 }
 0x765   :  { %5799 = vmatpush3.bf16.msra.mxu0 %v6447_v31 }
 0x766   :  { %5800 = vmatprep.subr.bf16.mxu0 %v6448_v10 }
 0x769   :  { %5801 = vmatpush3.bf16.msra.mxu0 %v6449_v48 }
 0x76a   :  { %5802 = vmatprep.subr.bf16.mxu0 %v6450_v16 }
 0x76d   :  { %5803 = vmatpush3.bf16.msra.mxu0 %v6451_v29 }
 0x76e   :  { %5804 = vmatprep.subr.bf16.mxu0 %v6452_v38 }
 0x771   :  { %5805 = vmatpush3.bf16.msra.mxu0 %v6453_v50 }
 0x774   :  { %5180 = vmatmul.mubr.bf16.vlgmr.msra.gmra.mxu0 %v4718_v17 }
 0x814   :  { %v5784_v46 = vpop.f32.mrf.mxu0  ;;  %v5828_v36 = vpop.f32.mrf.mxu1 }
 0x816   :  { %v5785_v56 = vpop.f32.mrf.mxu0  ;;  %v5829_v26 = vpop.f32.mrf.mxu1 }
 0x817   :  { %v5786_v52 = vadd.f32 %v5785_v56, %v5784_v46  ;;  %v5830_v18 = vadd.f32 %v5829_v26, %v5828_v36 }
 0x818   :  { %v5787_v9 = vpop.f32.mrf.mxu0  ;;  %v5831_v32 = vpop.f32.mrf.mxu1 }
 0x819   :  { %v5142_v7 = vadd.f32 %v5786_v52, %v4818_v11 }
 0x81a   :  { %v5788_v54 = vpop.f32.mrf.mxu0  ;;  %v5832_v51 = vpop.f32.mrf.mxu1 }
 0x834   :  { %v5806_v57 = vpop.f32.mrf.mxu0 }
 0x836   :  { %v5807_v21 = vpop.f32.mrf.mxu0 }
 0x837   :  { %v5808_v20 = vadd.f32 %v5807_v21, %v5806_v57 }
 0x838   :  { %v5809_v60 = vpop.f32.mrf.mxu0 }
 0x839   :  { %v5182_v27 = vadd.f32 %v5808_v20, %v5142_v7 }
 0x83a   :  { %v5810_v55 = vpop.f32.mrf.mxu0 }
 0x83b   :  { %v5222_v47 = vadd.f32 %v5830_v18, %v5182_v27 }
 0x83d   :  { %5228 = vst [vmem:[#allocation14 + $0x1] sm:$0x1] %v5222_v47 }
 0x83e   :  { %6916 = shalt.err (!%p6913_p11)
}
 0x83f   :  { %s6947_s3 = smov 16   ;;  %s6948_s6 = smov 1  }
 0x840   :  { %5240 = dma.vmem_to_hbm [thread:$0]  %s5235_s21, 32, %s8696_s9, [#allocation4], %s6947_s3, %s6947_s3, %s6948_s6  }
 0x841   :  { %6933 = dma.done.wait [#allocation4], 32  }
 0x842   :  { %6934 = vsyncadd [#allocation4], 4294967264 }
 0x843   :  { %5244 = vsyncpa [#allocation3], 1 }
 0x844   :  { %5245 = vsyncpa [#allocation6], 1 }
 0x845   :  { %5246 = vsyncpa [#allocation9], 1 }
 0x846   :  { %5247 = vsyncpa [#allocation12], 1 }
 0x847   :  { %5248 = vsyncpa [#allocation4], 1 }

</bundles_post_ra>
